<compile_context>
chip_gen: v5e
topology: v5e:2x2
jax: 0.10.0
libtpu: 0.0.40
codegen_flags: <defaults>
</compile_context>

<pallas_src>
import math
import numpy as np

import jax
import jax.numpy as jnp
from jax.experimental import pallas as pl
from jax.experimental.pallas import tpu as pltpu

# ---------------------------------------------------------------- constants
H = 32
W = 32
P = H * W                      # 1024 pixels (whole image in one kernel step)
F_TOTAL = 96                   # number of mesh faces (synthetic)
F_PAD = 128                    # faces padded to lane width
L_MAX = 2                      # at most 2 labels (fg / bg after combine)
L_ROWS = 16                    # label rows padded to a native bf16 sublane tile
THRESHOLD_COUNTS = 2           # config.sam_mesh.face2label_threshold default
GT_VOTE_THRESHOLD_PCT = 30     # config.sam_mesh.gt_vote_threshold_percentage

_DISTANCE = 2.5
VIEW_POSITIONS_CUSTOM = {
    "position": [0.0, 0.0, _DISTANCE],
    "target": [0.0, 0.0, 0.0],
    "up": [0.0, 1.0, 0.0],
}


def custom_look_at(eye, target, up):
    eye, target, up = map(lambda v: np.array(v, dtype=np.float32), [eye, target, up])
    z_axis = eye - target
    z_axis /= np.linalg.norm(z_axis)
    x_axis = np.cross(up, z_axis)
    x_axis /= np.linalg.norm(x_axis)
    y_axis = np.cross(z_axis, x_axis)
    rotation = np.identity(4, dtype=np.float32)
    rotation[0, :3] = x_axis
    rotation[1, :3] = y_axis
    rotation[2, :3] = z_axis
    translation = np.identity(4, dtype=np.float32)
    translation[:3, 3] = -eye
    return np.linalg.inv(np.matmul(rotation, translation))


# ------------------------------------------------------------------ kernel
def face_count_kernel(lookat_ref, px_ref, cm_ref, labels_ref, counts_ref):
    """counts[j, f] = #pixels with cmask == labels[j] AND |norm . lookat| > 0
    AND faceid == f, computed in a single step with one MXU contraction."""
    px = px_ref[...]                                    # [P, 8] f32
    fid = px[:, 0:1]                                    # face id as float
    nd = (px[:, 1:2] * lookat_ref[0]
          + px[:, 2:3] * lookat_ref[1]
          + px[:, 3:4] * lookat_ref[2])                 # norms . lookat  [P, 1]

    # norms_mask() & (faceid != -1); exact-zero compare matches the reference.
    vis = (jnp.abs(nd) > 0.0) & (fid != -1.0)           # [P, 1] bool
    fid_masked = jnp.where(vis, fid, -2.0)              # fold visibility once

    # Face one-hot: pixels on sublanes, faces on lanes (bf16, 0/1 exact).
    face_iota = jax.lax.broadcasted_iota(
        jnp.int32, (P, F_PAD), 1).astype(jnp.float32)
    onehot = (fid_masked == face_iota).astype(jnp.float32).astype(jnp.bfloat16)

    # Label mask: labels on sublanes, pixels on lanes (bf16, 0/1 exact).
    lab_mask = (labels_ref[...] == cm_ref[...]
                ).astype(jnp.float32).astype(jnp.bfloat16)       # [L_ROWS, P]

    # One MXU matmul, f32 accumulate, single full-tile store.
    counts_ref[...] = jnp.dot(lab_mask, onehot,
                              preferred_element_type=jnp.float32)


def face_label_counts(faceid_hw, cmask_hw, norms_hw3, lookat3, labels):
    """Wrapper: pack pixel fields lane-densely and call the Pallas kernel once."""
    fid_f = faceid_hw.reshape(P).astype(jnp.float32)     # small ints: exact in f32
    nx = norms_hw3[..., 0].reshape(P).astype(jnp.float32)
    ny = norms_hw3[..., 1].reshape(P).astype(jnp.float32)
    nz = norms_hw3[..., 2].reshape(P).astype(jnp.float32)
    zeros = jnp.zeros((P,), jnp.float32)
    px = jnp.stack([fid_f, nx, ny, nz, zeros, zeros, zeros, zeros], axis=1)  # [P, 8]

    cm_row = cmask_hw.reshape(1, P).astype(jnp.float32)               # pixels on lanes

    labels_col = jnp.full((L_ROWS, 1), -12345.0, jnp.float32)
    labels_col = labels_col.at[: len(labels), 0].set(
        jnp.asarray(labels, jnp.float32))

    lookat_pad = jnp.zeros((4,), jnp.float32).at[:3].set(
        jnp.asarray(lookat3, jnp.float32))

    # TODO(synk): if the real pipeline renders multiple views, batch them into a
    # leading "parallel" grid axis of one pallas_call instead of calling per view.
    counts = pl.pallas_call(
        face_count_kernel,
        out_shape=jax.ShapeDtypeStruct((L_ROWS, F_PAD), jnp.float32),
        grid=(1,),
        in_specs=[
            pl.BlockSpec(memory_space=pltpu.MemorySpace.SMEM),   # lookat (4,)
            pl.BlockSpec((P, 8), lambda i: (0, 0)),              # packed pixels
            pl.BlockSpec((1, P), lambda i: (0, 0)),              # cmask row
            pl.BlockSpec((L_ROWS, 1), lambda i: (0, 0)),         # labels column
        ],
        out_specs=pl.BlockSpec((L_ROWS, F_PAD), lambda i: (0, 0)),
        compiler_params=pltpu.CompilerParams(
            dimension_semantics=("arbitrary",)),
    )(lookat_pad, px, cm_row, labels_col)
    return counts


# ------------------------------------------------------- numpy reference
def reference_counts(faceid, cmask, norms, lookat, labels):
    normal_mask = np.abs(norms @ lookat) > 0.0
    vis = normal_mask & (faceid != -1)
    counts = np.zeros((len(labels), F_TOTAL), dtype=np.float64)
    for j, lab in enumerate(labels):
        fm = (cmask == lab) & vis
        faces, cts = np.unique(faceid[fm], return_counts=True)
        for f, c in zip(faces, cts):
            if f != -1:
                counts[j, int(f)] = c
    return counts


# ---------------------------------------------------------------- forward
if __name__ == "__main__":
    key = jax.random.PRNGKey(0)
    k1, k2, k3 = jax.random.split(key, 3)

    # Synthetic renderer output (Renderer.render is untranslatable):
    # TODO(synk): real pipeline rasterizes a trimesh; we synthesize faceid/norms.
    faceid = jax.random.randint(k1, (H, W), -1, F_TOTAL, dtype=jnp.int32)
    norms = jax.random.normal(k2, (H, W, 3), dtype=jnp.float32)
    norms = norms / (jnp.linalg.norm(norms, axis=-1, keepdims=True) + 1e-8)
    gt = jax.random.randint(k3, (H, W), 0, 256, dtype=jnp.int32)  # "pred.png"

    faceid_np = np.asarray(faceid)
    norms_np = np.asarray(norms)
    gt_np = np.asarray(gt).astype(np.uint8)

    # call_segmentation(): threshold of the (synthetic) prediction image.
    fg_mask = gt_np > 127
    bg_mask = ~fg_mask
    bmasks = [fg_mask, bg_mask]

    # combine_bmasks(sort=True) + cmask adjustment from render()  (host glue)
    masks_sorted = sorted(bmasks, key=lambda x: x.sum(), reverse=True)
    cmask_np = np.zeros((H, W), dtype=np.int32)
    for i, m in enumerate(masks_sorted):
        cmask_np[m] = i + 1
    cmask_np = cmask_np + 1
    cmask_np[faceid_np == -1] = 0

    labels = np.unique(cmask_np)
    labels = labels[labels != 0]           # typically [2, 3]

    # camera pose ('custom' view) and lookat direction
    pose = custom_look_at(VIEW_POSITIONS_CUSTOM["position"],
                          VIEW_POSITIONS_CUSTOM["target"],
                          VIEW_POSITIONS_CUSTOM["up"])
    lookat = pose[:3, :3] @ np.array([0.0, 0.0, 1.0], dtype=np.float32)

    # ---- Pallas hot path: per-face / per-label visible-pixel counts ----
    counts = face_label_counts(jnp.asarray(faceid_np), jnp.asarray(cmask_np),
                               jnp.asarray(norms_np), lookat, labels)
    counts = jax.block_until_ready(counts)
    counts_np = np.asarray(counts)

    # correctness check against pure-NumPy compute_face2label counting
    ref = reference_counts(faceid_np, cmask_np, norms_np, lookat, labels)
    np.testing.assert_allclose(counts_np[: len(labels), :F_TOTAL], ref,
                               rtol=0, atol=0)

    # lift(): valid faces per mask (count > threshold), then GT voting.
    # Only 'mask1' (label index j == 1) contributes votes; with a single view
    # min_votes_required = max(1, int(1 * 30 / 100)) = 1.
    face2label_final = np.zeros(F_TOTAL, dtype=np.int32)
    if len(labels) >= 2:
        valid_mask1 = counts_np[1, :F_TOTAL] > THRESHOLD_COUNTS
        face2label_final[valid_mask1] = 1
    # (forward() returns this per-face {0,1} labeling together with the mesh;
    #  the mesh object itself is untranslatable.)

    assert face2label_final.shape[0] == F_TOTAL
    print("KERNEL_OK")
</pallas_src>

<mosaic_0001>
module attributes {stable_mosaic.version = 11 : i64} {
  func.func @face_count_kernel(%arg0: i32, %arg1: memref<4xf32, #tpu.memory_space<smem>>, %arg2: memref<1024x8xf32, #tpu.memory_space<vmem>>, %arg3: memref<1x1024xf32, #tpu.memory_space<vmem>>, %arg4: memref<16x1xf32, #tpu.memory_space<vmem>>, %arg5: memref<16x128xf32, #tpu.memory_space<vmem>>) attributes {dimension_semantics = [#tpu.dimension_semantics<arbitrary>], iteration_bounds = array<i64: 1>, scalar_prefetch = 0 : i64, scratch_operands = 0 : i64, tpu.core_type = #tpu.core_type<tc>, window_params = [{transform_indices = @transform_0, window_bounds = array<i64: 4>}, {pipeline_mode = #tpu.pipeline_mode<synchronous>, transform_indices = @transform_1, window_bounds = array<i64: 1024, 8>}, {pipeline_mode = #tpu.pipeline_mode<synchronous>, transform_indices = @transform_2, window_bounds = array<i64: 1, 1024>}, {pipeline_mode = #tpu.pipeline_mode<synchronous>, transform_indices = @transform_3, window_bounds = array<i64: 16, 1>}, {pipeline_mode = #tpu.pipeline_mode<synchronous>, transform_indices = @transform_4, window_bounds = array<i64: 16, 128>}]} {
    %c0 = arith.constant 0 : index
    %c0_0 = arith.constant 0 : index
    %0 = vector.load %arg2[%c0, %c0_0] : memref<1024x8xf32, #tpu.memory_space<vmem>>, vector<1024x8xf32>
    %1 = vector.extract_strided_slice %0 {offsets = [0, 0], sizes = [1024, 1], strides = [1, 1]} : vector<1024x8xf32> to vector<1024x1xf32>
    %2 = vector.extract_strided_slice %0 {offsets = [0, 1], sizes = [1024, 1], strides = [1, 1]} : vector<1024x8xf32> to vector<1024x1xf32>
    %c0_1 = arith.constant 0 : index
    %3 = memref.load %arg1[%c0_1] : memref<4xf32, #tpu.memory_space<smem>>
    %4 = vector.broadcast %3 : f32 to vector<1024x1xf32>
    %5 = arith.mulf %2, %4 : vector<1024x1xf32>
    %6 = vector.extract_strided_slice %0 {offsets = [0, 2], sizes = [1024, 1], strides = [1, 1]} : vector<1024x8xf32> to vector<1024x1xf32>
    %c1 = arith.constant 1 : index
    %7 = memref.load %arg1[%c1] : memref<4xf32, #tpu.memory_space<smem>>
    %8 = vector.broadcast %7 : f32 to vector<1024x1xf32>
    %9 = arith.mulf %6, %8 : vector<1024x1xf32>
    %10 = arith.addf %5, %9 : vector<1024x1xf32>
    %11 = vector.extract_strided_slice %0 {offsets = [0, 3], sizes = [1024, 1], strides = [1, 1]} : vector<1024x8xf32> to vector<1024x1xf32>
    %c2 = arith.constant 2 : index
    %12 = memref.load %arg1[%c2] : memref<4xf32, #tpu.memory_space<smem>>
    %13 = vector.broadcast %12 : f32 to vector<1024x1xf32>
    %14 = arith.mulf %11, %13 : vector<1024x1xf32>
    %15 = arith.addf %10, %14 : vector<1024x1xf32>
    %16 = math.absf %15 : vector<1024x1xf32>
    %cst = arith.constant 0.000000e+00 : f32
    %17 = vector.broadcast %cst : f32 to vector<1024x1xf32>
    %18 = arith.cmpf ogt, %16, %17 : vector<1024x1xf32>
    %cst_2 = arith.constant -1.000000e+00 : f32
    %19 = vector.broadcast %cst_2 : f32 to vector<1024x1xf32>
    %20 = arith.cmpf one, %1, %19 : vector<1024x1xf32>
    %21 = arith.andi %18, %20 : vector<1024x1xi1>
    %cst_3 = arith.constant -2.000000e+00 : f32
    %22 = vector.broadcast %cst_3 : f32 to vector<1024x1xf32>
    %23 = arith.select %21, %1, %22 : vector<1024x1xi1>, vector<1024x1xf32>
    %24 = tpu.iota {dimensions = array<i32: 1>} : vector<1024x128xi32>
    %25 = arith.sitofp %24 : vector<1024x128xi32> to vector<1024x128xf32>
    %26 = vector.broadcast %23 : vector<1024x1xf32> to vector<1024x128xf32>
    %27 = arith.cmpf oeq, %26, %25 : vector<1024x128xf32>
    %28 = arith.extui %27 : vector<1024x128xi1> to vector<1024x128xi32>
    %29 = arith.sitofp %28 : vector<1024x128xi32> to vector<1024x128xf32>
    %30 = arith.truncf %29 : vector<1024x128xf32> to vector<1024x128xbf16>
    %c0_4 = arith.constant 0 : index
    %c0_5 = arith.constant 0 : index
    %31 = vector.load %arg4[%c0_4, %c0_5] : memref<16x1xf32, #tpu.memory_space<vmem>>, vector<16x1xf32>
    %c0_6 = arith.constant 0 : index
    %c0_7 = arith.constant 0 : index
    %32 = vector.load %arg3[%c0_6, %c0_7] : memref<1x1024xf32, #tpu.memory_space<vmem>>, vector<1x1024xf32>
    %33 = vector.broadcast %31 : vector<16x1xf32> to vector<16x1024xf32>
    %34 = vector.broadcast %32 : vector<1x1024xf32> to vector<16x1024xf32>
    %35 = arith.cmpf oeq, %33, %34 : vector<16x1024xf32>
    %36 = arith.extui %35 : vector<16x1024xi1> to vector<16x1024xi32>
    %37 = arith.sitofp %36 : vector<16x1024xi32> to vector<16x1024xf32>
    %38 = arith.truncf %37 : vector<16x1024xf32> to vector<16x1024xbf16>
    %cst_8 = arith.constant dense<0.000000e+00> : vector<16x128xf32>
    %39 = tpu.matmul %38, %30, %cst_8 {dimension_numbers = #tpu.dot_dimension_numbers<[1], [0], [0], [1], [0, 0, 1, 1], [], []>} : vector<16x1024xbf16>, vector<1024x128xbf16>, vector<16x128xf32> -> vector<16x128xf32>
    %c0_9 = arith.constant 0 : index
    %c0_10 = arith.constant 0 : index
    %40 = vector.load %arg5[%c0_9, %c0_10] : memref<16x128xf32, #tpu.memory_space<vmem>>, vector<16x128xf32>
    tpu.vector_store %arg5[%c0_9, %c0_10], %39 {strides = array<i32>} : memref<16x128xf32, #tpu.memory_space<vmem>>, vector<16x128xf32>,
    return
  }
  func.func @transform_0(%arg0: i32) -> i32 {
    %c0_i32 = arith.constant 0 : i32
    %c0_i32_0 = arith.constant 0 : i32
    return %c0_i32 : i32
  }
  func.func @transform_1(%arg0: i32) -> (i32, i32) {
    %c0_i32 = arith.constant 0 : i32
    %c0_i32_0 = arith.constant 0 : i32
    %c0_i32_1 = arith.constant 0 : i32
    return %c0_i32, %c0_i32_0 : i32, i32
  }
  func.func @transform_2(%arg0: i32) -> (i32, i32) {
    %c0_i32 = arith.constant 0 : i32
    %c0_i32_0 = arith.constant 0 : i32
    %c0_i32_1 = arith.constant 0 : i32
    return %c0_i32, %c0_i32_0 : i32, i32
  }
  func.func @transform_3(%arg0: i32) -> (i32, i32) {
    %c0_i32 = arith.constant 0 : i32
    %c0_i32_0 = arith.constant 0 : i32
    %c0_i32_1 = arith.constant 0 : i32
    return %c0_i32, %c0_i32_0 : i32, i32
  }
  func.func @transform_4(%arg0: i32) -> (i32, i32) {
    %c0_i32 = arith.constant 0 : i32
    %c0_i32_0 = arith.constant 0 : i32
    %c0_i32_1 = arith.constant 0 : i32
    return %c0_i32, %c0_i32_0 : i32, i32
  }
}

</mosaic_0001>

<bundles_post_ra>
// kernel: tpu_custom_call.1
= control target key start
LH: loop header
LB: loop body
LE: loop exit
PB: predicated region body
PF: predicated region fallthrough
CT: control target
= control target key end

     0   :  { %9 = vsyncpa [#allocation4], 0  ;;  %s10931_s0 = inlined_call_operand.vmem [shape: f32[4], index: 0, kind: input, shape index: {}]   ;;  %s10932_s1 = inlined_call_operand.vmem [shape: f32[1024,8], index: 1, kind: input, shape index: {}]   ;;  %s10933_s2 = inlined_call_operand.vmem [shape: f32[1,1024], index: 2, kind: input, shape index: {}]   ;;  %s10934_s3 = inlined_call_operand.vmem [shape: f32[16,1], index: 3, kind: input, shape index: {}]   ;;  %s10935_s4 = inlined_call_operand.hbm [shape: f32[16,128], index: 4, kind: output, shape index: {}]  }
   0x1   :  { %10 = vsyncpa [#allocation3], 0  ;;  %s16_s17 = sshll.u32 %s10931_s0, 4  ;;  %s5407_s18 = smov [#allocation2]   ;;  %s17_s17 = int_to_ptr.vmem [resolvable:$true] %s16_s17 }
   0x2   :  { %19 = dma.vmem_to_smem %s17_s17, 16, %s5407_s18, [#allocation4]  }
   0x3   :  { %5403 = dma.done.wait [#allocation4], 16  }
   0x4   :  { %5404 = vsyncadd [#allocation4], 4294967280 }
   0x5   :  { %30 = sfence }
   0x6   :  { %s4803_s19 = sld [smem:[#allocation2 + $0x1]]  ;;  %v5448_v0 = vld [vmem:[%s10932_s1 + $0x20] sm:$0xff]  ;;  %v5453_v1 = vld [vmem:[%s10932_s1 + $0x10] sm:$0xff]  ;;  %s5408_s0 = smov 127   ;;  %v5474_v7 = vld [vmem:[%s10932_s1 + $0x28] sm:$0xff] }
   0x7   :  { %v5458_v2 = vld [vmem:[%s10932_s1] sm:$0xff]  ;;  %v5479_v8 = vld [vmem:[%s10932_s1 + $0x18] sm:$0xff]  ;;  %v5484_v9 = vld [vmem:[%s10932_s1 + $0x8] sm:$0xff]  ;;  %s4804_s10 = sld [smem:[#allocation2 + $0x2]]  ;;  %s5409_s17 = smov 126  }
   0x8   :  { %v5498_v13 = vld [vmem:[%s10932_s1 + $0x40] sm:$0xff]  ;;  %v5503_v14 = vld [vmem:[%s10932_s1 + $0x38] sm:$0xff]  ;;  %v5508_v15 = vld [vmem:[%s10932_s1 + $0x30] sm:$0xff]  ;;  %s5411_s21 = smov 1   ;;  %s4790_s8 = sshll.u32 %s10935_s4, 4  ;;  %s4791_s8 = int_to_ptr.hbm [resolvable:$true] %s4790_s8 }
   0x9   :  { %v5522_v19 = vld [vmem:[%s10932_s1 + $0x58] sm:$0xff]  ;;  %v5527_v20 = vld [vmem:[%s10932_s1 + $0x50] sm:$0xff]  ;;  %v5532_v21 = vld [vmem:[%s10932_s1 + $0x48] sm:$0xff]  ;;  %s5415_s9 = smov 128  }
   0xa   :  { %v5546_v25 = vld [vmem:[%s10932_s1 + $0x70] sm:$0xff]  ;;  %v5551_v26 = vld [vmem:[%s10932_s1 + $0x68] sm:$0xff]  ;;  %v5556_v27 = vld [vmem:[%s10932_s1 + $0x60] sm:$0xff] }
   0xb   :  { %v5570_v31 = vld [vmem:[%s10932_s1 + $0x88] sm:$0xff]  ;;  %v5575_v32 = vld [vmem:[%s10932_s1 + $0x80] sm:$0xff]  ;;  %v5580_v33 = vld [vmem:[%s10932_s1 + $0x78] sm:$0xff] }
   0xc   :  { %v5460_v3 = vstv %s4803_s19  ;;  %v5594_v37 = vld [vmem:[%s10932_s1 + $0xa0] sm:$0xff]  ;;  %v5599_v38 = vld [vmem:[%s10932_s1 + $0x98] sm:$0xff]  ;;  %v5604_v39 = vld [vmem:[%s10932_s1 + $0x90] sm:$0xff]  ;;  %s159_s19 = sld [smem:[#allocation2]] }
   0xd   :  { %v295_v4 = vmul.f32 %v5460_v3, %v5448_v0  ;;  %v293_v5 = vmul.f32 %v5460_v3, %v5453_v1  ;;  %v291_v6 = vmul.f32 %v5460_v3, %v5458_v2  ;;  %v296_v10 = vmul.f32 %v5460_v3, %v5474_v7  ;;  %v5618_v43 = vld [vmem:[%s10932_s1 + $0xb8] sm:$0xff]  ;;  %v5623_v44 = vld [vmem:[%s10932_s1 + $0xb0] sm:$0xff]  ;;  %v5628_v45 = vld [vmem:[%s10932_s1 + $0xa8] sm:$0xff] }
   0xe   :  { %v294_v11 = vmul.f32 %v5460_v3, %v5479_v8  ;;  %v292_v12 = vmul.f32 %v5460_v3, %v5484_v9  ;;  %v299_v16 = vmul.f32 %v5460_v3, %v5498_v13  ;;  %v298_v17 = vmul.f32 %v5460_v3, %v5503_v14  ;;  %v5642_v49 = vld [vmem:[%s10932_s1 + $0xd0] sm:$0xff]  ;;  %v5647_v50 = vld [vmem:[%s10932_s1 + $0xc8] sm:$0xff]  ;;  %v5652_v51 = vld [vmem:[%s10932_s1 + $0xc0] sm:$0xff] }
   0xf   :  { %555 = vrot.lane.b32.xlu2 %v295_v4, %s5408_s0  ;;  %551 = vrot.lane.b32.xlu1 %v293_v5, %s5408_s0  ;;  %v297_v18 = vmul.f32 %v5460_v3, %v5508_v15  ;;  %v302_v22 = vmul.f32 %v5460_v3, %v5522_v19  ;;  %v301_v23 = vmul.f32 %v5460_v3, %v5527_v20  ;;  %v5666_v55 = vld [vmem:[%s10932_s1 + $0xe8] sm:$0xff]  ;;  %v5671_v56 = vld [vmem:[%s10932_s1 + $0xe0] sm:$0xff] }
  0x10   :  { %547 = vrot.lane.b32.xlu0 %v291_v6, %s5408_s0  ;;  %v300_v24 = vmul.f32 %v5460_v3, %v5532_v21  ;;  %v305_v28 = vmul.f32 %v5460_v3, %v5546_v25  ;;  %v304_v29 = vmul.f32 %v5460_v3, %v5551_v26  ;;  %v303_v30 = vmul.f32 %v5460_v3, %v5556_v27  ;;  %v5676_v57 = vld [vmem:[%s10932_s1 + $0xd8] sm:$0xff]  ;;  %v5690_v61 = vld [vmem:[%s10932_s1 + $0x100] sm:$0xff]  ;;  %v5700_v63 = vld [vmem:[%s10932_s1 + $0xf0] sm:$0xff] }
  0x11   :  { %v308_v34 = vmul.f32 %v5460_v3, %v5570_v31  ;;  %v307_v35 = vmul.f32 %v5460_v3, %v5575_v32  ;;  %v306_v36 = vmul.f32 %v5460_v3, %v5580_v33  ;;  %v311_v40 = vmul.f32 %v5460_v3, %v5594_v37  ;;  %v5695_v62 = vld [vmem:[%s10932_s1 + $0xf8] sm:$0xff] }
  0x12   :  { %v310_v41 = vmul.f32 %v5460_v3, %v5599_v38  ;;  %v309_v42 = vmul.f32 %v5460_v3, %v5604_v39  ;;  %v314_v46 = vmul.f32 %v5460_v3, %v5618_v43  ;;  %v313_v47 = vmul.f32 %v5460_v3, %v5623_v44 }
  0x13   :  { %v312_v48 = vmul.f32 %v5460_v3, %v5628_v45  ;;  %v317_v52 = vmul.f32 %v5460_v3, %v5642_v49  ;;  %v316_v53 = vmul.f32 %v5460_v3, %v5647_v50  ;;  %v315_v54 = vmul.f32 %v5460_v3, %v5652_v51 }
  0x14   :  { %v320_v58 = vmul.f32 %v5460_v3, %v5666_v55  ;;  %v319_v59 = vmul.f32 %v5460_v3, %v5671_v56  ;;  %v318_v60 = vmul.f32 %v5460_v3, %v5676_v57  ;;  %v323_v4 = vmul.f32 %v5460_v3, %v5690_v61 }
  0x15   :  { %v322_v5 = vmul.f32 %v5460_v3, %v5695_v62  ;;  %v321_v6 = vmul.f32 %v5460_v3, %v5700_v63 }
  0x17   :  { %557 = vrot.lane.b32.xlu2 %v296_v10, %s5408_s0  ;;  %553 = vrot.lane.b32.xlu1 %v294_v11, %s5408_s0  ;;  %v5714_v10 = vld [vmem:[%s10932_s1 + $0x118] sm:$0xff]  ;;  %v5719_v11 = vld [vmem:[%s10932_s1 + $0x110] sm:$0xff] }
  0x18   :  { %549 = vrot.lane.b32.xlu0 %v292_v12, %s5408_s0  ;;  %v5724_v12 = vld [vmem:[%s10932_s1 + $0x108] sm:$0xff] }
  0x1f   :  { %563 = vrot.lane.b32.xlu2 %v299_v16, %s5408_s0  ;;  %561 = vrot.lane.b32.xlu1 %v298_v17, %s5408_s0  ;;  %v326_v16 = vmul.f32 %v5460_v3, %v5714_v10  ;;  %v325_v17 = vmul.f32 %v5460_v3, %v5719_v11 }
  0x20   :  { %559 = vrot.lane.b32.xlu0 %v297_v18, %s5408_s0  ;;  %v324_v18 = vmul.f32 %v5460_v3, %v5724_v12 }
  0x27   :  { %569 = vrot.lane.b32.xlu2 %v302_v22, %s5408_s0  ;;  %567 = vrot.lane.b32.xlu1 %v301_v23, %s5408_s0  ;;  %v5738_v22 = vld [vmem:[%s10932_s1 + $0x130] sm:$0xff]  ;;  %v5743_v23 = vld [vmem:[%s10932_s1 + $0x128] sm:$0xff] }
  0x28   :  { %565 = vrot.lane.b32.xlu0 %v300_v24, %s5408_s0 }
  0x2f   :  { %575 = vrot.lane.b32.xlu2 %v305_v28, %s5408_s0  ;;  %573 = vrot.lane.b32.xlu1 %v304_v29, %s5408_s0  ;;  %v5750_v28 = vld [vmem:[%s10932_s1 + $0x120] sm:$0xff]  ;;  %v329_v29 = vmul.f32 %v5460_v3, %v5738_v22 }
  0x30   :  { %571 = vrot.lane.b32.xlu0 %v303_v30, %s5408_s0  ;;  %v328_v30 = vmul.f32 %v5460_v3, %v5743_v23 }
  0x37   :  { %581 = vrot.lane.b32.xlu2 %v308_v34, %s5408_s0  ;;  %579 = vrot.lane.b32.xlu1 %v307_v35, %s5408_s0  ;;  %v327_v34 = vmul.f32 %v5460_v3, %v5750_v28  ;;  %v5764_v35 = vld [vmem:[%s10932_s1 + $0x148] sm:$0xff] }
  0x38   :  { %577 = vrot.lane.b32.xlu0 %v306_v36, %s5408_s0  ;;  %v5769_v36 = vld [vmem:[%s10932_s1 + $0x140] sm:$0xff] }
  0x3f   :  { %587 = vrot.lane.b32.xlu2 %v311_v40, %s5408_s0  ;;  %585 = vrot.lane.b32.xlu1 %v310_v41, %s5408_s0  ;;  %v5776_v41 = vld [vmem:[%s10932_s1 + $0x138] sm:$0xff] }
  0x40   :  { %583 = vrot.lane.b32.xlu0 %v309_v42, %s5408_s0  ;;  %v332_v42 = vmul.f32 %v5460_v3, %v5764_v35 }
  0x47   :  { %593 = vrot.lane.b32.xlu2 %v314_v46, %s5408_s0  ;;  %591 = vrot.lane.b32.xlu1 %v313_v47, %s5408_s0  ;;  %v331_v46 = vmul.f32 %v5460_v3, %v5769_v36  ;;  %v330_v47 = vmul.f32 %v5460_v3, %v5776_v41 }
  0x48   :  { %589 = vrot.lane.b32.xlu0 %v312_v48, %s5408_s0  ;;  %v5790_v48 = vld [vmem:[%s10932_s1 + $0x160] sm:$0xff] }
  0x4f   :  { %599 = vrot.lane.b32.xlu2 %v317_v52, %s5408_s0  ;;  %597 = vrot.lane.b32.xlu1 %v316_v53, %s5408_s0  ;;  %v5795_v52 = vld [vmem:[%s10932_s1 + $0x158] sm:$0xff] }
  0x50   :  { %595 = vrot.lane.b32.xlu0 %v315_v54, %s5408_s0  ;;  %v5802_v54 = vld [vmem:[%s10932_s1 + $0x150] sm:$0xff] }
  0x57   :  { %605 = vrot.lane.b32.xlu2 %v320_v58, %s5408_s0  ;;  %603 = vrot.lane.b32.xlu1 %v319_v59, %s5408_s0  ;;  %v335_v58 = vmul.f32 %v5460_v3, %v5790_v48  ;;  %v334_v59 = vmul.f32 %v5460_v3, %v5795_v52 }
  0x58   :  { %601 = vrot.lane.b32.xlu0 %v318_v60, %s5408_s0  ;;  %v333_v60 = vmul.f32 %v5460_v3, %v5802_v54 }
  0x5f   :  { %611 = vrot.lane.b32.xlu2 %v323_v4, %s5408_s0  ;;  %609 = vrot.lane.b32.xlu1 %v322_v5, %s5408_s0  ;;  %v5816_v4 = vld [vmem:[%s10932_s1 + $0x178] sm:$0xff]  ;;  %v5821_v5 = vld [vmem:[%s10932_s1 + $0x170] sm:$0xff] }
  0x60   :  { %607 = vrot.lane.b32.xlu0 %v321_v6, %s5408_s0 }
  0x67   :  { %617 = vrot.lane.b32.xlu2 %v326_v16, %s5408_s0  ;;  %615 = vrot.lane.b32.xlu1 %v325_v17, %s5408_s0  ;;  %v5830_v17 = vld [vmem:[%s10932_s1 + $0x168] sm:$0xff] }
  0x68   :  { %613 = vrot.lane.b32.xlu0 %v324_v18, %s5408_s0 }
  0x69   :  { %v5745_v24 = vpop.permute.xlu2 %555 }
  0x6a   :  { %11119 = vst [vmem:[#allocation8_spill] sm:$0xff] %v5745_v24 }
  0x6f   :  { %623 = vrot.lane.b32.xlu2 %v329_v29, %s5408_s0  ;;  %621 = vrot.lane.b32.xlu1 %v328_v30, %s5408_s0  ;;  %v338_v29 = vmul.f32 %v5460_v3, %v5816_v4  ;;  %v337_v30 = vmul.f32 %v5460_v3, %v5821_v5 }
  0x70   :  { %619 = vrot.lane.b32.xlu0 %v327_v34, %s5408_s0  ;;  %v336_v34 = vmul.f32 %v5460_v3, %v5830_v17 }
  0x71   :  { %v5771_v40 = vpop.permute.xlu2 %557 }
  0x72   :  { %11120 = vst [vmem:[#allocation9_spill] sm:$0xff] %v5771_v40 }
  0x77   :  { %629 = vrot.lane.b32.xlu2 %v332_v42, %s5408_s0  ;;  %627 = vrot.lane.b32.xlu1 %v331_v46, %s5408_s0  ;;  %v5846_v42 = vld [vmem:[%s10932_s1 + $0x190] sm:$0xff]  ;;  %v5851_v46 = vld [vmem:[%s10932_s1 + $0x188] sm:$0xff] }
  0x78   :  { %625 = vrot.lane.b32.xlu0 %v330_v47, %s5408_s0 }
  0x79   :  { %v5797_v53 = vpop.permute.xlu2 %563 }
  0x7a   :  { %11121 = vst [vmem:[#allocation10_spill] sm:$0xff] %v5797_v53 }
  0x7f   :  { %635 = vrot.lane.b32.xlu2 %v335_v58, %s5408_s0  ;;  %633 = vrot.lane.b32.xlu1 %v334_v59, %s5408_s0  ;;  %v5860_v59 = vld [vmem:[%s10932_s1 + $0x180] sm:$0xff] }
  0x80   :  { %631 = vrot.lane.b32.xlu0 %v333_v60, %s5408_s0 }
  0x81   :  { %v5823_v6 = vpop.permute.xlu2 %569  ;;  %v5825_v16 = vpop.permute.xlu1 %551 }
  0x82   :  { %11122 = vst [vmem:[#allocation11_spill] sm:$0xff] %v5823_v6  ;;  %v5832_v18 = vpop.permute.xlu0 %547  ;;  %v5881_v6 = vld [vmem:[%s10932_s1 + $0x1a0] sm:$0xff] }
  0x83   :  { %11123 = vst [vmem:[#allocation12_spill] sm:$0xff] %v5825_v16  ;;  %v343_v24 = vmul.f32 %v5460_v3, %v5881_v6 }
  0x84   :  { %11124 = vst [vmem:[#allocation13_spill] sm:$0xff] %v5832_v18 }
  0x85   :  { %11128 = vst [vmem:[#allocation17_spill] sm:$0xff] %v5881_v6 }
  0x87   :  { %641 = vrot.lane.b32.xlu2 %v338_v29, %s5408_s0  ;;  %639 = vrot.lane.b32.xlu1 %v337_v30, %s5408_s0  ;;  %v341_v29 = vmul.f32 %v5460_v3, %v5846_v42  ;;  %v340_v30 = vmul.f32 %v5460_v3, %v5851_v46 }
  0x88   :  { %637 = vrot.lane.b32.xlu0 %v336_v34, %s5408_s0  ;;  %v339_v34 = vmul.f32 %v5460_v3, %v5860_v59 }
  0x89   :  { %v5853_v47 = vpop.permute.xlu2 %575  ;;  %v5855_v58 = vpop.permute.xlu1 %553 }
  0x8a   :  { %11125 = vst [vmem:[#allocation14_spill] sm:$0xff] %v5853_v47  ;;  %v5862_v60 = vpop.permute.xlu0 %549  ;;  %v5876_v47 = vld [vmem:[%s10932_s1 + $0x1a8] sm:$0xff] }
  0x8b   :  { %11126 = vst [vmem:[#allocation15_spill] sm:$0xff] %v5855_v58 }
  0x8c   :  { %11127 = vst [vmem:[#allocation16_spill] sm:$0xff] %v5862_v60 }
  0x8f   :  { %647 = vrot.lane.b32.xlu2 %v341_v29, %s5408_s0  ;;  %645 = vrot.lane.b32.xlu1 %v340_v30, %s5408_s0  ;;  %v5890_v29 = vld [vmem:[%s10932_s1 + $0x198] sm:$0xff] }
  0x90   :  { %643 = vrot.lane.b32.xlu0 %v339_v34, %s5408_s0  ;;  %v344_v34 = vmul.f32 %v5460_v3, %v5876_v47  ;;  %v342_v60 = vmul.f32 %v5460_v3, %v5890_v29 }
  0x91   :  { %v5883_v53 = vpop.permute.xlu2 %581  ;;  %v5885_v40 = vpop.permute.xlu1 %561 }
  0x92   :  { %11129 = vst [vmem:[#allocation18_spill] sm:$0xff] %v5883_v53  ;;  %v5892_v30 = vpop.permute.xlu0 %559  ;;  %v5906_v53 = vld [vmem:[%s10932_s1 + $0x1c0] sm:$0xff] }
  0x93   :  { %11130 = vst [vmem:[#allocation19_spill] sm:$0xff] %v5885_v40  ;;  %v5911_v40 = vld [vmem:[%s10932_s1 + $0x1b8] sm:$0xff] }
  0x94   :  { %11131 = vst [vmem:[#allocation20_spill] sm:$0xff] %v5892_v30  ;;  %v346_v58 = vmul.f32 %v5460_v3, %v5911_v40 }
  0x95   :  { %11132 = vst [vmem:[#allocation21_spill] sm:$0xff] %v5906_v53 }
  0x96   :  { %11133 = vst [vmem:[#allocation22_spill] sm:$0xff] %v5911_v40 }
  0x97   :  { %653 = vrot.lane.b32.xlu2 %v344_v34, %s5408_s0  ;;  %651 = vrot.lane.b32.xlu1 %v343_v24, %s5408_s0  ;;  %v5920_v24 = vld [vmem:[%s10932_s1 + $0x1b0] sm:$0xff]  ;;  %v347_v34 = vmul.f32 %v5460_v3, %v5906_v53 }
  0x98   :  { %649 = vrot.lane.b32.xlu0 %v342_v60, %s5408_s0  ;;  %v345_v18 = vmul.f32 %v5460_v3, %v5920_v24 }
  0x99   :  { %v5913_v30 = vpop.permute.xlu2 %587  ;;  %v5915_v16 = vpop.permute.xlu1 %567 }
  0x9a   :  { %11134 = vst [vmem:[#allocation23_spill] sm:$0xff] %v5913_v30  ;;  %v5922_v60 = vpop.permute.xlu0 %565  ;;  %v5936_v30 = vld [vmem:[%s10932_s1 + $0x1d8] sm:$0xff] }
  0x9b   :  { %11135 = vst [vmem:[#allocation24_spill] sm:$0xff] %v5915_v16  ;;  %v5941_v16 = vld [vmem:[%s10932_s1 + $0x1d0] sm:$0xff] }
  0x9c   :  { %11136 = vst [vmem:[#allocation25_spill] sm:$0xff] %v5922_v60  ;;  %v349_v53 = vmul.f32 %v5460_v3, %v5941_v16 }
  0x9d   :  { %11137 = vst [vmem:[#allocation26_spill] sm:$0xff] %v5936_v30 }
  0x9e   :  { %11138 = vst [vmem:[#allocation27_spill] sm:$0xff] %v5941_v16 }
  0x9f   :  { %659 = vrot.lane.b32.xlu2 %v347_v34, %s5408_s0  ;;  %657 = vrot.lane.b32.xlu1 %v346_v58, %s5408_s0  ;;  %v5950_v58 = vld [vmem:[%s10932_s1 + $0x1c8] sm:$0xff]  ;;  %v350_v34 = vmul.f32 %v5460_v3, %v5936_v30 }
  0xa0   :  { %655 = vrot.lane.b32.xlu0 %v345_v18, %s5408_s0  ;;  %11141 = vst [vmem:[#allocation30_spill] sm:$0xff] %v5950_v58  ;;  %v348_v6 = vmul.f32 %v5460_v3, %v5950_v58 }
  0xa1   :  { %v5943_v60 = vpop.permute.xlu2 %593  ;;  %v5945_v40 = vpop.permute.xlu1 %573 }
  0xa2   :  { %11139 = vst [vmem:[#allocation28_spill] sm:$0xff] %v5943_v60  ;;  %v5952_v18 = vpop.permute.xlu0 %571  ;;  %v5966_v60 = vld [vmem:[%s10932_s1 + $0x1f0] sm:$0xff] }
  0xa3   :  { %11140 = vst [vmem:[#allocation29_spill] sm:$0xff] %v5945_v40  ;;  %v5971_v40 = vld [vmem:[%s10932_s1 + $0x1e8] sm:$0xff] }
  0xa4   :  { %11142 = vst [vmem:[#allocation31_spill] sm:$0xff] %v5952_v18  ;;  %v352_v30 = vmul.f32 %v5460_v3, %v5971_v40 }
  0xa5   :  { %11143 = vst [vmem:[#allocation32_spill] sm:$0xff] %v5966_v60 }
  0xa6   :  { %11144 = vst [vmem:[#allocation33_spill] sm:$0xff] %v5971_v40 }
  0xa7   :  { %665 = vrot.lane.b32.xlu2 %v350_v34, %s5408_s0  ;;  %663 = vrot.lane.b32.xlu1 %v349_v53, %s5408_s0  ;;  %v5980_v53 = vld [vmem:[%s10932_s1 + $0x1e0] sm:$0xff]  ;;  %v353_v34 = vmul.f32 %v5460_v3, %v5966_v60 }
  0xa8   :  { %661 = vrot.lane.b32.xlu0 %v348_v6, %s5408_s0  ;;  %11147 = vst [vmem:[#allocation36_spill] sm:$0xff] %v5980_v53  ;;  %v351_v58 = vmul.f32 %v5460_v3, %v5980_v53 }
  0xa9   :  { %v5973_v18 = vpop.permute.xlu2 %599  ;;  %v5975_v16 = vpop.permute.xlu1 %579 }
  0xaa   :  { %11145 = vst [vmem:[#allocation34_spill] sm:$0xff] %v5973_v18  ;;  %v5982_v6 = vpop.permute.xlu0 %577  ;;  %v5996_v18 = vld [vmem:[%s10932_s1 + $0x208] sm:$0xff] }
  0xab   :  { %11146 = vst [vmem:[#allocation35_spill] sm:$0xff] %v5975_v16  ;;  %v6001_v16 = vld [vmem:[%s10932_s1 + $0x200] sm:$0xff] }
  0xac   :  { %11148 = vst [vmem:[#allocation37_spill] sm:$0xff] %v5982_v6  ;;  %v355_v60 = vmul.f32 %v5460_v3, %v6001_v16 }
  0xad   :  { %11149 = vst [vmem:[#allocation38_spill] sm:$0xff] %v5996_v18 }
  0xae   :  { %11150 = vst [vmem:[#allocation39_spill] sm:$0xff] %v6001_v16 }
  0xaf   :  { %671 = vrot.lane.b32.xlu2 %v353_v34, %s5408_s0  ;;  %669 = vrot.lane.b32.xlu1 %v352_v30, %s5408_s0  ;;  %v6010_v30 = vld [vmem:[%s10932_s1 + $0x1f8] sm:$0xff]  ;;  %v356_v34 = vmul.f32 %v5460_v3, %v5996_v18 }
  0xb0   :  { %667 = vrot.lane.b32.xlu0 %v351_v58, %s5408_s0  ;;  %11153 = vst [vmem:[#allocation42_spill] sm:$0xff] %v6010_v30  ;;  %v354_v53 = vmul.f32 %v5460_v3, %v6010_v30 }
  0xb1   :  { %v6003_v6 = vpop.permute.xlu2 %605  ;;  %v6005_v40 = vpop.permute.xlu1 %585 }
  0xb2   :  { %11151 = vst [vmem:[#allocation40_spill] sm:$0xff] %v6003_v6  ;;  %v6012_v58 = vpop.permute.xlu0 %583  ;;  %v6026_v6 = vld [vmem:[%s10932_s1 + $0x220] sm:$0xff] }
  0xb3   :  { %11152 = vst [vmem:[#allocation41_spill] sm:$0xff] %v6005_v40  ;;  %v6031_v40 = vld [vmem:[%s10932_s1 + $0x218] sm:$0xff] }
  0xb4   :  { %11154 = vst [vmem:[#allocation43_spill] sm:$0xff] %v6012_v58  ;;  %v358_v18 = vmul.f32 %v5460_v3, %v6031_v40 }
  0xb5   :  { %11155 = vst [vmem:[#allocation44_spill] sm:$0xff] %v6026_v6 }
  0xb6   :  { %11156 = vst [vmem:[#allocation45_spill] sm:$0xff] %v6031_v40 }
  0xb7   :  { %677 = vrot.lane.b32.xlu2 %v356_v34, %s5408_s0  ;;  %675 = vrot.lane.b32.xlu1 %v355_v60, %s5408_s0  ;;  %v6040_v60 = vld [vmem:[%s10932_s1 + $0x210] sm:$0xff]  ;;  %v359_v34 = vmul.f32 %v5460_v3, %v6026_v6 }
  0xb8   :  { %673 = vrot.lane.b32.xlu0 %v354_v53, %s5408_s0  ;;  %11159 = vst [vmem:[#allocation48_spill] sm:$0xff] %v6040_v60  ;;  %v357_v30 = vmul.f32 %v5460_v3, %v6040_v60 }
  0xb9   :  { %v6033_v58 = vpop.permute.xlu2 %611  ;;  %v6035_v16 = vpop.permute.xlu1 %591 }
  0xba   :  { %11157 = vst [vmem:[#allocation46_spill] sm:$0xff] %v6033_v58  ;;  %v6042_v53 = vpop.permute.xlu0 %589  ;;  %v6056_v58 = vld [vmem:[%s10932_s1 + $0x238] sm:$0xff] }
  0xbb   :  { %11158 = vst [vmem:[#allocation47_spill] sm:$0xff] %v6035_v16  ;;  %v6061_v16 = vld [vmem:[%s10932_s1 + $0x230] sm:$0xff] }
  0xbc   :  { %11160 = vst [vmem:[#allocation49_spill] sm:$0xff] %v6042_v53  ;;  %v361_v6 = vmul.f32 %v5460_v3, %v6061_v16 }
  0xbd   :  { %11161 = vst [vmem:[#allocation50_spill] sm:$0xff] %v6056_v58 }
  0xbe   :  { %11162 = vst [vmem:[#allocation51_spill] sm:$0xff] %v6061_v16 }
  0xbf   :  { %683 = vrot.lane.b32.xlu2 %v359_v34, %s5408_s0  ;;  %681 = vrot.lane.b32.xlu1 %v358_v18, %s5408_s0  ;;  %v6070_v18 = vld [vmem:[%s10932_s1 + $0x228] sm:$0xff]  ;;  %v362_v34 = vmul.f32 %v5460_v3, %v6056_v58 }
  0xc0   :  { %679 = vrot.lane.b32.xlu0 %v357_v30, %s5408_s0  ;;  %11165 = vst [vmem:[#allocation54_spill] sm:$0xff] %v6070_v18  ;;  %v360_v60 = vmul.f32 %v5460_v3, %v6070_v18 }
  0xc1   :  { %v6063_v53 = vpop.permute.xlu2 %617  ;;  %v6065_v40 = vpop.permute.xlu1 %597 }
  0xc2   :  { %11163 = vst [vmem:[#allocation52_spill] sm:$0xff] %v6063_v53  ;;  %v6072_v30 = vpop.permute.xlu0 %595  ;;  %v6086_v53 = vld [vmem:[%s10932_s1 + $0x250] sm:$0xff] }
  0xc3   :  { %11164 = vst [vmem:[#allocation53_spill] sm:$0xff] %v6065_v40  ;;  %v6091_v40 = vld [vmem:[%s10932_s1 + $0x248] sm:$0xff] }
  0xc4   :  { %11166 = vst [vmem:[#allocation55_spill] sm:$0xff] %v6072_v30  ;;  %v364_v58 = vmul.f32 %v5460_v3, %v6091_v40 }
  0xc5   :  { %11167 = vst [vmem:[#allocation56_spill] sm:$0xff] %v6086_v53 }
  0xc6   :  { %11168 = vst [vmem:[#allocation57_spill] sm:$0xff] %v6091_v40 }
  0xc7   :  { %689 = vrot.lane.b32.xlu2 %v362_v34, %s5408_s0  ;;  %687 = vrot.lane.b32.xlu1 %v361_v6, %s5408_s0  ;;  %v6100_v6 = vld [vmem:[%s10932_s1 + $0x240] sm:$0xff]  ;;  %v365_v34 = vmul.f32 %v5460_v3, %v6086_v53 }
  0xc8   :  { %685 = vrot.lane.b32.xlu0 %v360_v60, %s5408_s0  ;;  %11171 = vst [vmem:[#allocation60_spill] sm:$0xff] %v6100_v6  ;;  %v363_v18 = vmul.f32 %v5460_v3, %v6100_v6 }
  0xc9   :  { %v6093_v30 = vpop.permute.xlu2 %623  ;;  %v6095_v16 = vpop.permute.xlu1 %603 }
  0xca   :  { %11169 = vst [vmem:[#allocation58_spill] sm:$0xff] %v6093_v30  ;;  %v6102_v60 = vpop.permute.xlu0 %601  ;;  %v6116_v30 = vld [vmem:[%s10932_s1 + $0x268] sm:$0xff] }
  0xcb   :  { %11170 = vst [vmem:[#allocation59_spill] sm:$0xff] %v6095_v16  ;;  %v6121_v16 = vld [vmem:[%s10932_s1 + $0x260] sm:$0xff] }
  0xcc   :  { %11172 = vst [vmem:[#allocation61_spill] sm:$0xff] %v6102_v60  ;;  %v367_v53 = vmul.f32 %v5460_v3, %v6121_v16 }
  0xcd   :  { %11173 = vst [vmem:[#allocation62_spill] sm:$0xff] %v6116_v30 }
  0xce   :  { %11174 = vst [vmem:[#allocation63_spill] sm:$0xff] %v6121_v16 }
  0xcf   :  { %695 = vrot.lane.b32.xlu2 %v365_v34, %s5408_s0  ;;  %693 = vrot.lane.b32.xlu1 %v364_v58, %s5408_s0  ;;  %v6130_v58 = vld [vmem:[%s10932_s1 + $0x258] sm:$0xff]  ;;  %v368_v34 = vmul.f32 %v5460_v3, %v6116_v30 }
  0xd0   :  { %691 = vrot.lane.b32.xlu0 %v363_v18, %s5408_s0  ;;  %11177 = vst [vmem:[#allocation66_spill] sm:$0xff] %v6130_v58  ;;  %v366_v6 = vmul.f32 %v5460_v3, %v6130_v58 }
  0xd1   :  { %v6123_v60 = vpop.permute.xlu2 %629  ;;  %v6125_v40 = vpop.permute.xlu1 %609 }
  0xd2   :  { %11175 = vst [vmem:[#allocation64_spill] sm:$0xff] %v6123_v60  ;;  %v6132_v18 = vpop.permute.xlu0 %607  ;;  %v6146_v60 = vld [vmem:[%s10932_s1 + $0x280] sm:$0xff] }
  0xd3   :  { %11176 = vst [vmem:[#allocation65_spill] sm:$0xff] %v6125_v40  ;;  %v6151_v40 = vld [vmem:[%s10932_s1 + $0x278] sm:$0xff] }
  0xd4   :  { %11178 = vst [vmem:[#allocation67_spill] sm:$0xff] %v6132_v18  ;;  %v370_v30 = vmul.f32 %v5460_v3, %v6151_v40 }
  0xd5   :  { %11179 = vst [vmem:[#allocation68_spill] sm:$0xff] %v6146_v60 }
  0xd6   :  { %11180 = vst [vmem:[#allocation69_spill] sm:$0xff] %v6151_v40 }
  0xd7   :  { %701 = vrot.lane.b32.xlu2 %v368_v34, %s5408_s0  ;;  %699 = vrot.lane.b32.xlu1 %v367_v53, %s5408_s0  ;;  %v6160_v53 = vld [vmem:[%s10932_s1 + $0x270] sm:$0xff]  ;;  %v371_v34 = vmul.f32 %v5460_v3, %v6146_v60 }
  0xd8   :  { %697 = vrot.lane.b32.xlu0 %v366_v6, %s5408_s0  ;;  %11183 = vst [vmem:[#allocation72_spill] sm:$0xff] %v6160_v53  ;;  %v369_v58 = vmul.f32 %v5460_v3, %v6160_v53 }
  0xd9   :  { %v6153_v18 = vpop.permute.xlu2 %635  ;;  %v6155_v16 = vpop.permute.xlu1 %615 }
  0xda   :  { %11181 = vst [vmem:[#allocation70_spill] sm:$0xff] %v6153_v18  ;;  %v6162_v6 = vpop.permute.xlu0 %613  ;;  %v6176_v18 = vld [vmem:[%s10932_s1 + $0x298] sm:$0xff] }
  0xdb   :  { %11182 = vst [vmem:[#allocation71_spill] sm:$0xff] %v6155_v16  ;;  %v6181_v16 = vld [vmem:[%s10932_s1 + $0x290] sm:$0xff] }
  0xdc   :  { %11184 = vst [vmem:[#allocation73_spill] sm:$0xff] %v6162_v6  ;;  %v373_v60 = vmul.f32 %v5460_v3, %v6181_v16 }
  0xdd   :  { %11185 = vst [vmem:[#allocation74_spill] sm:$0xff] %v6176_v18 }
  0xde   :  { %11186 = vst [vmem:[#allocation75_spill] sm:$0xff] %v6181_v16 }
  0xdf   :  { %707 = vrot.lane.b32.xlu2 %v371_v34, %s5408_s0  ;;  %705 = vrot.lane.b32.xlu1 %v370_v30, %s5408_s0  ;;  %v6190_v30 = vld [vmem:[%s10932_s1 + $0x288] sm:$0xff]  ;;  %v374_v34 = vmul.f32 %v5460_v3, %v6176_v18 }
  0xe0   :  { %703 = vrot.lane.b32.xlu0 %v369_v58, %s5408_s0  ;;  %11189 = vst [vmem:[#allocation78_spill] sm:$0xff] %v6190_v30  ;;  %v372_v53 = vmul.f32 %v5460_v3, %v6190_v30 }
  0xe1   :  { %v6183_v6 = vpop.permute.xlu2 %641  ;;  %v6185_v40 = vpop.permute.xlu1 %621 }
  0xe2   :  { %11187 = vst [vmem:[#allocation76_spill] sm:$0xff] %v6183_v6  ;;  %v6192_v58 = vpop.permute.xlu0 %619  ;;  %v6206_v6 = vld [vmem:[%s10932_s1 + $0x2b0] sm:$0xff] }
  0xe3   :  { %11188 = vst [vmem:[#allocation77_spill] sm:$0xff] %v6185_v40  ;;  %v6211_v40 = vld [vmem:[%s10932_s1 + $0x2a8] sm:$0xff] }
  0xe4   :  { %11190 = vst [vmem:[#allocation79_spill] sm:$0xff] %v6192_v58  ;;  %v376_v18 = vmul.f32 %v5460_v3, %v6211_v40 }
  0xe5   :  { %11191 = vst [vmem:[#allocation80_spill] sm:$0xff] %v6206_v6 }
  0xe6   :  { %11192 = vst [vmem:[#allocation81_spill] sm:$0xff] %v6211_v40 }
  0xe7   :  { %713 = vrot.lane.b32.xlu2 %v374_v34, %s5408_s0  ;;  %711 = vrot.lane.b32.xlu1 %v373_v60, %s5408_s0  ;;  %v6220_v60 = vld [vmem:[%s10932_s1 + $0x2a0] sm:$0xff]  ;;  %v377_v34 = vmul.f32 %v5460_v3, %v6206_v6 }
  0xe8   :  { %709 = vrot.lane.b32.xlu0 %v372_v53, %s5408_s0  ;;  %11195 = vst [vmem:[#allocation84_spill] sm:$0xff] %v6220_v60  ;;  %v375_v30 = vmul.f32 %v5460_v3, %v6220_v60 }
  0xe9   :  { %v6213_v58 = vpop.permute.xlu2 %647  ;;  %v6215_v16 = vpop.permute.xlu1 %627 }
  0xea   :  { %11193 = vst [vmem:[#allocation82_spill] sm:$0xff] %v6213_v58  ;;  %v6222_v53 = vpop.permute.xlu0 %625  ;;  %v6236_v58 = vld [vmem:[%s10932_s1 + $0x2c8] sm:$0xff] }
  0xeb   :  { %11194 = vst [vmem:[#allocation83_spill] sm:$0xff] %v6215_v16  ;;  %v6241_v16 = vld [vmem:[%s10932_s1 + $0x2c0] sm:$0xff] }
  0xec   :  { %11196 = vst [vmem:[#allocation85_spill] sm:$0xff] %v6222_v53  ;;  %v379_v6 = vmul.f32 %v5460_v3, %v6241_v16 }
  0xed   :  { %11197 = vst [vmem:[#allocation86_spill] sm:$0xff] %v6236_v58 }
  0xee   :  { %11198 = vst [vmem:[#allocation87_spill] sm:$0xff] %v6241_v16 }
  0xef   :  { %719 = vrot.lane.b32.xlu2 %v377_v34, %s5408_s0  ;;  %717 = vrot.lane.b32.xlu1 %v376_v18, %s5408_s0  ;;  %v6250_v18 = vld [vmem:[%s10932_s1 + $0x2b8] sm:$0xff]  ;;  %v380_v34 = vmul.f32 %v5460_v3, %v6236_v58 }
  0xf0   :  { %715 = vrot.lane.b32.xlu0 %v375_v30, %s5408_s0  ;;  %11201 = vst [vmem:[#allocation90_spill] sm:$0xff] %v6250_v18  ;;  %v378_v60 = vmul.f32 %v5460_v3, %v6250_v18 }
  0xf1   :  { %v6243_v53 = vpop.permute.xlu2 %653  ;;  %v6245_v40 = vpop.permute.xlu1 %633 }
  0xf2   :  { %11199 = vst [vmem:[#allocation88_spill] sm:$0xff] %v6243_v53  ;;  %v6252_v30 = vpop.permute.xlu0 %631  ;;  %v6266_v53 = vld [vmem:[%s10932_s1 + $0x2e0] sm:$0xff] }
  0xf3   :  { %11200 = vst [vmem:[#allocation89_spill] sm:$0xff] %v6245_v40  ;;  %v6271_v40 = vld [vmem:[%s10932_s1 + $0x2d8] sm:$0xff] }
  0xf4   :  { %11202 = vst [vmem:[#allocation91_spill] sm:$0xff] %v6252_v30  ;;  %v382_v58 = vmul.f32 %v5460_v3, %v6271_v40 }
  0xf5   :  { %11203 = vst [vmem:[#allocation92_spill] sm:$0xff] %v6266_v53 }
  0xf6   :  { %11204 = vst [vmem:[#allocation93_spill] sm:$0xff] %v6271_v40 }
  0xf7   :  { %725 = vrot.lane.b32.xlu2 %v380_v34, %s5408_s0  ;;  %723 = vrot.lane.b32.xlu1 %v379_v6, %s5408_s0  ;;  %v6280_v6 = vld [vmem:[%s10932_s1 + $0x2d0] sm:$0xff]  ;;  %v383_v34 = vmul.f32 %v5460_v3, %v6266_v53 }
  0xf8   :  { %721 = vrot.lane.b32.xlu0 %v378_v60, %s5408_s0  ;;  %11207 = vst [vmem:[#allocation96_spill] sm:$0xff] %v6280_v6  ;;  %v381_v18 = vmul.f32 %v5460_v3, %v6280_v6 }
  0xf9   :  { %v6273_v30 = vpop.permute.xlu2 %659  ;;  %v6275_v16 = vpop.permute.xlu1 %639 }
  0xfa   :  { %11205 = vst [vmem:[#allocation94_spill] sm:$0xff] %v6273_v30  ;;  %v6282_v60 = vpop.permute.xlu0 %637  ;;  %v6296_v30 = vld [vmem:[%s10932_s1 + $0x2f8] sm:$0xff] }
  0xfb   :  { %11206 = vst [vmem:[#allocation95_spill] sm:$0xff] %v6275_v16  ;;  %v6301_v16 = vld [vmem:[%s10932_s1 + $0x2f0] sm:$0xff] }
  0xfc   :  { %11208 = vst [vmem:[#allocation97_spill] sm:$0xff] %v6282_v60  ;;  %v385_v53 = vmul.f32 %v5460_v3, %v6301_v16 }
  0xfd   :  { %11209 = vst [vmem:[#allocation98_spill] sm:$0xff] %v6296_v30 }
  0xfe   :  { %11210 = vst [vmem:[#allocation99_spill] sm:$0xff] %v6301_v16 }
  0xff   :  { %731 = vrot.lane.b32.xlu2 %v383_v34, %s5408_s0  ;;  %729 = vrot.lane.b32.xlu1 %v382_v58, %s5408_s0  ;;  %v6310_v58 = vld [vmem:[%s10932_s1 + $0x2e8] sm:$0xff]  ;;  %v386_v34 = vmul.f32 %v5460_v3, %v6296_v30 }
 0x100   :  { %727 = vrot.lane.b32.xlu0 %v381_v18, %s5408_s0  ;;  %11213 = vst [vmem:[#allocation102_spill] sm:$0xff] %v6310_v58  ;;  %v384_v6 = vmul.f32 %v5460_v3, %v6310_v58 }
 0x101   :  { %v6303_v60 = vpop.permute.xlu2 %665  ;;  %v6305_v40 = vpop.permute.xlu1 %645 }
 0x102   :  { %11211 = vst [vmem:[#allocation100_spill] sm:$0xff] %v6303_v60  ;;  %v6312_v18 = vpop.permute.xlu0 %643  ;;  %v6326_v60 = vld [vmem:[%s10932_s1 + $0x310] sm:$0xff] }
 0x103   :  { %11212 = vst [vmem:[#allocation101_spill] sm:$0xff] %v6305_v40  ;;  %v6331_v40 = vld [vmem:[%s10932_s1 + $0x308] sm:$0xff] }
 0x104   :  { %11214 = vst [vmem:[#allocation103_spill] sm:$0xff] %v6312_v18  ;;  %v388_v30 = vmul.f32 %v5460_v3, %v6331_v40 }
 0x105   :  { %11215 = vst [vmem:[#allocation104_spill] sm:$0xff] %v6326_v60 }
 0x106   :  { %11216 = vst [vmem:[#allocation105_spill] sm:$0xff] %v6331_v40 }
 0x107   :  { %737 = vrot.lane.b32.xlu2 %v386_v34, %s5408_s0  ;;  %735 = vrot.lane.b32.xlu1 %v385_v53, %s5408_s0  ;;  %v6340_v53 = vld [vmem:[%s10932_s1 + $0x300] sm:$0xff]  ;;  %v389_v34 = vmul.f32 %v5460_v3, %v6326_v60 }
 0x108   :  { %733 = vrot.lane.b32.xlu0 %v384_v6, %s5408_s0  ;;  %11219 = vst [vmem:[#allocation108_spill] sm:$0xff] %v6340_v53  ;;  %v387_v58 = vmul.f32 %v5460_v3, %v6340_v53 }
 0x109   :  { %v6333_v18 = vpop.permute.xlu2 %671  ;;  %v6335_v16 = vpop.permute.xlu1 %651 }
 0x10a   :  { %11217 = vst [vmem:[#allocation106_spill] sm:$0xff] %v6333_v18  ;;  %v6342_v6 = vpop.permute.xlu0 %649  ;;  %v6356_v18 = vld [vmem:[%s10932_s1 + $0x328] sm:$0xff] }
 0x10b   :  { %11218 = vst [vmem:[#allocation107_spill] sm:$0xff] %v6335_v16  ;;  %v6361_v16 = vld [vmem:[%s10932_s1 + $0x320] sm:$0xff] }
 0x10c   :  { %11220 = vst [vmem:[#allocation109_spill] sm:$0xff] %v6342_v6  ;;  %v391_v60 = vmul.f32 %v5460_v3, %v6361_v16 }
 0x10d   :  { %11221 = vst [vmem:[#allocation110_spill] sm:$0xff] %v6356_v18 }
 0x10e   :  { %11222 = vst [vmem:[#allocation111_spill] sm:$0xff] %v6361_v16 }
 0x10f   :  { %743 = vrot.lane.b32.xlu2 %v389_v34, %s5408_s0  ;;  %741 = vrot.lane.b32.xlu1 %v388_v30, %s5408_s0  ;;  %v6370_v30 = vld [vmem:[%s10932_s1 + $0x318] sm:$0xff]  ;;  %v392_v34 = vmul.f32 %v5460_v3, %v6356_v18 }
 0x110   :  { %739 = vrot.lane.b32.xlu0 %v387_v58, %s5408_s0  ;;  %11225 = vst [vmem:[#allocation114_spill] sm:$0xff] %v6370_v30  ;;  %v390_v53 = vmul.f32 %v5460_v3, %v6370_v30 }
 0x111   :  { %v6363_v6 = vpop.permute.xlu2 %677  ;;  %v6365_v40 = vpop.permute.xlu1 %657 }
 0x112   :  { %11223 = vst [vmem:[#allocation112_spill] sm:$0xff] %v6363_v6  ;;  %v6372_v58 = vpop.permute.xlu0 %655  ;;  %v6386_v6 = vld [vmem:[%s10932_s1 + $0x340] sm:$0xff] }
 0x113   :  { %11224 = vst [vmem:[#allocation113_spill] sm:$0xff] %v6365_v40  ;;  %v6391_v40 = vld [vmem:[%s10932_s1 + $0x338] sm:$0xff] }
 0x114   :  { %11226 = vst [vmem:[#allocation115_spill] sm:$0xff] %v6372_v58  ;;  %v394_v18 = vmul.f32 %v5460_v3, %v6391_v40 }
 0x115   :  { %11227 = vst [vmem:[#allocation116_spill] sm:$0xff] %v6386_v6 }
 0x116   :  { %11228 = vst [vmem:[#allocation117_spill] sm:$0xff] %v6391_v40 }
 0x117   :  { %749 = vrot.lane.b32.xlu2 %v392_v34, %s5408_s0  ;;  %747 = vrot.lane.b32.xlu1 %v391_v60, %s5408_s0  ;;  %v6400_v60 = vld [vmem:[%s10932_s1 + $0x330] sm:$0xff]  ;;  %v395_v34 = vmul.f32 %v5460_v3, %v6386_v6 }
 0x118   :  { %745 = vrot.lane.b32.xlu0 %v390_v53, %s5408_s0  ;;  %11231 = vst [vmem:[#allocation120_spill] sm:$0xff] %v6400_v60  ;;  %v393_v30 = vmul.f32 %v5460_v3, %v6400_v60 }
 0x119   :  { %v6393_v58 = vpop.permute.xlu2 %683  ;;  %v6395_v16 = vpop.permute.xlu1 %663 }
 0x11a   :  { %11229 = vst [vmem:[#allocation118_spill] sm:$0xff] %v6393_v58  ;;  %v6402_v53 = vpop.permute.xlu0 %661  ;;  %v6416_v58 = vld [vmem:[%s10932_s1 + $0x358] sm:$0xff] }
 0x11b   :  { %11230 = vst [vmem:[#allocation119_spill] sm:$0xff] %v6395_v16  ;;  %v6421_v16 = vld [vmem:[%s10932_s1 + $0x350] sm:$0xff] }
 0x11c   :  { %11232 = vst [vmem:[#allocation121_spill] sm:$0xff] %v6402_v53  ;;  %v397_v6 = vmul.f32 %v5460_v3, %v6421_v16 }
 0x11d   :  { %11233 = vst [vmem:[#allocation122_spill] sm:$0xff] %v6416_v58 }
 0x11e   :  { %11234 = vst [vmem:[#allocation123_spill] sm:$0xff] %v6421_v16 }
 0x11f   :  { %755 = vrot.lane.b32.xlu2 %v395_v34, %s5408_s0  ;;  %753 = vrot.lane.b32.xlu1 %v394_v18, %s5408_s0  ;;  %v6430_v18 = vld [vmem:[%s10932_s1 + $0x348] sm:$0xff]  ;;  %v398_v34 = vmul.f32 %v5460_v3, %v6416_v58 }
 0x120   :  { %751 = vrot.lane.b32.xlu0 %v393_v30, %s5408_s0  ;;  %11237 = vst [vmem:[#allocation126_spill] sm:$0xff] %v6430_v18  ;;  %v396_v60 = vmul.f32 %v5460_v3, %v6430_v18 }
 0x121   :  { %v6423_v53 = vpop.permute.xlu2 %689  ;;  %v6425_v40 = vpop.permute.xlu1 %669 }
 0x122   :  { %11235 = vst [vmem:[#allocation124_spill] sm:$0xff] %v6423_v53  ;;  %v6432_v30 = vpop.permute.xlu0 %667  ;;  %v6446_v53 = vld [vmem:[%s10932_s1 + $0x370] sm:$0xff] }
 0x123   :  { %11236 = vst [vmem:[#allocation125_spill] sm:$0xff] %v6425_v40  ;;  %v6451_v40 = vld [vmem:[%s10932_s1 + $0x368] sm:$0xff] }
 0x124   :  { %11238 = vst [vmem:[#allocation127_spill] sm:$0xff] %v6432_v30  ;;  %v400_v58 = vmul.f32 %v5460_v3, %v6451_v40 }
 0x125   :  { %11239 = vst [vmem:[#allocation128_spill] sm:$0xff] %v6446_v53 }
 0x126   :  { %11240 = vst [vmem:[#allocation129_spill] sm:$0xff] %v6451_v40 }
 0x127   :  { %761 = vrot.lane.b32.xlu2 %v398_v34, %s5408_s0  ;;  %759 = vrot.lane.b32.xlu1 %v397_v6, %s5408_s0  ;;  %v6460_v6 = vld [vmem:[%s10932_s1 + $0x360] sm:$0xff]  ;;  %v401_v34 = vmul.f32 %v5460_v3, %v6446_v53 }
 0x128   :  { %757 = vrot.lane.b32.xlu0 %v396_v60, %s5408_s0  ;;  %11243 = vst [vmem:[#allocation132_spill] sm:$0xff] %v6460_v6  ;;  %v399_v18 = vmul.f32 %v5460_v3, %v6460_v6 }
 0x129   :  { %v6453_v30 = vpop.permute.xlu2 %695  ;;  %v6455_v16 = vpop.permute.xlu1 %675 }
 0x12a   :  { %11241 = vst [vmem:[#allocation130_spill] sm:$0xff] %v6453_v30  ;;  %v6462_v60 = vpop.permute.xlu0 %673  ;;  %v6476_v30 = vld [vmem:[%s10932_s1 + $0x388] sm:$0xff] }
 0x12b   :  { %11242 = vst [vmem:[#allocation131_spill] sm:$0xff] %v6455_v16  ;;  %v6481_v16 = vld [vmem:[%s10932_s1 + $0x380] sm:$0xff] }
 0x12c   :  { %11244 = vst [vmem:[#allocation133_spill] sm:$0xff] %v6462_v60  ;;  %v403_v53 = vmul.f32 %v5460_v3, %v6481_v16 }
 0x12d   :  { %11245 = vst [vmem:[#allocation134_spill] sm:$0xff] %v6476_v30 }
 0x12e   :  { %11246 = vst [vmem:[#allocation135_spill] sm:$0xff] %v6481_v16 }
 0x12f   :  { %767 = vrot.lane.b32.xlu2 %v401_v34, %s5408_s0  ;;  %765 = vrot.lane.b32.xlu1 %v400_v58, %s5408_s0  ;;  %v6490_v58 = vld [vmem:[%s10932_s1 + $0x378] sm:$0xff]  ;;  %v404_v34 = vmul.f32 %v5460_v3, %v6476_v30 }
 0x130   :  { %763 = vrot.lane.b32.xlu0 %v399_v18, %s5408_s0  ;;  %11249 = vst [vmem:[#allocation138_spill] sm:$0xff] %v6490_v58  ;;  %v402_v6 = vmul.f32 %v5460_v3, %v6490_v58 }
 0x131   :  { %v6483_v60 = vpop.permute.xlu2 %701  ;;  %v6485_v40 = vpop.permute.xlu1 %681 }
 0x132   :  { %11247 = vst [vmem:[#allocation136_spill] sm:$0xff] %v6483_v60  ;;  %v6492_v18 = vpop.permute.xlu0 %679  ;;  %v6506_v60 = vld [vmem:[%s10932_s1 + $0x3a0] sm:$0xff] }
 0x133   :  { %11248 = vst [vmem:[#allocation137_spill] sm:$0xff] %v6485_v40  ;;  %v6511_v40 = vld [vmem:[%s10932_s1 + $0x398] sm:$0xff] }
 0x134   :  { %11250 = vst [vmem:[#allocation139_spill] sm:$0xff] %v6492_v18  ;;  %v406_v30 = vmul.f32 %v5460_v3, %v6511_v40 }
 0x135   :  { %11251 = vst [vmem:[#allocation140_spill] sm:$0xff] %v6506_v60 }
 0x136   :  { %11252 = vst [vmem:[#allocation141_spill] sm:$0xff] %v6511_v40 }
 0x137   :  { %773 = vrot.lane.b32.xlu2 %v404_v34, %s5408_s0  ;;  %771 = vrot.lane.b32.xlu1 %v403_v53, %s5408_s0  ;;  %v6520_v53 = vld [vmem:[%s10932_s1 + $0x390] sm:$0xff]  ;;  %v407_v34 = vmul.f32 %v5460_v3, %v6506_v60 }
 0x138   :  { %769 = vrot.lane.b32.xlu0 %v402_v6, %s5408_s0  ;;  %11255 = vst [vmem:[#allocation144_spill] sm:$0xff] %v6520_v53  ;;  %v405_v58 = vmul.f32 %v5460_v3, %v6520_v53 }
 0x139   :  { %v6513_v18 = vpop.permute.xlu2 %707  ;;  %v6515_v16 = vpop.permute.xlu1 %687 }
 0x13a   :  { %11253 = vst [vmem:[#allocation142_spill] sm:$0xff] %v6513_v18  ;;  %v6522_v6 = vpop.permute.xlu0 %685  ;;  %v6536_v18 = vld [vmem:[%s10932_s1 + $0x3b8] sm:$0xff] }
 0x13b   :  { %11254 = vst [vmem:[#allocation143_spill] sm:$0xff] %v6515_v16  ;;  %v6541_v16 = vld [vmem:[%s10932_s1 + $0x3b0] sm:$0xff] }
 0x13c   :  { %11256 = vst [vmem:[#allocation145_spill] sm:$0xff] %v6522_v6  ;;  %v409_v60 = vmul.f32 %v5460_v3, %v6541_v16 }
 0x13d   :  { %11257 = vst [vmem:[#allocation146_spill] sm:$0xff] %v6536_v18 }
 0x13e   :  { %11258 = vst [vmem:[#allocation147_spill] sm:$0xff] %v6541_v16 }
 0x13f   :  { %779 = vrot.lane.b32.xlu2 %v407_v34, %s5408_s0  ;;  %777 = vrot.lane.b32.xlu1 %v406_v30, %s5408_s0  ;;  %v6550_v30 = vld [vmem:[%s10932_s1 + $0x3a8] sm:$0xff]  ;;  %v410_v34 = vmul.f32 %v5460_v3, %v6536_v18 }
 0x140   :  { %775 = vrot.lane.b32.xlu0 %v405_v58, %s5408_s0  ;;  %11261 = vst [vmem:[#allocation150_spill] sm:$0xff] %v6550_v30  ;;  %v408_v53 = vmul.f32 %v5460_v3, %v6550_v30 }
 0x141   :  { %v6543_v6 = vpop.permute.xlu2 %713  ;;  %v6545_v40 = vpop.permute.xlu1 %693 }
 0x142   :  { %11259 = vst [vmem:[#allocation148_spill] sm:$0xff] %v6543_v6  ;;  %v6552_v58 = vpop.permute.xlu0 %691  ;;  %v6566_v6 = vld [vmem:[%s10932_s1 + $0x3d0] sm:$0xff] }
 0x143   :  { %11260 = vst [vmem:[#allocation149_spill] sm:$0xff] %v6545_v40  ;;  %v6571_v40 = vld [vmem:[%s10932_s1 + $0x3c8] sm:$0xff] }
 0x144   :  { %11262 = vst [vmem:[#allocation151_spill] sm:$0xff] %v6552_v58  ;;  %v412_v18 = vmul.f32 %v5460_v3, %v6571_v40 }
 0x145   :  { %11263 = vst [vmem:[#allocation152_spill] sm:$0xff] %v6566_v6 }
 0x146   :  { %11264 = vst [vmem:[#allocation153_spill] sm:$0xff] %v6571_v40 }
 0x147   :  { %785 = vrot.lane.b32.xlu2 %v410_v34, %s5408_s0  ;;  %783 = vrot.lane.b32.xlu1 %v409_v60, %s5408_s0  ;;  %v6580_v60 = vld [vmem:[%s10932_s1 + $0x3c0] sm:$0xff]  ;;  %v413_v34 = vmul.f32 %v5460_v3, %v6566_v6 }
 0x148   :  { %781 = vrot.lane.b32.xlu0 %v408_v53, %s5408_s0  ;;  %11267 = vst [vmem:[#allocation156_spill] sm:$0xff] %v6580_v60  ;;  %v411_v30 = vmul.f32 %v5460_v3, %v6580_v60 }
 0x149   :  { %v6573_v58 = vpop.permute.xlu2 %719  ;;  %v6575_v16 = vpop.permute.xlu1 %699 }
 0x14a   :  { %11265 = vst [vmem:[#allocation154_spill] sm:$0xff] %v6573_v58  ;;  %v6582_v53 = vpop.permute.xlu0 %697  ;;  %v6596_v58 = vld [vmem:[%s10932_s1 + $0x3e8] sm:$0xff] }
 0x14b   :  { %11266 = vst [vmem:[#allocation155_spill] sm:$0xff] %v6575_v16  ;;  %v6601_v16 = vld [vmem:[%s10932_s1 + $0x3e0] sm:$0xff] }
 0x14c   :  { %11268 = vst [vmem:[#allocation157_spill] sm:$0xff] %v6582_v53  ;;  %v415_v6 = vmul.f32 %v5460_v3, %v6601_v16 }
 0x14d   :  { %11269 = vst [vmem:[#allocation158_spill] sm:$0xff] %v6596_v58 }
 0x14e   :  { %11270 = vst [vmem:[#allocation159_spill] sm:$0xff] %v6601_v16  ;;  %v6637_v16 = vld [vmem:[%s10932_s1 + $0x3f0] sm:$0xff] }
 0x14f   :  { %791 = vrot.lane.b32.xlu2 %v413_v34, %s5408_s0  ;;  %789 = vrot.lane.b32.xlu1 %v412_v18, %s5408_s0  ;;  %v6610_v18 = vld [vmem:[%s10932_s1 + $0x3d8] sm:$0xff]  ;;  %v416_v34 = vmul.f32 %v5460_v3, %v6596_v58 }
 0x150   :  { %787 = vrot.lane.b32.xlu0 %v411_v30, %s5408_s0  ;;  %11273 = vst [vmem:[#allocation162_spill] sm:$0xff] %v6610_v18  ;;  %v414_v60 = vmul.f32 %v5460_v3, %v6610_v18  ;;  %v417_v18 = vmul.f32 %v5460_v3, %v6637_v16 }
 0x151   :  { %v6603_v53 = vpop.permute.xlu2 %725  ;;  %v6605_v40 = vpop.permute.xlu1 %705 }
 0x152   :  { %11271 = vst [vmem:[#allocation160_spill] sm:$0xff] %v6603_v53  ;;  %v6612_v30 = vpop.permute.xlu0 %703  ;;  %v6626_v53 = vld [vmem:[%s10932_s1 + $0x3f8] sm:$0xff] }
 0x153   :  { %11272 = vst [vmem:[#allocation161_spill] sm:$0xff] %v6605_v40  ;;  %v6628_v40 = vstv %s4804_s10  ;;  %s5416_s10 = smov 8  }
 0x154   :  { %11274 = vst [vmem:[#allocation163_spill] sm:$0xff] %v6612_v30 }
 0x155   :  { %11275 = vst [vmem:[#allocation164_spill] sm:$0xff] %v6626_v53 }
 0x157   :  { %797 = vrot.lane.b32.xlu2 %v416_v34, %s5408_s0  ;;  %795 = vrot.lane.b32.xlu1 %v415_v6, %s5408_s0  ;;  %v418_v6 = vmul.f32 %v5460_v3, %v6626_v53  ;;  %v1063_v53 = vmul.f32 %v6628_v40, %v5453_v1  ;;  %v1062_v3 = vmul.f32 %v6628_v40, %v5484_v9 }
 0x158   :  { %793 = vrot.lane.b32.xlu0 %v414_v60, %s5408_s0  ;;  %v1061_v60 = vmul.f32 %v6628_v40, %v5458_v2  ;;  %v1064_v2 = vmul.f32 %v6628_v40, %v5479_v8  ;;  %v1066_v1 = vmul.f32 %v6628_v40, %v5474_v7  ;;  %v1067_v8 = vmul.f32 %v6628_v40, %v5508_v15 }
 0x159   :  { %v6630_v30 = vpop.permute.xlu2 %731  ;;  %v6632_v58 = vpop.permute.xlu1 %711  ;;  %v1065_v9 = vmul.f32 %v6628_v40, %v5448_v0  ;;  %v1069_v7 = vmul.f32 %v6628_v40, %v5498_v13  ;;  %v1070_v15 = vmul.f32 %v6628_v40, %v5532_v21  ;;  %v1068_v0 = vmul.f32 %v6628_v40, %v5503_v14 }
 0x15a   :  { %11276 = vst [vmem:[#allocation165_spill] sm:$0xff] %v6630_v30  ;;  %v6639_v34 = vpop.permute.xlu0 %709  ;;  %v1072_v13 = vmul.f32 %v6628_v40, %v5522_v19  ;;  %v1073_v21 = vmul.f32 %v6628_v40, %v5556_v27  ;;  %v1071_v14 = vmul.f32 %v6628_v40, %v5527_v20  ;;  %v1075_v19 = vmul.f32 %v6628_v40, %v5546_v25 }
 0x15b   :  { %11277 = vst [vmem:[#allocation166_spill] sm:$0xff] %v6632_v58  ;;  %v1076_v27 = vmul.f32 %v6628_v40, %v5580_v33  ;;  %v1074_v20 = vmul.f32 %v6628_v40, %v5551_v26  ;;  %v1078_v25 = vmul.f32 %v6628_v40, %v5570_v31  ;;  %v1079_v33 = vmul.f32 %v6628_v40, %v5604_v39 }
 0x15c   :  { %11278 = vst [vmem:[#allocation167_spill] sm:$0xff] %v6639_v34  ;;  %v1077_v26 = vmul.f32 %v6628_v40, %v5575_v32  ;;  %v1081_v31 = vmul.f32 %v6628_v40, %v5594_v37  ;;  %v1082_v39 = vmul.f32 %v6628_v40, %v5628_v45  ;;  %v1080_v32 = vmul.f32 %v6628_v40, %v5599_v38 }
 0x15d   :  { %v1084_v37 = vmul.f32 %v6628_v40, %v5618_v43  ;;  %v1085_v45 = vmul.f32 %v6628_v40, %v5652_v51  ;;  %v1083_v38 = vmul.f32 %v6628_v40, %v5623_v44  ;;  %v1087_v43 = vmul.f32 %v6628_v40, %v5642_v49 }
 0x15e   :  { %v1088_v51 = vmul.f32 %v6628_v40, %v5676_v57  ;;  %v1086_v44 = vmul.f32 %v6628_v40, %v5647_v50  ;;  %v1090_v49 = vmul.f32 %v6628_v40, %v5666_v55  ;;  %v1091_v57 = vmul.f32 %v6628_v40, %v5700_v63 }
 0x15f   :  { %801 = vrot.lane.b32.xlu1 %v418_v6, %s5408_s0  ;;  %1317 = vrot.lane.b32.xlu2 %v1061_v60, %s5409_s17  ;;  %v1089_v50 = vmul.f32 %v6628_v40, %v5671_v56  ;;  %v1093_v55 = vmul.f32 %v6628_v40, %v5690_v61  ;;  %v1094_v63 = vmul.f32 %v6628_v40, %v5724_v12 }
 0x160   :  { %799 = vrot.lane.b32.xlu0 %v417_v18, %s5408_s0  ;;  %v1092_v56 = vmul.f32 %v6628_v40, %v5695_v62  ;;  %v1096_v61 = vmul.f32 %v6628_v40, %v5714_v10  ;;  %v1097_v12 = vmul.f32 %v6628_v40, %v5750_v28  ;;  %v1095_v62 = vmul.f32 %v6628_v40, %v5719_v11 }
 0x161   :  { %v6650_v30 = vpop.permute.xlu2 %737  ;;  %v6652_v58 = vpop.permute.xlu1 %717  ;;  %v1099_v10 = vmul.f32 %v6628_v40, %v5738_v22  ;;  %v1100_v28 = vmul.f32 %v6628_v40, %v5776_v41  ;;  %v1098_v11 = vmul.f32 %v6628_v40, %v5743_v23  ;;  %v1102_v22 = vmul.f32 %v6628_v40, %v5764_v35 }
 0x162   :  { %11279 = vst [vmem:[#allocation168_spill] sm:$0xff] %v6650_v30  ;;  %v6654_v34 = vpop.permute.xlu0 %715  ;;  %v1103_v41 = vmul.f32 %v6628_v40, %v5802_v54  ;;  %v1101_v23 = vmul.f32 %v6628_v40, %v5769_v36  ;;  %v1105_v35 = vmul.f32 %v6628_v40, %v5790_v48  ;;  %v1106_v54 = vmul.f32 %v6628_v40, %v5830_v17  ;;  %v11391_v30 = vld [vmem:[#allocation74_spill] sm:$0xff] }
 0x163   :  { %11280 = vst [vmem:[#allocation169_spill] sm:$0xff] %v6652_v58  ;;  %v1104_v36 = vmul.f32 %v6628_v40, %v5795_v52  ;;  %v1108_v48 = vmul.f32 %v6628_v40, %v5816_v4  ;;  %v1109_v17 = vmul.f32 %v6628_v40, %v5860_v59  ;;  %v1107_v52 = vmul.f32 %v6628_v40, %v5821_v5  ;;  %v11411_v58 = vld [vmem:[#allocation93_spill] sm:$0xff] }
 0x164   :  { %11281 = vst [vmem:[#allocation170_spill] sm:$0xff] %v6654_v34  ;;  %v1111_v4 = vmul.f32 %v6628_v40, %v5846_v42  ;;  %v1112_v59 = vmul.f32 %v6628_v40, %v5890_v29  ;;  %v1110_v5 = vmul.f32 %v6628_v40, %v5851_v46  ;;  %v1114_v42 = vmul.f32 %v6628_v40, %v5876_v47  ;;  %v11415_v34 = vld [vmem:[#allocation98_spill] sm:$0xff] }
 0x165   :  { %v1115_v29 = vmul.f32 %v6628_v40, %v5920_v24 }
 0x167   :  { %1321 = vrot.lane.b32.xlu1 %v1063_v53, %s5409_s17  ;;  %1323 = vrot.lane.b32.xlu2 %v1064_v2, %s5409_s17 }
 0x168   :  { %1319 = vrot.lane.b32.xlu0 %v1062_v3, %s5409_s17 }
 0x169   :  { %v6665_v18 = vpop.permute.xlu2 %743  ;;  %v6667_v6 = vpop.permute.xlu1 %723 }
 0x16a   :  { %11282 = vst [vmem:[#allocation171_spill] sm:$0xff] %v6665_v18  ;;  %v6669_v60 = vpop.permute.xlu0 %721  ;;  %v11349_v18 = vld [vmem:[#allocation32_spill] sm:$0xff] }
 0x16b   :  { %11283 = vst [vmem:[#allocation172_spill] sm:$0xff] %v6667_v6  ;;  %v11409_v6 = vld [vmem:[#allocation92_spill] sm:$0xff] }
 0x16c   :  { %11284 = vst [vmem:[#allocation173_spill] sm:$0xff] %v6669_v60  ;;  %v11410_v60 = vld [vmem:[#allocation102_spill] sm:$0xff] }
 0x16f   :  { %1327 = vrot.lane.b32.xlu1 %v1066_v1, %s5409_s17  ;;  %1329 = vrot.lane.b32.xlu2 %v1067_v8, %s5409_s17 }
 0x170   :  { %1325 = vrot.lane.b32.xlu0 %v1065_v9, %s5409_s17 }
 0x171   :  { %v6680_v53 = vpop.permute.xlu2 %749  ;;  %v6682_v2 = vpop.permute.xlu1 %729 }
 0x172   :  { %11285 = vst [vmem:[#allocation174_spill] sm:$0xff] %v6680_v53  ;;  %v6684_v3 = vpop.permute.xlu0 %727  ;;  %v11351_v53 = vld [vmem:[#allocation33_spill] sm:$0xff] }
 0x173   :  { %11286 = vst [vmem:[#allocation175_spill] sm:$0xff] %v6682_v2  ;;  %v11404_v2 = vld [vmem:[#allocation96_spill] sm:$0xff] }
 0x174   :  { %11287 = vst [vmem:[#allocation176_spill] sm:$0xff] %v6684_v3  ;;  %v11405_v3 = vld [vmem:[#allocation87_spill] sm:$0xff] }
 0x177   :  { %1333 = vrot.lane.b32.xlu1 %v1069_v7, %s5409_s17  ;;  %1335 = vrot.lane.b32.xlu2 %v1070_v15, %s5409_s17 }
 0x178   :  { %1331 = vrot.lane.b32.xlu0 %v1068_v0, %s5409_s17 }
 0x179   :  { %v6695_v1 = vpop.permute.xlu2 %755  ;;  %v6697_v8 = vpop.permute.xlu1 %735 }
 0x17a   :  { %11288 = vst [vmem:[#allocation177_spill] sm:$0xff] %v6695_v1  ;;  %v6699_v9 = vpop.permute.xlu0 %733  ;;  %v11373_v1 = vld [vmem:[#allocation56_spill] sm:$0xff] }
 0x17b   :  { %11289 = vst [vmem:[#allocation178_spill] sm:$0xff] %v6697_v8  ;;  %v11393_v8 = vld [vmem:[#allocation75_spill] sm:$0xff] }
 0x17c   :  { %11290 = vst [vmem:[#allocation179_spill] sm:$0xff] %v6699_v9  ;;  %v11403_v9 = vld [vmem:[#allocation86_spill] sm:$0xff] }
 0x17f   :  { %1339 = vrot.lane.b32.xlu1 %v1072_v13, %s5409_s17  ;;  %1341 = vrot.lane.b32.xlu2 %v1073_v21, %s5409_s17 }
 0x180   :  { %1337 = vrot.lane.b32.xlu0 %v1071_v14, %s5409_s17 }
 0x181   :  { %v6710_v7 = vpop.permute.xlu2 %761  ;;  %v6712_v15 = vpop.permute.xlu1 %741 }
 0x182   :  { %11291 = vst [vmem:[#allocation180_spill] sm:$0xff] %v6710_v7  ;;  %v6714_v0 = vpop.permute.xlu0 %739  ;;  %v11379_v7 = vld [vmem:[#allocation62_spill] sm:$0xff] }
 0x183   :  { %11292 = vst [vmem:[#allocation181_spill] sm:$0xff] %v6712_v15  ;;  %v11338_v15 = vld [vmem:[#allocation30_spill] sm:$0xff] }
 0x184   :  { %11293 = vst [vmem:[#allocation182_spill] sm:$0xff] %v6714_v0  ;;  %v1118_v24 = vmul.f32 %v6628_v40, %v11338_v15  ;;  %v11344_v0 = vld [vmem:[#allocation36_spill] sm:$0xff] }
 0x185   :  { %v1121_v15 = vmul.f32 %v6628_v40, %v11344_v0 }
 0x187   :  { %1345 = vrot.lane.b32.xlu1 %v1075_v19, %s5409_s17  ;;  %1347 = vrot.lane.b32.xlu2 %v1076_v27, %s5409_s17 }
 0x188   :  { %1343 = vrot.lane.b32.xlu0 %v1074_v20, %s5409_s17 }
 0x189   :  { %v6725_v13 = vpop.permute.xlu2 %767  ;;  %v6727_v21 = vpop.permute.xlu1 %747 }
 0x18a   :  { %11294 = vst [vmem:[#allocation183_spill] sm:$0xff] %v6725_v13  ;;  %v6729_v14 = vpop.permute.xlu0 %745  ;;  %v11398_v13 = vld [vmem:[#allocation90_spill] sm:$0xff] }
 0x18b   :  { %11295 = vst [vmem:[#allocation184_spill] sm:$0xff] %v6727_v21  ;;  %v11355_v21 = vld [vmem:[#allocation38_spill] sm:$0xff] }
 0x18c   :  { %11296 = vst [vmem:[#allocation185_spill] sm:$0xff] %v6729_v14  ;;  %v11350_v14 = vld [vmem:[#allocation42_spill] sm:$0xff] }
 0x18d   :  { %v1124_v0 = vmul.f32 %v6628_v40, %v11350_v14 }
 0x18f   :  { %1351 = vrot.lane.b32.xlu1 %v1078_v25, %s5409_s17  ;;  %1353 = vrot.lane.b32.xlu2 %v1079_v33, %s5409_s17 }
 0x190   :  { %1349 = vrot.lane.b32.xlu0 %v1077_v26, %s5409_s17 }
 0x191   :  { %v6740_v19 = vpop.permute.xlu2 %773  ;;  %v6742_v27 = vpop.permute.xlu1 %753 }
 0x192   :  { %11297 = vst [vmem:[#allocation186_spill] sm:$0xff] %v6740_v19  ;;  %v6744_v20 = vpop.permute.xlu0 %751  ;;  %v11337_v19 = vld [vmem:[#allocation21_spill] sm:$0xff] }
 0x193   :  { %11298 = vst [vmem:[#allocation187_spill] sm:$0xff] %v6742_v27  ;;  %v1117_v47 = vmul.f32 %v6628_v40, %v11337_v19  ;;  %v11362_v27 = vld [vmem:[#allocation54_spill] sm:$0xff] }
 0x194   :  { %11299 = vst [vmem:[#allocation188_spill] sm:$0xff] %v6744_v20  ;;  %v11363_v20 = vld [vmem:[#allocation45_spill] sm:$0xff] }
 0x197   :  { %1357 = vrot.lane.b32.xlu1 %v1081_v31, %s5409_s17  ;;  %1359 = vrot.lane.b32.xlu2 %v1082_v39, %s5409_s17 }
 0x198   :  { %1355 = vrot.lane.b32.xlu0 %v1080_v32, %s5409_s17 }
 0x199   :  { %v6755_v25 = vpop.permute.xlu2 %779  ;;  %v6757_v33 = vpop.permute.xlu1 %759 }
 0x19a   :  { %11300 = vst [vmem:[#allocation189_spill] sm:$0xff] %v6755_v25  ;;  %v6759_v26 = vpop.permute.xlu0 %757  ;;  %v11356_v25 = vld [vmem:[#allocation48_spill] sm:$0xff] }
 0x19b   :  { %11301 = vst [vmem:[#allocation190_spill] sm:$0xff] %v6757_v33  ;;  %v1127_v14 = vmul.f32 %v6628_v40, %v11356_v25  ;;  %v1130_v25 = vmul.f32 %v6628_v40, %v11362_v27  ;;  %v11381_v33 = vld [vmem:[#allocation63_spill] sm:$0xff] }
 0x19c   :  { %11302 = vst [vmem:[#allocation191_spill] sm:$0xff] %v6759_v26  ;;  %v11369_v26 = vld [vmem:[#allocation51_spill] sm:$0xff] }
 0x19f   :  { %1363 = vrot.lane.b32.xlu1 %v1084_v37, %s5409_s17  ;;  %1365 = vrot.lane.b32.xlu2 %v1085_v45, %s5409_s17 }
 0x1a0   :  { %1361 = vrot.lane.b32.xlu0 %v1083_v38, %s5409_s17 }
 0x1a1   :  { %v6770_v31 = vpop.permute.xlu2 %785  ;;  %v6772_v39 = vpop.permute.xlu1 %765 }
 0x1a2   :  { %11303 = vst [vmem:[#allocation192_spill] sm:$0xff] %v6770_v31  ;;  %v6774_v32 = vpop.permute.xlu0 %763  ;;  %v11361_v31 = vld [vmem:[#allocation44_spill] sm:$0xff] }
 0x1a3   :  { %11304 = vst [vmem:[#allocation193_spill] sm:$0xff] %v6772_v39  ;;  %v11387_v39 = vld [vmem:[#allocation69_spill] sm:$0xff] }
 0x1a4   :  { %11305 = vst [vmem:[#allocation194_spill] sm:$0xff] %v6774_v32  ;;  %v11386_v32 = vld [vmem:[#allocation78_spill] sm:$0xff] }
 0x1a7   :  { %1369 = vrot.lane.b32.xlu1 %v1087_v43, %s5409_s17  ;;  %1371 = vrot.lane.b32.xlu2 %v1088_v51, %s5409_s17 }
 0x1a8   :  { %1367 = vrot.lane.b32.xlu0 %v1086_v44, %s5409_s17 }
 0x1a9   :  { %v6785_v37 = vpop.permute.xlu2 %791  ;;  %v6787_v45 = vpop.permute.xlu1 %771 }
 0x1aa   :  { %11306 = vst [vmem:[#allocation195_spill] sm:$0xff] %v6785_v37  ;;  %v6789_v38 = vpop.permute.xlu0 %769  ;;  %v11374_v37 = vld [vmem:[#allocation66_spill] sm:$0xff] }
 0x1ab   :  { %11307 = vst [vmem:[#allocation196_spill] sm:$0xff] %v6787_v45  ;;  %v11333_v45 = vld [vmem:[#allocation17_spill] sm:$0xff] }
 0x1ac   :  { %11308 = vst [vmem:[#allocation197_spill] sm:$0xff] %v6789_v38  ;;  %v1113_v46 = vmul.f32 %v6628_v40, %v11333_v45  ;;  %v11399_v38 = vld [vmem:[#allocation81_spill] sm:$0xff] }
 0x1af   :  { %1375 = vrot.lane.b32.xlu1 %v1090_v49, %s5409_s17  ;;  %1377 = vrot.lane.b32.xlu2 %v1091_v57, %s5409_s17 }
 0x1b0   :  { %1373 = vrot.lane.b32.xlu0 %v1089_v50, %s5409_s17 }
 0x1b1   :  { %v6800_v43 = vpop.permute.xlu2 %797  ;;  %v6802_v51 = vpop.permute.xlu1 %777 }
 0x1b2   :  { %11309 = vst [vmem:[#allocation198_spill] sm:$0xff] %v6800_v43  ;;  %v6804_v44 = vpop.permute.xlu0 %775  ;;  %v11380_v43 = vld [vmem:[#allocation72_spill] sm:$0xff] }
 0x1b3   :  { %11310 = vst [vmem:[#allocation199_spill] sm:$0xff] %v6802_v51  ;;  %v11343_v51 = vld [vmem:[#allocation26_spill] sm:$0xff] }
 0x1b4   :  { %11311 = vst [vmem:[#allocation200_spill] sm:$0xff] %v6804_v44  ;;  %v11339_v44 = vld [vmem:[#allocation22_spill] sm:$0xff]  ;;  %v1120_v19 = vmul.f32 %v6628_v40, %v11343_v51  ;;  %v1123_v51 = vmul.f32 %v6628_v40, %v11349_v18  ;;  %v1126_v18 = vmul.f32 %v6628_v40, %v11355_v21  ;;  %v1129_v21 = vmul.f32 %v6628_v40, %v11361_v31 }
 0x1b5   :  { %v1116_v45 = vmul.f32 %v6628_v40, %v11339_v44 }
 0x1b7   :  { %1381 = vrot.lane.b32.xlu1 %v1093_v55, %s5409_s17  ;;  %1383 = vrot.lane.b32.xlu2 %v1094_v63, %s5409_s17 }
 0x1b8   :  { %1379 = vrot.lane.b32.xlu0 %v1092_v56, %s5409_s17 }
 0x1b9   :  { %v6815_v49 = vpop.permute.xlu1 %783  ;;  %v6817_v57 = vpop.permute.xlu2 %1317 }
 0x1ba   :  { %11312 = vst [vmem:[#allocation201_spill] sm:$0xff] %v6815_v49  ;;  %v6819_v50 = vpop.permute.xlu0 %781  ;;  %v11357_v49 = vld [vmem:[#allocation39_spill] sm:$0xff] }
 0x1bb   :  { %11313 = vst [vmem:[#allocation202_spill] sm:$0xff] %v6817_v57  ;;  %v7879_v57 = vld [vmem:[%s10932_s1 + $0x1e8] sm:$0xff] }
 0x1bc   :  { %11314 = vst [vmem:[#allocation203_spill] sm:$0xff] %v6819_v50  ;;  %v11345_v50 = vld [vmem:[#allocation27_spill] sm:$0xff] }
 0x1bd   :  { %v1119_v44 = vmul.f32 %v6628_v40, %v11345_v50  ;;  %v1122_v50 = vmul.f32 %v6628_v40, %v11351_v53  ;;  %v1125_v53 = vmul.f32 %v6628_v40, %v11357_v49  ;;  %v1128_v49 = vmul.f32 %v6628_v40, %v11363_v20  ;;  %11543 = vst [vmem:[#allocation285_spill] sm:$0xff] %v7879_v57 }
 0x1be   :  { %v1131_v20 = vmul.f32 %v6628_v40, %v11369_v26 }
 0x1bf   :  { %1387 = vrot.lane.b32.xlu1 %v1096_v61, %s5409_s17  ;;  %1389 = vrot.lane.b32.xlu2 %v1097_v12, %s5409_s17 }
 0x1c0   :  { %1385 = vrot.lane.b32.xlu0 %v1095_v62, %s5409_s17 }
 0x1c1   :  { %v6830_v55 = vpop.permute.xlu1 %789  ;;  %v6832_v63 = vpop.permute.xlu2 %1323 }
 0x1c2   :  { %11315 = vst [vmem:[#allocation204_spill] sm:$0xff] %v6830_v55  ;;  %v6834_v56 = vpop.permute.xlu0 %787  ;;  %v11367_v55 = vld [vmem:[#allocation50_spill] sm:$0xff] }
 0x1c3   :  { %11316 = vst [vmem:[#allocation205_spill] sm:$0xff] %v6832_v63  ;;  %v1132_v31 = vmul.f32 %v6628_v40, %v11367_v55  ;;  %v1135_v55 = vmul.f32 %v6628_v40, %v11373_v1  ;;  %v1138_v1 = vmul.f32 %v6628_v40, %v11379_v7 }
 0x1c4   :  { %11317 = vst [vmem:[#allocation206_spill] sm:$0xff] %v6834_v56  ;;  %v11368_v56 = vld [vmem:[#allocation60_spill] sm:$0xff] }
 0x1c5   :  { %v1133_v27 = vmul.f32 %v6628_v40, %v11368_v56  ;;  %v1136_v56 = vmul.f32 %v6628_v40, %v11374_v37  ;;  %v1139_v37 = vmul.f32 %v6628_v40, %v11380_v43  ;;  %v1142_v43 = vmul.f32 %v6628_v40, %v11386_v32 }
 0x1c7   :  { %1393 = vrot.lane.b32.xlu1 %v1099_v10, %s5409_s17  ;;  %1395 = vrot.lane.b32.xlu2 %v1100_v28, %s5409_s17 }
 0x1c8   :  { %1391 = vrot.lane.b32.xlu0 %v1098_v11, %s5409_s17 }
 0x1c9   :  { %v6845_v61 = vpop.permute.xlu1 %795  ;;  %v6847_v12 = vpop.permute.xlu2 %1329 }
 0x1ca   :  { %11318 = vst [vmem:[#allocation207_spill] sm:$0xff] %v6845_v61  ;;  %v6849_v62 = vpop.permute.xlu0 %793  ;;  %v11385_v61 = vld [vmem:[#allocation68_spill] sm:$0xff] }
 0x1cb   :  { %11319 = vst [vmem:[#allocation208_spill] sm:$0xff] %v6847_v12  ;;  %v1141_v7 = vmul.f32 %v6628_v40, %v11385_v61  ;;  %v1144_v61 = vmul.f32 %v6628_v40, %v11391_v30  ;;  %v7783_v12 = vld [vmem:[%s10932_s1 + $0x198] sm:$0xff] }
 0x1cc   :  { %11320 = vst [vmem:[#allocation209_spill] sm:$0xff] %v6849_v62  ;;  %v11375_v62 = vld [vmem:[#allocation57_spill] sm:$0xff] }
 0x1cd   :  { %v1134_v26 = vmul.f32 %v6628_v40, %v11375_v62  ;;  %v1137_v62 = vmul.f32 %v6628_v40, %v11381_v33  ;;  %v1140_v33 = vmul.f32 %v6628_v40, %v11387_v39  ;;  %v1143_v39 = vmul.f32 %v6628_v40, %v11393_v8 }
 0x1ce   :  { %v1146_v8 = vmul.f32 %v6628_v40, %v11399_v38  ;;  %v1149_v38 = vmul.f32 %v6628_v40, %v11405_v3  ;;  %v1152_v3 = vmul.f32 %v6628_v40, %v11411_v58 }
 0x1cf   :  { %1399 = vrot.lane.b32.xlu1 %v1102_v22, %s5409_s17  ;;  %1401 = vrot.lane.b32.xlu2 %v1103_v41, %s5409_s17 }
 0x1d0   :  { %1397 = vrot.lane.b32.xlu0 %v1101_v23, %s5409_s17 }
 0x1d1   :  { %v6860_v10 = vpop.permute.xlu1 %801  ;;  %v6862_v28 = vpop.permute.xlu2 %1335 }
 0x1d2   :  { %11321 = vst [vmem:[#allocation210_spill] sm:$0xff] %v6860_v10  ;;  %v6864_v11 = vpop.permute.xlu0 %799  ;;  %v11392_v10 = vld [vmem:[#allocation84_spill] sm:$0xff] }
 0x1d3   :  { %11322 = vst [vmem:[#allocation211_spill] sm:$0xff] %v6862_v28  ;;  %v1145_v32 = vmul.f32 %v6628_v40, %v11392_v10  ;;  %v1148_v10 = vmul.f32 %v6628_v40, %v11398_v13  ;;  %v1151_v13 = vmul.f32 %v6628_v40, %v11404_v2  ;;  %v1154_v2 = vmul.f32 %v6628_v40, %v11410_v60  ;;  %v7759_v28 = vld [vmem:[%s10932_s1 + $0x188] sm:$0xff] }
 0x1d4   :  { %11323 = vst [vmem:[#allocation212_spill] sm:$0xff] %v6864_v11  ;;  %v11397_v11 = vld [vmem:[#allocation80_spill] sm:$0xff] }
 0x1d5   :  { %v1147_v30 = vmul.f32 %v6628_v40, %v11397_v11  ;;  %v1150_v11 = vmul.f32 %v6628_v40, %v11403_v9  ;;  %v1153_v9 = vmul.f32 %v6628_v40, %v11409_v6  ;;  %v1156_v6 = vmul.f32 %v6628_v40, %v11415_v34 }
 0x1d7   :  { %1405 = vrot.lane.b32.xlu1 %v1105_v35, %s5409_s17  ;;  %1407 = vrot.lane.b32.xlu2 %v1106_v54, %s5409_s17 }
 0x1d8   :  { %1403 = vrot.lane.b32.xlu0 %v1104_v36, %s5409_s17 }
 0x1d9   :  { %v6875_v22 = vpop.permute.xlu1 %1321  ;;  %v6877_v41 = vpop.permute.xlu2 %1341 }
 0x1da   :  { %11324 = vst [vmem:[#allocation213_spill] sm:$0xff] %v6875_v22  ;;  %v6879_v23 = vpop.permute.xlu0 %1319  ;;  %v7849_v22 = vld [vmem:[%s10932_s1 + $0x1d0] sm:$0xff] }
 0x1db   :  { %11325 = vst [vmem:[#allocation214_spill] sm:$0xff] %v6877_v41  ;;  %v7729_v41 = vld [vmem:[%s10932_s1 + $0x170] sm:$0xff] }
 0x1dc   :  { %11326 = vst [vmem:[#allocation215_spill] sm:$0xff] %v6879_v23  ;;  %v7843_v23 = vld [vmem:[%s10932_s1 + $0x1c8] sm:$0xff] }
 0x1dd   :  { %11538 = vst [vmem:[#allocation280_spill] sm:$0xff] %v7843_v23 }
 0x1df   :  { %1411 = vrot.lane.b32.xlu1 %v1108_v48, %s5409_s17  ;;  %1413 = vrot.lane.b32.xlu2 %v1109_v17, %s5409_s17 }
 0x1e0   :  { %1409 = vrot.lane.b32.xlu0 %v1107_v52, %s5409_s17 }
 0x1e1   :  { %v6890_v35 = vpop.permute.xlu1 %1327  ;;  %v6892_v54 = vpop.permute.xlu2 %1347 }
 0x1e2   :  { %11327 = vst [vmem:[#allocation216_spill] sm:$0xff] %v6890_v35  ;;  %v6894_v36 = vpop.permute.xlu0 %1325  ;;  %v7789_v35 = vld [vmem:[%s10932_s1 + $0x1a0] sm:$0xff] }
 0x1e3   :  { %11328 = vst [vmem:[#allocation217_spill] sm:$0xff] %v6892_v54 }
 0x1e4   :  { %11329 = vst [vmem:[#allocation218_spill] sm:$0xff] %v6894_v36  ;;  %v7813_v36 = vld [vmem:[%s10932_s1 + $0x1b0] sm:$0xff] }
 0x1e7   :  { %1417 = vrot.lane.b32.xlu1 %v1111_v4, %s5409_s17  ;;  %1419 = vrot.lane.b32.xlu2 %v1112_v59, %s5409_s17 }
 0x1e8   :  { %1415 = vrot.lane.b32.xlu0 %v1110_v5, %s5409_s17 }
 0x1e9   :  { %v6905_v48 = vpop.permute.xlu1 %1333  ;;  %v6907_v17 = vpop.permute.xlu2 %1353 }
 0x1ea   :  { %11330 = vst [vmem:[#allocation219_spill] sm:$0xff] %v6905_v48  ;;  %v6909_v52 = vpop.permute.xlu0 %1331 }
 0x1eb   :  { %11331 = vst [vmem:[#allocation220_spill] sm:$0xff] %v6907_v17 }
 0x1ec   :  { %11332 = vst [vmem:[#allocation221_spill] sm:$0xff] %v6909_v52 }
 0x1ef   :  { %1423 = vrot.lane.b32.xlu1 %v1114_v42, %s5409_s17  ;;  %1425 = vrot.lane.b32.xlu2 %v1115_v29, %s5409_s17 }
 0x1f0   :  { %1421 = vrot.lane.b32.xlu0 %v1113_v46, %s5409_s17 }
 0x1f1   :  { %v6920_v4 = vpop.permute.xlu1 %1339  ;;  %v6922_v59 = vpop.permute.xlu2 %1359 }
 0x1f2   :  { %11334 = vst [vmem:[#allocation17_spill] sm:$0xff] %v6920_v4  ;;  %v6924_v5 = vpop.permute.xlu0 %1337 }
 0x1f3   :  { %11335 = vst [vmem:[#allocation222_spill] sm:$0xff] %v6922_v59  ;;  %v7663_v59 = vld [vmem:[%s10932_s1 + $0x138] sm:$0xff] }
 0x1f4   :  { %11336 = vst [vmem:[#allocation223_spill] sm:$0xff] %v6924_v5 }
 0x1f7   :  { %1429 = vrot.lane.b32.xlu1 %v1117_v47, %s5409_s17  ;;  %1431 = vrot.lane.b32.xlu2 %v1118_v24, %s5409_s17 }
 0x1f8   :  { %1427 = vrot.lane.b32.xlu0 %v1116_v45, %s5409_s17 }
 0x1f9   :  { %v6935_v42 = vpop.permute.xlu1 %1345  ;;  %v6937_v29 = vpop.permute.xlu2 %1365 }
 0x1fa   :  { %11340 = vst [vmem:[#allocation21_spill] sm:$0xff] %v6935_v42  ;;  %v6939_v46 = vpop.permute.xlu0 %1343 }
 0x1fb   :  { %11341 = vst [vmem:[#allocation30_spill] sm:$0xff] %v6937_v29  ;;  %v7639_v29 = vld [vmem:[%s10932_s1 + $0x128] sm:$0xff] }
 0x1fc   :  { %11342 = vst [vmem:[#allocation22_spill] sm:$0xff] %v6939_v46  ;;  %v7723_v46 = vld [vmem:[%s10932_s1 + $0x168] sm:$0xff] }
 0x1ff   :  { %1435 = vrot.lane.b32.xlu1 %v1120_v19, %s5409_s17  ;;  %1437 = vrot.lane.b32.xlu2 %v1121_v15, %s5409_s17 }
 0x200   :  { %1433 = vrot.lane.b32.xlu0 %v1119_v44, %s5409_s17 }
 0x201   :  { %v6950_v47 = vpop.permute.xlu1 %1351  ;;  %v6952_v24 = vpop.permute.xlu2 %1371 }
 0x202   :  { %11346 = vst [vmem:[#allocation26_spill] sm:$0xff] %v6950_v47  ;;  %v6954_v45 = vpop.permute.xlu0 %1349  ;;  %v7693_v47 = vld [vmem:[%s10932_s1 + $0x150] sm:$0xff] }
 0x203   :  { %11347 = vst [vmem:[#allocation36_spill] sm:$0xff] %v6952_v24  ;;  %v7609_v24 = vld [vmem:[%s10932_s1 + $0x110] sm:$0xff] }
 0x204   :  { %11348 = vst [vmem:[#allocation27_spill] sm:$0xff] %v6954_v45  ;;  %v7699_v45 = vld [vmem:[%s10932_s1 + $0x158] sm:$0xff] }
 0x207   :  { %1441 = vrot.lane.b32.xlu1 %v1123_v51, %s5409_s17  ;;  %1443 = vrot.lane.b32.xlu2 %v1124_v0, %s5409_s17 }
 0x208   :  { %1439 = vrot.lane.b32.xlu0 %v1122_v50, %s5409_s17 }
 0x209   :  { %v6965_v19 = vpop.permute.xlu1 %1357  ;;  %v6967_v15 = vpop.permute.xlu2 %1377 }
 0x20a   :  { %11352 = vst [vmem:[#allocation32_spill] sm:$0xff] %v6965_v19  ;;  %v6969_v44 = vpop.permute.xlu0 %1355  ;;  %v7669_v19 = vld [vmem:[%s10932_s1 + $0x140] sm:$0xff] }
 0x20b   :  { %11353 = vst [vmem:[#allocation42_spill] sm:$0xff] %v6967_v15  ;;  %v7579_v15 = vld [vmem:[%s10932_s1 + $0xf8] sm:$0xff] }
 0x20c   :  { %11354 = vst [vmem:[#allocation33_spill] sm:$0xff] %v6969_v44 }
 0x20f   :  { %1447 = vrot.lane.b32.xlu1 %v1126_v18, %s5409_s17  ;;  %1449 = vrot.lane.b32.xlu2 %v1127_v14, %s5409_s17 }
 0x210   :  { %1445 = vrot.lane.b32.xlu0 %v1125_v53, %s5409_s17 }
 0x211   :  { %v6980_v51 = vpop.permute.xlu1 %1363  ;;  %v6982_v0 = vpop.permute.xlu2 %1383 }
 0x212   :  { %11358 = vst [vmem:[#allocation38_spill] sm:$0xff] %v6980_v51  ;;  %v6984_v50 = vpop.permute.xlu0 %1361 }
 0x213   :  { %11359 = vst [vmem:[#allocation48_spill] sm:$0xff] %v6982_v0  ;;  %v7549_v0 = vld [vmem:[%s10932_s1 + $0xe0] sm:$0xff] }
 0x214   :  { %11360 = vst [vmem:[#allocation39_spill] sm:$0xff] %v6984_v50 }
 0x217   :  { %1453 = vrot.lane.b32.xlu1 %v1129_v21, %s5409_s17  ;;  %1455 = vrot.lane.b32.xlu2 %v1130_v25, %s5409_s17 }
 0x218   :  { %1451 = vrot.lane.b32.xlu0 %v1128_v49, %s5409_s17 }
 0x219   :  { %v6995_v18 = vpop.permute.xlu1 %1369  ;;  %v6997_v14 = vpop.permute.xlu2 %1389 }
 0x21a   :  { %11364 = vst [vmem:[#allocation44_spill] sm:$0xff] %v6995_v18  ;;  %v6999_v53 = vpop.permute.xlu0 %1367 }
 0x21b   :  { %11365 = vst [vmem:[#allocation54_spill] sm:$0xff] %v6997_v14  ;;  %v7519_v14 = vld [vmem:[%s10932_s1 + $0xc8] sm:$0xff] }
 0x21c   :  { %11366 = vst [vmem:[#allocation45_spill] sm:$0xff] %v6999_v53  ;;  %v7633_v53 = vld [vmem:[%s10932_s1 + $0x120] sm:$0xff] }
 0x21f   :  { %1459 = vrot.lane.b32.xlu1 %v1132_v31, %s5409_s17  ;;  %1461 = vrot.lane.b32.xlu2 %v1133_v27, %s5409_s17 }
 0x220   :  { %1457 = vrot.lane.b32.xlu0 %v1131_v20, %s5409_s17 }
 0x221   :  { %v7010_v21 = vpop.permute.xlu1 %1375  ;;  %v7012_v25 = vpop.permute.xlu2 %1395 }
 0x222   :  { %11370 = vst [vmem:[#allocation50_spill] sm:$0xff] %v7010_v21  ;;  %v7014_v49 = vpop.permute.xlu0 %1373 }
 0x223   :  { %11371 = vst [vmem:[#allocation60_spill] sm:$0xff] %v7012_v25  ;;  %v7489_v25 = vld [vmem:[%s10932_s1 + $0xb0] sm:$0xff] }
 0x224   :  { %11372 = vst [vmem:[#allocation51_spill] sm:$0xff] %v7014_v49  ;;  %v7603_v49 = vld [vmem:[%s10932_s1 + $0x108] sm:$0xff] }
 0x227   :  { %1465 = vrot.lane.b32.xlu1 %v1135_v55, %s5409_s17  ;;  %1467 = vrot.lane.b32.xlu2 %v1136_v56, %s5409_s17 }
 0x228   :  { %1463 = vrot.lane.b32.xlu0 %v1134_v26, %s5409_s17 }
 0x229   :  { %v7025_v31 = vpop.permute.xlu1 %1381  ;;  %v7027_v27 = vpop.permute.xlu2 %1401 }
 0x22a   :  { %11376 = vst [vmem:[#allocation56_spill] sm:$0xff] %v7025_v31  ;;  %v7029_v20 = vpop.permute.xlu0 %1379 }
 0x22b   :  { %11377 = vst [vmem:[#allocation66_spill] sm:$0xff] %v7027_v27  ;;  %v7459_v27 = vld [vmem:[%s10932_s1 + $0x98] sm:$0xff] }
 0x22c   :  { %11378 = vst [vmem:[#allocation57_spill] sm:$0xff] %v7029_v20  ;;  %v7573_v20 = vld [vmem:[%s10932_s1 + $0xf0] sm:$0xff] }
 0x22f   :  { %1471 = vrot.lane.b32.xlu1 %v1138_v1, %s5409_s17  ;;  %1473 = vrot.lane.b32.xlu2 %v1139_v37, %s5409_s17 }
 0x230   :  { %1469 = vrot.lane.b32.xlu0 %v1137_v62, %s5409_s17 }
 0x231   :  { %v7040_v55 = vpop.permute.xlu1 %1387  ;;  %v7042_v56 = vpop.permute.xlu2 %1407 }
 0x232   :  { %11382 = vst [vmem:[#allocation62_spill] sm:$0xff] %v7040_v55  ;;  %v7044_v26 = vpop.permute.xlu0 %1385 }
 0x233   :  { %11383 = vst [vmem:[#allocation72_spill] sm:$0xff] %v7042_v56  ;;  %v7429_v56 = vld [vmem:[%s10932_s1 + $0x80] sm:$0xff] }
 0x234   :  { %11384 = vst [vmem:[#allocation63_spill] sm:$0xff] %v7044_v26  ;;  %vm2101_vm15 = vcmp.ne.f32.partialorder %v7429_v56, -1.0  ;;  %v7543_v26 = vld [vmem:[%s10932_s1 + $0xd8] sm:$0xff] }
 0x237   :  { %1477 = vrot.lane.b32.xlu1 %v1141_v7, %s5409_s17  ;;  %1479 = vrot.lane.b32.xlu2 %v1142_v43, %s5409_s17 }
 0x238   :  { %1475 = vrot.lane.b32.xlu0 %v1140_v33, %s5409_s17 }
 0x239   :  { %v7055_v1 = vpop.permute.xlu1 %1393  ;;  %v7057_v37 = vpop.permute.xlu2 %1413 }
 0x23a   :  { %11388 = vst [vmem:[#allocation68_spill] sm:$0xff] %v7055_v1  ;;  %v7059_v62 = vpop.permute.xlu0 %1391 }
 0x23b   :  { %11389 = vst [vmem:[#allocation78_spill] sm:$0xff] %v7057_v37  ;;  %v7399_v37 = vld [vmem:[%s10932_s1 + $0x68] sm:$0xff] }
 0x23c   :  { %11390 = vst [vmem:[#allocation69_spill] sm:$0xff] %v7059_v62  ;;  %vm2098_vm12 = vcmp.ne.f32.partialorder %v7399_v37, -1.0  ;;  %v7513_v62 = vld [vmem:[%s10932_s1 + $0xc0] sm:$0xff] }
 0x23f   :  { %1483 = vrot.lane.b32.xlu1 %v1144_v61, %s5409_s17  ;;  %1485 = vrot.lane.b32.xlu2 %v1145_v32, %s5409_s17 }
 0x240   :  { %1481 = vrot.lane.b32.xlu0 %v1143_v39, %s5409_s17 }
 0x241   :  { %v7070_v7 = vpop.permute.xlu1 %1399  ;;  %v7072_v43 = vpop.permute.xlu2 %1419 }
 0x242   :  { %11394 = vst [vmem:[#allocation74_spill] sm:$0xff] %v7070_v7  ;;  %v7074_v33 = vpop.permute.xlu0 %1397 }
 0x243   :  { %11395 = vst [vmem:[#allocation84_spill] sm:$0xff] %v7072_v43  ;;  %v11422_v43 = vld [vmem:[#allocation114_spill] sm:$0xff] }
 0x244   :  { %11396 = vst [vmem:[#allocation75_spill] sm:$0xff] %v7074_v33  ;;  %v7483_v33 = vld [vmem:[%s10932_s1 + $0xa8] sm:$0xff] }
 0x247   :  { %1489 = vrot.lane.b32.xlu1 %v1147_v30, %s5409_s17  ;;  %1491 = vrot.lane.b32.xlu2 %v1148_v10, %s5409_s17 }
 0x248   :  { %1487 = vrot.lane.b32.xlu0 %v1146_v8, %s5409_s17 }
 0x249   :  { %v7085_v61 = vpop.permute.xlu1 %1405  ;;  %v7087_v32 = vpop.permute.xlu2 %1425 }
 0x24a   :  { %11400 = vst [vmem:[#allocation80_spill] sm:$0xff] %v7085_v61  ;;  %v7089_v39 = vpop.permute.xlu0 %1403 }
 0x24b   :  { %11401 = vst [vmem:[#allocation90_spill] sm:$0xff] %v7087_v32  ;;  %v11417_v32 = vld [vmem:[#allocation99_spill] sm:$0xff] }
 0x24c   :  { %11402 = vst [vmem:[#allocation81_spill] sm:$0xff] %v7089_v39  ;;  %v1155_v58 = vmul.f32 %v6628_v40, %v11417_v32  ;;  %v7453_v39 = vld [vmem:[%s10932_s1 + $0x90] sm:$0xff] }
 0x24f   :  { %1495 = vrot.lane.b32.xlu1 %v1150_v11, %s5409_s17  ;;  %1497 = vrot.lane.b32.xlu2 %v1151_v13, %s5409_s17 }
 0x250   :  { %1493 = vrot.lane.b32.xlu0 %v1149_v38, %s5409_s17 }
 0x251   :  { %v7100_v30 = vpop.permute.xlu1 %1411  ;;  %v7102_v10 = vpop.permute.xlu2 %1431 }
 0x252   :  { %11406 = vst [vmem:[#allocation86_spill] sm:$0xff] %v7100_v30  ;;  %v7104_v8 = vpop.permute.xlu0 %1409 }
 0x253   :  { %11407 = vst [vmem:[#allocation96_spill] sm:$0xff] %v7102_v10  ;;  %v11416_v10 = vld [vmem:[#allocation108_spill] sm:$0xff] }
 0x254   :  { %11408 = vst [vmem:[#allocation87_spill] sm:$0xff] %v7104_v8  ;;  %v1157_v60 = vmul.f32 %v6628_v40, %v11416_v10  ;;  %v1160_v10 = vmul.f32 %v6628_v40, %v11422_v43  ;;  %v7423_v8 = vld [vmem:[%s10932_s1 + $0x78] sm:$0xff] }
 0x255   :  { %vm2100_vm14 = vcmp.ne.f32.partialorder %v7423_v8, -1.0 }
 0x257   :  { %1501 = vrot.lane.b32.xlu1 %v1153_v9, %s5409_s17  ;;  %1503 = vrot.lane.b32.xlu2 %v1154_v2, %s5409_s17 }
 0x258   :  { %1499 = vrot.lane.b32.xlu0 %v1152_v3, %s5409_s17 }
 0x259   :  { %v7115_v11 = vpop.permute.xlu1 %1417  ;;  %v7117_v13 = vpop.permute.xlu2 %1437 }
 0x25a   :  { %11412 = vst [vmem:[#allocation92_spill] sm:$0xff] %v7115_v11  ;;  %v7119_v38 = vpop.permute.xlu0 %1415  ;;  %v11423_v11 = vld [vmem:[#allocation105_spill] sm:$0xff] }
 0x25b   :  { %11413 = vst [vmem:[#allocation102_spill] sm:$0xff] %v7117_v13  ;;  %v11421_v13 = vld [vmem:[#allocation104_spill] sm:$0xff]  ;;  %v1158_v32 = vmul.f32 %v6628_v40, %v11423_v11 }
 0x25c   :  { %11414 = vst [vmem:[#allocation93_spill] sm:$0xff] %v7119_v38  ;;  %v1159_v34 = vmul.f32 %v6628_v40, %v11421_v13  ;;  %v7393_v38 = vld [vmem:[%s10932_s1 + $0x60] sm:$0xff] }
 0x25d   :  { %vm2097_vm11 = vcmp.ne.f32.partialorder %v7393_v38, -1.0 }
 0x25f   :  { %1507 = vrot.lane.b32.xlu1 %v1156_v6, %s5409_s17  ;;  %1509 = vrot.lane.b32.xlu2 %v1157_v60, %s5409_s17 }
 0x260   :  { %1505 = vrot.lane.b32.xlu0 %v1155_v58, %s5409_s17 }
 0x261   :  { %v7130_v9 = vpop.permute.xlu1 %1423  ;;  %v7132_v2 = vpop.permute.xlu2 %1443 }
 0x262   :  { %11418 = vst [vmem:[#allocation98_spill] sm:$0xff] %v7130_v9  ;;  %v7134_v3 = vpop.permute.xlu0 %1421  ;;  %v11428_v9 = vld [vmem:[#allocation120_spill] sm:$0xff] }
 0x263   :  { %11419 = vst [vmem:[#allocation108_spill] sm:$0xff] %v7132_v2  ;;  %v11427_v2 = vld [vmem:[#allocation110_spill] sm:$0xff]  ;;  %v1163_v43 = vmul.f32 %v6628_v40, %v11428_v9 }
 0x264   :  { %11420 = vst [vmem:[#allocation99_spill] sm:$0xff] %v7134_v3  ;;  %v1162_v13 = vmul.f32 %v6628_v40, %v11427_v2  ;;  %v11429_v3 = vld [vmem:[#allocation111_spill] sm:$0xff] }
 0x265   :  { %v1161_v11 = vmul.f32 %v6628_v40, %v11429_v3 }
 0x267   :  { %1513 = vrot.lane.b32.xlu1 %v1159_v34, %s5409_s17  ;;  %1515 = vrot.lane.b32.xlu2 %v1160_v10, %s5409_s17 }
 0x268   :  { %1511 = vrot.lane.b32.xlu0 %v1158_v32, %s5409_s17 }
 0x269   :  { %v7145_v6 = vpop.permute.xlu1 %1429  ;;  %v7147_v60 = vpop.permute.xlu2 %1449 }
 0x26a   :  { %11424 = vst [vmem:[#allocation104_spill] sm:$0xff] %v7145_v6  ;;  %v7149_v58 = vpop.permute.xlu0 %1427  ;;  %v11434_v6 = vld [vmem:[#allocation126_spill] sm:$0xff] }
 0x26b   :  { %11425 = vst [vmem:[#allocation114_spill] sm:$0xff] %v7147_v60  ;;  %v11433_v60 = vld [vmem:[#allocation116_spill] sm:$0xff]  ;;  %v1166_v9 = vmul.f32 %v6628_v40, %v11434_v6 }
 0x26c   :  { %11426 = vst [vmem:[#allocation105_spill] sm:$0xff] %v7149_v58  ;;  %v1165_v2 = vmul.f32 %v6628_v40, %v11433_v60  ;;  %v11435_v58 = vld [vmem:[#allocation117_spill] sm:$0xff] }
 0x26d   :  { %v1164_v3 = vmul.f32 %v6628_v40, %v11435_v58 }
 0x26f   :  { %1519 = vrot.lane.b32.xlu1 %v1162_v13, %s5409_s17  ;;  %1521 = vrot.lane.b32.xlu2 %v1163_v43, %s5409_s17 }
 0x270   :  { %1517 = vrot.lane.b32.xlu0 %v1161_v11, %s5409_s17 }
 0x271   :  { %v7160_v34 = vpop.permute.xlu1 %1435  ;;  %v7162_v10 = vpop.permute.xlu2 %1455 }
 0x272   :  { %11430 = vst [vmem:[#allocation110_spill] sm:$0xff] %v7160_v34  ;;  %v7164_v32 = vpop.permute.xlu0 %1433  ;;  %v11440_v34 = vld [vmem:[#allocation132_spill] sm:$0xff] }
 0x273   :  { %11431 = vst [vmem:[#allocation120_spill] sm:$0xff] %v7162_v10  ;;  %v11439_v10 = vld [vmem:[#allocation122_spill] sm:$0xff]  ;;  %v1169_v6 = vmul.f32 %v6628_v40, %v11440_v34 }
 0x274   :  { %11432 = vst [vmem:[#allocation111_spill] sm:$0xff] %v7164_v32  ;;  %v1168_v60 = vmul.f32 %v6628_v40, %v11439_v10  ;;  %v11441_v32 = vld [vmem:[#allocation123_spill] sm:$0xff] }
 0x275   :  { %v1167_v58 = vmul.f32 %v6628_v40, %v11441_v32 }
 0x277   :  { %1525 = vrot.lane.b32.xlu1 %v1165_v2, %s5409_s17  ;;  %1527 = vrot.lane.b32.xlu2 %v1166_v9, %s5409_s17 }
 0x278   :  { %1523 = vrot.lane.b32.xlu0 %v1164_v3, %s5409_s17 }
 0x279   :  { %v7175_v13 = vpop.permute.xlu1 %1441  ;;  %v7177_v43 = vpop.permute.xlu2 %1461 }
 0x27a   :  { %11436 = vst [vmem:[#allocation116_spill] sm:$0xff] %v7175_v13  ;;  %v7179_v11 = vpop.permute.xlu0 %1439  ;;  %v11446_v13 = vld [vmem:[#allocation138_spill] sm:$0xff] }
 0x27b   :  { %11437 = vst [vmem:[#allocation126_spill] sm:$0xff] %v7177_v43  ;;  %v11445_v43 = vld [vmem:[#allocation128_spill] sm:$0xff]  ;;  %v1172_v34 = vmul.f32 %v6628_v40, %v11446_v13 }
 0x27c   :  { %11438 = vst [vmem:[#allocation117_spill] sm:$0xff] %v7179_v11  ;;  %v1171_v10 = vmul.f32 %v6628_v40, %v11445_v43  ;;  %v11447_v11 = vld [vmem:[#allocation129_spill] sm:$0xff] }
 0x27d   :  { %v1170_v32 = vmul.f32 %v6628_v40, %v11447_v11 }
 0x27f   :  { %1531 = vrot.lane.b32.xlu1 %v1168_v60, %s5409_s17  ;;  %1533 = vrot.lane.b32.xlu2 %v1169_v6, %s5409_s17 }
 0x280   :  { %1529 = vrot.lane.b32.xlu0 %v1167_v58, %s5409_s17 }
 0x281   :  { %v7190_v2 = vpop.permute.xlu1 %1447  ;;  %v7192_v9 = vpop.permute.xlu2 %1467 }
 0x282   :  { %11442 = vst [vmem:[#allocation122_spill] sm:$0xff] %v7190_v2  ;;  %v7194_v3 = vpop.permute.xlu0 %1445  ;;  %v11452_v2 = vld [vmem:[#allocation144_spill] sm:$0xff] }
 0x283   :  { %11443 = vst [vmem:[#allocation132_spill] sm:$0xff] %v7192_v9  ;;  %v11451_v9 = vld [vmem:[#allocation134_spill] sm:$0xff]  ;;  %v1175_v13 = vmul.f32 %v6628_v40, %v11452_v2 }
 0x284   :  { %11444 = vst [vmem:[#allocation123_spill] sm:$0xff] %v7194_v3  ;;  %v1174_v43 = vmul.f32 %v6628_v40, %v11451_v9  ;;  %v11453_v3 = vld [vmem:[#allocation135_spill] sm:$0xff] }
 0x285   :  { %v1173_v11 = vmul.f32 %v6628_v40, %v11453_v3 }
 0x287   :  { %1537 = vrot.lane.b32.xlu1 %v1171_v10, %s5409_s17  ;;  %1539 = vrot.lane.b32.xlu2 %v1172_v34, %s5409_s17 }
 0x288   :  { %1535 = vrot.lane.b32.xlu0 %v1170_v32, %s5409_s17 }
 0x289   :  { %v7205_v60 = vpop.permute.xlu1 %1453  ;;  %v7207_v6 = vpop.permute.xlu2 %1473 }
 0x28a   :  { %11448 = vst [vmem:[#allocation128_spill] sm:$0xff] %v7205_v60  ;;  %v7209_v58 = vpop.permute.xlu0 %1451  ;;  %v11458_v60 = vld [vmem:[#allocation150_spill] sm:$0xff] }
 0x28b   :  { %11449 = vst [vmem:[#allocation138_spill] sm:$0xff] %v7207_v6  ;;  %v11457_v6 = vld [vmem:[#allocation140_spill] sm:$0xff]  ;;  %v1178_v2 = vmul.f32 %v6628_v40, %v11458_v60 }
 0x28c   :  { %11450 = vst [vmem:[#allocation129_spill] sm:$0xff] %v7209_v58  ;;  %v1177_v9 = vmul.f32 %v6628_v40, %v11457_v6  ;;  %v11459_v58 = vld [vmem:[#allocation141_spill] sm:$0xff] }
 0x28d   :  { %v1176_v3 = vmul.f32 %v6628_v40, %v11459_v58 }
 0x28f   :  { %1543 = vrot.lane.b32.xlu1 %v1174_v43, %s5409_s17  ;;  %1545 = vrot.lane.b32.xlu2 %v1175_v13, %s5409_s17 }
 0x290   :  { %1541 = vrot.lane.b32.xlu0 %v1173_v11, %s5409_s17 }
 0x291   :  { %v7220_v10 = vpop.permute.xlu1 %1459  ;;  %v7222_v34 = vpop.permute.xlu2 %1479 }
 0x292   :  { %11454 = vst [vmem:[#allocation134_spill] sm:$0xff] %v7220_v10  ;;  %v7224_v32 = vpop.permute.xlu0 %1457  ;;  %v11464_v10 = vld [vmem:[#allocation156_spill] sm:$0xff] }
 0x293   :  { %11455 = vst [vmem:[#allocation144_spill] sm:$0xff] %v7222_v34  ;;  %v11463_v34 = vld [vmem:[#allocation146_spill] sm:$0xff]  ;;  %v1181_v60 = vmul.f32 %v6628_v40, %v11464_v10 }
 0x294   :  { %11456 = vst [vmem:[#allocation135_spill] sm:$0xff] %v7224_v32  ;;  %v1180_v6 = vmul.f32 %v6628_v40, %v11463_v34  ;;  %v11465_v32 = vld [vmem:[#allocation147_spill] sm:$0xff] }
 0x295   :  { %v1179_v58 = vmul.f32 %v6628_v40, %v11465_v32 }
 0x297   :  { %1549 = vrot.lane.b32.xlu1 %v1177_v9, %s5409_s17  ;;  %1551 = vrot.lane.b32.xlu2 %v1178_v2, %s5409_s17 }
 0x298   :  { %1547 = vrot.lane.b32.xlu0 %v1176_v3, %s5409_s17 }
 0x299   :  { %v7235_v43 = vpop.permute.xlu1 %1465  ;;  %v7237_v13 = vpop.permute.xlu2 %1485 }
 0x29a   :  { %11460 = vst [vmem:[#allocation140_spill] sm:$0xff] %v7235_v43  ;;  %v7239_v11 = vpop.permute.xlu0 %1463  ;;  %v11470_v43 = vld [vmem:[#allocation162_spill] sm:$0xff] }
 0x29b   :  { %11461 = vst [vmem:[#allocation150_spill] sm:$0xff] %v7237_v13  ;;  %v11469_v13 = vld [vmem:[#allocation152_spill] sm:$0xff]  ;;  %v1184_v10 = vmul.f32 %v6628_v40, %v11470_v43  ;;  %v1187_v43 = vmul.f32 %v6628_v40, %v6637_v16  ;;  %v5112_v16 = vld [vmem:[%s10932_s1 + $0x8] sm:$0xff] }
 0x29c   :  { %11462 = vst [vmem:[#allocation141_spill] sm:$0xff] %v7239_v11  ;;  %v1183_v34 = vmul.f32 %v6628_v40, %v11469_v13  ;;  %v11471_v11 = vld [vmem:[#allocation153_spill] sm:$0xff]  ;;  %vm2086_vm1 = vcmp.ne.f32.partialorder %v5112_v16, -1.0 }
 0x29d   :  { %v1182_v32 = vmul.f32 %v6628_v40, %v11471_v11 }
 0x29f   :  { %1555 = vrot.lane.b32.xlu1 %v1180_v6, %s5409_s17  ;;  %1557 = vrot.lane.b32.xlu2 %v1181_v60, %s5409_s17 }
 0x2a0   :  { %1553 = vrot.lane.b32.xlu0 %v1179_v58, %s5409_s17 }
 0x2a1   :  { %v7250_v9 = vpop.permute.xlu1 %1471  ;;  %v7252_v2 = vpop.permute.xlu2 %1491 }
 0x2a2   :  { %11466 = vst [vmem:[#allocation146_spill] sm:$0xff] %v7250_v9  ;;  %v7254_v3 = vpop.permute.xlu0 %1469  ;;  %v11476_v9 = vld [vmem:[#allocation159_spill] sm:$0xff] }
 0x2a3   :  { %11467 = vst [vmem:[#allocation156_spill] sm:$0xff] %v7252_v2  ;;  %v11475_v2 = vld [vmem:[#allocation158_spill] sm:$0xff]  ;;  %v1185_v11 = vmul.f32 %v6628_v40, %v11476_v9 }
 0x2a4   :  { %11468 = vst [vmem:[#allocation147_spill] sm:$0xff] %v7254_v3  ;;  %v1186_v13 = vmul.f32 %v6628_v40, %v11475_v2  ;;  %v5111_v2 = vld [vmem:[%s10932_s1] sm:$0xff] }
 0x2a5   :  { %vm2085_vm0 = vcmp.ne.f32.partialorder %v5111_v2, -1.0 }
 0x2a7   :  { %1561 = vrot.lane.b32.xlu1 %v1183_v34, %s5409_s17  ;;  %1563 = vrot.lane.b32.xlu2 %v1184_v10, %s5409_s17 }
 0x2a8   :  { %1559 = vrot.lane.b32.xlu0 %v1182_v32, %s5409_s17  ;;  %v11009_v32 = vmov 0  }
 0x2a9   :  { %v7265_v6 = vpop.permute.xlu1 %1477  ;;  %v7267_v60 = vpop.permute.xlu2 %1497 }
 0x2aa   :  { %11472 = vst [vmem:[#allocation152_spill] sm:$0xff] %v7265_v6  ;;  %v7269_v58 = vpop.permute.xlu0 %1475  ;;  %v7363_v6 = vld [vmem:[%s10932_s1 + $0x48] sm:$0xff] }
 0x2ab   :  { %11473 = vst [vmem:[#allocation162_spill] sm:$0xff] %v7267_v60  ;;  %v5113_v60 = vld [vmem:[%s10932_s1 + $0x18] sm:$0xff]  ;;  %vm2094_vm8 = vcmp.ne.f32.partialorder %v7363_v6, -1.0 }
 0x2ac   :  { %11474 = vst [vmem:[#allocation153_spill] sm:$0xff] %v7269_v58  ;;  %vm2088_vm2 = vcmp.ne.f32.partialorder %v5113_v60, -1.0  ;;  %v7369_v58 = vld [vmem:[%s10932_s1 + $0x50] sm:$0xff] }
 0x2ad   :  { %vm2095_vm9 = vcmp.ne.f32.partialorder %v7369_v58, -1.0 }
 0x2af   :  { %1567 = vrot.lane.b32.xlu1 %v1186_v13, %s5409_s17  ;;  %1569 = vrot.lane.b32.xlu2 %v1187_v43, %s5409_s17  ;;  %v2213_v13 = vsel %vm2085_vm0, 1, %v11009_v32  ;;  %v2214_v43 = vsel %vm2086_vm1, 1, %v11009_v32  ;;  %vm2103_vm1 = vcmp.ne.f32.partialorder %v7453_v39, -1.0 }
 0x2b0   :  { %1565 = vrot.lane.b32.xlu0 %v1185_v11, %s5409_s17  ;;  %v11480_v11 = vld [vmem:[#allocation164_spill] sm:$0xff] }
 0x2b1   :  { %v7280_v34 = vpop.permute.xlu1 %1483  ;;  %v7282_v10 = vpop.permute.xlu2 %1503 }
 0x2b2   :  { %11477 = vst [vmem:[#allocation158_spill] sm:$0xff] %v7280_v34  ;;  %v7290_v9 = vpop.permute.xlu0 %1481 }
 0x2b3   :  { %11478 = vst [vmem:[#allocation159_spill] sm:$0xff] %v7282_v10  ;;  %v1188_v10 = vmul.f32 %v6628_v40, %v11480_v11  ;;  %v7309_v40 = vld [vmem:[%s10932_s1 + $0x20] sm:$0xff] }
 0x2b4   :  { %11479 = vst [vmem:[#allocation224_spill] sm:$0xff] %v7290_v9  ;;  %vm2089_vm3 = vcmp.ne.f32.partialorder %v7309_v40, -1.0 }
 0x2b5   :  { %v2217_v60 = vsel %vm2089_vm3, 1, %v11009_v32 }
 0x2b7   :  { %2341 = vrot.lane.b32.xlu1 %v2213_v13, %s5411_s21  ;;  %2343 = vrot.lane.b32.xlu2 %v2214_v43, %s5411_s21  ;;  %v2216_v43 = vsel %vm2088_vm2, 1, %v11009_v32  ;;  %vm2104_vm2 = vcmp.ne.f32.partialorder %v7459_v27, -1.0 }
 0x2b8   :  { %1571 = vrot.lane.b32.xlu0 %v1188_v10, %s5409_s17  ;;  %v7317_v10 = vld [vmem:[%s10932_s1 + $0x10] sm:$0xff] }
 0x2b9   :  { %v7299_v2 = vpop.permute.xlu1 %1489  ;;  %v7301_v16 = vpop.permute.xlu2 %1509  ;;  %vm2087_vm4 = vcmp.ne.f32.partialorder %v7317_v10, -1.0 }
 0x2ba   :  { %11481 = vst [vmem:[#allocation164_spill] sm:$0xff] %v7299_v2  ;;  %v7312_v13 = vpop.permute.xlu0 %1487  ;;  %v2215_v11 = vsel %vm2087_vm4, 1, %v11009_v32  ;;  %v7339_v32 = vld [vmem:[%s10932_s1 + $0x38] sm:$0xff]  ;;  %vm2106_vm4 = vcmp.ne.f32.partialorder %v7483_v33, -1.0 }
 0x2bb   :  { %11482 = vst [vmem:[#allocation225_spill] sm:$0xff] %v7301_v16  ;;  %vm2092_vm6 = vcmp.ne.f32.partialorder %v7339_v32, -1.0 }
 0x2bc   :  { %11483 = vst [vmem:[#allocation226_spill] sm:$0xff] %v7312_v13  ;;  %v7333_v13 = vld [vmem:[%s10932_s1 + $0x30] sm:$0xff] }
 0x2bd   :  { %vm2091_vm5 = vcmp.ne.f32.partialorder %v7333_v13, -1.0 }
 0x2bf   :  { %2347 = vrot.lane.b32.xlu1 %v2216_v43, %s5411_s21  ;;  %2349 = vrot.lane.b32.xlu2 %v2217_v60, %s5411_s21  ;;  %v7347_v60 = vld [vmem:[%s10932_s1 + $0x28] sm:$0xff] }
 0x2c0   :  { %2345 = vrot.lane.b32.xlu0 %v2215_v11, %s5411_s21  ;;  %vm2090_vm7 = vcmp.ne.f32.partialorder %v7347_v60, -1.0  ;;  %v11487_v11 = vmov 0  }
 0x2c1   :  { %v7326_v16 = vpop.permute.xlu1 %1495  ;;  %v7328_v2 = vpop.permute.xlu2 %1515  ;;  %v2218_v34 = vsel %vm2090_vm7, 1, %v11487_v11  ;;  %vm2109_vm7 = vcmp.ne.f32.partialorder %v7513_v62, -1.0 }
 0x2c2   :  { %11484 = vst [vmem:[#allocation227_spill] sm:$0xff] %v7326_v16  ;;  %v7342_v43 = vpop.permute.xlu0 %1493  ;;  %v2220_v16 = vsel %vm2092_vm6, 1, %v11487_v11 }
 0x2c3   :  { %11485 = vst [vmem:[#allocation228_spill] sm:$0xff] %v7328_v2  ;;  %v2219_v2 = vsel %vm2091_vm5, 1, %v11487_v11  ;;  %vm2107_vm5 = vcmp.ne.f32.partialorder %v7489_v25, -1.0 }
 0x2c4   :  { %11486 = vst [vmem:[#allocation229_spill] sm:$0xff] %v7342_v43 }
 0x2c7   :  { %2353 = vrot.lane.b32.xlu1 %v2219_v2, %s5411_s21  ;;  %2355 = vrot.lane.b32.xlu2 %v2220_v16, %s5411_s21  ;;  %v2222_v16 = vsel %vm2094_vm8, 1, %v11487_v11  ;;  %vm2110_vm8 = vcmp.ne.f32.partialorder %v7519_v14, -1.0 }
 0x2c8   :  { %2351 = vrot.lane.b32.xlu0 %v2218_v34, %s5411_s21  ;;  %v7377_v34 = vld [vmem:[%s10932_s1 + $0x40] sm:$0xff] }
 0x2c9   :  { %v7356_v43 = vpop.permute.xlu1 %1501  ;;  %v7358_v9 = vpop.permute.xlu2 %1521  ;;  %vm2093_vm10 = vcmp.ne.f32.partialorder %v7377_v34, -1.0 }
 0x2ca   :  { %11488 = vst [vmem:[#allocation230_spill] sm:$0xff] %v7356_v43  ;;  %v7372_v2 = vpop.permute.xlu0 %1499  ;;  %v2221_v43 = vsel %vm2093_vm10, 1, %v11487_v11  ;;  %vm2112_vm10 = vcmp.ne.f32.partialorder %v7543_v26, -1.0 }
 0x2cb   :  { %11489 = vst [vmem:[#allocation231_spill] sm:$0xff] %v7358_v9  ;;  %v2223_v9 = vsel %vm2095_vm9, 1, %v11487_v11 }
 0x2cc   :  { %11490 = vst [vmem:[#allocation232_spill] sm:$0xff] %v7372_v2 }
 0x2cf   :  { %2359 = vrot.lane.b32.xlu1 %v2222_v16, %s5411_s21  ;;  %2361 = vrot.lane.b32.xlu2 %v2223_v9, %s5411_s21  ;;  %v2225_v16 = vsel %vm2097_vm11, 1, %v11487_v11  ;;  %vm2113_vm11 = vcmp.ne.f32.partialorder %v7549_v0, -1.0 }
 0x2d0   :  { %2357 = vrot.lane.b32.xlu0 %v2221_v43, %s5411_s21  ;;  %v7407_v43 = vld [vmem:[%s10932_s1 + $0x58] sm:$0xff] }
 0x2d1   :  { %v7386_v2 = vpop.permute.xlu1 %1507  ;;  %v7388_v3 = vpop.permute.xlu2 %1527  ;;  %vm2096_vm13 = vcmp.ne.f32.partialorder %v7407_v43, -1.0 }
 0x2d2   :  { %11491 = vst [vmem:[#allocation233_spill] sm:$0xff] %v7386_v2  ;;  %v7402_v9 = vpop.permute.xlu0 %1505  ;;  %v2224_v2 = vsel %vm2096_vm13, 1, %v11487_v11  ;;  %vm2115_vm13 = vcmp.ne.f32.partialorder %v7573_v20, -1.0 }
 0x2d3   :  { %11492 = vst [vmem:[#allocation234_spill] sm:$0xff] %v7388_v3  ;;  %v2226_v3 = vsel %vm2098_vm12, 1, %v11487_v11 }
 0x2d4   :  { %11493 = vst [vmem:[#allocation235_spill] sm:$0xff] %v7402_v9 }
 0x2d7   :  { %2365 = vrot.lane.b32.xlu1 %v2225_v16, %s5411_s21  ;;  %2367 = vrot.lane.b32.xlu2 %v2226_v3, %s5411_s21  ;;  %v2228_v16 = vsel %vm2100_vm14, 1, %v11487_v11  ;;  %vm2116_vm14 = vcmp.ne.f32.partialorder %v7579_v15, -1.0 }
 0x2d8   :  { %2363 = vrot.lane.b32.xlu0 %v2224_v2, %s5411_s21  ;;  %v7437_v2 = vld [vmem:[%s10932_s1 + $0x70] sm:$0xff] }
 0x2d9   :  { %v7416_v9 = vpop.permute.xlu1 %1513  ;;  %v7418_v30 = vpop.permute.xlu2 %1533  ;;  %vm2099_vm0 = vcmp.ne.f32.partialorder %v7437_v2, -1.0 }
 0x2da   :  { %11494 = vst [vmem:[#allocation236_spill] sm:$0xff] %v7416_v9  ;;  %v7432_v3 = vpop.permute.xlu0 %1511  ;;  %v2229_v9 = vsel %vm2101_vm15, 1, %v11487_v11 }
 0x2db   :  { %11495 = vst [vmem:[#allocation237_spill] sm:$0xff] %v7418_v30  ;;  %v2227_v30 = vsel %vm2099_vm0, 1, %v11487_v11  ;;  %vm2118_vm0 = vcmp.ne.f32.partialorder %v7603_v49, -1.0 }
 0x2dc   :  { %11496 = vst [vmem:[#allocation238_spill] sm:$0xff] %v7432_v3 }
 0x2df   :  { %2371 = vrot.lane.b32.xlu1 %v2228_v16, %s5411_s21  ;;  %2373 = vrot.lane.b32.xlu2 %v2229_v9, %s5411_s21  ;;  %v2231_v16 = vsel %vm2103_vm1, 1, %v11487_v11  ;;  %vm2119_vm1 = vcmp.ne.f32.partialorder %v7609_v24, -1.0 }
 0x2e0   :  { %2369 = vrot.lane.b32.xlu0 %v2227_v30, %s5411_s21  ;;  %v7467_v30 = vld [vmem:[%s10932_s1 + $0x88] sm:$0xff] }
 0x2e1   :  { %v7446_v3 = vpop.permute.xlu1 %1519  ;;  %v7448_v61 = vpop.permute.xlu2 %1539  ;;  %vm2102_vm3 = vcmp.ne.f32.partialorder %v7467_v30, -1.0 }
 0x2e2   :  { %11497 = vst [vmem:[#allocation239_spill] sm:$0xff] %v7446_v3  ;;  %v7462_v9 = vpop.permute.xlu0 %1517  ;;  %v2232_v3 = vsel %vm2104_vm2, 1, %v11487_v11 }
 0x2e3   :  { %11498 = vst [vmem:[#allocation240_spill] sm:$0xff] %v7448_v61  ;;  %v2230_v61 = vsel %vm2102_vm3, 1, %v11487_v11  ;;  %vm2121_vm3 = vcmp.ne.f32.partialorder %v7633_v53, -1.0 }
 0x2e4   :  { %11499 = vst [vmem:[#allocation241_spill] sm:$0xff] %v7462_v9 }
 0x2e7   :  { %2377 = vrot.lane.b32.xlu1 %v2231_v16, %s5411_s21  ;;  %2379 = vrot.lane.b32.xlu2 %v2232_v3, %s5411_s21  ;;  %v2234_v16 = vsel %vm2106_vm4, 1, %v11487_v11  ;;  %vm2122_vm4 = vcmp.ne.f32.partialorder %v7639_v29, -1.0 }
 0x2e8   :  { %2375 = vrot.lane.b32.xlu0 %v2230_v61, %s5411_s21  ;;  %v7497_v61 = vld [vmem:[%s10932_s1 + $0xa0] sm:$0xff] }
 0x2e9   :  { %v7476_v9 = vpop.permute.xlu1 %1525  ;;  %v7478_v7 = vpop.permute.xlu2 %1545  ;;  %vm2105_vm6 = vcmp.ne.f32.partialorder %v7497_v61, -1.0 }
 0x2ea   :  { %11500 = vst [vmem:[#allocation242_spill] sm:$0xff] %v7476_v9  ;;  %v7492_v3 = vpop.permute.xlu0 %1523  ;;  %v2233_v9 = vsel %vm2105_vm6, 1, %v11487_v11  ;;  %vm2124_vm6 = vcmp.ne.f32.partialorder %v7663_v59, -1.0 }
 0x2eb   :  { %11501 = vst [vmem:[#allocation243_spill] sm:$0xff] %v7478_v7  ;;  %v2235_v7 = vsel %vm2107_vm5, 1, %v11487_v11 }
 0x2ec   :  { %11502 = vst [vmem:[#allocation244_spill] sm:$0xff] %v7492_v3 }
 0x2ef   :  { %2383 = vrot.lane.b32.xlu1 %v2234_v16, %s5411_s21  ;;  %2385 = vrot.lane.b32.xlu2 %v2235_v7, %s5411_s21  ;;  %v2237_v16 = vsel %vm2109_vm7, 1, %v11487_v11  ;;  %vm2125_vm7 = vcmp.ne.f32.partialorder %v7669_v19, -1.0 }
 0x2f0   :  { %2381 = vrot.lane.b32.xlu0 %v2233_v9, %s5411_s21  ;;  %v7527_v9 = vld [vmem:[%s10932_s1 + $0xb8] sm:$0xff] }
 0x2f1   :  { %v7506_v3 = vpop.permute.xlu1 %1531  ;;  %v7508_v1 = vpop.permute.xlu2 %1551  ;;  %vm2108_vm9 = vcmp.ne.f32.partialorder %v7527_v9, -1.0 }
 0x2f2   :  { %11503 = vst [vmem:[#allocation245_spill] sm:$0xff] %v7506_v3  ;;  %v7522_v7 = vpop.permute.xlu0 %1529  ;;  %v2236_v3 = vsel %vm2108_vm9, 1, %v11487_v11  ;;  %vm2127_vm9 = vcmp.ne.f32.partialorder %v7693_v47, -1.0 }
 0x2f3   :  { %11504 = vst [vmem:[#allocation246_spill] sm:$0xff] %v7508_v1  ;;  %v2238_v1 = vsel %vm2110_vm8, 1, %v11487_v11 }
 0x2f4   :  { %11505 = vst [vmem:[#allocation247_spill] sm:$0xff] %v7522_v7 }
 0x2f7   :  { %2389 = vrot.lane.b32.xlu1 %v2237_v16, %s5411_s21  ;;  %2391 = vrot.lane.b32.xlu2 %v2238_v1, %s5411_s21  ;;  %v2240_v16 = vsel %vm2112_vm10, 1, %v11487_v11  ;;  %vm2128_vm10 = vcmp.ne.f32.partialorder %v7699_v45, -1.0 }
 0x2f8   :  { %2387 = vrot.lane.b32.xlu0 %v2236_v3, %s5411_s21  ;;  %v7557_v3 = vld [vmem:[%s10932_s1 + $0xd0] sm:$0xff] }
 0x2f9   :  { %v7536_v7 = vpop.permute.xlu1 %1537  ;;  %v7538_v55 = vpop.permute.xlu2 %1557  ;;  %vm2111_vm12 = vcmp.ne.f32.partialorder %v7557_v3, -1.0 }
 0x2fa   :  { %11506 = vst [vmem:[#allocation248_spill] sm:$0xff] %v7536_v7  ;;  %v7552_v1 = vpop.permute.xlu0 %1535  ;;  %v2239_v7 = vsel %vm2111_vm12, 1, %v11487_v11  ;;  %vm2130_vm12 = vcmp.ne.f32.partialorder %v7723_v46, -1.0 }
 0x2fb   :  { %11507 = vst [vmem:[#allocation249_spill] sm:$0xff] %v7538_v55  ;;  %v2241_v55 = vsel %vm2113_vm11, 1, %v11487_v11 }
 0x2fc   :  { %11508 = vst [vmem:[#allocation250_spill] sm:$0xff] %v7552_v1 }
 0x2ff   :  { %2395 = vrot.lane.b32.xlu1 %v2240_v16, %s5411_s21  ;;  %2397 = vrot.lane.b32.xlu2 %v2241_v55, %s5411_s21  ;;  %v2243_v16 = vsel %vm2115_vm13, 1, %v11487_v11  ;;  %vm2131_vm13 = vcmp.ne.f32.partialorder %v7729_v41, -1.0 }
 0x300   :  { %2393 = vrot.lane.b32.xlu0 %v2239_v7, %s5411_s21  ;;  %v7587_v7 = vld [vmem:[%s10932_s1 + $0xe8] sm:$0xff] }
 0x301   :  { %v7566_v1 = vpop.permute.xlu1 %1543  ;;  %v7568_v31 = vpop.permute.xlu2 %1563  ;;  %vm2114_vm15 = vcmp.ne.f32.partialorder %v7587_v7, -1.0 }
 0x302   :  { %11509 = vst [vmem:[#allocation251_spill] sm:$0xff] %v7566_v1  ;;  %v7582_v55 = vpop.permute.xlu0 %1541  ;;  %v2244_v1 = vsel %vm2116_vm14, 1, %v11487_v11 }
 0x303   :  { %11510 = vst [vmem:[#allocation252_spill] sm:$0xff] %v7568_v31  ;;  %v2242_v31 = vsel %vm2114_vm15, 1, %v11487_v11 }
 0x304   :  { %11511 = vst [vmem:[#allocation253_spill] sm:$0xff] %v7582_v55 }
 0x307   :  { %2401 = vrot.lane.b32.xlu1 %v2243_v16, %s5411_s21  ;;  %2403 = vrot.lane.b32.xlu2 %v2244_v1, %s5411_s21  ;;  %v2246_v16 = vsel %vm2118_vm0, 1, %v11487_v11  ;;  %vm2134_vm0 = vcmp.ne.f32.partialorder %v7759_v28, -1.0 }
 0x308   :  { %2399 = vrot.lane.b32.xlu0 %v2242_v31, %s5411_s21  ;;  %v7617_v31 = vld [vmem:[%s10932_s1 + $0x100] sm:$0xff] }
 0x309   :  { %v7596_v55 = vpop.permute.xlu1 %1549  ;;  %v7598_v21 = vpop.permute.xlu2 %1569  ;;  %vm2117_vm2 = vcmp.ne.f32.partialorder %v7617_v31, -1.0 }
 0x30a   :  { %11512 = vst [vmem:[#allocation254_spill] sm:$0xff] %v7596_v55  ;;  %v7612_v1 = vpop.permute.xlu0 %1547  ;;  %v2247_v55 = vsel %vm2119_vm1, 1, %v11487_v11 }
 0x30b   :  { %11513 = vst [vmem:[#allocation255_spill] sm:$0xff] %v7598_v21  ;;  %v2245_v21 = vsel %vm2117_vm2, 1, %v11487_v11  ;;  %vm2136_vm2 = vcmp.ne.f32.partialorder %v7783_v12, -1.0 }
 0x30c   :  { %11514 = vst [vmem:[#allocation256_spill] sm:$0xff] %v7612_v1 }
 0x30f   :  { %2407 = vrot.lane.b32.xlu1 %v2246_v16, %s5411_s21  ;;  %2409 = vrot.lane.b32.xlu2 %v2247_v55, %s5411_s21  ;;  %v2249_v16 = vsel %vm2121_vm3, 1, %v11487_v11  ;;  %vm2137_vm3 = vcmp.ne.f32.partialorder %v7789_v35, -1.0 }
 0x310   :  { %2405 = vrot.lane.b32.xlu0 %v2245_v21, %s5411_s21  ;;  %v7647_v21 = vld [vmem:[%s10932_s1 + $0x118] sm:$0xff] }
 0x311   :  { %v7626_v1 = vpop.permute.xlu1 %1555  ;;  %v7628_v18 = vpop.permute.xlu2 %2343  ;;  %vm2120_vm5 = vcmp.ne.f32.partialorder %v7647_v21, -1.0 }
 0x312   :  { %11515 = vst [vmem:[#allocation257_spill] sm:$0xff] %v7626_v1  ;;  %v7642_v55 = vpop.permute.xlu0 %1553  ;;  %v2250_v1 = vsel %vm2122_vm4, 1, %v11487_v11  ;;  %v2248_v51 = vsel %vm2120_vm5, 1, %v11487_v11  ;;  %vm2139_vm5 = vcmp.ne.f32.partialorder %v7813_v36, -1.0 }
 0x313   :  { %11516 = vst [vmem:[#allocation258_spill] sm:$0xff] %v7628_v18 }
 0x314   :  { %11517 = vst [vmem:[#allocation259_spill] sm:$0xff] %v7642_v55 }
 0x317   :  { %2413 = vrot.lane.b32.xlu1 %v2249_v16, %s5411_s21  ;;  %2415 = vrot.lane.b32.xlu2 %v2250_v1, %s5411_s21  ;;  %v2252_v16 = vsel %vm2124_vm6, 1, %v11487_v11 }
 0x318   :  { %2411 = vrot.lane.b32.xlu0 %v2248_v51, %s5411_s21  ;;  %v7677_v51 = vld [vmem:[%s10932_s1 + $0x130] sm:$0xff] }
 0x319   :  { %v7656_v55 = vpop.permute.xlu1 %1561  ;;  %v7658_v50 = vpop.permute.xlu2 %2349  ;;  %vm2123_vm8 = vcmp.ne.f32.partialorder %v7677_v51, -1.0 }
 0x31a   :  { %11518 = vst [vmem:[#allocation260_spill] sm:$0xff] %v7656_v55  ;;  %v7672_v1 = vpop.permute.xlu0 %1559  ;;  %v2253_v55 = vsel %vm2125_vm7, 1, %v11487_v11  ;;  %v2251_v44 = vsel %vm2123_vm8, 1, %v11487_v11  ;;  %vm2142_vm8 = vcmp.ne.f32.partialorder %v7843_v23, -1.0  ;;  %v7909_v23 = vld [vmem:[%s10932_s1 + $0x200] sm:$0xff] }
 0x31b   :  { %11519 = vst [vmem:[#allocation261_spill] sm:$0xff] %v7658_v50 }
 0x31c   :  { %11520 = vst [vmem:[#allocation262_spill] sm:$0xff] %v7672_v1 }
 0x31d   :  { %11548 = vst [vmem:[#allocation290_spill] sm:$0xff] %v7909_v23 }
 0x31f   :  { %2419 = vrot.lane.b32.xlu1 %v2252_v16, %s5411_s21  ;;  %2421 = vrot.lane.b32.xlu2 %v2253_v55, %s5411_s21  ;;  %v2255_v16 = vsel %vm2127_vm9, 1, %v11487_v11  ;;  %vm2143_vm9 = vcmp.ne.f32.partialorder %v7849_v22, -1.0 }
 0x320   :  { %2417 = vrot.lane.b32.xlu0 %v2251_v44, %s5411_s21  ;;  %v7707_v44 = vld [vmem:[%s10932_s1 + $0x148] sm:$0xff] }
 0x321   :  { %v7686_v1 = vpop.permute.xlu1 %1567  ;;  %v7688_v17 = vpop.permute.xlu2 %2355  ;;  %vm2126_vm11 = vcmp.ne.f32.partialorder %v7707_v44, -1.0 }
 0x322   :  { %11521 = vst [vmem:[#allocation263_spill] sm:$0xff] %v7686_v1  ;;  %v7702_v55 = vpop.permute.xlu0 %1565  ;;  %v2256_v1 = vsel %vm2128_vm10, 1, %v11487_v11  ;;  %v2254_v54 = vsel %vm2126_vm11, 1, %v11487_v11 }
 0x323   :  { %11522 = vst [vmem:[#allocation264_spill] sm:$0xff] %v7688_v17  ;;  %v7753_v17 = vld [vmem:[%s10932_s1 + $0x180] sm:$0xff] }
 0x324   :  { %11523 = vst [vmem:[#allocation265_spill] sm:$0xff] %v7702_v55  ;;  %vm2133_vm15 = vcmp.ne.f32.partialorder %v7753_v17, -1.0 }
 0x327   :  { %2425 = vrot.lane.b32.xlu1 %v2255_v16, %s5411_s21  ;;  %2427 = vrot.lane.b32.xlu2 %v2256_v1, %s5411_s21  ;;  %v2258_v16 = vsel %vm2130_vm12, 1, %v11487_v11  ;;  %vm2146_vm12 = vcmp.ne.f32.partialorder %v7879_v57, -1.0  ;;  %v7903_v57 = vld [vmem:[%s10932_s1 + $0x1f8] sm:$0xff] }
 0x328   :  { %2423 = vrot.lane.b32.xlu0 %v2254_v54, %s5411_s21  ;;  %v7737_v54 = vld [vmem:[%s10932_s1 + $0x160] sm:$0xff]  ;;  %11547 = vst [vmem:[#allocation289_spill] sm:$0xff] %v7903_v57 }
 0x329   :  { %v7716_v55 = vpop.permute.xlu1 %2341  ;;  %v7718_v42 = vpop.permute.xlu2 %2361  ;;  %vm2129_vm14 = vcmp.ne.f32.partialorder %v7737_v54, -1.0 }
 0x32a   :  { %11524 = vst [vmem:[#allocation266_spill] sm:$0xff] %v7716_v55  ;;  %v7732_v1 = vpop.permute.xlu0 %1571  ;;  %v2257_v4 = vsel %vm2129_vm14, 1, %v11487_v11  ;;  %v7873_v55 = vld [vmem:[%s10932_s1 + $0x1e0] sm:$0xff]  ;;  %vm2148_vm14 = vcmp.ne.f32.partialorder %v7903_v57, -1.0 }
 0x32b   :  { %11525 = vst [vmem:[#allocation267_spill] sm:$0xff] %v7718_v42  ;;  %v2259_v42 = vsel %vm2131_vm13, 1, %v11487_v11  ;;  %vm2145_vm11 = vcmp.ne.f32.partialorder %v7873_v55, -1.0 }
 0x32c   :  { %11526 = vst [vmem:[#allocation268_spill] sm:$0xff] %v7732_v1 }
 0x32d   :  { %11542 = vst [vmem:[#allocation284_spill] sm:$0xff] %v7873_v55 }
 0x32f   :  { %2431 = vrot.lane.b32.xlu1 %v2258_v16, %s5411_s21  ;;  %2433 = vrot.lane.b32.xlu2 %v2259_v42, %s5411_s21  ;;  %v2261_v16 = vsel %vm2133_vm15, 1, %v11487_v11  ;;  %vm2149_vm15 = vcmp.ne.f32.partialorder %v7909_v23, -1.0  ;;  %v7933_v23 = vld [vmem:[%s10932_s1 + $0x210] sm:$0xff] }
 0x330   :  { %2429 = vrot.lane.b32.xlu0 %v2257_v4, %s5411_s21  ;;  %v7767_v4 = vld [vmem:[%s10932_s1 + $0x178] sm:$0xff]  ;;  %11553 = vst [vmem:[#allocation295_spill] sm:$0xff] %v7933_v23 }
 0x331   :  { %v7746_v1 = vpop.permute.xlu1 %2347  ;;  %v7748_v5 = vpop.permute.xlu2 %2367  ;;  %vm2132_vm1 = vcmp.ne.f32.partialorder %v7767_v4, -1.0 }
 0x332   :  { %11527 = vst [vmem:[#allocation269_spill] sm:$0xff] %v7746_v1  ;;  %v7762_v42 = vpop.permute.xlu0 %2345  ;;  %v2260_v48 = vsel %vm2132_vm1, 1, %v11487_v11  ;;  %vm2151_vm1 = vcmp.ne.f32.partialorder %v7933_v23, -1.0 }
 0x333   :  { %11528 = vst [vmem:[#allocation270_spill] sm:$0xff] %v7748_v5  ;;  %v2262_v5 = vsel %vm2134_vm0, 1, %v11487_v11 }
 0x334   :  { %11529 = vst [vmem:[#allocation271_spill] sm:$0xff] %v7762_v42  ;;  %v7819_v42 = vld [vmem:[%s10932_s1 + $0x1b8] sm:$0xff] }
 0x335   :  { %vm2140_vm6 = vcmp.ne.f32.partialorder %v7819_v42, -1.0 }
 0x337   :  { %2437 = vrot.lane.b32.xlu1 %v2261_v16, %s5411_s21  ;;  %2439 = vrot.lane.b32.xlu2 %v2262_v5, %s5411_s21  ;;  %v2264_v16 = vsel %vm2136_vm2, 1, %v11487_v11 }
 0x338   :  { %2435 = vrot.lane.b32.xlu0 %v2260_v48, %s5411_s21  ;;  %v7797_v48 = vld [vmem:[%s10932_s1 + $0x190] sm:$0xff] }
 0x339   :  { %v7776_v52 = vpop.permute.xlu1 %2353  ;;  %v7778_v50 = vpop.permute.xlu2 %2373  ;;  %vm2135_vm4 = vcmp.ne.f32.partialorder %v7797_v48, -1.0 }
 0x33a   :  { %11530 = vst [vmem:[#allocation272_spill] sm:$0xff] %v7776_v52  ;;  %v7792_v5 = vpop.permute.xlu0 %2351  ;;  %v2263_v52 = vsel %vm2135_vm4, 1, %v11487_v11 }
 0x33b   :  { %11531 = vst [vmem:[#allocation273_spill] sm:$0xff] %v7778_v50  ;;  %v2265_v50 = vsel %vm2137_vm3, 1, %v11487_v11 }
 0x33c   :  { %11532 = vst [vmem:[#allocation274_spill] sm:$0xff] %v7792_v5 }
 0x33f   :  { %2443 = vrot.lane.b32.xlu1 %v2264_v16, %s5411_s21  ;;  %2445 = vrot.lane.b32.xlu2 %v2265_v50, %s5411_s21  ;;  %v2267_v16 = vsel %vm2139_vm5, 1, %v11487_v11 }
 0x340   :  { %2441 = vrot.lane.b32.xlu0 %v2263_v52, %s5411_s21  ;;  %v7827_v52 = vld [vmem:[%s10932_s1 + $0x1a8] sm:$0xff] }
 0x341   :  { %v7806_v5 = vpop.permute.xlu1 %2359  ;;  %v7808_v18 = vpop.permute.xlu2 %2379  ;;  %vm2138_vm7 = vcmp.ne.f32.partialorder %v7827_v52, -1.0 }
 0x342   :  { %11533 = vst [vmem:[#allocation275_spill] sm:$0xff] %v7806_v5  ;;  %v7822_v50 = vpop.permute.xlu0 %2357  ;;  %v2266_v5 = vsel %vm2138_vm7, 1, %v11487_v11 }
 0x343   :  { %11534 = vst [vmem:[#allocation276_spill] sm:$0xff] %v7808_v18  ;;  %v2268_v18 = vsel %vm2140_vm6, 1, %v11487_v11 }
 0x344   :  { %11535 = vst [vmem:[#allocation277_spill] sm:$0xff] %v7822_v50 }
 0x347   :  { %2449 = vrot.lane.b32.xlu1 %v2267_v16, %s5411_s21  ;;  %2451 = vrot.lane.b32.xlu2 %v2268_v18, %s5411_s21  ;;  %v2270_v16 = vsel %vm2142_vm8, 1, %v11487_v11 }
 0x348   :  { %2447 = vrot.lane.b32.xlu0 %v2266_v5, %s5411_s21  ;;  %v7857_v5 = vld [vmem:[%s10932_s1 + $0x1c0] sm:$0xff] }
 0x349   :  { %v7836_v50 = vpop.permute.xlu1 %2365  ;;  %v7838_v1 = vpop.permute.xlu2 %2385  ;;  %vm2141_vm10 = vcmp.ne.f32.partialorder %v7857_v5, -1.0 }
 0x34a   :  { %11536 = vst [vmem:[#allocation278_spill] sm:$0xff] %v7836_v50  ;;  %v7852_v18 = vpop.permute.xlu0 %2363  ;;  %v2269_v50 = vsel %vm2141_vm10, 1, %v11487_v11 }
 0x34b   :  { %11537 = vst [vmem:[#allocation279_spill] sm:$0xff] %v7838_v1  ;;  %v2271_v1 = vsel %vm2143_vm9, 1, %v11487_v11 }
 0x34c   :  { %11539 = vst [vmem:[#allocation281_spill] sm:$0xff] %v7852_v18 }
 0x34f   :  { %2455 = vrot.lane.b32.xlu1 %v2270_v16, %s5411_s21  ;;  %2457 = vrot.lane.b32.xlu2 %v2271_v1, %s5411_s21  ;;  %v2273_v16 = vsel %vm2145_vm11, 1, %v11487_v11 }
 0x350   :  { %2453 = vrot.lane.b32.xlu0 %v2269_v50, %s5411_s21  ;;  %v7887_v50 = vld [vmem:[%s10932_s1 + $0x1d8] sm:$0xff] }
 0x351   :  { %v7866_v18 = vpop.permute.xlu1 %2371  ;;  %v7868_v63 = vpop.permute.xlu2 %2391  ;;  %vm2144_vm13 = vcmp.ne.f32.partialorder %v7887_v50, -1.0 }
 0x352   :  { %11540 = vst [vmem:[#allocation282_spill] sm:$0xff] %v7866_v18  ;;  %v7882_v1 = vpop.permute.xlu0 %2369  ;;  %v2272_v18 = vsel %vm2144_vm13, 1, %v11487_v11 }
 0x353   :  { %11541 = vst [vmem:[#allocation283_spill] sm:$0xff] %v7868_v63  ;;  %v2274_v63 = vsel %vm2146_vm12, 1, %v11487_v11 }
 0x354   :  { %11544 = vst [vmem:[#allocation286_spill] sm:$0xff] %v7882_v1 }
 0x357   :  { %2461 = vrot.lane.b32.xlu1 %v2273_v16, %s5411_s21  ;;  %2463 = vrot.lane.b32.xlu2 %v2274_v63, %s5411_s21  ;;  %v2276_v16 = vsel %vm2148_vm14, 1, %v11487_v11 }
 0x358   :  { %2459 = vrot.lane.b32.xlu0 %v2272_v18, %s5411_s21  ;;  %v7917_v18 = vld [vmem:[%s10932_s1 + $0x1f0] sm:$0xff] }
 0x359   :  { %v7896_v1 = vpop.permute.xlu1 %2377  ;;  %v7898_v55 = vpop.permute.xlu2 %2397  ;;  %11550 = vst [vmem:[#allocation292_spill] sm:$0xff] %v7917_v18  ;;  %vm2147_vm0 = vcmp.ne.f32.partialorder %v7917_v18, -1.0  ;;  %v7939_v18 = vld [vmem:[%s10932_s1 + $0x218] sm:$0xff] }
 0x35a   :  { %11545 = vst [vmem:[#allocation287_spill] sm:$0xff] %v7896_v1  ;;  %v7912_v63 = vpop.permute.xlu0 %2375  ;;  %v2275_v1 = vsel %vm2147_vm0, 1, %v11487_v11  ;;  %vm2152_vm2 = vcmp.ne.f32.partialorder %v7939_v18, -1.0 }
 0x35b   :  { %11546 = vst [vmem:[#allocation288_spill] sm:$0xff] %v7898_v55  ;;  %v2277_v55 = vsel %vm2149_vm15, 1, %v11487_v11 }
 0x35c   :  { %11549 = vst [vmem:[#allocation291_spill] sm:$0xff] %v7912_v63 }
 0x35d   :  { %11554 = vst [vmem:[#allocation296_spill] sm:$0xff] %v7939_v18  ;;  %v7963_v18 = vld [vmem:[%s10932_s1 + $0x228] sm:$0xff] }
 0x35e   :  { %11559 = vst [vmem:[#allocation301_spill] sm:$0xff] %v7963_v18  ;;  %vm2154_vm4 = vcmp.ne.f32.partialorder %v7963_v18, -1.0 }
 0x35f   :  { %2467 = vrot.lane.b32.xlu1 %v2276_v16, %s5411_s21  ;;  %2469 = vrot.lane.b32.xlu2 %v2277_v55, %s5411_s21  ;;  %v2279_v16 = vsel %vm2151_vm1, 1, %v11487_v11 }
 0x360   :  { %2465 = vrot.lane.b32.xlu0 %v2275_v1, %s5411_s21  ;;  %v7947_v1 = vld [vmem:[%s10932_s1 + $0x208] sm:$0xff] }
 0x361   :  { %v7926_v63 = vpop.permute.xlu1 %2383  ;;  %v7928_v57 = vpop.permute.xlu2 %2403  ;;  %11556 = vst [vmem:[#allocation298_spill] sm:$0xff] %v7947_v1  ;;  %vm2150_vm3 = vcmp.ne.f32.partialorder %v7947_v1, -1.0  ;;  %v7969_v1 = vld [vmem:[%s10932_s1 + $0x230] sm:$0xff] }
 0x362   :  { %11551 = vst [vmem:[#allocation293_spill] sm:$0xff] %v7926_v63  ;;  %v7942_v55 = vpop.permute.xlu0 %2381  ;;  %v2278_v63 = vsel %vm2150_vm3, 1, %v11487_v11  ;;  %vm2155_vm5 = vcmp.ne.f32.partialorder %v7969_v1, -1.0 }
 0x363   :  { %11552 = vst [vmem:[#allocation294_spill] sm:$0xff] %v7928_v57  ;;  %v2280_v57 = vsel %vm2152_vm2, 1, %v11487_v11 }
 0x364   :  { %11555 = vst [vmem:[#allocation297_spill] sm:$0xff] %v7942_v55 }
 0x365   :  { %11560 = vst [vmem:[#allocation302_spill] sm:$0xff] %v7969_v1  ;;  %v7993_v1 = vld [vmem:[%s10932_s1 + $0x240] sm:$0xff] }
 0x366   :  { %11565 = vst [vmem:[#allocation307_spill] sm:$0xff] %v7993_v1  ;;  %vm2157_vm7 = vcmp.ne.f32.partialorder %v7993_v1, -1.0 }
 0x367   :  { %2473 = vrot.lane.b32.xlu1 %v2279_v16, %s5411_s21  ;;  %2475 = vrot.lane.b32.xlu2 %v2280_v57, %s5411_s21  ;;  %v2282_v16 = vsel %vm2154_vm4, 1, %v11487_v11 }
 0x368   :  { %2471 = vrot.lane.b32.xlu0 %v2278_v63, %s5411_s21  ;;  %v7977_v63 = vld [vmem:[%s10932_s1 + $0x220] sm:$0xff] }
 0x369   :  { %v7956_v55 = vpop.permute.xlu1 %2389  ;;  %v7958_v23 = vpop.permute.xlu2 %2409  ;;  %11562 = vst [vmem:[#allocation304_spill] sm:$0xff] %v7977_v63  ;;  %vm2153_vm6 = vcmp.ne.f32.partialorder %v7977_v63, -1.0  ;;  %v7999_v63 = vld [vmem:[%s10932_s1 + $0x248] sm:$0xff] }
 0x36a   :  { %11557 = vst [vmem:[#allocation299_spill] sm:$0xff] %v7956_v55  ;;  %v7972_v57 = vpop.permute.xlu0 %2387  ;;  %v2281_v55 = vsel %vm2153_vm6, 1, %v11487_v11  ;;  %vm2158_vm8 = vcmp.ne.f32.partialorder %v7999_v63, -1.0 }
 0x36b   :  { %11558 = vst [vmem:[#allocation300_spill] sm:$0xff] %v7958_v23  ;;  %v2283_v23 = vsel %vm2155_vm5, 1, %v11487_v11 }
 0x36c   :  { %11561 = vst [vmem:[#allocation303_spill] sm:$0xff] %v7972_v57 }
 0x36d   :  { %11566 = vst [vmem:[#allocation308_spill] sm:$0xff] %v7999_v63  ;;  %v8023_v63 = vld [vmem:[%s10932_s1 + $0x258] sm:$0xff] }
 0x36e   :  { %11571 = vst [vmem:[#allocation313_spill] sm:$0xff] %v8023_v63  ;;  %vm2160_vm10 = vcmp.ne.f32.partialorder %v8023_v63, -1.0 }
 0x36f   :  { %2479 = vrot.lane.b32.xlu1 %v2282_v16, %s5411_s21  ;;  %2481 = vrot.lane.b32.xlu2 %v2283_v23, %s5411_s21  ;;  %v2285_v16 = vsel %vm2157_vm7, 1, %v11487_v11 }
 0x370   :  { %2477 = vrot.lane.b32.xlu0 %v2281_v55, %s5411_s21  ;;  %v8007_v55 = vld [vmem:[%s10932_s1 + $0x238] sm:$0xff] }
 0x371   :  { %v7986_v57 = vpop.permute.xlu1 %2395  ;;  %v7988_v18 = vpop.permute.xlu2 %2415  ;;  %11568 = vst [vmem:[#allocation310_spill] sm:$0xff] %v8007_v55  ;;  %vm2156_vm9 = vcmp.ne.f32.partialorder %v8007_v55, -1.0  ;;  %v8029_v55 = vld [vmem:[%s10932_s1 + $0x260] sm:$0xff] }
 0x372   :  { %11563 = vst [vmem:[#allocation305_spill] sm:$0xff] %v7986_v57  ;;  %v8002_v23 = vpop.permute.xlu0 %2393  ;;  %v2284_v57 = vsel %vm2156_vm9, 1, %v11487_v11  ;;  %vm2161_vm11 = vcmp.ne.f32.partialorder %v8029_v55, -1.0 }
 0x373   :  { %11564 = vst [vmem:[#allocation306_spill] sm:$0xff] %v7988_v18  ;;  %v2286_v18 = vsel %vm2158_vm8, 1, %v11487_v11 }
 0x374   :  { %11567 = vst [vmem:[#allocation309_spill] sm:$0xff] %v8002_v23 }
 0x375   :  { %11572 = vst [vmem:[#allocation314_spill] sm:$0xff] %v8029_v55  ;;  %v8053_v55 = vld [vmem:[%s10932_s1 + $0x270] sm:$0xff] }
 0x376   :  { %11577 = vst [vmem:[#allocation319_spill] sm:$0xff] %v8053_v55  ;;  %vm2163_vm13 = vcmp.ne.f32.partialorder %v8053_v55, -1.0 }
 0x377   :  { %2485 = vrot.lane.b32.xlu1 %v2285_v16, %s5411_s21  ;;  %2487 = vrot.lane.b32.xlu2 %v2286_v18, %s5411_s21  ;;  %v2288_v16 = vsel %vm2160_vm10, 1, %v11487_v11 }
 0x378   :  { %2483 = vrot.lane.b32.xlu0 %v2284_v57, %s5411_s21  ;;  %v8037_v57 = vld [vmem:[%s10932_s1 + $0x250] sm:$0xff] }
 0x379   :  { %v8016_v23 = vpop.permute.xlu1 %2401  ;;  %v8018_v1 = vpop.permute.xlu2 %2421  ;;  %11574 = vst [vmem:[#allocation316_spill] sm:$0xff] %v8037_v57  ;;  %vm2159_vm12 = vcmp.ne.f32.partialorder %v8037_v57, -1.0  ;;  %v8059_v57 = vld [vmem:[%s10932_s1 + $0x278] sm:$0xff] }
 0x37a   :  { %11569 = vst [vmem:[#allocation311_spill] sm:$0xff] %v8016_v23  ;;  %v8032_v18 = vpop.permute.xlu0 %2399  ;;  %v2287_v23 = vsel %vm2159_vm12, 1, %v11487_v11  ;;  %vm2164_vm14 = vcmp.ne.f32.partialorder %v8059_v57, -1.0 }
 0x37b   :  { %11570 = vst [vmem:[#allocation312_spill] sm:$0xff] %v8018_v1  ;;  %v2289_v1 = vsel %vm2161_vm11, 1, %v11487_v11 }
 0x37c   :  { %11573 = vst [vmem:[#allocation315_spill] sm:$0xff] %v8032_v18 }
 0x37d   :  { %11578 = vst [vmem:[#allocation320_spill] sm:$0xff] %v8059_v57  ;;  %v8083_v57 = vld [vmem:[%s10932_s1 + $0x288] sm:$0xff] }
 0x37e   :  { %11583 = vst [vmem:[#allocation325_spill] sm:$0xff] %v8083_v57  ;;  %vm2166_vm0 = vcmp.ne.f32.partialorder %v8083_v57, -1.0 }
 0x37f   :  { %2491 = vrot.lane.b32.xlu1 %v2288_v16, %s5411_s21  ;;  %2493 = vrot.lane.b32.xlu2 %v2289_v1, %s5411_s21  ;;  %v2291_v16 = vsel %vm2163_vm13, 1, %v11487_v11 }
 0x380   :  { %2489 = vrot.lane.b32.xlu0 %v2287_v23, %s5411_s21  ;;  %v8067_v23 = vld [vmem:[%s10932_s1 + $0x268] sm:$0xff] }
 0x381   :  { %v8046_v18 = vpop.permute.xlu1 %2407  ;;  %v8048_v63 = vpop.permute.xlu2 %2427  ;;  %11580 = vst [vmem:[#allocation322_spill] sm:$0xff] %v8067_v23  ;;  %vm2162_vm15 = vcmp.ne.f32.partialorder %v8067_v23, -1.0  ;;  %v8089_v23 = vld [vmem:[%s10932_s1 + $0x290] sm:$0xff] }
 0x382   :  { %11575 = vst [vmem:[#allocation317_spill] sm:$0xff] %v8046_v18  ;;  %v8062_v1 = vpop.permute.xlu0 %2405  ;;  %v2290_v18 = vsel %vm2162_vm15, 1, %v11487_v11  ;;  %vm2167_vm1 = vcmp.ne.f32.partialorder %v8089_v23, -1.0 }
 0x383   :  { %11576 = vst [vmem:[#allocation318_spill] sm:$0xff] %v8048_v63  ;;  %v2292_v63 = vsel %vm2164_vm14, 1, %v11487_v11 }
 0x384   :  { %11579 = vst [vmem:[#allocation321_spill] sm:$0xff] %v8062_v1 }
 0x385   :  { %11584 = vst [vmem:[#allocation326_spill] sm:$0xff] %v8089_v23  ;;  %v8113_v23 = vld [vmem:[%s10932_s1 + $0x2a0] sm:$0xff] }
 0x386   :  { %11589 = vst [vmem:[#allocation331_spill] sm:$0xff] %v8113_v23  ;;  %vm2169_vm3 = vcmp.ne.f32.partialorder %v8113_v23, -1.0 }
 0x387   :  { %2497 = vrot.lane.b32.xlu1 %v2291_v16, %s5411_s21  ;;  %2499 = vrot.lane.b32.xlu2 %v2292_v63, %s5411_s21  ;;  %v2294_v16 = vsel %vm2166_vm0, 1, %v11487_v11 }
 0x388   :  { %2495 = vrot.lane.b32.xlu0 %v2290_v18, %s5411_s21  ;;  %v8097_v18 = vld [vmem:[%s10932_s1 + $0x280] sm:$0xff] }
 0x389   :  { %v8076_v1 = vpop.permute.xlu1 %2413  ;;  %v8078_v55 = vpop.permute.xlu2 %2433  ;;  %11586 = vst [vmem:[#allocation328_spill] sm:$0xff] %v8097_v18  ;;  %vm2165_vm2 = vcmp.ne.f32.partialorder %v8097_v18, -1.0  ;;  %v8119_v18 = vld [vmem:[%s10932_s1 + $0x2a8] sm:$0xff] }
 0x38a   :  { %11581 = vst [vmem:[#allocation323_spill] sm:$0xff] %v8076_v1  ;;  %v8092_v63 = vpop.permute.xlu0 %2411  ;;  %v2293_v1 = vsel %vm2165_vm2, 1, %v11487_v11  ;;  %vm2170_vm4 = vcmp.ne.f32.partialorder %v8119_v18, -1.0 }
 0x38b   :  { %11582 = vst [vmem:[#allocation324_spill] sm:$0xff] %v8078_v55  ;;  %v2295_v55 = vsel %vm2167_vm1, 1, %v11487_v11 }
 0x38c   :  { %11585 = vst [vmem:[#allocation327_spill] sm:$0xff] %v8092_v63 }
 0x38d   :  { %11590 = vst [vmem:[#allocation332_spill] sm:$0xff] %v8119_v18  ;;  %v8143_v18 = vld [vmem:[%s10932_s1 + $0x2b8] sm:$0xff] }
 0x38e   :  { %11595 = vst [vmem:[#allocation337_spill] sm:$0xff] %v8143_v18  ;;  %vm2172_vm6 = vcmp.ne.f32.partialorder %v8143_v18, -1.0 }
 0x38f   :  { %2503 = vrot.lane.b32.xlu1 %v2294_v16, %s5411_s21  ;;  %2505 = vrot.lane.b32.xlu2 %v2295_v55, %s5411_s21  ;;  %v2297_v16 = vsel %vm2169_vm3, 1, %v11487_v11 }
 0x390   :  { %2501 = vrot.lane.b32.xlu0 %v2293_v1, %s5411_s21  ;;  %v8127_v1 = vld [vmem:[%s10932_s1 + $0x298] sm:$0xff] }
 0x391   :  { %v8106_v63 = vpop.permute.xlu1 %2419  ;;  %v8108_v57 = vpop.permute.xlu2 %2439  ;;  %11592 = vst [vmem:[#allocation334_spill] sm:$0xff] %v8127_v1  ;;  %vm2168_vm5 = vcmp.ne.f32.partialorder %v8127_v1, -1.0  ;;  %v8149_v1 = vld [vmem:[%s10932_s1 + $0x2c0] sm:$0xff] }
 0x392   :  { %11587 = vst [vmem:[#allocation329_spill] sm:$0xff] %v8106_v63  ;;  %v8122_v55 = vpop.permute.xlu0 %2417  ;;  %v2296_v63 = vsel %vm2168_vm5, 1, %v11487_v11  ;;  %vm2173_vm7 = vcmp.ne.f32.partialorder %v8149_v1, -1.0 }
 0x393   :  { %11588 = vst [vmem:[#allocation330_spill] sm:$0xff] %v8108_v57  ;;  %v2298_v57 = vsel %vm2170_vm4, 1, %v11487_v11 }
 0x394   :  { %11591 = vst [vmem:[#allocation333_spill] sm:$0xff] %v8122_v55 }
 0x395   :  { %11596 = vst [vmem:[#allocation338_spill] sm:$0xff] %v8149_v1  ;;  %v8173_v1 = vld [vmem:[%s10932_s1 + $0x2d0] sm:$0xff] }
 0x396   :  { %11601 = vst [vmem:[#allocation343_spill] sm:$0xff] %v8173_v1  ;;  %vm2175_vm9 = vcmp.ne.f32.partialorder %v8173_v1, -1.0 }
 0x397   :  { %2509 = vrot.lane.b32.xlu1 %v2297_v16, %s5411_s21  ;;  %2511 = vrot.lane.b32.xlu2 %v2298_v57, %s5411_s21  ;;  %v2300_v16 = vsel %vm2172_vm6, 1, %v11487_v11 }
 0x398   :  { %2507 = vrot.lane.b32.xlu0 %v2296_v63, %s5411_s21  ;;  %v8157_v63 = vld [vmem:[%s10932_s1 + $0x2b0] sm:$0xff] }
 0x399   :  { %v8136_v55 = vpop.permute.xlu1 %2425  ;;  %v8138_v23 = vpop.permute.xlu2 %2445  ;;  %11598 = vst [vmem:[#allocation340_spill] sm:$0xff] %v8157_v63  ;;  %vm2171_vm8 = vcmp.ne.f32.partialorder %v8157_v63, -1.0  ;;  %v8179_v63 = vld [vmem:[%s10932_s1 + $0x2d8] sm:$0xff] }
 0x39a   :  { %11593 = vst [vmem:[#allocation335_spill] sm:$0xff] %v8136_v55  ;;  %v8152_v57 = vpop.permute.xlu0 %2423  ;;  %v2299_v55 = vsel %vm2171_vm8, 1, %v11487_v11  ;;  %vm2176_vm10 = vcmp.ne.f32.partialorder %v8179_v63, -1.0 }
 0x39b   :  { %11594 = vst [vmem:[#allocation336_spill] sm:$0xff] %v8138_v23  ;;  %v2301_v23 = vsel %vm2173_vm7, 1, %v11487_v11 }
 0x39c   :  { %11597 = vst [vmem:[#allocation339_spill] sm:$0xff] %v8152_v57 }
 0x39d   :  { %11602 = vst [vmem:[#allocation344_spill] sm:$0xff] %v8179_v63  ;;  %v8203_v63 = vld [vmem:[%s10932_s1 + $0x2e8] sm:$0xff] }
 0x39e   :  { %11607 = vst [vmem:[#allocation349_spill] sm:$0xff] %v8203_v63  ;;  %vm2178_vm12 = vcmp.ne.f32.partialorder %v8203_v63, -1.0 }
 0x39f   :  { %2515 = vrot.lane.b32.xlu1 %v2300_v16, %s5411_s21  ;;  %2517 = vrot.lane.b32.xlu2 %v2301_v23, %s5411_s21  ;;  %v2303_v16 = vsel %vm2175_vm9, 1, %v11487_v11 }
 0x3a0   :  { %2513 = vrot.lane.b32.xlu0 %v2299_v55, %s5411_s21  ;;  %v8187_v55 = vld [vmem:[%s10932_s1 + $0x2c8] sm:$0xff] }
 0x3a1   :  { %v8166_v57 = vpop.permute.xlu1 %2431  ;;  %v8168_v18 = vpop.permute.xlu2 %2451  ;;  %11604 = vst [vmem:[#allocation346_spill] sm:$0xff] %v8187_v55  ;;  %vm2174_vm11 = vcmp.ne.f32.partialorder %v8187_v55, -1.0  ;;  %v8209_v55 = vld [vmem:[%s10932_s1 + $0x2f0] sm:$0xff] }
 0x3a2   :  { %11599 = vst [vmem:[#allocation341_spill] sm:$0xff] %v8166_v57  ;;  %v8182_v23 = vpop.permute.xlu0 %2429  ;;  %v2302_v57 = vsel %vm2174_vm11, 1, %v11487_v11  ;;  %vm2179_vm13 = vcmp.ne.f32.partialorder %v8209_v55, -1.0 }
 0x3a3   :  { %11600 = vst [vmem:[#allocation342_spill] sm:$0xff] %v8168_v18  ;;  %v2304_v18 = vsel %vm2176_vm10, 1, %v11487_v11 }
 0x3a4   :  { %11603 = vst [vmem:[#allocation345_spill] sm:$0xff] %v8182_v23 }
 0x3a5   :  { %11608 = vst [vmem:[#allocation350_spill] sm:$0xff] %v8209_v55  ;;  %v8233_v55 = vld [vmem:[%s10932_s1 + $0x300] sm:$0xff] }
 0x3a6   :  { %11613 = vst [vmem:[#allocation355_spill] sm:$0xff] %v8233_v55  ;;  %vm2181_vm15 = vcmp.ne.f32.partialorder %v8233_v55, -1.0 }
 0x3a7   :  { %2521 = vrot.lane.b32.xlu1 %v2303_v16, %s5411_s21  ;;  %2523 = vrot.lane.b32.xlu2 %v2304_v18, %s5411_s21  ;;  %v2306_v16 = vsel %vm2178_vm12, 1, %v11487_v11 }
 0x3a8   :  { %2519 = vrot.lane.b32.xlu0 %v2302_v57, %s5411_s21  ;;  %v8217_v57 = vld [vmem:[%s10932_s1 + $0x2e0] sm:$0xff] }
 0x3a9   :  { %v8196_v23 = vpop.permute.xlu1 %2437  ;;  %v8198_v1 = vpop.permute.xlu2 %2457  ;;  %11610 = vst [vmem:[#allocation352_spill] sm:$0xff] %v8217_v57  ;;  %vm2177_vm14 = vcmp.ne.f32.partialorder %v8217_v57, -1.0  ;;  %v8239_v57 = vld [vmem:[%s10932_s1 + $0x308] sm:$0xff] }
 0x3aa   :  { %11605 = vst [vmem:[#allocation347_spill] sm:$0xff] %v8196_v23  ;;  %v8212_v18 = vpop.permute.xlu0 %2435  ;;  %v2305_v23 = vsel %vm2177_vm14, 1, %v11487_v11  ;;  %vm2182_vm0 = vcmp.ne.f32.partialorder %v8239_v57, -1.0 }
 0x3ab   :  { %11606 = vst [vmem:[#allocation348_spill] sm:$0xff] %v8198_v1  ;;  %v2307_v1 = vsel %vm2179_vm13, 1, %v11487_v11 }
 0x3ac   :  { %11609 = vst [vmem:[#allocation351_spill] sm:$0xff] %v8212_v18 }
 0x3ad   :  { %11614 = vst [vmem:[#allocation356_spill] sm:$0xff] %v8239_v57  ;;  %v8263_v57 = vld [vmem:[%s10932_s1 + $0x318] sm:$0xff] }
 0x3ae   :  { %11619 = vst [vmem:[#allocation361_spill] sm:$0xff] %v8263_v57  ;;  %vm2184_vm2 = vcmp.ne.f32.partialorder %v8263_v57, -1.0 }
 0x3af   :  { %2527 = vrot.lane.b32.xlu1 %v2306_v16, %s5411_s21  ;;  %2529 = vrot.lane.b32.xlu2 %v2307_v1, %s5411_s21  ;;  %v2309_v16 = vsel %vm2181_vm15, 1, %v11487_v11 }
 0x3b0   :  { %2525 = vrot.lane.b32.xlu0 %v2305_v23, %s5411_s21  ;;  %v8247_v23 = vld [vmem:[%s10932_s1 + $0x2f8] sm:$0xff] }
 0x3b1   :  { %v8226_v18 = vpop.permute.xlu1 %2443  ;;  %v8228_v63 = vpop.permute.xlu2 %2463  ;;  %11616 = vst [vmem:[#allocation358_spill] sm:$0xff] %v8247_v23  ;;  %vm2180_vm1 = vcmp.ne.f32.partialorder %v8247_v23, -1.0  ;;  %v8269_v23 = vld [vmem:[%s10932_s1 + $0x320] sm:$0xff] }
 0x3b2   :  { %11611 = vst [vmem:[#allocation353_spill] sm:$0xff] %v8226_v18  ;;  %v8242_v1 = vpop.permute.xlu0 %2441  ;;  %v2308_v18 = vsel %vm2180_vm1, 1, %v11487_v11  ;;  %vm2185_vm3 = vcmp.ne.f32.partialorder %v8269_v23, -1.0 }
 0x3b3   :  { %11612 = vst [vmem:[#allocation354_spill] sm:$0xff] %v8228_v63  ;;  %v2310_v63 = vsel %vm2182_vm0, 1, %v11487_v11 }
 0x3b4   :  { %11615 = vst [vmem:[#allocation357_spill] sm:$0xff] %v8242_v1 }
 0x3b5   :  { %11620 = vst [vmem:[#allocation362_spill] sm:$0xff] %v8269_v23  ;;  %v8293_v23 = vld [vmem:[%s10932_s1 + $0x330] sm:$0xff] }
 0x3b6   :  { %11625 = vst [vmem:[#allocation367_spill] sm:$0xff] %v8293_v23  ;;  %vm2187_vm5 = vcmp.ne.f32.partialorder %v8293_v23, -1.0 }
 0x3b7   :  { %2533 = vrot.lane.b32.xlu1 %v2309_v16, %s5411_s21  ;;  %2535 = vrot.lane.b32.xlu2 %v2310_v63, %s5411_s21  ;;  %v2312_v16 = vsel %vm2184_vm2, 1, %v11487_v11 }
 0x3b8   :  { %2531 = vrot.lane.b32.xlu0 %v2308_v18, %s5411_s21  ;;  %v8277_v18 = vld [vmem:[%s10932_s1 + $0x310] sm:$0xff] }
 0x3b9   :  { %v8256_v1 = vpop.permute.xlu1 %2449  ;;  %v8258_v55 = vpop.permute.xlu2 %2469  ;;  %11622 = vst [vmem:[#allocation364_spill] sm:$0xff] %v8277_v18  ;;  %vm2183_vm4 = vcmp.ne.f32.partialorder %v8277_v18, -1.0  ;;  %v8299_v18 = vld [vmem:[%s10932_s1 + $0x338] sm:$0xff] }
 0x3ba   :  { %11617 = vst [vmem:[#allocation359_spill] sm:$0xff] %v8256_v1  ;;  %v8272_v63 = vpop.permute.xlu0 %2447  ;;  %v2311_v1 = vsel %vm2183_vm4, 1, %v11487_v11  ;;  %vm2188_vm6 = vcmp.ne.f32.partialorder %v8299_v18, -1.0 }
 0x3bb   :  { %11618 = vst [vmem:[#allocation360_spill] sm:$0xff] %v8258_v55  ;;  %v2313_v55 = vsel %vm2185_vm3, 1, %v11487_v11 }
 0x3bc   :  { %11621 = vst [vmem:[#allocation363_spill] sm:$0xff] %v8272_v63 }
 0x3bd   :  { %11626 = vst [vmem:[#allocation368_spill] sm:$0xff] %v8299_v18  ;;  %v8323_v18 = vld [vmem:[%s10932_s1 + $0x348] sm:$0xff] }
 0x3be   :  { %11631 = vst [vmem:[#allocation373_spill] sm:$0xff] %v8323_v18  ;;  %vm2190_vm8 = vcmp.ne.f32.partialorder %v8323_v18, -1.0 }
 0x3bf   :  { %2539 = vrot.lane.b32.xlu1 %v2312_v16, %s5411_s21  ;;  %2541 = vrot.lane.b32.xlu2 %v2313_v55, %s5411_s21  ;;  %v2315_v16 = vsel %vm2187_vm5, 1, %v11487_v11 }
 0x3c0   :  { %2537 = vrot.lane.b32.xlu0 %v2311_v1, %s5411_s21  ;;  %v8307_v1 = vld [vmem:[%s10932_s1 + $0x328] sm:$0xff] }
 0x3c1   :  { %v8286_v63 = vpop.permute.xlu1 %2455  ;;  %v8288_v57 = vpop.permute.xlu2 %2475  ;;  %11628 = vst [vmem:[#allocation370_spill] sm:$0xff] %v8307_v1  ;;  %vm2186_vm7 = vcmp.ne.f32.partialorder %v8307_v1, -1.0  ;;  %v8329_v1 = vld [vmem:[%s10932_s1 + $0x350] sm:$0xff] }
 0x3c2   :  { %11623 = vst [vmem:[#allocation365_spill] sm:$0xff] %v8286_v63  ;;  %v8302_v55 = vpop.permute.xlu0 %2453  ;;  %v2314_v63 = vsel %vm2186_vm7, 1, %v11487_v11  ;;  %vm2191_vm9 = vcmp.ne.f32.partialorder %v8329_v1, -1.0 }
 0x3c3   :  { %11624 = vst [vmem:[#allocation366_spill] sm:$0xff] %v8288_v57  ;;  %v2316_v57 = vsel %vm2188_vm6, 1, %v11487_v11 }
 0x3c4   :  { %11627 = vst [vmem:[#allocation369_spill] sm:$0xff] %v8302_v55 }
 0x3c5   :  { %11632 = vst [vmem:[#allocation374_spill] sm:$0xff] %v8329_v1  ;;  %v8353_v1 = vld [vmem:[%s10932_s1 + $0x360] sm:$0xff] }
 0x3c6   :  { %11637 = vst [vmem:[#allocation379_spill] sm:$0xff] %v8353_v1  ;;  %vm2193_vm11 = vcmp.ne.f32.partialorder %v8353_v1, -1.0 }
 0x3c7   :  { %2545 = vrot.lane.b32.xlu1 %v2315_v16, %s5411_s21  ;;  %2547 = vrot.lane.b32.xlu2 %v2316_v57, %s5411_s21  ;;  %v2318_v16 = vsel %vm2190_vm8, 1, %v11487_v11 }
 0x3c8   :  { %2543 = vrot.lane.b32.xlu0 %v2314_v63, %s5411_s21  ;;  %v8337_v63 = vld [vmem:[%s10932_s1 + $0x340] sm:$0xff] }
 0x3c9   :  { %v8316_v55 = vpop.permute.xlu1 %2461  ;;  %v8318_v23 = vpop.permute.xlu2 %2481  ;;  %11634 = vst [vmem:[#allocation376_spill] sm:$0xff] %v8337_v63  ;;  %vm2189_vm10 = vcmp.ne.f32.partialorder %v8337_v63, -1.0  ;;  %v8359_v63 = vld [vmem:[%s10932_s1 + $0x368] sm:$0xff] }
 0x3ca   :  { %11629 = vst [vmem:[#allocation371_spill] sm:$0xff] %v8316_v55  ;;  %v8332_v57 = vpop.permute.xlu0 %2459  ;;  %v2317_v55 = vsel %vm2189_vm10, 1, %v11487_v11  ;;  %vm2194_vm12 = vcmp.ne.f32.partialorder %v8359_v63, -1.0 }
 0x3cb   :  { %11630 = vst [vmem:[#allocation372_spill] sm:$0xff] %v8318_v23  ;;  %v2319_v23 = vsel %vm2191_vm9, 1, %v11487_v11 }
 0x3cc   :  { %11633 = vst [vmem:[#allocation375_spill] sm:$0xff] %v8332_v57 }
 0x3cd   :  { %11638 = vst [vmem:[#allocation380_spill] sm:$0xff] %v8359_v63  ;;  %v8383_v63 = vld [vmem:[%s10932_s1 + $0x378] sm:$0xff] }
 0x3ce   :  { %11643 = vst [vmem:[#allocation385_spill] sm:$0xff] %v8383_v63  ;;  %vm2196_vm14 = vcmp.ne.f32.partialorder %v8383_v63, -1.0 }
 0x3cf   :  { %2551 = vrot.lane.b32.xlu1 %v2318_v16, %s5411_s21  ;;  %2553 = vrot.lane.b32.xlu2 %v2319_v23, %s5411_s21  ;;  %v2321_v16 = vsel %vm2193_vm11, 1, %v11487_v11 }
 0x3d0   :  { %2549 = vrot.lane.b32.xlu0 %v2317_v55, %s5411_s21  ;;  %v8367_v55 = vld [vmem:[%s10932_s1 + $0x358] sm:$0xff] }
 0x3d1   :  { %v8346_v57 = vpop.permute.xlu1 %2467  ;;  %v8348_v18 = vpop.permute.xlu2 %2487  ;;  %11640 = vst [vmem:[#allocation382_spill] sm:$0xff] %v8367_v55  ;;  %vm2192_vm13 = vcmp.ne.f32.partialorder %v8367_v55, -1.0  ;;  %v8389_v55 = vld [vmem:[%s10932_s1 + $0x380] sm:$0xff] }
 0x3d2   :  { %11635 = vst [vmem:[#allocation377_spill] sm:$0xff] %v8346_v57  ;;  %v8362_v23 = vpop.permute.xlu0 %2465  ;;  %v2320_v57 = vsel %vm2192_vm13, 1, %v11487_v11  ;;  %vm2197_vm15 = vcmp.ne.f32.partialorder %v8389_v55, -1.0 }
 0x3d3   :  { %11636 = vst [vmem:[#allocation378_spill] sm:$0xff] %v8348_v18  ;;  %v2322_v18 = vsel %vm2194_vm12, 1, %v11487_v11 }
 0x3d4   :  { %11639 = vst [vmem:[#allocation381_spill] sm:$0xff] %v8362_v23 }
 0x3d5   :  { %11644 = vst [vmem:[#allocation386_spill] sm:$0xff] %v8389_v55  ;;  %v8413_v55 = vld [vmem:[%s10932_s1 + $0x390] sm:$0xff] }
 0x3d6   :  { %11649 = vst [vmem:[#allocation391_spill] sm:$0xff] %v8413_v55  ;;  %vm2199_vm1 = vcmp.ne.f32.partialorder %v8413_v55, -1.0 }
 0x3d7   :  { %2557 = vrot.lane.b32.xlu1 %v2321_v16, %s5411_s21  ;;  %2559 = vrot.lane.b32.xlu2 %v2322_v18, %s5411_s21  ;;  %v2324_v16 = vsel %vm2196_vm14, 1, %v11487_v11 }
 0x3d8   :  { %2555 = vrot.lane.b32.xlu0 %v2320_v57, %s5411_s21  ;;  %v8397_v57 = vld [vmem:[%s10932_s1 + $0x370] sm:$0xff] }
 0x3d9   :  { %v8376_v23 = vpop.permute.xlu1 %2473  ;;  %v8378_v1 = vpop.permute.xlu2 %2493  ;;  %11646 = vst [vmem:[#allocation388_spill] sm:$0xff] %v8397_v57  ;;  %vm2195_vm0 = vcmp.ne.f32.partialorder %v8397_v57, -1.0  ;;  %v8419_v57 = vld [vmem:[%s10932_s1 + $0x398] sm:$0xff] }
 0x3da   :  { %11641 = vst [vmem:[#allocation383_spill] sm:$0xff] %v8376_v23  ;;  %v8392_v18 = vpop.permute.xlu0 %2471  ;;  %v2323_v23 = vsel %vm2195_vm0, 1, %v11487_v11  ;;  %vm2200_vm2 = vcmp.ne.f32.partialorder %v8419_v57, -1.0 }
 0x3db   :  { %11642 = vst [vmem:[#allocation384_spill] sm:$0xff] %v8378_v1  ;;  %v2325_v1 = vsel %vm2197_vm15, 1, %v11487_v11 }
 0x3dc   :  { %11645 = vst [vmem:[#allocation387_spill] sm:$0xff] %v8392_v18 }
 0x3dd   :  { %11650 = vst [vmem:[#allocation392_spill] sm:$0xff] %v8419_v57  ;;  %v8443_v57 = vld [vmem:[%s10932_s1 + $0x3a8] sm:$0xff] }
 0x3de   :  { %11655 = vst [vmem:[#allocation397_spill] sm:$0xff] %v8443_v57  ;;  %vm2202_vm4 = vcmp.ne.f32.partialorder %v8443_v57, -1.0 }
 0x3df   :  { %2563 = vrot.lane.b32.xlu1 %v2324_v16, %s5411_s21  ;;  %2565 = vrot.lane.b32.xlu2 %v2325_v1, %s5411_s21  ;;  %v2327_v16 = vsel %vm2199_vm1, 1, %v11487_v11 }
 0x3e0   :  { %2561 = vrot.lane.b32.xlu0 %v2323_v23, %s5411_s21  ;;  %v8427_v23 = vld [vmem:[%s10932_s1 + $0x388] sm:$0xff] }
 0x3e1   :  { %v8406_v18 = vpop.permute.xlu1 %2479  ;;  %v8408_v63 = vpop.permute.xlu2 %2499  ;;  %11652 = vst [vmem:[#allocation394_spill] sm:$0xff] %v8427_v23  ;;  %vm2198_vm3 = vcmp.ne.f32.partialorder %v8427_v23, -1.0  ;;  %v8449_v23 = vld [vmem:[%s10932_s1 + $0x3b0] sm:$0xff] }
 0x3e2   :  { %11647 = vst [vmem:[#allocation389_spill] sm:$0xff] %v8406_v18  ;;  %v8422_v1 = vpop.permute.xlu0 %2477  ;;  %v2326_v18 = vsel %vm2198_vm3, 1, %v11487_v11  ;;  %vm2203_vm5 = vcmp.ne.f32.partialorder %v8449_v23, -1.0 }
 0x3e3   :  { %11648 = vst [vmem:[#allocation390_spill] sm:$0xff] %v8408_v63  ;;  %v2328_v63 = vsel %vm2200_vm2, 1, %v11487_v11 }
 0x3e4   :  { %11651 = vst [vmem:[#allocation393_spill] sm:$0xff] %v8422_v1 }
 0x3e5   :  { %11656 = vst [vmem:[#allocation398_spill] sm:$0xff] %v8449_v23  ;;  %v8473_v23 = vld [vmem:[%s10932_s1 + $0x3c0] sm:$0xff] }
 0x3e6   :  { %11661 = vst [vmem:[#allocation403_spill] sm:$0xff] %v8473_v23  ;;  %vm2205_vm7 = vcmp.ne.f32.partialorder %v8473_v23, -1.0 }
 0x3e7   :  { %2569 = vrot.lane.b32.xlu1 %v2327_v16, %s5411_s21  ;;  %2571 = vrot.lane.b32.xlu2 %v2328_v63, %s5411_s21  ;;  %v2330_v16 = vsel %vm2202_vm4, 1, %v11487_v11 }
 0x3e8   :  { %2567 = vrot.lane.b32.xlu0 %v2326_v18, %s5411_s21  ;;  %v8457_v18 = vld [vmem:[%s10932_s1 + $0x3a0] sm:$0xff] }
 0x3e9   :  { %v8436_v1 = vpop.permute.xlu1 %2485  ;;  %v8438_v55 = vpop.permute.xlu2 %2505  ;;  %11658 = vst [vmem:[#allocation400_spill] sm:$0xff] %v8457_v18  ;;  %vm2201_vm6 = vcmp.ne.f32.partialorder %v8457_v18, -1.0  ;;  %v8479_v18 = vld [vmem:[%s10932_s1 + $0x3c8] sm:$0xff] }
 0x3ea   :  { %11653 = vst [vmem:[#allocation395_spill] sm:$0xff] %v8436_v1  ;;  %v8452_v63 = vpop.permute.xlu0 %2483  ;;  %v2329_v1 = vsel %vm2201_vm6, 1, %v11487_v11  ;;  %vm2206_vm8 = vcmp.ne.f32.partialorder %v8479_v18, -1.0 }
 0x3eb   :  { %11654 = vst [vmem:[#allocation396_spill] sm:$0xff] %v8438_v55  ;;  %v2331_v55 = vsel %vm2203_vm5, 1, %v11487_v11 }
 0x3ec   :  { %11657 = vst [vmem:[#allocation399_spill] sm:$0xff] %v8452_v63 }
 0x3ed   :  { %11662 = vst [vmem:[#allocation404_spill] sm:$0xff] %v8479_v18  ;;  %v8503_v18 = vld [vmem:[%s10932_s1 + $0x3d8] sm:$0xff] }
 0x3ee   :  { %11667 = vst [vmem:[#allocation409_spill] sm:$0xff] %v8503_v18  ;;  %vm2208_vm10 = vcmp.ne.f32.partialorder %v8503_v18, -1.0 }
 0x3ef   :  { %2575 = vrot.lane.b32.xlu1 %v2330_v16, %s5411_s21  ;;  %2577 = vrot.lane.b32.xlu2 %v2331_v55, %s5411_s21  ;;  %v2333_v16 = vsel %vm2205_vm7, 1, %v11487_v11 }
 0x3f0   :  { %2573 = vrot.lane.b32.xlu0 %v2329_v1, %s5411_s21  ;;  %v8487_v1 = vld [vmem:[%s10932_s1 + $0x3b8] sm:$0xff] }
 0x3f1   :  { %v8466_v63 = vpop.permute.xlu1 %2491  ;;  %v8468_v57 = vpop.permute.xlu2 %2511  ;;  %11664 = vst [vmem:[#allocation406_spill] sm:$0xff] %v8487_v1  ;;  %vm2204_vm9 = vcmp.ne.f32.partialorder %v8487_v1, -1.0  ;;  %v8509_v1 = vld [vmem:[%s10932_s1 + $0x3e0] sm:$0xff] }
 0x3f2   :  { %11659 = vst [vmem:[#allocation401_spill] sm:$0xff] %v8466_v63  ;;  %v8482_v55 = vpop.permute.xlu0 %2489  ;;  %v2332_v63 = vsel %vm2204_vm9, 1, %v11487_v11  ;;  %vm2209_vm11 = vcmp.ne.f32.partialorder %v8509_v1, -1.0 }
 0x3f3   :  { %11660 = vst [vmem:[#allocation402_spill] sm:$0xff] %v8468_v57  ;;  %v2334_v57 = vsel %vm2206_vm8, 1, %v11487_v11 }
 0x3f4   :  { %11663 = vst [vmem:[#allocation405_spill] sm:$0xff] %v8482_v55 }
 0x3f5   :  { %11668 = vst [vmem:[#allocation410_spill] sm:$0xff] %v8509_v1  ;;  %v8533_v1 = vld [vmem:[%s10932_s1 + $0x3f0] sm:$0xff] }
 0x3f6   :  { %11673 = vst [vmem:[#allocation415_spill] sm:$0xff] %v8533_v1  ;;  %vm2211_vm13 = vcmp.ne.f32.partialorder %v8533_v1, -1.0 }
 0x3f7   :  { %2581 = vrot.lane.b32.xlu1 %v2333_v16, %s5411_s21  ;;  %2583 = vrot.lane.b32.xlu2 %v2334_v57, %s5411_s21  ;;  %v2336_v16 = vsel %vm2208_vm10, 1, %v11487_v11 }
 0x3f8   :  { %2579 = vrot.lane.b32.xlu0 %v2332_v63, %s5411_s21  ;;  %v8517_v63 = vld [vmem:[%s10932_s1 + $0x3d0] sm:$0xff] }
 0x3f9   :  { %v8496_v55 = vpop.permute.xlu1 %2497  ;;  %v8498_v23 = vpop.permute.xlu2 %2517  ;;  %11670 = vst [vmem:[#allocation412_spill] sm:$0xff] %v8517_v63  ;;  %vm2207_vm12 = vcmp.ne.f32.partialorder %v8517_v63, -1.0  ;;  %v8539_v63 = vld [vmem:[%s10932_s1 + $0x3f8] sm:$0xff] }
 0x3fa   :  { %11665 = vst [vmem:[#allocation407_spill] sm:$0xff] %v8496_v55  ;;  %v8512_v57 = vpop.permute.xlu0 %2495  ;;  %v2335_v55 = vsel %vm2207_vm12, 1, %v11487_v11  ;;  %vm2212_vm14 = vcmp.ne.f32.partialorder %v8539_v63, -1.0 }
 0x3fb   :  { %11666 = vst [vmem:[#allocation408_spill] sm:$0xff] %v8498_v23  ;;  %v2337_v23 = vsel %vm2209_vm11, 1, %v11487_v11 }
 0x3fc   :  { %11669 = vst [vmem:[#allocation411_spill] sm:$0xff] %v8512_v57 }
 0x3fd   :  { %11674 = vst [vmem:[#allocation416_spill] sm:$0xff] %v8539_v63 }
 0x3ff   :  { %2587 = vrot.lane.b32.xlu1 %v2336_v16, %s5411_s21  ;;  %2589 = vrot.lane.b32.xlu2 %v2337_v23, %s5411_s21  ;;  %v2339_v16 = vsel %vm2211_vm13, 1, %v11487_v11 }
 0x400   :  { %2585 = vrot.lane.b32.xlu0 %v2335_v55, %s5411_s21  ;;  %v8547_v55 = vld [vmem:[%s10932_s1 + $0x3e8] sm:$0xff] }
 0x401   :  { %v8526_v57 = vpop.permute.xlu1 %2503  ;;  %v8528_v18 = vpop.permute.xlu2 %2523  ;;  %11676 = vst [vmem:[#allocation418_spill] sm:$0xff] %v8547_v55  ;;  %vm2210_vm15 = vcmp.ne.f32.partialorder %v8547_v55, -1.0  ;;  %v8565_v55 = vld [vmem:[%s10932_s1 + $0x8] sm:$0xff] }
 0x402   :  { %11671 = vst [vmem:[#allocation413_spill] sm:$0xff] %v8526_v57  ;;  %v8542_v23 = vpop.permute.xlu0 %2501  ;;  %v2338_v57 = vsel %vm2210_vm15, 1, %v11487_v11 }
 0x403   :  { %11672 = vst [vmem:[#allocation414_spill] sm:$0xff] %v8528_v18  ;;  %v2340_v18 = vsel %vm2212_vm14, 1, %v11487_v11 }
 0x404   :  { %11675 = vst [vmem:[#allocation417_spill] sm:$0xff] %v8542_v23 }
 0x407   :  { %2593 = vrot.lane.b32.xlu1 %v2339_v16, %s5411_s21  ;;  %2595 = vrot.lane.b32.xlu2 %v2340_v18, %s5411_s21  ;;  %v8574_v18 = vld [vmem:[%s10932_s1] sm:$0xff] }
 0x408   :  { %2591 = vrot.lane.b32.xlu0 %v2338_v57, %s5411_s21 }
 0x409   :  { %v8556_v23 = vpop.permute.xlu1 %2509  ;;  %v8558_v1 = vpop.permute.xlu2 %2529 }
 0x40a   :  { %11677 = vst [vmem:[#allocation419_spill] sm:$0xff] %v8556_v23  ;;  %v8560_v63 = vpop.permute.xlu0 %2507 }
 0x40b   :  { %11678 = vst [vmem:[#allocation420_spill] sm:$0xff] %v8558_v1 }
 0x40c   :  { %11679 = vst [vmem:[#allocation421_spill] sm:$0xff] %v8560_v63  ;;  %v11770_v63 = vld [vmem:[#allocation356_spill] sm:$0xff] }
 0x40f   :  { %2983 = vrot.lane.b32.xlu1 %v8565_v55, %s5411_s21  ;;  %2985 = vrot.lane.b32.xlu2 %v7317_v10, %s5411_s21  ;;  %v8591_v10 = vld [vmem:[%s10932_s1 + $0x18] sm:$0xff] }
 0x410   :  { %2981 = vrot.lane.b32.xlu0 %v8574_v18, %s5411_s21 }
 0x411   :  { %v8578_v57 = vpop.permute.xlu1 %2515  ;;  %v8580_v16 = vpop.permute.xlu2 %2535 }
 0x412   :  { %11680 = vst [vmem:[#allocation422_spill] sm:$0xff] %v8578_v57  ;;  %v8582_v11 = vpop.permute.xlu0 %2513 }
 0x413   :  { %11681 = vst [vmem:[#allocation423_spill] sm:$0xff] %v8580_v16 }
 0x414   :  { %11682 = vst [vmem:[#allocation424_spill] sm:$0xff] %v8582_v11 }
 0x417   :  { %2989 = vrot.lane.b32.xlu1 %v7309_v40, %s5411_s21  ;;  %2991 = vrot.lane.b32.xlu2 %v7347_v60, %s5411_s21 }
 0x418   :  { %2987 = vrot.lane.b32.xlu0 %v8591_v10, %s5411_s21 }
 0x419   :  { %v8595_v1 = vpop.permute.xlu1 %2521  ;;  %v8597_v57 = vpop.permute.xlu2 %2541 }
 0x41a   :  { %11683 = vst [vmem:[#allocation425_spill] sm:$0xff] %v8595_v1  ;;  %v8599_v16 = vpop.permute.xlu0 %2519  ;;  %v11764_v1 = vld [vmem:[#allocation350_spill] sm:$0xff] }
 0x41b   :  { %11684 = vst [vmem:[#allocation426_spill] sm:$0xff] %v8597_v57 }
 0x41c   :  { %11685 = vst [vmem:[#allocation427_spill] sm:$0xff] %v8599_v16  ;;  %v11765_v16 = vld [vmem:[#allocation358_spill] sm:$0xff] }
 0x41f   :  { %2995 = vrot.lane.b32.xlu1 %v7339_v32, %s5411_s21  ;;  %2997 = vrot.lane.b32.xlu2 %v7377_v34, %s5411_s21 }
 0x420   :  { %2993 = vrot.lane.b32.xlu0 %v7333_v13, %s5411_s21 }
 0x421   :  { %v8607_v40 = vpop.permute.xlu1 %2527  ;;  %v8609_v60 = vpop.permute.xlu2 %2547 }
 0x422   :  { %11686 = vst [vmem:[#allocation428_spill] sm:$0xff] %v8607_v40  ;;  %v8611_v11 = vpop.permute.xlu0 %2525  ;;  %v11759_v40 = vld [vmem:[#allocation352_spill] sm:$0xff] }
 0x423   :  { %11687 = vst [vmem:[#allocation429_spill] sm:$0xff] %v8609_v60  ;;  %v11732_v60 = vld [vmem:[#allocation308_spill] sm:$0xff] }
 0x424   :  { %11688 = vst [vmem:[#allocation430_spill] sm:$0xff] %v8611_v11 }
 0x427   :  { %3001 = vrot.lane.b32.xlu1 %v7369_v58, %s5411_s21  ;;  %3003 = vrot.lane.b32.xlu2 %v7407_v43, %s5411_s21 }
 0x428   :  { %2999 = vrot.lane.b32.xlu0 %v7363_v6, %s5411_s21 }
 0x429   :  { %v8619_v32 = vpop.permute.xlu1 %2533  ;;  %v8621_v34 = vpop.permute.xlu2 %2553 }
 0x42a   :  { %11689 = vst [vmem:[#allocation431_spill] sm:$0xff] %v8619_v32  ;;  %v8623_v13 = vpop.permute.xlu0 %2531  ;;  %v11723_v32 = vld [vmem:[#allocation290_spill] sm:$0xff] }
 0x42b   :  { %11690 = vst [vmem:[#allocation432_spill] sm:$0xff] %v8621_v34  ;;  %v11744_v34 = vld [vmem:[#allocation334_spill] sm:$0xff] }
 0x42c   :  { %11691 = vst [vmem:[#allocation433_spill] sm:$0xff] %v8623_v13 }
 0x42f   :  { %3007 = vrot.lane.b32.xlu1 %v7399_v37, %s5411_s21  ;;  %3009 = vrot.lane.b32.xlu2 %v7437_v2, %s5411_s21 }
 0x430   :  { %3005 = vrot.lane.b32.xlu0 %v7393_v38, %s5411_s21 }
 0x431   :  { %v8631_v58 = vpop.permute.xlu1 %2539  ;;  %v8633_v43 = vpop.permute.xlu2 %2559 }
 0x432   :  { %11692 = vst [vmem:[#allocation434_spill] sm:$0xff] %v8631_v58  ;;  %v8635_v6 = vpop.permute.xlu0 %2537  ;;  %v11726_v58 = vld [vmem:[#allocation296_spill] sm:$0xff] }
 0x433   :  { %11693 = vst [vmem:[#allocation435_spill] sm:$0xff] %v8633_v43  ;;  %v11748_v43 = vld [vmem:[#allocation340_spill] sm:$0xff] }
 0x434   :  { %11694 = vst [vmem:[#allocation436_spill] sm:$0xff] %v8635_v6 }
 0x437   :  { %3013 = vrot.lane.b32.xlu1 %v7429_v56, %s5411_s21  ;;  %3015 = vrot.lane.b32.xlu2 %v7467_v30, %s5411_s21 }
 0x438   :  { %3011 = vrot.lane.b32.xlu0 %v7423_v8, %s5411_s21 }
 0x439   :  { %v8643_v37 = vpop.permute.xlu1 %2545  ;;  %v8645_v2 = vpop.permute.xlu2 %2565 }
 0x43a   :  { %11695 = vst [vmem:[#allocation437_spill] sm:$0xff] %v8643_v37  ;;  %v8647_v38 = vpop.permute.xlu0 %2543  ;;  %v11733_v37 = vld [vmem:[#allocation316_spill] sm:$0xff] }
 0x43b   :  { %11696 = vst [vmem:[#allocation438_spill] sm:$0xff] %v8645_v2 }
 0x43c   :  { %11697 = vst [vmem:[#allocation439_spill] sm:$0xff] %v8647_v38  ;;  %v11727_v38 = vld [vmem:[#allocation304_spill] sm:$0xff] }
 0x43f   :  { %3019 = vrot.lane.b32.xlu1 %v7459_v27, %s5411_s21  ;;  %3021 = vrot.lane.b32.xlu2 %v7497_v61, %s5411_s21 }
 0x440   :  { %3017 = vrot.lane.b32.xlu0 %v7453_v39, %s5411_s21 }
 0x441   :  { %v8655_v56 = vpop.permute.xlu1 %2551  ;;  %v8657_v30 = vpop.permute.xlu2 %2571 }
 0x442   :  { %11698 = vst [vmem:[#allocation440_spill] sm:$0xff] %v8655_v56  ;;  %v8659_v8 = vpop.permute.xlu0 %2549  ;;  %v11736_v56 = vld [vmem:[#allocation322_spill] sm:$0xff] }
 0x443   :  { %11699 = vst [vmem:[#allocation441_spill] sm:$0xff] %v8657_v30 }
 0x444   :  { %11700 = vst [vmem:[#allocation442_spill] sm:$0xff] %v8659_v8 }
 0x447   :  { %3025 = vrot.lane.b32.xlu1 %v7489_v25, %s5411_s21  ;;  %3027 = vrot.lane.b32.xlu2 %v7527_v9, %s5411_s21 }
 0x448   :  { %3023 = vrot.lane.b32.xlu0 %v7483_v33, %s5411_s21 }
 0x449   :  { %v8667_v27 = vpop.permute.xlu1 %2557  ;;  %v8669_v61 = vpop.permute.xlu2 %2577 }
 0x44a   :  { %11701 = vst [vmem:[#allocation443_spill] sm:$0xff] %v8667_v27  ;;  %v8671_v39 = vpop.permute.xlu0 %2555  ;;  %v11747_v27 = vld [vmem:[#allocation332_spill] sm:$0xff] }
 0x44b   :  { %11702 = vst [vmem:[#allocation444_spill] sm:$0xff] %v8669_v61  ;;  %v11730_v61 = vld [vmem:[#allocation310_spill] sm:$0xff] }
 0x44c   :  { %11703 = vst [vmem:[#allocation445_spill] sm:$0xff] %v8671_v39 }
 0x44f   :  { %3031 = vrot.lane.b32.xlu1 %v7519_v14, %s5411_s21  ;;  %3033 = vrot.lane.b32.xlu2 %v7557_v3, %s5411_s21 }
 0x450   :  { %3029 = vrot.lane.b32.xlu0 %v7513_v62, %s5411_s21 }
 0x451   :  { %v8679_v25 = vpop.permute.xlu1 %2563  ;;  %v8681_v9 = vpop.permute.xlu2 %2583 }
 0x452   :  { %11704 = vst [vmem:[#allocation446_spill] sm:$0xff] %v8679_v25  ;;  %v8683_v33 = vpop.permute.xlu0 %2561  ;;  %v11758_v25 = vld [vmem:[#allocation344_spill] sm:$0xff] }
 0x453   :  { %11705 = vst [vmem:[#allocation447_spill] sm:$0xff] %v8681_v9 }
 0x454   :  { %11706 = vst [vmem:[#allocation448_spill] sm:$0xff] %v8683_v33 }
 0x457   :  { %3037 = vrot.lane.b32.xlu1 %v7549_v0, %s5411_s21  ;;  %3039 = vrot.lane.b32.xlu2 %v7587_v7, %s5411_s21 }
 0x458   :  { %3035 = vrot.lane.b32.xlu0 %v7543_v26, %s5411_s21 }
 0x459   :  { %v8691_v14 = vpop.permute.xlu1 %2569  ;;  %v8693_v3 = vpop.permute.xlu2 %2589 }
 0x45a   :  { %11707 = vst [vmem:[#allocation449_spill] sm:$0xff] %v8691_v14  ;;  %v8695_v62 = vpop.permute.xlu0 %2567  ;;  %v11721_v14 = vld [vmem:[#allocation292_spill] sm:$0xff] }
 0x45b   :  { %11708 = vst [vmem:[#allocation450_spill] sm:$0xff] %v8693_v3 }
 0x45c   :  { %11709 = vst [vmem:[#allocation451_spill] sm:$0xff] %v8695_v62  ;;  %v11720_v62 = vld [vmem:[#allocation285_spill] sm:$0xff] }
 0x45f   :  { %3043 = vrot.lane.b32.xlu1 %v7579_v15, %s5411_s21  ;;  %3045 = vrot.lane.b32.xlu2 %v7617_v31, %s5411_s21 }
 0x460   :  { %3041 = vrot.lane.b32.xlu0 %v7573_v20, %s5411_s21 }
 0x461   :  { %v8703_v0 = vpop.permute.xlu1 %2575  ;;  %v8705_v7 = vpop.permute.xlu2 %2595 }
 0x462   :  { %11710 = vst [vmem:[#allocation452_spill] sm:$0xff] %v8703_v0  ;;  %v8707_v26 = vpop.permute.xlu0 %2573  ;;  %v11724_v0 = vld [vmem:[#allocation298_spill] sm:$0xff] }
 0x463   :  { %11711 = vst [vmem:[#allocation453_spill] sm:$0xff] %v8705_v7  ;;  %v11752_v7 = vld [vmem:[#allocation338_spill] sm:$0xff] }
 0x464   :  { %11712 = vst [vmem:[#allocation454_spill] sm:$0xff] %v8707_v26  ;;  %v11729_v26 = vld [vmem:[#allocation302_spill] sm:$0xff] }
 0x467   :  { %3049 = vrot.lane.b32.xlu1 %v7609_v24, %s5411_s21  ;;  %3051 = vrot.lane.b32.xlu2 %v7647_v21, %s5411_s21 }
 0x468   :  { %3047 = vrot.lane.b32.xlu0 %v7603_v49, %s5411_s21 }
 0x469   :  { %v8715_v15 = vpop.permute.xlu1 %2581  ;;  %v8717_v31 = vpop.permute.xlu2 %2985 }
 0x46a   :  { %11713 = vst [vmem:[#allocation455_spill] sm:$0xff] %v8715_v15  ;;  %v8719_v20 = vpop.permute.xlu0 %2579  ;;  %v11735_v15 = vld [vmem:[#allocation314_spill] sm:$0xff] }
 0x46b   :  { %11714 = vst [vmem:[#allocation456_spill] sm:$0xff] %v8719_v20 }
 0x46f   :  { %3055 = vrot.lane.b32.xlu1 %v7639_v29, %s5411_s21  ;;  %3057 = vrot.lane.b32.xlu2 %v7677_v51, %s5411_s21 }
 0x470   :  { %3053 = vrot.lane.b32.xlu0 %v7633_v53, %s5411_s21 }
 0x471   :  { %v8727_v24 = vpop.permute.xlu1 %2587  ;;  %v8729_v21 = vpop.permute.xlu2 %2991 }
 0x472   :  { %11715 = vst [vmem:[#allocation457_spill] sm:$0xff] %v8727_v24  ;;  %v8731_v49 = vpop.permute.xlu0 %2585  ;;  %v11740_v24 = vld [vmem:[#allocation328_spill] sm:$0xff] }
 0x473   :  { %11716 = vst [vmem:[#allocation458_spill] sm:$0xff] %v8731_v49  ;;  %v11739_v49 = vld [vmem:[#allocation320_spill] sm:$0xff] }
 0x477   :  { %3061 = vrot.lane.b32.xlu1 %v7669_v19, %s5411_s21  ;;  %3063 = vrot.lane.b32.xlu2 %v7707_v44, %s5411_s21 }
 0x478   :  { %3059 = vrot.lane.b32.xlu0 %v7663_v59, %s5411_s21 }
 0x479   :  { %v8739_v29 = vpop.permute.xlu1 %2593  ;;  %v8741_v51 = vpop.permute.xlu2 %2997 }
 0x47a   :  { %11717 = vst [vmem:[#allocation459_spill] sm:$0xff] %v8739_v29  ;;  %v8743_v53 = vpop.permute.xlu0 %2591  ;;  %v11753_v29 = vld [vmem:[#allocation346_spill] sm:$0xff] }
 0x47b   :  { %11718 = vst [vmem:[#allocation460_spill] sm:$0xff] %v8743_v53  ;;  %v11743_v53 = vld [vmem:[#allocation326_spill] sm:$0xff] }
 0x47f   :  { %3067 = vrot.lane.b32.xlu1 %v7699_v45, %s5411_s21  ;;  %3069 = vrot.lane.b32.xlu2 %v7737_v54, %s5411_s21 }
 0x480   :  { %3065 = vrot.lane.b32.xlu0 %v7693_v47, %s5411_s21 }
 0x481   :  { %v8751_v19 = vpop.permute.xlu1 %2983  ;;  %v8753_v44 = vpop.permute.xlu2 %3003 }
 0x482   :  { %v8755_v59 = vpop.permute.xlu0 %2981 }
 0x487   :  { %3073 = vrot.lane.b32.xlu1 %v7729_v41, %s5411_s21  ;;  %3075 = vrot.lane.b32.xlu2 %v7767_v4, %s5411_s21 }
 0x488   :  { %3071 = vrot.lane.b32.xlu0 %v7723_v46, %s5411_s21 }
 0x489   :  { %v8763_v45 = vpop.permute.xlu1 %2989  ;;  %v8765_v54 = vpop.permute.xlu2 %3009 }
 0x48a   :  { %v8767_v47 = vpop.permute.xlu0 %2987 }
 0x48f   :  { %3079 = vrot.lane.b32.xlu1 %v7759_v28, %s5411_s21  ;;  %3081 = vrot.lane.b32.xlu2 %v7797_v48, %s5411_s21 }
 0x490   :  { %3077 = vrot.lane.b32.xlu0 %v7753_v17, %s5411_s21 }
 0x491   :  { %v8775_v41 = vpop.permute.xlu1 %2995  ;;  %v8777_v4 = vpop.permute.xlu2 %3015 }
 0x492   :  { %v8779_v46 = vpop.permute.xlu0 %2993 }
 0x497   :  { %3085 = vrot.lane.b32.xlu1 %v7789_v35, %s5411_s21  ;;  %3087 = vrot.lane.b32.xlu2 %v7827_v52, %s5411_s21 }
 0x498   :  { %3083 = vrot.lane.b32.xlu0 %v7783_v12, %s5411_s21 }
 0x499   :  { %v8787_v28 = vpop.permute.xlu1 %3001  ;;  %v8789_v48 = vpop.permute.xlu2 %3021 }
 0x49a   :  { %v8791_v17 = vpop.permute.xlu0 %2999 }
 0x49f   :  { %3091 = vrot.lane.b32.xlu1 %v7819_v42, %s5411_s21  ;;  %3093 = vrot.lane.b32.xlu2 %v7857_v5, %s5411_s21  ;;  %v11719_v42 = vld [vmem:[#allocation280_spill] sm:$0xff] }
 0x4a0   :  { %3089 = vrot.lane.b32.xlu0 %v7813_v36, %s5411_s21 }
 0x4a1   :  { %v8799_v35 = vpop.permute.xlu1 %3007  ;;  %v8801_v52 = vpop.permute.xlu2 %3027 }
 0x4a2   :  { %v8803_v12 = vpop.permute.xlu0 %3005 }
 0x4a7   :  { %3097 = vrot.lane.b32.xlu1 %v7849_v22, %s5411_s21  ;;  %3099 = vrot.lane.b32.xlu2 %v7887_v50, %s5411_s21  ;;  %v11722_v22 = vld [vmem:[#allocation284_spill] sm:$0xff] }
 0x4a8   :  { %3095 = vrot.lane.b32.xlu0 %v11719_v42, %s5411_s21 }
 0x4a9   :  { %v8811_v2 = vpop.permute.xlu1 %3013  ;;  %v8813_v5 = vpop.permute.xlu2 %3033 }
 0x4aa   :  { %v8815_v36 = vpop.permute.xlu0 %3011 }
 0x4af   :  { %3103 = vrot.lane.b32.xlu1 %v11720_v62, %s5411_s21  ;;  %3105 = vrot.lane.b32.xlu2 %v11721_v14, %s5411_s21  ;;  %v11725_v62 = vld [vmem:[#allocation289_spill] sm:$0xff] }
 0x4b0   :  { %3101 = vrot.lane.b32.xlu0 %v11722_v22, %s5411_s21 }
 0x4b1   :  { %v8823_v30 = vpop.permute.xlu1 %3019  ;;  %v8825_v50 = vpop.permute.xlu2 %3039 }
 0x4b2   :  { %v8827_v42 = vpop.permute.xlu0 %3017 }
 0x4b7   :  { %3109 = vrot.lane.b32.xlu1 %v11723_v32, %s5411_s21  ;;  %3111 = vrot.lane.b32.xlu2 %v11724_v0, %s5411_s21  ;;  %v11728_v32 = vld [vmem:[#allocation295_spill] sm:$0xff] }
 0x4b8   :  { %3107 = vrot.lane.b32.xlu0 %v11725_v62, %s5411_s21 }
 0x4b9   :  { %v8835_v6 = vpop.permute.xlu1 %3025  ;;  %v8837_v14 = vpop.permute.xlu2 %3045 }
 0x4ba   :  { %v8839_v22 = vpop.permute.xlu0 %3023 }
 0x4bf   :  { %3115 = vrot.lane.b32.xlu1 %v11726_v58, %s5411_s21  ;;  %3117 = vrot.lane.b32.xlu2 %v11727_v38, %s5411_s21  ;;  %v11731_v58 = vld [vmem:[#allocation301_spill] sm:$0xff] }
 0x4c0   :  { %3113 = vrot.lane.b32.xlu0 %v11728_v32, %s5411_s21 }
 0x4c1   :  { %v8847_v57 = vpop.permute.xlu1 %3031  ;;  %v8849_v0 = vpop.permute.xlu2 %3051 }
 0x4c2   :  { %v8851_v62 = vpop.permute.xlu0 %3029 }
 0x4c7   :  { %3121 = vrot.lane.b32.xlu1 %v11729_v26, %s5411_s21  ;;  %3123 = vrot.lane.b32.xlu2 %v11730_v61, %s5411_s21  ;;  %v11734_v26 = vld [vmem:[#allocation307_spill] sm:$0xff] }
 0x4c8   :  { %3119 = vrot.lane.b32.xlu0 %v11731_v58, %s5411_s21 }
 0x4c9   :  { %v8859_v20 = vpop.permute.xlu1 %3037  ;;  %v8861_v38 = vpop.permute.xlu2 %3057 }
 0x4ca   :  { %v8863_v32 = vpop.permute.xlu0 %3035 }
 0x4cf   :  { %3127 = vrot.lane.b32.xlu1 %v11732_v60, %s5411_s21  ;;  %3129 = vrot.lane.b32.xlu2 %v11733_v37, %s5411_s21  ;;  %v11737_v60 = vld [vmem:[#allocation313_spill] sm:$0xff] }
 0x4d0   :  { %3125 = vrot.lane.b32.xlu0 %v11734_v26, %s5411_s21 }
 0x4d1   :  { %v8871_v9 = vpop.permute.xlu1 %3043  ;;  %v8873_v61 = vpop.permute.xlu2 %3063 }
 0x4d2   :  { %v8875_v58 = vpop.permute.xlu0 %3041 }
 0x4d7   :  { %3133 = vrot.lane.b32.xlu1 %v11735_v15, %s5411_s21  ;;  %3135 = vrot.lane.b32.xlu2 %v11736_v56, %s5411_s21  ;;  %v11741_v15 = vld [vmem:[#allocation319_spill] sm:$0xff] }
 0x4d8   :  { %3131 = vrot.lane.b32.xlu0 %v11737_v60, %s5411_s21 }
 0x4d9   :  { %v8883_v8 = vpop.permute.xlu1 %3049  ;;  %v8885_v37 = vpop.permute.xlu2 %3069 }
 0x4da   :  { %11738 = vst [vmem:[#allocation280_spill] sm:$0xff] %v8885_v37  ;;  %v8887_v26 = vpop.permute.xlu0 %3047  ;;  %v11848_v37 = vld [vmem:[#allocation258_spill] sm:$0xff] }
 0x4db   :  { %vm2598_vm6 = vcmp.ne.s32.totalorder %v11848_v37, 0  ;;  %v5247_v37 = vld [vmem:[%s10932_s1 + $0x40] sm:$0xff] }
 0x4df   :  { %3139 = vrot.lane.b32.xlu1 %v11739_v49, %s5411_s21  ;;  %3141 = vrot.lane.b32.xlu2 %v11740_v24, %s5411_s21  ;;  %v11745_v49 = vld [vmem:[#allocation325_spill] sm:$0xff] }
 0x4e0   :  { %3137 = vrot.lane.b32.xlu0 %v11741_v15, %s5411_s21 }
 0x4e1   :  { %v8895_v39 = vpop.permute.xlu1 %3055  ;;  %v8897_v56 = vpop.permute.xlu2 %3075 }
 0x4e2   :  { %11742 = vst [vmem:[#allocation285_spill] sm:$0xff] %v8897_v56  ;;  %v8899_v60 = vpop.permute.xlu0 %3053 }
 0x4e7   :  { %3145 = vrot.lane.b32.xlu1 %v11743_v53, %s5411_s21  ;;  %3147 = vrot.lane.b32.xlu2 %v11744_v34, %s5411_s21  ;;  %v11749_v53 = vld [vmem:[#allocation331_spill] sm:$0xff] }
 0x4e8   :  { %3143 = vrot.lane.b32.xlu0 %v11745_v49, %s5411_s21 }
 0x4e9   :  { %v8907_v3 = vpop.permute.xlu1 %3061  ;;  %v8909_v24 = vpop.permute.xlu2 %3081 }
 0x4ea   :  { %11746 = vst [vmem:[#allocation292_spill] sm:$0xff] %v8909_v24  ;;  %v8911_v15 = vpop.permute.xlu0 %3059 }
 0x4ef   :  { %3151 = vrot.lane.b32.xlu1 %v11747_v27, %s5411_s21  ;;  %3153 = vrot.lane.b32.xlu2 %v11748_v43, %s5411_s21  ;;  %v11754_v27 = vld [vmem:[#allocation337_spill] sm:$0xff] }
 0x4f0   :  { %3149 = vrot.lane.b32.xlu0 %v11749_v53, %s5411_s21 }
 0x4f1   :  { %v8919_v13 = vpop.permute.xlu1 %3067  ;;  %v8921_v34 = vpop.permute.xlu2 %3087 }
 0x4f2   :  { %11750 = vst [vmem:[#allocation284_spill] sm:$0xff] %v8919_v13  ;;  %v8923_v49 = vpop.permute.xlu0 %3065 }
 0x4f3   :  { %11751 = vst [vmem:[#allocation290_spill] sm:$0xff] %v8921_v34 }
 0x4f7   :  { %3157 = vrot.lane.b32.xlu1 %v11752_v7, %s5411_s21  ;;  %3159 = vrot.lane.b32.xlu2 %v11753_v29, %s5411_s21  ;;  %v11760_v7 = vld [vmem:[#allocation343_spill] sm:$0xff] }
 0x4f8   :  { %3155 = vrot.lane.b32.xlu0 %v11754_v27, %s5411_s21 }
 0x4f9   :  { %v8931_v33 = vpop.permute.xlu1 %3073  ;;  %v8933_v43 = vpop.permute.xlu2 %3093 }
 0x4fa   :  { %11755 = vst [vmem:[#allocation298_spill] sm:$0xff] %v8931_v33  ;;  %v8935_v53 = vpop.permute.xlu0 %3071  ;;  %v11833_v33 = vld [vmem:[#allocation266_spill] sm:$0xff] }
 0x4fb   :  { %11756 = vst [vmem:[#allocation289_spill] sm:$0xff] %v8933_v43  ;;  %vm2597_vm0 = vcmp.ne.s32.totalorder %v11833_v33, 0  ;;  %v5244_v33 = vld [vmem:[%s10932_s1 + $0x28] sm:$0xff] }
 0x4fc   :  { %11757 = vst [vmem:[#allocation296_spill] sm:$0xff] %v8935_v53  ;;  %v11836_v53 = vld [vmem:[#allocation205_spill] sm:$0xff] }
 0x4ff   :  { %3163 = vrot.lane.b32.xlu1 %v11758_v25, %s5411_s21  ;;  %3165 = vrot.lane.b32.xlu2 %v11759_v40, %s5411_s21  ;;  %v11766_v25 = vld [vmem:[#allocation349_spill] sm:$0xff] }
 0x500   :  { %3161 = vrot.lane.b32.xlu0 %v11760_v7, %s5411_s21 }
 0x501   :  { %v8943_v11 = vpop.permute.xlu1 %3079  ;;  %v8945_v29 = vpop.permute.xlu2 %3099 }
 0x502   :  { %11761 = vst [vmem:[#allocation304_spill] sm:$0xff] %v8943_v11  ;;  %v8947_v27 = vpop.permute.xlu0 %3077  ;;  %v11825_v11 = vld [vmem:[#allocation202_spill] sm:$0xff] }
 0x503   :  { %11762 = vst [vmem:[#allocation295_spill] sm:$0xff] %v8945_v29  ;;  %v11771_v29 = vld [vmem:[#allocation364_spill] sm:$0xff] }
 0x504   :  { %11763 = vst [vmem:[#allocation302_spill] sm:$0xff] %v8947_v27 }
 0x507   :  { %3169 = vrot.lane.b32.xlu1 %v11764_v1, %s5411_s21  ;;  %3171 = vrot.lane.b32.xlu2 %v11765_v16, %s5411_s21  ;;  %v11772_v1 = vld [vmem:[#allocation355_spill] sm:$0xff] }
 0x508   :  { %3167 = vrot.lane.b32.xlu0 %v11766_v25, %s5411_s21 }
 0x509   :  { %v8955_v23 = vpop.permute.xlu1 %3085  ;;  %v8957_v40 = vpop.permute.xlu2 %3105 }
 0x50a   :  { %11767 = vst [vmem:[#allocation310_spill] sm:$0xff] %v8955_v23  ;;  %v8959_v7 = vpop.permute.xlu0 %3083  ;;  %v11776_v23 = vld [vmem:[#allocation362_spill] sm:$0xff] }
 0x50b   :  { %11768 = vst [vmem:[#allocation301_spill] sm:$0xff] %v8957_v40  ;;  %v11777_v40 = vld [vmem:[#allocation370_spill] sm:$0xff] }
 0x50c   :  { %11769 = vst [vmem:[#allocation308_spill] sm:$0xff] %v8959_v7 }
 0x50f   :  { %3175 = vrot.lane.b32.xlu1 %v11770_v63, %s5411_s21  ;;  %3177 = vrot.lane.b32.xlu2 %v11771_v29, %s5411_s21  ;;  %v11778_v63 = vld [vmem:[#allocation361_spill] sm:$0xff] }
 0x510   :  { %3173 = vrot.lane.b32.xlu0 %v11772_v1, %s5411_s21 }
 0x511   :  { %v8967_v43 = vpop.permute.xlu1 %3091  ;;  %v8969_v16 = vpop.permute.xlu2 %3111 }
 0x512   :  { %11773 = vst [vmem:[#allocation316_spill] sm:$0xff] %v8967_v43  ;;  %v8971_v25 = vpop.permute.xlu0 %3089  ;;  %v11782_v43 = vld [vmem:[#allocation368_spill] sm:$0xff] }
 0x513   :  { %11774 = vst [vmem:[#allocation307_spill] sm:$0xff] %v8969_v16  ;;  %v11783_v16 = vld [vmem:[#allocation376_spill] sm:$0xff] }
 0x514   :  { %11775 = vst [vmem:[#allocation314_spill] sm:$0xff] %v8971_v25 }
 0x517   :  { %3181 = vrot.lane.b32.xlu1 %v11776_v23, %s5411_s21  ;;  %3183 = vrot.lane.b32.xlu2 %v11777_v40, %s5411_s21  ;;  %v11784_v23 = vld [vmem:[#allocation367_spill] sm:$0xff] }
 0x518   :  { %3179 = vrot.lane.b32.xlu0 %v11778_v63, %s5411_s21 }
 0x519   :  { %v8979_v34 = vpop.permute.xlu1 %3097  ;;  %v8981_v29 = vpop.permute.xlu2 %3117 }
 0x51a   :  { %11779 = vst [vmem:[#allocation322_spill] sm:$0xff] %v8979_v34  ;;  %v8983_v1 = vpop.permute.xlu0 %3095  ;;  %v11788_v34 = vld [vmem:[#allocation374_spill] sm:$0xff] }
 0x51b   :  { %11780 = vst [vmem:[#allocation313_spill] sm:$0xff] %v8981_v29  ;;  %v11789_v29 = vld [vmem:[#allocation382_spill] sm:$0xff] }
 0x51c   :  { %11781 = vst [vmem:[#allocation320_spill] sm:$0xff] %v8983_v1 }
 0x51f   :  { %3187 = vrot.lane.b32.xlu1 %v11782_v43, %s5411_s21  ;;  %3189 = vrot.lane.b32.xlu2 %v11783_v16, %s5411_s21  ;;  %v11790_v43 = vld [vmem:[#allocation373_spill] sm:$0xff] }
 0x520   :  { %3185 = vrot.lane.b32.xlu0 %v11784_v23, %s5411_s21 }
 0x521   :  { %v8991_v25 = vpop.permute.xlu1 %3103  ;;  %v8993_v40 = vpop.permute.xlu2 %3123 }
 0x522   :  { %11785 = vst [vmem:[#allocation328_spill] sm:$0xff] %v8991_v25  ;;  %v8995_v63 = vpop.permute.xlu0 %3101  ;;  %v11794_v25 = vld [vmem:[#allocation380_spill] sm:$0xff] }
 0x523   :  { %11786 = vst [vmem:[#allocation319_spill] sm:$0xff] %v8993_v40  ;;  %v11795_v40 = vld [vmem:[#allocation388_spill] sm:$0xff] }
 0x524   :  { %11787 = vst [vmem:[#allocation326_spill] sm:$0xff] %v8995_v63 }
 0x527   :  { %3193 = vrot.lane.b32.xlu1 %v11788_v34, %s5411_s21  ;;  %3195 = vrot.lane.b32.xlu2 %v11789_v29, %s5411_s21  ;;  %v11796_v34 = vld [vmem:[#allocation379_spill] sm:$0xff] }
 0x528   :  { %3191 = vrot.lane.b32.xlu0 %v11790_v43, %s5411_s21 }
 0x529   :  { %v9003_v1 = vpop.permute.xlu1 %3109  ;;  %v9005_v16 = vpop.permute.xlu2 %3129 }
 0x52a   :  { %11791 = vst [vmem:[#allocation334_spill] sm:$0xff] %v9003_v1  ;;  %v9007_v23 = vpop.permute.xlu0 %3107  ;;  %v11800_v1 = vld [vmem:[#allocation386_spill] sm:$0xff] }
 0x52b   :  { %11792 = vst [vmem:[#allocation325_spill] sm:$0xff] %v9005_v16  ;;  %v11801_v16 = vld [vmem:[#allocation394_spill] sm:$0xff] }
 0x52c   :  { %11793 = vst [vmem:[#allocation332_spill] sm:$0xff] %v9007_v23 }
 0x52f   :  { %3199 = vrot.lane.b32.xlu1 %v11794_v25, %s5411_s21  ;;  %3201 = vrot.lane.b32.xlu2 %v11795_v40, %s5411_s21  ;;  %v11802_v25 = vld [vmem:[#allocation385_spill] sm:$0xff] }
 0x530   :  { %3197 = vrot.lane.b32.xlu0 %v11796_v34, %s5411_s21 }
 0x531   :  { %v9015_v63 = vpop.permute.xlu1 %3115  ;;  %v9017_v29 = vpop.permute.xlu2 %3135 }
 0x532   :  { %11797 = vst [vmem:[#allocation340_spill] sm:$0xff] %v9015_v63  ;;  %v9019_v43 = vpop.permute.xlu0 %3113  ;;  %v11115_v63 = vmov 1  }
 0x533   :  { %11798 = vst [vmem:[#allocation331_spill] sm:$0xff] %v9017_v29  ;;  %5103 = vset.pattern.permute.xlu2 %v11115_v63  ;;  %5105 = vset.pattern.permute.xlu1 %v11115_v63 }
 0x534   :  { %11799 = vst [vmem:[#allocation338_spill] sm:$0xff] %v9019_v43  ;;  %5104 = vset.pattern.permute.xlu0 %v11115_v63  ;;  %v11813_v63 = vld [vmem:[#allocation406_spill] sm:$0xff] }
 0x537   :  { %3205 = vrot.lane.b32.xlu1 %v11800_v1, %s5411_s21  ;;  %3207 = vrot.lane.b32.xlu2 %v11801_v16, %s5411_s21  ;;  %v11806_v1 = vld [vmem:[#allocation392_spill] sm:$0xff] }
 0x538   :  { %3203 = vrot.lane.b32.xlu0 %v11802_v25, %s5411_s21  ;;  %v11807_v16 = vld [vmem:[#allocation400_spill] sm:$0xff]  ;;  %v11808_v25 = vld [vmem:[#allocation391_spill] sm:$0xff] }
 0x539   :  { %v9027_v23 = vpop.permute.xlu1 %3121  ;;  %v9029_v40 = vpop.permute.xlu2 %3141 }
 0x53a   :  { %11803 = vst [vmem:[#allocation346_spill] sm:$0xff] %v9027_v23  ;;  %v9031_v34 = vpop.permute.xlu0 %3119 }
 0x53b   :  { %11804 = vst [vmem:[#allocation337_spill] sm:$0xff] %v9029_v40 }
 0x53c   :  { %11805 = vst [vmem:[#allocation344_spill] sm:$0xff] %v9031_v34  ;;  %v11812_v34 = vld [vmem:[#allocation398_spill] sm:$0xff] }
 0x53f   :  { %3211 = vrot.lane.b32.xlu1 %v11806_v1, %s5411_s21  ;;  %3213 = vrot.lane.b32.xlu2 %v11807_v16, %s5411_s21  ;;  %v11814_v1 = vld [vmem:[#allocation397_spill] sm:$0xff] }
 0x540   :  { %3209 = vrot.lane.b32.xlu0 %v11808_v25, %s5411_s21 }
 0x541   :  { %v9042_v29 = vpop.permute.xlu1 %3127  ;;  %v9044_v40 = vpop.permute.xlu2 %3147 }
 0x542   :  { %11809 = vst [vmem:[#allocation352_spill] sm:$0xff] %v9042_v29  ;;  %v9046_v23 = vpop.permute.xlu0 %3125  ;;  %v9060_v29 = vstv %s159_s19 }
 0x543   :  { %11810 = vst [vmem:[#allocation343_spill] sm:$0xff] %v9044_v40  ;;  %v161_v40 = vmul.f32 %v8574_v18, %v9060_v29  ;;  %v164_v18 = vmul.f32 %v8591_v10, %v9060_v29  ;;  %v11829_v10 = vld [vmem:[#allocation15_spill] sm:$0xff] }
 0x544   :  { %11811 = vst [vmem:[#allocation350_spill] sm:$0xff] %v9046_v23  ;;  %v11818_v23 = vld [vmem:[#allocation404_spill] sm:$0xff] }
 0x547   :  { %3217 = vrot.lane.b32.xlu1 %v11812_v34, %s5411_s21  ;;  %3219 = vrot.lane.b32.xlu2 %v11813_v63, %s5411_s21  ;;  %v11819_v34 = vld [vmem:[#allocation412_spill] sm:$0xff]  ;;  %v11820_v63 = vld [vmem:[#allocation403_spill] sm:$0xff] }
 0x548   :  { %3215 = vrot.lane.b32.xlu0 %v11814_v1, %s5411_s21 }
 0x549   :  { %v9054_v16 = vpop.permute.xlu1 %3133  ;;  %v9056_v43 = vpop.permute.xlu2 %3153 }
 0x54a   :  { %11815 = vst [vmem:[#allocation358_spill] sm:$0xff] %v9054_v16  ;;  %v9058_v25 = vpop.permute.xlu0 %3131 }
 0x54b   :  { %11816 = vst [vmem:[#allocation349_spill] sm:$0xff] %v9056_v43  ;;  %v11823_v43 = vld [vmem:[#allocation13_spill] sm:$0xff] }
 0x54c   :  { %11817 = vst [vmem:[#allocation356_spill] sm:$0xff] %v9058_v25  ;;  %v931_v25 = vadd.f32 %v11823_v43, %v161_v40  ;;  %v11827_v43 = vld [vmem:[#allocation418_spill] sm:$0xff] }
 0x54e   :  { %v1701_v24 = vadd.f32 %v11825_v11, %v931_v25  ;;  %v11828_v11 = vld [vmem:[#allocation409_spill] sm:$0xff]  ;;  %v934_v25 = vadd.f32 %v11829_v10, %v164_v18  ;;  %v5243_v18 = vld [vmem:[%s10932_s1 + $0x20] sm:$0xff]  ;;  %v11838_v10 = vld [vmem:[#allocation215_spill] sm:$0xff] }
 0x54f   :  { %3223 = vrot.lane.b32.xlu1 %v11818_v23, %s5411_s21  ;;  %3225 = vrot.lane.b32.xlu2 %v11819_v34, %s5411_s21  ;;  %v5242_v23 = vld [vmem:[%s10932_s1 + $0x10] sm:$0xff] }
 0x550   :  { %3221 = vrot.lane.b32.xlu0 %v11820_v63, %s5411_s21  ;;  %v163_v34 = vmul.f32 %v5242_v23, %v9060_v29  ;;  %v162_v63 = vmul.f32 %v8565_v55, %v9060_v29  ;;  %v1829_v40 = vand.u32 2147483647, %v1701_v24  ;;  %v11832_v23 = vld [vmem:[#allocation12_spill] sm:$0xff]  ;;  %v11837_v24 = vld [vmem:[#allocation213_spill] sm:$0xff] }
 0x551   :  { %v9070_v1 = vpop.permute.xlu1 %3139  ;;  %v9072_v16 = vpop.permute.xlu2 %3159 }
 0x552   :  { %11821 = vst [vmem:[#allocation364_spill] sm:$0xff] %v9070_v1  ;;  %v9075_v7 = vpop.permute.xlu0 %3137  ;;  %v933_v27 = vadd.f32 %v11832_v23, %v163_v34  ;;  %vm1957_vm1 = vcmp.gt.f32.partialorder %v1829_v40, 0.0  ;;  %v166_v34 = vmul.f32 %v5244_v33, %v9060_v29  ;;  %v11840_v23 = vld [vmem:[#allocation415_spill] sm:$0xff] }
 0x553   :  { %11822 = vst [vmem:[#allocation355_spill] sm:$0xff] %v9072_v16  ;;  %v11826_v16 = vld [vmem:[#allocation410_spill] sm:$0xff]  ;;  %vm2725_vm2 = vmand %vm1957_vm1, %vm2597_vm0 }
 0x554   :  { %11824 = vst [vmem:[#allocation362_spill] sm:$0xff] %v9075_v7  ;;  %v1703_v13 = vadd.f32 %v11837_v24, %v933_v27  ;;  %v5245_v27 = vld [vmem:[%s10932_s1 + $0x30] sm:$0xff] }
 0x557   :  { %3229 = vrot.lane.b32.xlu1 %v11826_v16, %s5411_s21  ;;  %3231 = vrot.lane.b32.xlu2 %v11827_v43, %s5411_s21  ;;  %v11835_v16 = vld [vmem:[#allocation16_spill] sm:$0xff]  ;;  %v1704_v43 = vadd.f32 %v11836_v53, %v934_v25  ;;  %v3365_v53 = vsel %vm2725_vm2, %v8755_v59, -2.0 }
 0x558   :  { %3227 = vrot.lane.b32.xlu0 %v11828_v11, %s5411_s21  ;;  %v932_v56 = vadd.f32 %v11835_v16, %v162_v63  ;;  %v165_v11 = vmul.f32 %v5243_v18, %v9060_v29  ;;  %v167_v63 = vmul.f32 %v5245_v27, %v9060_v29  ;;  %v11839_v25 = vld [vmem:[#allocation416_spill] sm:$0xff] }
 0x559   :  { %v9093_v1 = vpop.permute.xlu1 %3145  ;;  %v9095_v7 = vpop.permute.xlu2 %3165  ;;  %v1832_v40 = vand.u32 2147483647, %v1704_v43  ;;  %v11841_v16 = vld [vmem:[#allocation8_spill] sm:$0xff]  ;;  %v11845_v43 = vld [vmem:[#allocation271_spill] sm:$0xff] }
 0x55a   :  { %11830 = vst [vmem:[#allocation370_spill] sm:$0xff] %v9093_v1  ;;  %v9099_v55 = vpop.permute.xlu0 %3143  ;;  %v935_v24 = vadd.f32 %v11841_v16, %v165_v11  ;;  %v11844_v1 = vld [vmem:[#allocation9_spill] sm:$0xff]  ;;  %vm2599_vm4 = vcmp.ne.s32.totalorder %v11845_v43, 0 }
 0x55b   :  { %11831 = vst [vmem:[#allocation361_spill] sm:$0xff] %v9095_v7  ;;  %v1702_v7 = vadd.f32 %v11838_v10, %v932_v56  ;;  %v1831_v56 = vand.u32 2147483647, %v1703_v13  ;;  %v11842_v10 = vld [vmem:[#allocation269_spill] sm:$0xff]  ;;  %v936_v27 = vadd.f32 %v11844_v1, %v166_v34  ;;  %vm1960_vm5 = vcmp.gt.f32.partialorder %v1832_v40, 0.0 }
 0x55c   :  { %11834 = vst [vmem:[#allocation368_spill] sm:$0xff] %v9099_v55  ;;  %vm2600_vm3 = vcmp.ne.s32.totalorder %v11842_v10, 0  ;;  %v5246_v1 = vld [vmem:[%s10932_s1 + $0x38] sm:$0xff]  ;;  %v11852_v10 = vld [vmem:[#allocation208_spill] sm:$0xff]  ;;  %v169_v40 = vmul.f32 %v5247_v37, %v9060_v29 }
 0x55d   :  { %v1830_v18 = vand.u32 2147483647, %v1702_v7  ;;  %vm1959_vm7 = vcmp.gt.f32.partialorder %v1831_v56, 0.0  ;;  %v11849_v7 = vld [vmem:[#allocation216_spill] sm:$0xff]  ;;  %vm9136_vm8 = vmand %vm1960_vm5, %vm2600_vm3  ;;  %v168_v34 = vmul.f32 %v5246_v1, %v9060_v29  ;;  %v11854_v1 = vld [vmem:[#allocation261_spill] sm:$0xff] }
 0x55e   :  { %v1706_v11 = vadd.f32 %v11849_v7, %v936_v27  ;;  %vm2727_vm10 = vmand %vm1959_vm7, %vm2599_vm4  ;;  %v5248_v27 = vld [vmem:[%s10932_s1 + $0x48] sm:$0xff]  ;;  %vm2601_vm12 = vcmp.ne.s32.totalorder %v11854_v1, 0  ;;  %v5251_v1 = vld [vmem:[%s10932_s1 + $0x60] sm:$0xff] }
 0x55f   :  { %3235 = vrot.lane.b32.xlu1 %v11839_v25, %s5411_s21  ;;  %3498 = vperm.xlu2 %5103, %v3365_v53   ;;  %v11846_v53 = vld [vmem:[#allocation20_spill] sm:$0xff]  ;;  %v11847_v25 = vld [vmem:[#allocation218_spill] sm:$0xff]  ;;  %vm1958_vm9 = vcmp.gt.f32.partialorder %v1830_v18, 0.0  ;;  %v3367_v56 = vsel %vm2727_vm10, %v8717_v31, -2.0  ;;  %v170_v18 = vmul.f32 %v5248_v27, %v9060_v29 }
 0x560   :  { %3233 = vrot.lane.b32.xlu0 %v11840_v23, %s5411_s21  ;;  %v937_v13 = vadd.f32 %v11846_v53, %v167_v63  ;;  %v1705_v23 = vadd.f32 %v11847_v25, %v935_v24  ;;  %vm2726_vm11 = vmand %vm1958_vm9, %vm2598_vm6  ;;  %v3368_v24 = vsel %vm9136_vm8, %v8767_v47, -2.0  ;;  %v11853_v25 = vld [vmem:[#allocation19_spill] sm:$0xff]  ;;  %v11860_v27 = vld [vmem:[#allocation272_spill] sm:$0xff] }
 0x561   :  { %v9124_v59 = vpop.permute.xlu1 %3151  ;;  %v9126_v33 = vpop.permute.xlu2 %3171  ;;  %v3366_v53 = vsel %vm2726_vm11, %v8751_v19, -2.0  ;;  %v938_v31 = vadd.f32 %v11853_v25, %v168_v34  ;;  %v11858_v19 = vld [vmem:[#allocation25_spill] sm:$0xff]  ;;  %vm2603_vm15 = vcmp.ne.s32.totalorder %v11860_v27, 0  ;;  %v11861_v34 = vld [vmem:[#allocation219_spill] sm:$0xff] }
 0x562   :  { %11843 = vst [vmem:[#allocation376_spill] sm:$0xff] %v9126_v33  ;;  %v9130_v55 = vpop.permute.xlu0 %3149  ;;  %v1707_v63 = vadd.f32 %v11852_v10, %v937_v13  ;;  %v1833_v43 = vand.u32 2147483647, %v1705_v23  ;;  %v1834_v13 = vand.u32 2147483647, %v1706_v11  ;;  %v11856_v10 = vld [vmem:[#allocation10_spill] sm:$0xff] }
 0x563   :  { %v939_v37 = vadd.f32 %v11856_v10, %v169_v40  ;;  %v11857_v33 = vld [vmem:[#allocation274_spill] sm:$0xff]  ;;  %v11859_v11 = vld [vmem:[#allocation221_spill] sm:$0xff] }
 0x564   :  { %v1835_v7 = vand.u32 2147483647, %v1707_v63  ;;  %vm2602_vm13 = vcmp.ne.s32.totalorder %v11857_v33, 0  ;;  %vm1961_vm14 = vcmp.gt.f32.partialorder %v1833_v43, 0.0  ;;  %vm1962_vm0 = vcmp.gt.f32.partialorder %v1834_v13, 0.0  ;;  %v11862_v33 = vld [vmem:[#allocation211_spill] sm:$0xff] }
 0x565   :  { %v1709_v63 = vadd.f32 %v11861_v34, %v939_v37  ;;  %vm2729_vm1 = vmand %vm1961_vm14, %vm2601_vm12 }
 0x566   :  { %vm1963_vm2 = vcmp.gt.f32.partialorder %v1835_v7, 0.0  ;;  %vm2730_vm3 = vmand %vm1962_vm0, %vm2602_vm13  ;;  %v173_v7 = vmul.f32 %v5251_v1, %v9060_v29  ;;  %v11870_v1 = vld [vmem:[#allocation275_spill] sm:$0xff] }
 0x567   :  { %3508 = vperm.xlu1 %5105, %v3367_v56   ;;  %3513 = vperm.xlu2 %5103, %v3368_v24   ;;  %v940_v56 = vadd.f32 %v11858_v19, %v170_v18  ;;  %v1708_v24 = vadd.f32 %v11859_v11, %v938_v31  ;;  %v5250_v18 = vld [vmem:[%s10932_s1 + $0x58] sm:$0xff]  ;;  %v3370_v13 = vsel %vm2730_vm3, %v8729_v21, -2.0  ;;  %v3369_v31 = vsel %vm2729_vm1, %v8763_v45, -2.0  ;;  %vm2731_vm4 = vmand %vm1963_vm2, %vm2603_vm15  ;;  %v11864_v21 = vld [vmem:[#allocation264_spill] sm:$0xff] }
 0x568   :  { %3503 = vperm.xlu0 %5104, %v3366_v53   ;;  %v5249_v53 = vld [vmem:[%s10932_s1 + $0x50] sm:$0xff]  ;;  %v172_v43 = vmul.f32 %v5250_v18, %v9060_v29  ;;  %v3371_v37 = vsel %vm2731_vm4, %v8779_v46, -2.0  ;;  %v1837_v19 = vand.u32 2147483647, %v1709_v63  ;;  %vm2604_vm5 = vcmp.ne.s32.totalorder %v11864_v21, 0  ;;  %v11867_v18 = vld [vmem:[#allocation277_spill] sm:$0xff] }
 0x569   :  { %v9160_v16 = vpop.permute.xlu1 %3157  ;;  %v9162_v47 = vpop.permute.xlu2 %3177  ;;  %v171_v40 = vmul.f32 %v5249_v53, %v9060_v29  ;;  %v1710_v25 = vadd.f32 %v11862_v33, %v940_v56  ;;  %v1836_v10 = vand.u32 2147483647, %v1708_v24  ;;  %v11863_v56 = vld [vmem:[#allocation24_spill] sm:$0xff]  ;;  %v11866_v53 = vld [vmem:[#allocation11_spill] sm:$0xff]  ;;  %vm2605_vm6 = vcmp.ne.s32.totalorder %v11867_v18, 0 }
 0x56a   :  { %11855 = vst [vmem:[#allocation367_spill] sm:$0xff] %v9162_v47  ;;  %v9166_v23 = vpop.permute.xlu0 %3155  ;;  %v942_v33 = vadd.f32 %v11866_v53, %v172_v43  ;;  %v11868_v46 = vld [vmem:[#allocation31_spill] sm:$0xff]  ;;  %vm2606_vm8 = vcmp.ne.s32.totalorder %v11870_v1, 0  ;;  %vm1965_vm9 = vcmp.gt.f32.partialorder %v1837_v19, 0.0  ;;  %v5254_v53 = vld [vmem:[%s10932_s1 + $0x78] sm:$0xff] }
 0x56b   :  { %v941_v11 = vadd.f32 %v11863_v56, %v171_v40  ;;  %v1838_v27 = vand.u32 2147483647, %v1710_v25  ;;  %vm1964_vm7 = vcmp.gt.f32.partialorder %v1836_v10, 0.0  ;;  %v11869_v63 = vld [vmem:[#allocation223_spill] sm:$0xff]  ;;  %v11871_v40 = vld [vmem:[#allocation17_spill] sm:$0xff]  ;;  %v11872_v56 = vld [vmem:[#allocation214_spill] sm:$0xff] }
 0x56c   :  { %v1712_v25 = vadd.f32 %v11871_v40, %v942_v33  ;;  %vm2732_vm10 = vmand %vm1964_vm7, %vm2604_vm5 }
 0x56d   :  { %vm1966_vm11 = vcmp.gt.f32.partialorder %v1838_v27, 0.0  ;;  %vm2733_vm12 = vmand %vm1965_vm9, %vm2605_vm6  ;;  %v176_v27 = vmul.f32 %v5254_v53, %v9060_v29  ;;  %v11879_v53 = vld [vmem:[#allocation278_spill] sm:$0xff] }
 0x56e   :  { %v3373_v19 = vsel %vm2733_vm12, %v8741_v51, -2.0  ;;  %vm2734_vm13 = vmand %vm1966_vm11, %vm2606_vm8  ;;  %v11874_v51 = vld [vmem:[#allocation267_spill] sm:$0xff]  ;;  %vm2609_vm1 = vcmp.ne.s32.totalorder %v11879_v53, 0 }
 0x56f   :  { %3518 = vperm.xlu1 %5105, %v3369_v31   ;;  %3523 = vperm.xlu2 %5103, %v3370_v13   ;;  %v943_v31 = vadd.f32 %v11868_v46, %v173_v7  ;;  %v1711_v13 = vadd.f32 %v11869_v63, %v941_v11  ;;  %v5253_v7 = vld [vmem:[%s10932_s1 + $0x70] sm:$0xff]  ;;  %v3372_v11 = vsel %vm2732_vm10, %v8775_v41, -2.0  ;;  %v3374_v18 = vsel %vm2734_vm13, %v8791_v17, -2.0  ;;  %v11877_v17 = vld [vmem:[#allocation37_spill] sm:$0xff] }
 0x570   :  { %3528 = vperm.xlu0 %5104, %v3371_v37   ;;  %v5252_v37 = vld [vmem:[%s10932_s1 + $0x68] sm:$0xff]  ;;  %v175_v10 = vmul.f32 %v5253_v7, %v9060_v29  ;;  %v1840_v46 = vand.u32 2147483647, %v1712_v25  ;;  %vm2607_vm14 = vcmp.ne.s32.totalorder %v11874_v51, 0  ;;  %v11876_v7 = vld [vmem:[#allocation281_spill] sm:$0xff]  ;;  %v11878_v25 = vld [vmem:[#allocation22_spill] sm:$0xff] }
 0x571   :  { %v9190_v45 = vpop.permute.xlu1 %3163  ;;  %v9192_v34 = vpop.permute.xlu2 %3183  ;;  %v174_v43 = vmul.f32 %v5252_v37, %v9060_v29  ;;  %v1713_v21 = vadd.f32 %v11872_v56, %v943_v31  ;;  %v1839_v33 = vand.u32 2147483647, %v1711_v13  ;;  %v11873_v31 = vld [vmem:[#allocation29_spill] sm:$0xff]  ;;  %v11875_v37 = vld [vmem:[#allocation14_spill] sm:$0xff]  ;;  %vm2608_vm15 = vcmp.ne.s32.totalorder %v11876_v7, 0 }
 0x572   :  { %11865 = vst [vmem:[#allocation374_spill] sm:$0xff] %v9192_v34  ;;  %v9196_v24 = vpop.permute.xlu0 %3161  ;;  %v945_v56 = vadd.f32 %v11875_v37, %v175_v10  ;;  %vm1968_vm2 = vcmp.gt.f32.partialorder %v1840_v46, 0.0  ;;  %v5257_v37 = vld [vmem:[%s10932_s1 + $0x90] sm:$0xff] }
 0x573   :  { %v944_v63 = vadd.f32 %v11873_v31, %v174_v43  ;;  %v1841_v1 = vand.u32 2147483647, %v1713_v21  ;;  %vm1967_vm0 = vcmp.gt.f32.partialorder %v1839_v33, 0.0  ;;  %v11880_v43 = vld [vmem:[#allocation21_spill] sm:$0xff]  ;;  %vm2736_vm5 = vmand %vm1968_vm2, %vm2608_vm15  ;;  %v12037_v34 = vld [vmem:[#allocation100_spill] sm:$0xff] }
 0x574   :  { %v1715_v21 = vadd.f32 %v11880_v43, %v945_v56  ;;  %vm2735_vm3 = vmand %vm1967_vm0, %vm2607_vm14  ;;  %v11881_v31 = vld [vmem:[#allocation217_spill] sm:$0xff]  ;;  %v3376_v46 = vsel %vm2736_vm5, %v8753_v44, -2.0  ;;  %v11883_v44 = vld [vmem:[#allocation270_spill] sm:$0xff] }
 0x575   :  { %vm1969_vm4 = vcmp.gt.f32.partialorder %v1841_v1, 0.0  ;;  %v179_v1 = vmul.f32 %v5257_v37, %v9060_v29  ;;  %vm2610_vm7 = vcmp.ne.s32.totalorder %v11883_v44, 0  ;;  %v11890_v37 = vld [vmem:[#allocation282_spill] sm:$0xff] }
 0x576   :  { %vm2737_vm6 = vmand %vm1969_vm4, %vm2609_vm1  ;;  %vm2612_vm10 = vcmp.ne.s32.totalorder %v11890_v37, 0 }
 0x577   :  { %3533 = vperm.xlu1 %5105, %v3372_v11   ;;  %3538 = vperm.xlu2 %5103, %v3373_v19   ;;  %v946_v11 = vadd.f32 %v11877_v17, %v176_v27  ;;  %v1714_v19 = vadd.f32 %v11878_v25, %v944_v63  ;;  %v5256_v27 = vld [vmem:[%s10932_s1 + $0x88] sm:$0xff]  ;;  %v3375_v63 = vsel %vm2735_vm3, %v8787_v28, -2.0  ;;  %v3377_v7 = vsel %vm2737_vm6, %v8803_v12, -2.0 }
 0x578   :  { %3543 = vperm.xlu0 %5104, %v3374_v18   ;;  %v5255_v18 = vld [vmem:[%s10932_s1 + $0x80] sm:$0xff]  ;;  %v178_v33 = vmul.f32 %v5256_v27, %v9060_v29  ;;  %v1843_v17 = vand.u32 2147483647, %v1715_v21  ;;  %v11888_v12 = vld [vmem:[#allocation43_spill] sm:$0xff] }
 0x579   :  { %v9220_v41 = vpop.permute.xlu1 %3169  ;;  %v9222_v40 = vpop.permute.xlu2 %3189  ;;  %v177_v10 = vmul.f32 %v5255_v18, %v9060_v29  ;;  %v1716_v51 = vadd.f32 %v11881_v31, %v946_v11  ;;  %v1842_v56 = vand.u32 2147483647, %v1714_v19  ;;  %v11882_v11 = vld [vmem:[#allocation35_spill] sm:$0xff]  ;;  %v11885_v18 = vld [vmem:[#allocation18_spill] sm:$0xff] }
 0x57a   :  { %v9226_v13 = vpop.permute.xlu0 %3167  ;;  %v948_v31 = vadd.f32 %v11885_v18, %v178_v33  ;;  %v11886_v27 = vld [vmem:[#allocation286_spill] sm:$0xff]  ;;  %v11889_v21 = vld [vmem:[#allocation27_spill] sm:$0xff]  ;;  %vm1971_vm11 = vcmp.gt.f32.partialorder %v1843_v17, 0.0 }
 0x57b   :  { %v947_v25 = vadd.f32 %v11882_v11, %v177_v10  ;;  %v1844_v53 = vand.u32 2147483647, %v1716_v51  ;;  %vm2611_vm8 = vcmp.ne.s32.totalorder %v11886_v27, 0  ;;  %vm1970_vm9 = vcmp.gt.f32.partialorder %v1842_v56, 0.0  ;;  %v11891_v10 = vld [vmem:[#allocation26_spill] sm:$0xff]  ;;  %v11892_v11 = vld [vmem:[#allocation220_spill] sm:$0xff] }
 0x57c   :  { %v1718_v51 = vadd.f32 %v11891_v10, %v948_v31  ;;  %vm2738_vm12 = vmand %vm1970_vm9, %vm2610_vm7  ;;  %v5260_v18 = vld [vmem:[%s10932_s1 + $0xa8] sm:$0xff] }
 0x57d   :  { %vm1972_vm13 = vcmp.gt.f32.partialorder %v1844_v53, 0.0  ;;  %vm2739_vm14 = vmand %vm1971_vm11, %vm2611_vm8  ;;  %v182_v53 = vmul.f32 %v5260_v18, %v9060_v29  ;;  %v11901_v18 = vld [vmem:[#allocation287_spill] sm:$0xff] }
 0x57e   :  { %v3379_v17 = vsel %vm2739_vm14, %v8765_v54, -2.0  ;;  %vm2740_vm15 = vmand %vm1972_vm13, %vm2612_vm10  ;;  %v11894_v54 = vld [vmem:[#allocation273_spill] sm:$0xff]  ;;  %vm2615_vm3 = vcmp.ne.s32.totalorder %v11901_v18, 0 }
 0x57f   :  { %3548 = vperm.xlu1 %5105, %v3375_v63   ;;  %3553 = vperm.xlu2 %5103, %v3376_v46   ;;  %v949_v63 = vadd.f32 %v11888_v12, %v179_v1  ;;  %v1717_v46 = vadd.f32 %v11889_v21, %v947_v25  ;;  %v5259_v1 = vld [vmem:[%s10932_s1 + $0xa0] sm:$0xff]  ;;  %v3378_v25 = vsel %vm2738_vm12, %v8799_v35, -2.0  ;;  %v3380_v27 = vsel %vm2740_vm15, %v8815_v36, -2.0  ;;  %v11899_v36 = vld [vmem:[#allocation49_spill] sm:$0xff] }
 0x580   :  { %3558 = vperm.xlu0 %5104, %v3377_v7   ;;  %v5258_v7 = vld [vmem:[%s10932_s1 + $0x98] sm:$0xff]  ;;  %v181_v56 = vmul.f32 %v5259_v1, %v9060_v29  ;;  %v1846_v12 = vand.u32 2147483647, %v1718_v51  ;;  %vm2613_vm0 = vcmp.ne.s32.totalorder %v11894_v54, 0  ;;  %v11897_v1 = vld [vmem:[#allocation291_spill] sm:$0xff] }
 0x581   :  { %v9250_v28 = vpop.permute.xlu1 %3175  ;;  %v9252_v43 = vpop.permute.xlu2 %3195  ;;  %v180_v33 = vmul.f32 %v5258_v7, %v9060_v29  ;;  %v1719_v44 = vadd.f32 %v11892_v11, %v949_v63  ;;  %v1845_v31 = vand.u32 2147483647, %v1717_v46  ;;  %v11893_v63 = vld [vmem:[#allocation41_spill] sm:$0xff]  ;;  %v11896_v7 = vld [vmem:[#allocation23_spill] sm:$0xff]  ;;  %vm2614_vm1 = vcmp.ne.s32.totalorder %v11897_v1, 0 }
 0x582   :  { %11884 = vst [vmem:[#allocation382_spill] sm:$0xff] %v9250_v28  ;;  %v9256_v19 = vpop.permute.xlu0 %3173  ;;  %v951_v11 = vadd.f32 %v11896_v7, %v181_v56  ;;  %v11900_v51 = vld [vmem:[#allocation33_spill] sm:$0xff]  ;;  %vm1974_vm4 = vcmp.gt.f32.partialorder %v1846_v12, 0.0  ;;  %v5263_v7 = vld [vmem:[%s10932_s1 + $0xc0] sm:$0xff] }
 0x583   :  { %11887 = vst [vmem:[#allocation373_spill] sm:$0xff] %v9256_v19  ;;  %v950_v21 = vadd.f32 %v11893_v63, %v180_v33  ;;  %v1847_v37 = vand.u32 2147483647, %v1719_v44  ;;  %vm1973_vm2 = vcmp.gt.f32.partialorder %v1845_v31, 0.0  ;;  %v11902_v33 = vld [vmem:[#allocation32_spill] sm:$0xff]  ;;  %v11903_v63 = vld [vmem:[#allocation222_spill] sm:$0xff]  ;;  %vm2742_vm7 = vmand %vm1974_vm4, %vm2614_vm1 }
 0x584   :  { %v1721_v44 = vadd.f32 %v11902_v33, %v951_v11  ;;  %vm2741_vm5 = vmand %vm1973_vm2, %vm2613_vm0  ;;  %v3382_v12 = vsel %vm2742_vm7, %v8777_v4, -2.0  ;;  %v11905_v4 = vld [vmem:[#allocation276_spill] sm:$0xff]  ;;  %v12014_v19 = vld [vmem:[#allocation357_spill] sm:$0xff] }
 0x585   :  { %vm1975_vm6 = vcmp.gt.f32.partialorder %v1847_v37, 0.0  ;;  %v185_v37 = vmul.f32 %v5263_v7, %v9060_v29  ;;  %vm2616_vm9 = vcmp.ne.s32.totalorder %v11905_v4, 0  ;;  %v11913_v7 = vld [vmem:[#allocation293_spill] sm:$0xff] }
 0x586   :  { %vm2743_vm8 = vmand %vm1975_vm6, %vm2615_vm3  ;;  %vm2618_vm12 = vcmp.ne.s32.totalorder %v11913_v7, 0 }
 0x587   :  { %3563 = vperm.xlu1 %5105, %v3378_v25   ;;  %3568 = vperm.xlu2 %5103, %v3379_v17   ;;  %v952_v25 = vadd.f32 %v11899_v36, %v182_v53  ;;  %v1720_v17 = vadd.f32 %v11900_v51, %v950_v21  ;;  %v5262_v53 = vld [vmem:[%s10932_s1 + $0xb8] sm:$0xff]  ;;  %v3381_v21 = vsel %vm2741_vm5, %v8811_v2, -2.0  ;;  %v3383_v1 = vsel %vm2743_vm8, %v8827_v42, -2.0  ;;  %v11911_v42 = vld [vmem:[#allocation55_spill] sm:$0xff] }
 0x588   :  { %3573 = vperm.xlu0 %5104, %v3380_v27   ;;  %v5261_v27 = vld [vmem:[%s10932_s1 + $0xb0] sm:$0xff]  ;;  %v184_v31 = vmul.f32 %v5262_v53, %v9060_v29  ;;  %v1849_v36 = vand.u32 2147483647, %v1721_v44  ;;  %v11909_v53 = vld [vmem:[#allocation297_spill] sm:$0xff]  ;;  %v11912_v44 = vld [vmem:[#allocation39_spill] sm:$0xff] }
 0x589   :  { %v9280_v35 = vpop.permute.xlu1 %3181  ;;  %v9282_v10 = vpop.permute.xlu2 %3201  ;;  %v183_v56 = vmul.f32 %v5261_v27, %v9060_v29  ;;  %v1722_v54 = vadd.f32 %v11903_v63, %v952_v25  ;;  %v1848_v11 = vand.u32 2147483647, %v1720_v17  ;;  %v11904_v25 = vld [vmem:[#allocation47_spill] sm:$0xff]  ;;  %v11908_v27 = vld [vmem:[#allocation28_spill] sm:$0xff]  ;;  %vm2617_vm10 = vcmp.ne.s32.totalorder %v11909_v53, 0 }
 0x58a   :  { %11895 = vst [vmem:[#allocation380_spill] sm:$0xff] %v9280_v35  ;;  %v9286_v46 = vpop.permute.xlu0 %3179  ;;  %v954_v63 = vadd.f32 %v11908_v27, %v184_v31  ;;  %vm1977_vm13 = vcmp.gt.f32.partialorder %v1849_v36, 0.0  ;;  %v5266_v27 = vld [vmem:[%s10932_s1 + $0xd8] sm:$0xff] }
 0x58b   :  { %11898 = vst [vmem:[#allocation388_spill] sm:$0xff] %v9286_v46  ;;  %v953_v51 = vadd.f32 %v11904_v25, %v183_v56  ;;  %v1850_v18 = vand.u32 2147483647, %v1722_v54  ;;  %vm1976_vm11 = vcmp.gt.f32.partialorder %v1848_v11, 0.0  ;;  %v11914_v56 = vld [vmem:[#allocation38_spill] sm:$0xff]  ;;  %vm2745_vm0 = vmand %vm1977_vm13, %vm2617_vm10  ;;  %v12026_v46 = vld [vmem:[#allocation363_spill] sm:$0xff] }
 0x58c   :  { %v1724_v54 = vadd.f32 %v11914_v56, %v954_v63  ;;  %vm2744_vm14 = vmand %vm1976_vm11, %vm2616_vm9  ;;  %v11915_v25 = vld [vmem:[#allocation30_spill] sm:$0xff]  ;;  %v3385_v36 = vsel %vm2745_vm0, %v8789_v48, -2.0  ;;  %v11917_v48 = vld [vmem:[#allocation279_spill] sm:$0xff] }
 0x58d   :  { %vm1978_vm15 = vcmp.gt.f32.partialorder %v1850_v18, 0.0  ;;  %v188_v18 = vmul.f32 %v5266_v27, %v9060_v29  ;;  %vm2619_vm2 = vcmp.ne.s32.totalorder %v11917_v48, 0  ;;  %v11923_v27 = vld [vmem:[#allocation299_spill] sm:$0xff] }
 0x58e   :  { %vm2746_vm1 = vmand %vm1978_vm15, %vm2618_vm12  ;;  %vm2621_vm5 = vcmp.ne.s32.totalorder %v11923_v27, 0 }
 0x58f   :  { %3578 = vperm.xlu1 %5105, %v3381_v21   ;;  %3583 = vperm.xlu2 %5103, %v3382_v12   ;;  %v955_v21 = vadd.f32 %v11911_v42, %v185_v37  ;;  %v1723_v12 = vadd.f32 %v11912_v44, %v953_v51  ;;  %v5265_v37 = vld [vmem:[%s10932_s1 + $0xd0] sm:$0xff]  ;;  %v3384_v51 = vsel %vm2744_vm14, %v8823_v30, -2.0  ;;  %v3386_v53 = vsel %vm2746_vm1, %v8839_v22, -2.0  ;;  %v11921_v22 = vld [vmem:[#allocation61_spill] sm:$0xff] }
 0x590   :  { %3588 = vperm.xlu0 %5104, %v3383_v1   ;;  %v5264_v1 = vld [vmem:[%s10932_s1 + $0xc8] sm:$0xff]  ;;  %v187_v11 = vmul.f32 %v5265_v37, %v9060_v29  ;;  %v1852_v42 = vand.u32 2147483647, %v1724_v54  ;;  %v11922_v54 = vld [vmem:[#allocation45_spill] sm:$0xff] }
 0x591   :  { %v9310_v2 = vpop.permute.xlu1 %3187  ;;  %v9312_v33 = vpop.permute.xlu2 %3207  ;;  %v186_v31 = vmul.f32 %v5264_v1, %v9060_v29  ;;  %v1725_v4 = vadd.f32 %v11915_v25, %v955_v21  ;;  %v1851_v63 = vand.u32 2147483647, %v1723_v12  ;;  %v11916_v21 = vld [vmem:[#allocation53_spill] sm:$0xff]  ;;  %v11919_v1 = vld [vmem:[#allocation34_spill] sm:$0xff]  ;;  %v11920_v37 = vld [vmem:[#allocation303_spill] sm:$0xff] }
 0x592   :  { %11906 = vst [vmem:[#allocation379_spill] sm:$0xff] %v9310_v2  ;;  %v9316_v17 = vpop.permute.xlu0 %3185  ;;  %v957_v25 = vadd.f32 %v11919_v1, %v187_v11  ;;  %vm2620_vm3 = vcmp.ne.s32.totalorder %v11920_v37, 0  ;;  %vm1980_vm6 = vcmp.gt.f32.partialorder %v1852_v42, 0.0  ;;  %v5269_v1 = vld [vmem:[%s10932_s1 + $0xf0] sm:$0xff]  ;;  %v12050_v2 = vld [vmem:[#allocation106_spill] sm:$0xff] }
 0x593   :  { %11907 = vst [vmem:[#allocation386_spill] sm:$0xff] %v9312_v33  ;;  %v956_v44 = vadd.f32 %v11916_v21, %v186_v31  ;;  %v1853_v7 = vand.u32 2147483647, %v1725_v4  ;;  %vm1979_vm4 = vcmp.gt.f32.partialorder %v1851_v63, 0.0  ;;  %v11924_v31 = vld [vmem:[#allocation44_spill] sm:$0xff]  ;;  %vm2748_vm9 = vmand %vm1980_vm6, %vm2620_vm3  ;;  %v12002_v33 = vld [vmem:[#allocation351_spill] sm:$0xff] }
 0x594   :  { %11910 = vst [vmem:[#allocation394_spill] sm:$0xff] %v9316_v17  ;;  %v1727_v4 = vadd.f32 %v11924_v31, %v957_v25  ;;  %vm2747_vm7 = vmand %vm1979_vm4, %vm2619_vm2  ;;  %v11925_v21 = vld [vmem:[#allocation36_spill] sm:$0xff]  ;;  %v3388_v42 = vsel %vm2748_vm9, %v8801_v52, -2.0  ;;  %v11927_v52 = vld [vmem:[#allocation283_spill] sm:$0xff] }
 0x595   :  { %vm1981_vm8 = vcmp.gt.f32.partialorder %v1853_v7, 0.0  ;;  %v191_v7 = vmul.f32 %v5269_v1, %v9060_v29  ;;  %vm2622_vm11 = vcmp.ne.s32.totalorder %v11927_v52, 0  ;;  %v11933_v1 = vld [vmem:[#allocation305_spill] sm:$0xff] }
 0x596   :  { %vm2749_vm10 = vmand %vm1981_vm8, %vm2621_vm5  ;;  %vm2624_vm14 = vcmp.ne.s32.totalorder %v11933_v1, 0 }
 0x597   :  { %3593 = vperm.xlu1 %5105, %v3384_v51   ;;  %3598 = vperm.xlu2 %5103, %v3385_v36   ;;  %v958_v51 = vadd.f32 %v11921_v22, %v188_v18  ;;  %v1726_v36 = vadd.f32 %v11922_v54, %v956_v44  ;;  %v5268_v18 = vld [vmem:[%s10932_s1 + $0xe8] sm:$0xff]  ;;  %v3387_v44 = vsel %vm2747_vm7, %v8835_v6, -2.0  ;;  %v3389_v37 = vsel %vm2749_vm10, %v8851_v62, -2.0 }
 0x598   :  { %3603 = vperm.xlu0 %5104, %v3386_v53   ;;  %v5267_v53 = vld [vmem:[%s10932_s1 + $0xe0] sm:$0xff]  ;;  %v190_v63 = vmul.f32 %v5268_v18, %v9060_v29  ;;  %v1855_v22 = vand.u32 2147483647, %v1727_v4  ;;  %v11930_v18 = vld [vmem:[#allocation309_spill] sm:$0xff]  ;;  %v11931_v62 = vld [vmem:[#allocation67_spill] sm:$0xff] }
 0x599   :  { %v9340_v30 = vpop.permute.xlu1 %3193  ;;  %v9342_v56 = vpop.permute.xlu2 %3213  ;;  %v189_v11 = vmul.f32 %v5267_v53, %v9060_v29  ;;  %v1728_v48 = vadd.f32 %v11925_v21, %v958_v51  ;;  %v1854_v25 = vand.u32 2147483647, %v1726_v36  ;;  %v11926_v51 = vld [vmem:[#allocation59_spill] sm:$0xff]  ;;  %v11929_v53 = vld [vmem:[#allocation40_spill] sm:$0xff]  ;;  %vm2623_vm12 = vcmp.ne.s32.totalorder %v11930_v18, 0 }
 0x59a   :  { %11918 = vst [vmem:[#allocation385_spill] sm:$0xff] %v9342_v56  ;;  %v9346_v12 = vpop.permute.xlu0 %3191  ;;  %v960_v21 = vadd.f32 %v11929_v53, %v190_v63  ;;  %v11932_v4 = vld [vmem:[#allocation51_spill] sm:$0xff]  ;;  %vm1983_vm15 = vcmp.gt.f32.partialorder %v1855_v22, 0.0 }
 0x59b   :  { %v959_v54 = vadd.f32 %v11926_v51, %v189_v11  ;;  %v1856_v27 = vand.u32 2147483647, %v1728_v48  ;;  %vm1982_vm13 = vcmp.gt.f32.partialorder %v1854_v25, 0.0  ;;  %v11934_v11 = vld [vmem:[#allocation50_spill] sm:$0xff]  ;;  %vm2751_vm2 = vmand %vm1983_vm15, %vm2623_vm12  ;;  %v5272_v53 = vld [vmem:[%s10932_s1 + $0x108] sm:$0xff] }
 0x59c   :  { %v1730_v48 = vadd.f32 %v11934_v11, %v960_v21  ;;  %vm2750_vm0 = vmand %vm1982_vm13, %vm2622_vm11  ;;  %v11935_v51 = vld [vmem:[#allocation42_spill] sm:$0xff]  ;;  %v3391_v22 = vsel %vm2751_vm2, %v8813_v5, -2.0  ;;  %v11937_v5 = vld [vmem:[#allocation288_spill] sm:$0xff] }
 0x59d   :  { %vm1984_vm1 = vcmp.gt.f32.partialorder %v1856_v27, 0.0  ;;  %v194_v27 = vmul.f32 %v5272_v53, %v9060_v29  ;;  %vm2625_vm4 = vcmp.ne.s32.totalorder %v11937_v5, 0  ;;  %v11943_v53 = vld [vmem:[#allocation311_spill] sm:$0xff] }
 0x59e   :  { %vm2752_vm3 = vmand %vm1984_vm1, %vm2624_vm14  ;;  %vm2627_vm7 = vcmp.ne.s32.totalorder %v11943_v53, 0 }
 0x59f   :  { %3608 = vperm.xlu1 %5105, %v3387_v44   ;;  %3613 = vperm.xlu2 %5103, %v3388_v42   ;;  %v961_v44 = vadd.f32 %v11931_v62, %v191_v7  ;;  %v1729_v42 = vadd.f32 %v11932_v4, %v959_v54  ;;  %v5271_v7 = vld [vmem:[%s10932_s1 + $0x100] sm:$0xff]  ;;  %v3390_v54 = vsel %vm2750_vm0, %v8847_v57, -2.0  ;;  %v3392_v18 = vsel %vm2752_vm3, %v8863_v32, -2.0  ;;  %v11941_v32 = vld [vmem:[#allocation73_spill] sm:$0xff] }
 0x5a0   :  { %3618 = vperm.xlu0 %5104, %v3389_v37   ;;  %v5270_v37 = vld [vmem:[%s10932_s1 + $0xf8] sm:$0xff]  ;;  %v193_v25 = vmul.f32 %v5271_v7, %v9060_v29  ;;  %v1858_v62 = vand.u32 2147483647, %v1730_v48  ;;  %v11940_v7 = vld [vmem:[#allocation315_spill] sm:$0xff] }
 0x5a1   :  { %v9370_v6 = vpop.permute.xlu1 %3199  ;;  %v9372_v31 = vpop.permute.xlu2 %3219  ;;  %v192_v63 = vmul.f32 %v5270_v37, %v9060_v29  ;;  %v1731_v52 = vadd.f32 %v11935_v51, %v961_v44  ;;  %v1857_v21 = vand.u32 2147483647, %v1729_v42  ;;  %v11936_v44 = vld [vmem:[#allocation65_spill] sm:$0xff]  ;;  %v11939_v37 = vld [vmem:[#allocation46_spill] sm:$0xff]  ;;  %vm2626_vm5 = vcmp.ne.s32.totalorder %v11940_v7, 0 }
 0x5a2   :  { %11928 = vst [vmem:[#allocation392_spill] sm:$0xff] %v9372_v31  ;;  %v9376_v36 = vpop.permute.xlu0 %3197  ;;  %v963_v51 = vadd.f32 %v11939_v37, %v193_v25  ;;  %v11942_v48 = vld [vmem:[#allocation57_spill] sm:$0xff]  ;;  %vm1986_vm8 = vcmp.gt.f32.partialorder %v1858_v62, 0.0  ;;  %v5275_v37 = vld [vmem:[%s10932_s1 + $0x120] sm:$0xff] }
 0x5a3   :  { %v962_v4 = vadd.f32 %v11936_v44, %v192_v63  ;;  %v1859_v1 = vand.u32 2147483647, %v1731_v52  ;;  %vm1985_vm6 = vcmp.gt.f32.partialorder %v1857_v21, 0.0  ;;  %v11944_v63 = vld [vmem:[#allocation56_spill] sm:$0xff]  ;;  %vm2754_vm11 = vmand %vm1986_vm8, %vm2626_vm5 }
 0x5a4   :  { %v1733_v52 = vadd.f32 %v11944_v63, %v963_v51  ;;  %vm2753_vm9 = vmand %vm1985_vm6, %vm2625_vm4  ;;  %v11945_v44 = vld [vmem:[#allocation48_spill] sm:$0xff]  ;;  %v3394_v62 = vsel %vm2754_vm11, %v8825_v50, -2.0  ;;  %v11947_v50 = vld [vmem:[#allocation294_spill] sm:$0xff] }
 0x5a5   :  { %vm1987_vm10 = vcmp.gt.f32.partialorder %v1859_v1, 0.0  ;;  %v197_v1 = vmul.f32 %v5275_v37, %v9060_v29  ;;  %vm2628_vm13 = vcmp.ne.s32.totalorder %v11947_v50, 0  ;;  %v11954_v37 = vld [vmem:[#allocation317_spill] sm:$0xff] }
 0x5a6   :  { %vm2755_vm12 = vmand %vm1987_vm10, %vm2627_vm7  ;;  %vm2630_vm0 = vcmp.ne.s32.totalorder %v11954_v37, 0 }
 0x5a7   :  { %3623 = vperm.xlu1 %5105, %v3390_v54   ;;  %3628 = vperm.xlu2 %5103, %v3391_v22   ;;  %v964_v54 = vadd.f32 %v11941_v32, %v194_v27  ;;  %v1732_v22 = vadd.f32 %v11942_v48, %v962_v4  ;;  %v5274_v27 = vld [vmem:[%s10932_s1 + $0x118] sm:$0xff]  ;;  %v3393_v4 = vsel %vm2753_vm9, %v8859_v20, -2.0  ;;  %v3395_v7 = vsel %vm2755_vm12, %v8875_v58, -2.0  ;;  %v11952_v58 = vld [vmem:[#allocation79_spill] sm:$0xff] }
 0x5a8   :  { %3633 = vperm.xlu0 %5104, %v3392_v18   ;;  %v5273_v18 = vld [vmem:[%s10932_s1 + $0x110] sm:$0xff]  ;;  %v196_v21 = vmul.f32 %v5274_v27, %v9060_v29  ;;  %v1861_v32 = vand.u32 2147483647, %v1733_v52  ;;  %v11950_v27 = vld [vmem:[#allocation321_spill] sm:$0xff]  ;;  %v11953_v52 = vld [vmem:[#allocation63_spill] sm:$0xff] }
 0x5a9   :  { %v9400_v57 = vpop.permute.xlu1 %3205  ;;  %v9402_v11 = vpop.permute.xlu2 %3225  ;;  %v195_v25 = vmul.f32 %v5273_v18, %v9060_v29  ;;  %v1734_v5 = vadd.f32 %v11945_v44, %v964_v54  ;;  %v1860_v51 = vand.u32 2147483647, %v1732_v22  ;;  %v11946_v54 = vld [vmem:[#allocation71_spill] sm:$0xff]  ;;  %v11949_v18 = vld [vmem:[#allocation52_spill] sm:$0xff]  ;;  %vm2629_vm14 = vcmp.ne.s32.totalorder %v11950_v27, 0 }
 0x5aa   :  { %11938 = vst [vmem:[#allocation400_spill] sm:$0xff] %v9400_v57  ;;  %v9406_v42 = vpop.permute.xlu0 %3203  ;;  %v966_v44 = vadd.f32 %v11949_v18, %v196_v21  ;;  %vm1989_vm1 = vcmp.gt.f32.partialorder %v1861_v32, 0.0  ;;  %v5278_v18 = vld [vmem:[%s10932_s1 + $0x138] sm:$0xff]  ;;  %v12001_v57 = vld [vmem:[#allocation82_spill] sm:$0xff] }
 0x5ab   :  { %v965_v48 = vadd.f32 %v11946_v54, %v195_v25  ;;  %v1862_v53 = vand.u32 2147483647, %v1734_v5  ;;  %vm1988_vm15 = vcmp.gt.f32.partialorder %v1860_v51, 0.0  ;;  %v11955_v25 = vld [vmem:[#allocation62_spill] sm:$0xff]  ;;  %vm2757_vm4 = vmand %vm1989_vm1, %vm2629_vm14 }
 0x5ac   :  { %v1736_v5 = vadd.f32 %v11955_v25, %v966_v44  ;;  %vm2756_vm2 = vmand %vm1988_vm15, %vm2628_vm13  ;;  %v11956_v54 = vld [vmem:[#allocation54_spill] sm:$0xff]  ;;  %v3397_v32 = vsel %vm2757_vm4, %v8837_v14, -2.0  ;;  %v11958_v14 = vld [vmem:[#allocation300_spill] sm:$0xff] }
 0x5ad   :  { %vm1990_vm3 = vcmp.gt.f32.partialorder %v1862_v53, 0.0  ;;  %v200_v53 = vmul.f32 %v5278_v18, %v9060_v29  ;;  %vm2631_vm6 = vcmp.ne.s32.totalorder %v11958_v14, 0  ;;  %v11965_v18 = vld [vmem:[#allocation323_spill] sm:$0xff] }
 0x5ae   :  { %vm2758_vm5 = vmand %vm1990_vm3, %vm2630_vm0  ;;  %vm2633_vm9 = vcmp.ne.s32.totalorder %v11965_v18, 0 }
 0x5af   :  { %3638 = vperm.xlu1 %5105, %v3393_v4   ;;  %3643 = vperm.xlu2 %5103, %v3394_v62   ;;  %v967_v4 = vadd.f32 %v11952_v58, %v197_v1  ;;  %v1735_v62 = vadd.f32 %v11953_v52, %v965_v48  ;;  %v5277_v1 = vld [vmem:[%s10932_s1 + $0x130] sm:$0xff]  ;;  %v3396_v48 = vsel %vm2756_vm2, %v8871_v9, -2.0  ;;  %v3398_v27 = vsel %vm2758_vm5, %v8887_v26, -2.0  ;;  %v11963_v26 = vld [vmem:[#allocation85_spill] sm:$0xff] }
 0x5b0   :  { %3648 = vperm.xlu0 %5104, %v3395_v7   ;;  %v5276_v7 = vld [vmem:[%s10932_s1 + $0x128] sm:$0xff]  ;;  %v199_v51 = vmul.f32 %v5277_v1, %v9060_v29  ;;  %v1864_v58 = vand.u32 2147483647, %v1736_v5  ;;  %v11964_v5 = vld [vmem:[#allocation69_spill] sm:$0xff] }
 0x5b1   :  { %v9430_v20 = vpop.permute.xlu1 %3211  ;;  %v9432_v63 = vpop.permute.xlu2 %3231  ;;  %v198_v21 = vmul.f32 %v5276_v7, %v9060_v29  ;;  %v1737_v50 = vadd.f32 %v11956_v54, %v967_v4  ;;  %v1863_v44 = vand.u32 2147483647, %v1735_v62  ;;  %v11957_v4 = vld [vmem:[#allocation77_spill] sm:$0xff]  ;;  %v11960_v7 = vld [vmem:[#allocation58_spill] sm:$0xff]  ;;  %v11961_v1 = vld [vmem:[#allocation327_spill] sm:$0xff] }
 0x5b2   :  { %11948 = vst [vmem:[#allocation391_spill] sm:$0xff] %v9430_v20  ;;  %v9436_v22 = vpop.permute.xlu0 %3209  ;;  %v969_v54 = vadd.f32 %v11960_v7, %v199_v51  ;;  %vm2632_vm7 = vcmp.ne.s32.totalorder %v11961_v1, 0  ;;  %vm1992_vm10 = vcmp.gt.f32.partialorder %v1864_v58, 0.0  ;;  %v5281_v7 = vld [vmem:[%s10932_s1 + $0x150] sm:$0xff] }
 0x5b3   :  { %11951 = vst [vmem:[#allocation398_spill] sm:$0xff] %v9436_v22  ;;  %v968_v52 = vadd.f32 %v11957_v4, %v198_v21  ;;  %v1865_v37 = vand.u32 2147483647, %v1737_v50  ;;  %vm1991_vm8 = vcmp.gt.f32.partialorder %v1863_v44, 0.0  ;;  %v11966_v21 = vld [vmem:[#allocation68_spill] sm:$0xff]  ;;  %vm2760_vm13 = vmand %vm1992_vm10, %vm2632_vm7 }
 0x5b4   :  { %v1739_v50 = vadd.f32 %v11966_v21, %v969_v54  ;;  %vm2759_vm11 = vmand %vm1991_vm8, %vm2631_vm6  ;;  %v11967_v4 = vld [vmem:[#allocation60_spill] sm:$0xff]  ;;  %v3400_v58 = vsel %vm2760_vm13, %v8849_v0, -2.0  ;;  %v11969_v0 = vld [vmem:[#allocation306_spill] sm:$0xff] }
 0x5b5   :  { %vm1993_vm12 = vcmp.gt.f32.partialorder %v1865_v37, 0.0  ;;  %v203_v37 = vmul.f32 %v5281_v7, %v9060_v29  ;;  %vm2634_vm15 = vcmp.ne.s32.totalorder %v11969_v0, 0  ;;  %v11975_v7 = vld [vmem:[#allocation329_spill] sm:$0xff]  ;;  %v12013_v22 = vld [vmem:[#allocation88_spill] sm:$0xff] }
 0x5b6   :  { %vm2761_vm14 = vmand %vm1993_vm12, %vm2633_vm9  ;;  %vm2636_vm2 = vcmp.ne.s32.totalorder %v11975_v7, 0 }
 0x5b7   :  { %3653 = vperm.xlu1 %5105, %v3396_v48   ;;  %3658 = vperm.xlu2 %5103, %v3397_v32   ;;  %v970_v48 = vadd.f32 %v11963_v26, %v200_v53  ;;  %v1738_v32 = vadd.f32 %v11964_v5, %v968_v52  ;;  %v5280_v53 = vld [vmem:[%s10932_s1 + $0x148] sm:$0xff]  ;;  %v3399_v52 = vsel %vm2759_vm11, %v8883_v8, -2.0  ;;  %v3401_v1 = vsel %vm2761_vm14, %v8899_v60, -2.0 }
 0x5b8   :  { %3663 = vperm.xlu0 %5104, %v3398_v27   ;;  %v5279_v27 = vld [vmem:[%s10932_s1 + $0x140] sm:$0xff]  ;;  %v202_v44 = vmul.f32 %v5280_v53, %v9060_v29  ;;  %v1867_v26 = vand.u32 2147483647, %v1739_v50  ;;  %v11972_v53 = vld [vmem:[#allocation333_spill] sm:$0xff]  ;;  %v11973_v60 = vld [vmem:[#allocation91_spill] sm:$0xff] }
 0x5b9   :  { %v9460_v9 = vpop.permute.xlu1 %3217  ;;  %v9462_v25 = vpop.permute.xlu2 %3498  ;;  %v201_v51 = vmul.f32 %v5279_v27, %v9060_v29  ;;  %v1740_v14 = vadd.f32 %v11967_v4, %v970_v48  ;;  %v1866_v54 = vand.u32 2147483647, %v1738_v32  ;;  %v11968_v48 = vld [vmem:[#allocation83_spill] sm:$0xff]  ;;  %v11971_v27 = vld [vmem:[#allocation64_spill] sm:$0xff]  ;;  %vm2635_vm0 = vcmp.ne.s32.totalorder %v11972_v53, 0 }
 0x5ba   :  { %11959 = vst [vmem:[#allocation406_spill] sm:$0xff] %v9460_v9  ;;  %v9466_v62 = vpop.permute.xlu0 %3215  ;;  %v972_v4 = vadd.f32 %v11971_v27, %v202_v44  ;;  %v11974_v50 = vld [vmem:[#allocation75_spill] sm:$0xff]  ;;  %vm1995_vm3 = vcmp.gt.f32.partialorder %v1867_v26, 0.0  ;;  %v12039_v9 = vld [vmem:[#allocation369_spill] sm:$0xff] }
 0x5bb   :  { %11962 = vst [vmem:[#allocation397_spill] sm:$0xff] %v9466_v62  ;;  %v971_v5 = vadd.f32 %v11968_v48, %v201_v51  ;;  %v1868_v18 = vand.u32 2147483647, %v1740_v14  ;;  %vm1994_vm1 = vcmp.gt.f32.partialorder %v1866_v54, 0.0  ;;  %v11976_v51 = vld [vmem:[#allocation74_spill] sm:$0xff]  ;;  %vm2763_vm6 = vmand %vm1995_vm3, %vm2635_vm0  ;;  %v5284_v27 = vld [vmem:[%s10932_s1 + $0x168] sm:$0xff] }
 0x5bc   :  { %v1742_v14 = vadd.f32 %v11976_v51, %v972_v4  ;;  %vm2762_vm4 = vmand %vm1994_vm1, %vm2634_vm15  ;;  %v11977_v48 = vld [vmem:[#allocation66_spill] sm:$0xff]  ;;  %v3403_v26 = vsel %vm2763_vm6, %v8861_v38, -2.0  ;;  %v11979_v38 = vld [vmem:[#allocation312_spill] sm:$0xff] }
 0x5bd   :  { %vm1996_vm5 = vcmp.gt.f32.partialorder %v1868_v18, 0.0  ;;  %v206_v18 = vmul.f32 %v5284_v27, %v9060_v29  ;;  %vm2637_vm8 = vcmp.ne.s32.totalorder %v11979_v38, 0  ;;  %v11984_v27 = vld [vmem:[#allocation335_spill] sm:$0xff]  ;;  %v12025_v62 = vld [vmem:[#allocation94_spill] sm:$0xff] }
 0x5be   :  { %vm2764_vm7 = vmand %vm1996_vm5, %vm2636_vm2  ;;  %vm2639_vm11 = vcmp.ne.s32.totalorder %v11984_v27, 0 }
 0x5bf   :  { %3668 = vperm.xlu1 %5105, %v3399_v52   ;;  %3673 = vperm.xlu2 %5103, %v3400_v58   ;;  %v973_v52 = vadd.f32 %v11973_v60, %v203_v37  ;;  %v1741_v58 = vadd.f32 %v11974_v50, %v971_v5  ;;  %v5283_v37 = vld [vmem:[%s10932_s1 + $0x160] sm:$0xff]  ;;  %v3402_v5 = vsel %vm2762_vm4, %v8895_v39, -2.0  ;;  %v3404_v53 = vsel %vm2764_vm7, %v8911_v15, -2.0  ;;  %v11982_v15 = vld [vmem:[#allocation97_spill] sm:$0xff] }
 0x5c0   :  { %3678 = vperm.xlu0 %5104, %v3401_v1   ;;  %v5282_v1 = vld [vmem:[%s10932_s1 + $0x158] sm:$0xff]  ;;  %v205_v54 = vmul.f32 %v5283_v37, %v9060_v29  ;;  %v1870_v60 = vand.u32 2147483647, %v1742_v14  ;;  %v11981_v37 = vld [vmem:[#allocation339_spill] sm:$0xff] }
 0x5c1   :  { %v9490_v8 = vpop.permute.xlu1 %3223  ;;  %v9492_v21 = vpop.permute.xlu2 %3513  ;;  %v204_v44 = vmul.f32 %v5282_v1, %v9060_v29  ;;  %v1743_v0 = vadd.f32 %v11977_v48, %v973_v52  ;;  %v1869_v4 = vand.u32 2147483647, %v1741_v58  ;;  %v11978_v52 = vld [vmem:[#allocation89_spill] sm:$0xff]  ;;  %v11980_v1 = vld [vmem:[#allocation70_spill] sm:$0xff]  ;;  %vm2638_vm9 = vcmp.ne.s32.totalorder %v11981_v37, 0 }
 0x5c2   :  { %11970 = vst [vmem:[#allocation404_spill] sm:$0xff] %v9490_v8  ;;  %v9496_v32 = vpop.permute.xlu0 %3221  ;;  %v975_v48 = vadd.f32 %v11980_v1, %v205_v54  ;;  %v11983_v14 = vld [vmem:[#allocation81_spill] sm:$0xff]  ;;  %vm1998_vm12 = vcmp.gt.f32.partialorder %v1870_v60, 0.0  ;;  %v5287_v1 = vld [vmem:[%s10932_s1 + $0x180] sm:$0xff]  ;;  %v12133_v8 = vld [vmem:[#allocation411_spill] sm:$0xff] }
 0x5c3   :  { %v974_v50 = vadd.f32 %v11978_v52, %v204_v44  ;;  %v1871_v7 = vand.u32 2147483647, %v1743_v0  ;;  %vm1997_vm10 = vcmp.gt.f32.partialorder %v1869_v4, 0.0  ;;  %v11985_v44 = vld [vmem:[#allocation80_spill] sm:$0xff]  ;;  %vm2766_vm15 = vmand %vm1998_vm12, %vm2638_vm9 }
 0x5c4   :  { %v1745_v0 = vadd.f32 %v11985_v44, %v975_v48  ;;  %vm2765_vm13 = vmand %vm1997_vm10, %vm2637_vm8  ;;  %v11986_v52 = vld [vmem:[#allocation72_spill] sm:$0xff]  ;;  %v3406_v60 = vsel %vm2766_vm15, %v8873_v61, -2.0  ;;  %v11988_v61 = vld [vmem:[#allocation318_spill] sm:$0xff] }
 0x5c5   :  { %vm1999_vm14 = vcmp.gt.f32.partialorder %v1871_v7, 0.0  ;;  %v209_v7 = vmul.f32 %v5287_v1, %v9060_v29  ;;  %vm2640_vm1 = vcmp.ne.s32.totalorder %v11988_v61, 0  ;;  %v11993_v1 = vld [vmem:[#allocation341_spill] sm:$0xff] }
 0x5c6   :  { %vm2767_vm0 = vmand %vm1999_vm14, %vm2639_vm11  ;;  %vm2642_vm4 = vcmp.ne.s32.totalorder %v11993_v1, 0  ;;  %vm2644_vm11 = vcmp.ne.s32.totalorder %v12002_v33, 0  ;;  %v12007_v33 = vld [vmem:[#allocation84_spill] sm:$0xff] }
 0x5c7   :  { %3683 = vperm.xlu1 %5105, %v3402_v5   ;;  %3688 = vperm.xlu2 %5103, %v3403_v26   ;;  %v976_v5 = vadd.f32 %v11982_v15, %v206_v18  ;;  %v1744_v26 = vadd.f32 %v11983_v14, %v974_v50  ;;  %v5286_v18 = vld [vmem:[%s10932_s1 + $0x178] sm:$0xff]  ;;  %v3405_v50 = vsel %vm2765_vm13, %v8907_v3, -2.0  ;;  %v3407_v37 = vsel %vm2767_vm0, %v8923_v49, -2.0  ;;  %v11991_v49 = vld [vmem:[#allocation103_spill] sm:$0xff] }
 0x5c8   :  { %3693 = vperm.xlu0 %5104, %v3404_v53   ;;  %v5285_v53 = vld [vmem:[%s10932_s1 + $0x170] sm:$0xff]  ;;  %v208_v4 = vmul.f32 %v5286_v18, %v9060_v29  ;;  %v1873_v15 = vand.u32 2147483647, %v1745_v0  ;;  %v11990_v18 = vld [vmem:[#allocation345_spill] sm:$0xff]  ;;  %v11992_v0 = vld [vmem:[#allocation87_spill] sm:$0xff] }
 0x5c9   :  { %v9520_v39 = vpop.permute.xlu1 %3229  ;;  %v9522_v51 = vpop.permute.xlu2 %3523  ;;  %v207_v54 = vmul.f32 %v5285_v53, %v9060_v29  ;;  %v1746_v38 = vadd.f32 %v11986_v52, %v976_v5  ;;  %v1872_v48 = vand.u32 2147483647, %v1744_v26  ;;  %v11987_v5 = vld [vmem:[#allocation95_spill] sm:$0xff]  ;;  %v11989_v53 = vld [vmem:[#allocation76_spill] sm:$0xff]  ;;  %vm2641_vm2 = vcmp.ne.s32.totalorder %v11990_v18, 0  ;;  %v5290_v18 = vld [vmem:[%s10932_s1 + $0x198] sm:$0xff] }
 0x5ca   :  { %v9526_v58 = vpop.permute.xlu0 %3227  ;;  %v978_v52 = vadd.f32 %v11989_v53, %v208_v4  ;;  %vm2001_vm5 = vcmp.gt.f32.partialorder %v1873_v15, 0.0  ;;  %v11996_v15 = vld [vmem:[#allocation280_spill] sm:$0xff] }
 0x5cb   :  { %v977_v14 = vadd.f32 %v11987_v5, %v207_v54  ;;  %v1874_v27 = vand.u32 2147483647, %v1746_v38  ;;  %vm2000_vm3 = vcmp.gt.f32.partialorder %v1872_v48, 0.0  ;;  %v11994_v54 = vld [vmem:[#allocation86_spill] sm:$0xff]  ;;  %vm2769_vm8 = vmand %vm2001_vm5, %vm2641_vm2  ;;  %v11997_v53 = vld [vmem:[#allocation284_spill] sm:$0xff] }
 0x5cc   :  { %v1748_v38 = vadd.f32 %v11994_v54, %v978_v52  ;;  %vm2768_vm6 = vmand %vm2000_vm3, %vm2640_vm1  ;;  %v11995_v5 = vld [vmem:[#allocation78_spill] sm:$0xff]  ;;  %v11999_v54 = vld [vmem:[#allocation101_spill] sm:$0xff] }
 0x5cd   :  { %vm2002_vm7 = vcmp.gt.f32.partialorder %v1874_v27, 0.0  ;;  %v3408_v52 = vsel %vm2768_vm6, %v11997_v53, -2.0  ;;  %v212_v27 = vmul.f32 %v5290_v18, %v9060_v29  ;;  %v12003_v18 = vld [vmem:[#allocation109_spill] sm:$0xff] }
 0x5ce   :  { %vm2770_vm9 = vmand %vm2002_vm7, %vm2642_vm4  ;;  %v1876_v1 = vand.u32 2147483647, %v1748_v38  ;;  %v12004_v38 = vld [vmem:[#allocation93_spill] sm:$0xff]  ;;  %vm2647_vm4 = vcmp.ne.s32.totalorder %v12014_v19, 0  ;;  %v12019_v19 = vld [vmem:[#allocation90_spill] sm:$0xff] }
 0x5cf   :  { %3698 = vperm.xlu1 %5105, %v3405_v50   ;;  %3703 = vperm.xlu2 %5103, %v3406_v60   ;;  %v979_v50 = vadd.f32 %v11991_v49, %v209_v7  ;;  %v1747_v60 = vadd.f32 %v11992_v0, %v977_v14  ;;  %v5289_v7 = vld [vmem:[%s10932_s1 + $0x190] sm:$0xff]  ;;  %v3409_v14 = vsel %vm2769_vm8, %v11996_v15, -2.0 }
 0x5d0   :  { %3708 = vperm.xlu0 %5104, %v3407_v37   ;;  %v5288_v37 = vld [vmem:[%s10932_s1 + $0x188] sm:$0xff]  ;;  %v211_v48 = vmul.f32 %v5289_v7, %v9060_v29  ;;  %v12000_v7 = vld [vmem:[#allocation324_spill] sm:$0xff]  ;;  %vm2004_vm14 = vcmp.gt.f32.partialorder %v1876_v1, 0.0  ;;  %v12008_v1 = vld [vmem:[#allocation285_spill] sm:$0xff] }
 0x5d1   :  { %v9550_v3 = vpop.permute.xlu1 %3235  ;;  %v9552_v44 = vpop.permute.xlu2 %3538  ;;  %v210_v4 = vmul.f32 %v5288_v37, %v9060_v29  ;;  %v1749_v61 = vadd.f32 %v11995_v5, %v979_v50  ;;  %v1875_v49 = vand.u32 2147483647, %v1747_v60  ;;  %v11998_v50 = vld [vmem:[#allocation296_spill] sm:$0xff]  ;;  %vm2643_vm10 = vcmp.ne.s32.totalorder %v12000_v7, 0  ;;  %vm2772_vm1 = vmand %vm2004_vm14, %vm2644_vm11 }
 0x5d2   :  { %v9556_v26 = vpop.permute.xlu0 %3233  ;;  %v3410_v0 = vsel %vm2770_vm9, %v11998_v50, -2.0  ;;  %v981_v28 = vadd.f32 %v12001_v57, %v211_v48  ;;  %v12005_v50 = vld [vmem:[#allocation347_spill] sm:$0xff]  ;;  %v5293_v7 = vld [vmem:[%s10932_s1 + $0x1b0] sm:$0xff] }
 0x5d3   :  { %v980_v37 = vadd.f32 %v11999_v54, %v210_v4  ;;  %v1877_v5 = vand.u32 2147483647, %v1749_v61  ;;  %vm2003_vm12 = vcmp.gt.f32.partialorder %v1875_v49, 0.0  ;;  %vm2645_vm13 = vcmp.ne.s32.totalorder %v12005_v50, 0  ;;  %v12006_v4 = vld [vmem:[#allocation92_spill] sm:$0xff] }
 0x5d4   :  { %v1751_v61 = vadd.f32 %v12006_v4, %v981_v28  ;;  %vm2771_vm15 = vmand %vm2003_vm12, %vm2643_vm10  ;;  %v3412_v54 = vsel %vm2772_vm1, %v12008_v1, -2.0  ;;  %v12009_v28 = vld [vmem:[#allocation298_spill] sm:$0xff]  ;;  %v12011_v4 = vld [vmem:[#allocation107_spill] sm:$0xff] }
 0x5d5   :  { %vm2005_vm0 = vcmp.gt.f32.partialorder %v1877_v5, 0.0  ;;  %v215_v5 = vmul.f32 %v5293_v7, %v9060_v29  ;;  %v12015_v7 = vld [vmem:[#allocation115_spill] sm:$0xff] }
 0x5d6   :  { %vm2773_vm2 = vmand %vm2005_vm0, %vm2645_vm13  ;;  %v1879_v50 = vand.u32 2147483647, %v1751_v61  ;;  %v12016_v61 = vld [vmem:[#allocation99_spill] sm:$0xff]  ;;  %vm2650_vm13 = vcmp.ne.s32.totalorder %v12026_v46, 0  ;;  %v12031_v46 = vld [vmem:[#allocation96_spill] sm:$0xff] }
 0x5d7   :  { %3713 = vperm.xlu1 %5105, %v3408_v52   ;;  %3718 = vperm.xlu2 %5103, %v3409_v14   ;;  %v982_v52 = vadd.f32 %v12003_v18, %v212_v27  ;;  %v1750_v14 = vadd.f32 %v12004_v38, %v980_v37  ;;  %v5292_v27 = vld [vmem:[%s10932_s1 + $0x1a8] sm:$0xff]  ;;  %v3411_v37 = vsel %vm2771_vm15, %v12009_v28, -2.0 }
 0x5d8   :  { %3723 = vperm.xlu0 %5104, %v3410_v0   ;;  %v5291_v0 = vld [vmem:[%s10932_s1 + $0x1a0] sm:$0xff]  ;;  %v214_v49 = vmul.f32 %v5292_v27, %v9060_v29  ;;  %vm2007_vm7 = vcmp.gt.f32.partialorder %v1879_v50, 0.0  ;;  %v12020_v50 = vld [vmem:[#allocation292_spill] sm:$0xff] }
 0x5d9   :  { %v9580_v15 = vpop.permute.xlu1 %3508  ;;  %v9582_v53 = vpop.permute.xlu2 %3553  ;;  %v213_v57 = vmul.f32 %v5291_v0, %v9060_v29  ;;  %v1752_v48 = vadd.f32 %v12007_v33, %v982_v52  ;;  %v1878_v18 = vand.u32 2147483647, %v1750_v14  ;;  %v12010_v52 = vld [vmem:[#allocation302_spill] sm:$0xff]  ;;  %vm2775_vm10 = vmand %vm2007_vm7, %vm2647_vm4 }
 0x5da   :  { %v9586_v60 = vpop.permute.xlu0 %3503  ;;  %v3413_v38 = vsel %vm2773_vm2, %v12010_v52, -2.0  ;;  %v12012_v27 = vld [vmem:[#allocation330_spill] sm:$0xff]  ;;  %v984_v20 = vadd.f32 %v12013_v22, %v214_v49  ;;  %v12017_v52 = vld [vmem:[#allocation353_spill] sm:$0xff] }
 0x5db   :  { %v983_v0 = vadd.f32 %v12011_v4, %v213_v57  ;;  %v1880_v33 = vand.u32 2147483647, %v1752_v48  ;;  %vm2646_vm3 = vcmp.ne.s32.totalorder %v12012_v27, 0  ;;  %vm2006_vm5 = vcmp.gt.f32.partialorder %v1878_v18, 0.0  ;;  %v12018_v57 = vld [vmem:[#allocation98_spill] sm:$0xff]  ;;  %v5296_v27 = vld [vmem:[%s10932_s1 + $0x1c8] sm:$0xff] }
 0x5dc   :  { %vm2648_vm6 = vcmp.ne.s32.totalorder %v12017_v52, 0  ;;  %v1754_v48 = vadd.f32 %v12018_v57, %v984_v20  ;;  %vm2774_vm8 = vmand %vm2006_vm5, %vm2646_vm3  ;;  %v3415_v4 = vsel %vm2775_vm10, %v12020_v50, -2.0  ;;  %v12021_v20 = vld [vmem:[#allocation304_spill] sm:$0xff]  ;;  %v12023_v57 = vld [vmem:[#allocation113_spill] sm:$0xff] }
 0x5dd   :  { %vm2008_vm9 = vcmp.gt.f32.partialorder %v1880_v33, 0.0  ;;  %v218_v33 = vmul.f32 %v5296_v27, %v9060_v29  ;;  %v12027_v27 = vld [vmem:[#allocation121_spill] sm:$0xff] }
 0x5de   :  { %vm2776_vm11 = vmand %vm2008_vm9, %vm2648_vm6  ;;  %v1882_v52 = vand.u32 2147483647, %v1754_v48  ;;  %v12028_v48 = vld [vmem:[#allocation105_spill] sm:$0xff]  ;;  %vm2653_vm6 = vcmp.ne.s32.totalorder %v12039_v9, 0  ;;  %v12043_v9 = vld [vmem:[#allocation102_spill] sm:$0xff] }
 0x5df   :  { %3728 = vperm.xlu1 %5105, %v3411_v37   ;;  %3733 = vperm.xlu2 %5103, %v3412_v54   ;;  %v985_v37 = vadd.f32 %v12015_v7, %v215_v5  ;;  %v1753_v54 = vadd.f32 %v12016_v61, %v983_v0  ;;  %v5295_v5 = vld [vmem:[%s10932_s1 + $0x1c0] sm:$0xff]  ;;  %v3414_v0 = vsel %vm2774_vm8, %v12021_v20, -2.0 }
 0x5e0   :  { %3738 = vperm.xlu0 %5104, %v3413_v38   ;;  %v5294_v38 = vld [vmem:[%s10932_s1 + $0x1b8] sm:$0xff]  ;;  %v217_v18 = vmul.f32 %v5295_v5, %v9060_v29  ;;  %v12024_v5 = vld [vmem:[#allocation336_spill] sm:$0xff]  ;;  %vm2010_vm0 = vcmp.gt.f32.partialorder %v1882_v52, 0.0 }
 0x5e1   :  { %v9610_v1 = vpop.permute.xlu1 %3518  ;;  %v9612_v28 = vpop.permute.xlu2 %3568  ;;  %v216_v22 = vmul.f32 %v5294_v38, %v9060_v29  ;;  %v1755_v49 = vadd.f32 %v12019_v19, %v985_v37  ;;  %v1881_v7 = vand.u32 2147483647, %v1753_v54  ;;  %v12022_v37 = vld [vmem:[#allocation308_spill] sm:$0xff]  ;;  %vm2649_vm12 = vcmp.ne.s32.totalorder %v12024_v5, 0  ;;  %vm2778_vm3 = vmand %vm2010_vm0, %vm2650_vm13  ;;  %v12033_v5 = vld [vmem:[#allocation310_spill] sm:$0xff] }
 0x5e2   :  { %v9616_v14 = vpop.permute.xlu0 %3528  ;;  %v3416_v61 = vsel %vm2776_vm11, %v12022_v37, -2.0  ;;  %v987_v47 = vadd.f32 %v12025_v62, %v217_v18  ;;  %v12029_v37 = vld [vmem:[#allocation359_spill] sm:$0xff] }
 0x5e3   :  { %v986_v38 = vadd.f32 %v12023_v57, %v216_v22  ;;  %v1883_v19 = vand.u32 2147483647, %v1755_v49  ;;  %vm2009_vm14 = vcmp.gt.f32.partialorder %v1881_v7, 0.0  ;;  %vm2651_vm15 = vcmp.ne.s32.totalorder %v12029_v37, 0  ;;  %v5297_v22 = vld [vmem:[%s10932_s1 + $0x1d0] sm:$0xff]  ;;  %v12032_v57 = vld [vmem:[#allocation290_spill] sm:$0xff] }
 0x5e4   :  { %v219_v49 = vmul.f32 %v5297_v22, %v9060_v29  ;;  %vm2777_vm1 = vmand %vm2009_vm14, %vm2649_vm12  ;;  %v12035_v37 = vld [vmem:[#allocation119_spill] sm:$0xff] }
 0x5e5   :  { %vm2011_vm2 = vcmp.gt.f32.partialorder %v1883_v19, 0.0 }
 0x5e6   :  { %vm2779_vm4 = vmand %vm2011_vm2, %vm2651_vm15  ;;  %v989_v22 = vadd.f32 %v12035_v37, %v219_v49  ;;  %v5300_v49 = vld [vmem:[%s10932_s1 + $0x1e8] sm:$0xff] }
 0x5e7   :  { %3743 = vperm.xlu1 %5105, %v3414_v0   ;;  %3748 = vperm.xlu2 %5103, %v3415_v4   ;;  %v988_v0 = vadd.f32 %v12027_v27, %v218_v33  ;;  %v1756_v4 = vadd.f32 %v12028_v48, %v986_v38  ;;  %v5298_v33 = vld [vmem:[%s10932_s1 + $0x1d8] sm:$0xff]  ;;  %v3418_v38 = vsel %vm2778_vm3, %v12032_v57, -2.0  ;;  %v3417_v27 = vsel %vm2777_vm1, %v12033_v5, -2.0 }
 0x5e8   :  { %3753 = vperm.xlu0 %5104, %v3416_v61   ;;  %v12030_v61 = vld [vmem:[#allocation104_spill] sm:$0xff]  ;;  %v220_v7 = vmul.f32 %v5298_v33, %v9060_v29  ;;  %v12036_v33 = vld [vmem:[#allocation342_spill] sm:$0xff]  ;;  %v3493_v57 = vlaneseq }
 0x5e9   :  { %v9640_v50 = vpop.permute.xlu1 %3533  ;;  %v9642_v20 = vpop.permute.xlu2 %3583  ;;  %v1757_v62 = vadd.f32 %v12030_v61, %v987_v47  ;;  %v1758_v18 = vadd.f32 %v12031_v46, %v988_v0  ;;  %v5299_v47 = vld [vmem:[%s10932_s1 + $0x1e0] sm:$0xff]  ;;  %v1884_v19 = vand.u32 2147483647, %v1756_v4  ;;  %vm2652_vm5 = vcmp.ne.s32.totalorder %v12036_v33, 0 }
 0x5ea   :  { %v9646_v54 = vpop.permute.xlu0 %3543  ;;  %v221_v52 = vmul.f32 %v5299_v47, %v9060_v29  ;;  %v12034_v0 = vld [vmem:[#allocation314_spill] sm:$0xff]  ;;  %v990_v56 = vadd.f32 %v12037_v34, %v220_v7  ;;  %v12038_v47 = vld [vmem:[#allocation111_spill] sm:$0xff]  ;;  %v3494_v37 = vand.u32 127, %v3493_v57 }
 0x5eb   :  { %v3419_v48 = vsel %vm2779_vm4, %v12034_v0, -2.0  ;;  %v1885_v61 = vand.u32 2147483647, %v1757_v62  ;;  %v1886_v46 = vand.u32 2147483647, %v1758_v18  ;;  %v1759_v4 = vadd.f32 %v12038_v47, %v989_v22  ;;  %v12040_v18 = vld [vmem:[#allocation127_spill] sm:$0xff] }
 0x5ec   :  { %v222_v62 = vmul.f32 %v5300_v49, %v9060_v29  ;;  %vm2012_vm7 = vcmp.gt.f32.partialorder %v1884_v19, 0.0  ;;  %v12041_v0 = vld [vmem:[#allocation365_spill] sm:$0xff]  ;;  %v5301_v22 = vld [vmem:[%s10932_s1 + $0x1f0] sm:$0xff] }
 0x5ed   :  { %vm2654_vm8 = vcmp.ne.s32.totalorder %v12041_v0, 0  ;;  %vm2013_vm9 = vcmp.gt.f32.partialorder %v1885_v61, 0.0  ;;  %vm2780_vm10 = vmand %vm2012_vm7, %vm2652_vm5  ;;  %vm2014_vm11 = vcmp.gt.f32.partialorder %v1886_v46, 0.0  ;;  %v1887_v19 = vand.u32 2147483647, %v1759_v4  ;;  %v12044_v47 = vld [vmem:[#allocation289_spill] sm:$0xff] }
 0x5ee   :  { %vm2781_vm12 = vmand %vm2013_vm9, %vm2653_vm6  ;;  %v12045_v61 = vld [vmem:[#allocation316_spill] sm:$0xff]  ;;  %v5302_v46 = vld [vmem:[%s10932_s1 + $0x1f8] sm:$0xff] }
 0x5ef   :  { %3758 = vperm.xlu1 %5105, %v3417_v27   ;;  %3763 = vperm.xlu2 %5103, %v3418_v38   ;;  %v991_v38 = vadd.f32 %v12040_v18, %v221_v52  ;;  %v223_v52 = vmul.f32 %v5301_v22, %v9060_v29  ;;  %v3421_v49 = vsel %vm2781_vm12, %v12044_v47, -2.0  ;;  %v3420_v18 = vsel %vm2780_vm10, %v12045_v61, -2.0  ;;  %vm2782_vm13 = vmand %vm2014_vm11, %vm2654_vm8  ;;  %v12049_v22 = vld [vmem:[#allocation117_spill] sm:$0xff] }
 0x5f0   :  { %3768 = vperm.xlu0 %5104, %v3419_v48   ;;  %v12042_v48 = vld [vmem:[#allocation110_spill] sm:$0xff]  ;;  %v224_v57 = vmul.f32 %v5302_v46, %v9060_v29  ;;  %v9703_v61 = vcvt.s32.f32 %v3494_v37  ;;  %vm2015_vm15 = vcmp.gt.f32.partialorder %v1887_v19, 0.0  ;;  %v12051_v46 = vld [vmem:[#allocation375_spill] sm:$0xff]  ;;  %v12056_v19 = vld [vmem:[#allocation116_spill] sm:$0xff] }
 0x5f1   :  { %v9670_v5 = vpop.permute.xlu1 %3548  ;;  %v9672_v35 = vpop.permute.xlu2 %3598  ;;  %v1760_v34 = vadd.f32 %v12042_v48, %v990_v56  ;;  %v1761_v7 = vadd.f32 %v12043_v9, %v991_v38  ;;  %v12046_v56 = vld [vmem:[#allocation125_spill] sm:$0xff]  ;;  %v12047_v38 = vld [vmem:[#allocation320_spill] sm:$0xff]  ;;  %v993_v31 = vadd.f32 %v12050_v2, %v223_v52  ;;  %vm2656_vm0 = vcmp.ne.s32.totalorder %v12051_v46, 0  ;;  %v5303_v2 = vld [vmem:[%s10932_s1 + $0x208] sm:$0xff] }
 0x5f2   :  { %v9677_v27 = vpop.permute.xlu0 %3558  ;;  %v992_v33 = vadd.f32 %v12046_v56, %v222_v62  ;;  %v3422_v0 = vsel %vm2782_vm13, %v12047_v38, -2.0  ;;  %v12048_v9 = vld [vmem:[#allocation348_spill] sm:$0xff]  ;;  %vm4150_vm3 = vcmp.eq.f32.partialorder %v9612_v28, %v9703_v61  ;;  %v5304_v37 = vld [vmem:[%s10932_s1 + $0x200] sm:$0xff] }
 0x5f3   :  { %v1888_v48 = vand.u32 2147483647, %v1760_v34  ;;  %vm2655_vm14 = vcmp.ne.s32.totalorder %v12048_v9, 0  ;;  %v1889_v4 = vand.u32 2147483647, %v1761_v7  ;;  %v12053_v34 = vld [vmem:[#allocation371_spill] sm:$0xff]  ;;  %v226_v7 = vmul.f32 %v5303_v2, %v9060_v29 }
 0x5f4   :  { %v1762_v47 = vadd.f32 %v12049_v22, %v992_v33  ;;  %vm2657_vm1 = vcmp.ne.s32.totalorder %v12053_v34, 0  ;;  %vm9711_vm2 = vmand %vm2015_vm15, %vm2655_vm14  ;;  %v225_v52 = vmul.f32 %v5304_v37, %v9060_v29  ;;  %v1763_v33 = vadd.f32 %v12056_v19, %v993_v31  ;;  %v12057_v28 = vld [vmem:[#allocation108_spill] sm:$0xff]  ;;  %v12059_v2 = vld [vmem:[#allocation322_spill] sm:$0xff] }
 0x5f5   :  { %vm2016_vm5 = vcmp.gt.f32.partialorder %v1888_v48, 0.0  ;;  %vm2017_vm7 = vcmp.gt.f32.partialorder %v1889_v4, 0.0  ;;  %v11117_v22 = vmov 1.0|1.0   ;;  %v3423_v48 = vsel %vm9711_vm2, %v12059_v2, -2.0  ;;  %v5305_v31 = vld [vmem:[%s10932_s1 + $0x210] sm:$0xff] }
 0x5f6   :  { %v1890_v9 = vand.u32 2147483647, %v1762_v47  ;;  %vm2784_vm8 = vmand %vm2016_vm5, %vm2656_vm0  ;;  %v227_v4 = vmul.f32 %v5305_v31, %v9060_v29  ;;  %v12060_v47 = vld [vmem:[#allocation354_spill] sm:$0xff]  ;;  %vm4148_vm12 = vcmp.eq.f32.partialorder %v9677_v27, %v9703_v61  ;;  %v1891_v19 = vand.u32 2147483647, %v1763_v33  ;;  %v12063_v34 = vld [vmem:[#allocation112_spill] sm:$0xff] }
 0x5f7   :  { %3773 = vperm.xlu1 %5105, %v3420_v18   ;;  %3778 = vperm.xlu2 %5103, %v3421_v49   ;;  %v12052_v18 = vld [vmem:[#allocation133_spill] sm:$0xff]  ;;  %vm2785_vm10 = vmand %vm2017_vm7, %vm2657_vm1  ;;  %vm2658_vm11 = vcmp.ne.s32.totalorder %v12060_v47, 0  ;;  %v12061_v46 = vld [vmem:[#allocation326_spill] sm:$0xff]  ;;  %vm4146_vm15 = vcmp.eq.f32.partialorder %v9670_v5, %v9703_v61  ;;  %vm4153_vm2 = vcmp.eq.f32.partialorder %v9642_v20, %v9703_v61  ;;  %vm4147_vm5 = vcmp.eq.f32.partialorder %v9582_v53, %v9703_v61 }
 0x5f8   :  { %3783 = vperm.xlu0 %5104, %v3422_v0   ;;  %v994_v49 = vadd.f32 %v12052_v18, %v224_v57  ;;  %v12062_v0 = vld [vmem:[#allocation131_spill] sm:$0xff]  ;;  %vm2018_vm14 = vcmp.gt.f32.partialorder %v1890_v9, 0.0  ;;  %v12069_v9 = vld [vmem:[#allocation377_spill] sm:$0xff]  ;;  %vm2019_vm7 = vcmp.gt.f32.partialorder %v1891_v19, 0.0 }
 0x5f9   :  { %v3564_v62 = vpop.permute.xlu1 %3563  ;;  %v9705_v56 = vpop.permute.xlu2 %3613  ;;  %v995_v37 = vadd.f32 %v12062_v0, %v225_v52  ;;  %v12065_v52 = vld [vmem:[#allocation381_spill] sm:$0xff]  ;;  %vm9759_vm1 = vmand %vm2018_vm14, %vm2658_vm11  ;;  %v12068_v33 = vld [vmem:[#allocation139_spill] sm:$0xff]  ;;  %vm4145_vm11 = vcmp.eq.f32.partialorder %v9646_v54, %v9703_v61 }
 0x5fa   :  { %v3574_v38 = vpop.permute.xlu0 %3573  ;;  %v1764_v57 = vadd.f32 %v12057_v28, %v994_v49  ;;  %vm4149_vm9 = vcmp.eq.f32.partialorder %v3564_v62, %v9703_v61  ;;  %v3425_v49 = vsel %vm2785_vm10, %v12061_v46, -2.0  ;;  %v996_v28 = vadd.f32 %v12063_v34, %v226_v7  ;;  %v5306_v47 = vld [vmem:[%s10932_s1 + $0x218] sm:$0xff]  ;;  %v12072_v46 = vld [vmem:[#allocation122_spill] sm:$0xff] }
 0x5fb   :  { %vm4151_vm4 = vcmp.eq.f32.partialorder %v3574_v38, %v9703_v61  ;;  %v12058_v38 = vld [vmem:[#allocation295_spill] sm:$0xff]  ;;  %vm4951_vm13 = vmpackc.low %vm4149_vm9, %vm4148_vm12  ;;  %vm2659_vm0 = vcmp.ne.s32.totalorder %v12065_v52, 0  ;;  %v228_v20 = vmul.f32 %v5306_v47, %v9060_v29  ;;  %v5307_v0 = vld [vmem:[%s10932_s1 + $0x220] sm:$0xff] }
 0x5fc   :  { %vm4949_vm6 = vmpackc.low %vm4151_vm4, %vm4150_vm3  ;;  %v3424_v18 = vsel %vm2784_vm8, %v12058_v38, -2.0  ;;  %v1892_v38 = vand.u32 2147483647, %v1764_v57  ;;  %v997_v57 = vadd.f32 %v12068_v33, %v227_v4  ;;  %vm2660_vm4 = vcmp.ne.s32.totalorder %v12069_v9, 0  ;;  %v12073_v4 = vld [vmem:[#allocation114_spill] sm:$0xff]  ;;  %v12074_v5 = vld [vmem:[#allocation301_spill] sm:$0xff] }
 0x5fd   :  { %4950 = vmatpush.bf16.msk.msra.mxu0 %vm4949_vm6, %v11117_v22  ;;  %vm4953_vm8 = vmpackc.low %vm4147_vm5, %vm4146_vm15  ;;  %v12076_v52 = vld [vmem:[#allocation332_spill] sm:$0xff]  ;;  %vm4142_vm5 = vcmp.eq.f32.partialorder %v9616_v14, %v9703_v61  ;;  %v5310_v14 = vld [vmem:[%s10932_s1 + $0x238] sm:$0xff] }
 0x5fe   :  { %vm2020_vm9 = vcmp.gt.f32.partialorder %v1892_v38, 0.0  ;;  %v1767_v53 = vadd.f32 %v12073_v4, %v997_v57  ;;  %vm2787_vm10 = vmand %vm2019_vm7, %vm2659_vm0  ;;  %v12078_v47 = vld [vmem:[#allocation360_spill] sm:$0xff]  ;;  %vm4143_vm0 = vcmp.eq.f32.partialorder %v9640_v50, %v9703_v61  ;;  %v12079_v4 = vld [vmem:[#allocation118_spill] sm:$0xff]  ;;  %v232_v50 = vmul.f32 %v5310_v14, %v9060_v29 }
 0x5ff   :  { %3788 = vperm.xlu1 %5105, %v3423_v48   ;;  %3793 = vperm.xlu2 %5103, %v3424_v18   ;;  %v12064_v18 = vld [vmem:[#allocation123_spill] sm:$0xff]  ;;  %v3427_v34 = vsel %vm2787_vm10, %v12074_v5, -2.0  ;;  %vm2788_vm12 = vmand %vm2020_vm9, %vm2660_vm4  ;;  %vm2661_vm14 = vcmp.ne.s32.totalorder %v12078_v47, 0  ;;  %v12089_v47 = vld [vmem:[#allocation334_spill] sm:$0xff] }
 0x600   :  { %3798 = vperm.xlu0 %5104, %v3425_v49   ;;  %v1765_v48 = vadd.f32 %v12064_v18, %v995_v37  ;;  %v1766_v49 = vadd.f32 %v12072_v46, %v996_v28  ;;  %v229_v37 = vmul.f32 %v5307_v0, %v9060_v29  ;;  %v12075_v28 = vld [vmem:[#allocation328_spill] sm:$0xff]  ;;  %v3428_v33 = vsel %vm2788_vm12, %v12076_v52, -2.0  ;;  %v12081_v5 = vld [vmem:[#allocation387_spill] sm:$0xff] }
 0x601   :  { %4952 = vmatpush.bf16.msk.msra.mxu0 %vm4951_vm13, %v11117_v22  ;;  %v3579_v2 = vpop.permute.xlu1 %3578  ;;  %v9753_v27 = vpop.permute.xlu2 %3628  ;;  %v3426_v38 = vsel %vm9759_vm1, %v12075_v28, -2.0  ;;  %vm4144_vm13 = vcmp.eq.f32.partialorder %v9552_v44, %v9703_v61  ;;  %v1895_v9 = vand.u32 2147483647, %v1767_v53  ;;  %v12083_v28 = vld [vmem:[#allocation383_spill] sm:$0xff]  ;;  %v12087_v52 = vld [vmem:[#allocation120_spill] sm:$0xff] }
 0x602   :  { %vm4152_vm3 = vcmp.eq.f32.partialorder %v3579_v2, %v9703_v61  ;;  %v9766_v7 = vpop.permute.xlu0 %3588  ;;  %v1893_v19 = vand.u32 2147483647, %v1765_v48  ;;  %v5308_v2 = vld [vmem:[%s10932_s1 + $0x228] sm:$0xff]  ;;  %v12077_v48 = vld [vmem:[#allocation137_spill] sm:$0xff]  ;;  %v1894_v62 = vand.u32 2147483647, %v1766_v49  ;;  %vm4955_vm15 = vmpackc.low %vm4145_vm11, %vm4144_vm13  ;;  %vm4140_vm11 = vcmp.eq.f32.partialorder %v9610_v1, %v9703_v61 }
 0x603   :  { %vm9772_vm6 = vmpackc.low %vm4153_vm2, %vm4152_vm3  ;;  %v230_v18 = vmul.f32 %v5308_v2, %v9060_v29  ;;  %v998_v57 = vadd.f32 %v12077_v48, %v228_v20  ;;  %v999_v20 = vadd.f32 %v12079_v4, %v229_v37  ;;  %v12080_v49 = vld [vmem:[#allocation129_spill] sm:$0xff]  ;;  %vm2662_vm2 = vcmp.ne.s32.totalorder %v12081_v5, 0  ;;  %v12086_v37 = vld [vmem:[#allocation128_spill] sm:$0xff] }
 0x604   :  { %vm2021_vm1 = vcmp.gt.f32.partialorder %v1893_v19, 0.0  ;;  %vm2663_vm3 = vcmp.ne.s32.totalorder %v12083_v28, 0  ;;  %vm2022_vm7 = vcmp.gt.f32.partialorder %v1894_v62, 0.0  ;;  %v5309_v2 = vld [vmem:[%s10932_s1 + $0x230] sm:$0xff]  ;;  %vm2023_vm9 = vcmp.gt.f32.partialorder %v1895_v9, 0.0  ;;  %v5311_v4 = vld [vmem:[%s10932_s1 + $0x240] sm:$0xff] }
 0x605   :  { %4954 = vmatpush.bf16.msk.msra.mxu0 %vm4953_vm8, %v11117_v22  ;;  %v1768_v0 = vadd.f32 %v12080_v49, %v998_v57  ;;  %vm9828_vm4 = vmand %vm2021_vm1, %vm2661_vm14  ;;  %v1769_v19 = vadd.f32 %v12086_v37, %v999_v20  ;;  %v12088_v57 = vld [vmem:[#allocation307_spill] sm:$0xff]  ;;  %v233_v20 = vmul.f32 %v5311_v4, %v9060_v29  ;;  %v12090_v49 = vld [vmem:[#allocation338_spill] sm:$0xff]  ;;  %vm4141_vm13 = vcmp.eq.f32.partialorder %v9522_v51, %v9703_v61 }
 0x606   :  { %vm4957_vm8 = vmpackc.low %vm4143_vm0, %vm4142_vm5  ;;  %v3429_v9 = vsel %vm9828_vm4, %v12089_v47, -2.0  ;;  %vm4138_vm0 = vcmp.eq.f32.partialorder %v9580_v15, %v9703_v61  ;;  %v12095_v14 = vld [vmem:[#allocation151_spill] sm:$0xff]  ;;  %vm4139_vm5 = vcmp.eq.f32.partialorder %v9492_v21, %v9703_v61  ;;  %v5313_v21 = vld [vmem:[%s10932_s1 + $0x250] sm:$0xff] }
 0x607   :  { %3803 = vperm.xlu1 %5105, %v3426_v38   ;;  %3808 = vperm.xlu2 %5103, %v3427_v34   ;;  %v12082_v34 = vld [vmem:[#allocation145_spill] sm:$0xff]  ;;  %vm2790_vm10 = vmand %vm2022_vm7, %vm2662_vm2  ;;  %v1896_v48 = vand.u32 2147483647, %v1768_v0  ;;  %v1897_v0 = vand.u32 2147483647, %v1769_v19  ;;  %v12093_v19 = vld [vmem:[#allocation124_spill] sm:$0xff]  ;;  %v235_v15 = vmul.f32 %v5313_v21, %v9060_v29 }
 0x608   :  { %3813 = vperm.xlu0 %5104, %v3428_v33   ;;  %v1000_v53 = vadd.f32 %v12082_v34, %v230_v18  ;;  %v231_v18 = vmul.f32 %v5309_v2, %v9060_v29  ;;  %v3430_v62 = vsel %vm2790_vm10, %v12088_v57, -2.0  ;;  %vm2791_vm12 = vmand %vm2023_vm9, %vm2663_vm3  ;;  %v12091_v34 = vld [vmem:[#allocation366_spill] sm:$0xff]  ;;  %v1002_v2 = vadd.f32 %v12093_v19, %v232_v50  ;;  %v12106_v47 = vld [vmem:[#allocation372_spill] sm:$0xff] }
 0x609   :  { %4956 = vmatpush.bf16.msk.msra.mxu0 %vm4955_vm15, %v11117_v22  ;;  %v9815_v46 = vpop.permute.xlu1 %3593  ;;  %v9817_v44 = vpop.permute.xlu2 %3643  ;;  %v3431_v5 = vsel %vm2791_vm12, %v12090_v49, -2.0  ;;  %vm2664_vm14 = vcmp.ne.s32.totalorder %v12091_v34, 0  ;;  %vm4959_vm15 = vmpackc.low %vm4141_vm13, %vm4140_vm11  ;;  %vm2024_vm1 = vcmp.gt.f32.partialorder %v1896_v48, 0.0  ;;  %v1003_v57 = vadd.f32 %v12095_v14, %v233_v20  ;;  %v12100_v50 = vld [vmem:[#allocation134_spill] sm:$0xff]  ;;  %v12103_v34 = vld [vmem:[#allocation340_spill] sm:$0xff] }
 0x60a   :  { %v9822_v54 = vpop.permute.xlu0 %3603  ;;  %v1770_v33 = vadd.f32 %v12087_v52, %v1000_v53  ;;  %v12092_v53 = vld [vmem:[#allocation143_spill] sm:$0xff]  ;;  %v12094_v52 = vld [vmem:[#allocation393_spill] sm:$0xff]  ;;  %vm9884_vm4 = vmand %vm2024_vm1, %vm2664_vm14  ;;  %vm2025_vm7 = vcmp.gt.f32.partialorder %v1897_v0, 0.0  ;;  %v1772_v48 = vadd.f32 %v12100_v50, %v1002_v2  ;;  %vm4137_vm11 = vcmp.eq.f32.partialorder %v9586_v60, %v9703_v61 }
 0x60b   :  { %v1001_v28 = vadd.f32 %v12092_v53, %v231_v18  ;;  %vm2665_vm2 = vcmp.ne.s32.totalorder %v12094_v52, 0  ;;  %v12096_v18 = vld [vmem:[#allocation135_spill] sm:$0xff]  ;;  %v12101_v20 = vld [vmem:[#allocation126_spill] sm:$0xff]  ;;  %v3432_v53 = vsel %vm9884_vm4, %v12103_v34, -2.0  ;;  %v12104_v2 = vld [vmem:[#allocation344_spill] sm:$0xff]  ;;  %vm4136_vm13 = vcmp.eq.f32.partialorder %v9462_v25, %v9703_v61 }
 0x60c   :  { %v1898_v38 = vand.u32 2147483647, %v1770_v33  ;;  %v1773_v49 = vadd.f32 %v12101_v20, %v1003_v57  ;;  %vm2793_vm10 = vmand %vm2025_vm7, %vm2665_vm2  ;;  %v1900_v14 = vand.u32 2147483647, %v1772_v48  ;;  %v12105_v57 = vld [vmem:[#allocation149_spill] sm:$0xff]  ;;  %v12107_v25 = vld [vmem:[#allocation130_spill] sm:$0xff] }
 0x60d   :  { %4958 = vmatpush.bf16.msk.msra.mxu0 %vm4957_vm8, %v11117_v22  ;;  %v1771_v33 = vadd.f32 %v12096_v18, %v1001_v28  ;;  %vm4961_vm8 = vmpackc.low %vm4139_vm5, %vm4138_vm0  ;;  %v5314_v28 = vld [vmem:[%s10932_s1 + $0x258] sm:$0xff]  ;;  %v5315_v48 = vld [vmem:[%s10932_s1 + $0x260] sm:$0xff] }
 0x60e   :  { %vm2026_vm9 = vcmp.gt.f32.partialorder %v1898_v38, 0.0  ;;  %v236_v38 = vmul.f32 %v5314_v28, %v9060_v29  ;;  %vm4963_vm14 = vmpackc.low %vm4137_vm11, %vm4136_vm13  ;;  %v237_v60 = vmul.f32 %v5315_v48, %v9060_v29  ;;  %v12108_v20 = vld [vmem:[#allocation399_spill] sm:$0xff]  ;;  %v12113_v28 = vld [vmem:[#allocation132_spill] sm:$0xff] }
 0x60f   :  { %3818 = vperm.xlu1 %5105, %v3429_v9   ;;  %3823 = vperm.xlu2 %5103, %v3430_v62   ;;  %v12097_v62 = vld [vmem:[#allocation389_spill] sm:$0xff]  ;;  %v5312_v9 = vld [vmem:[%s10932_s1 + $0x248] sm:$0xff]  ;;  %v1899_v19 = vand.u32 2147483647, %v1771_v33  ;;  %vm2668_vm0 = vcmp.ne.s32.totalorder %v12108_v20, 0  ;;  %v12117_v20 = vld [vmem:[#allocation350_spill] sm:$0xff] }
 0x610   :  { %3828 = vperm.xlu0 %5104, %v3431_v5   ;;  %vm2666_vm3 = vcmp.ne.s32.totalorder %v12097_v62, 0  ;;  %v234_v4 = vmul.f32 %v5312_v9, %v9060_v29  ;;  %v12102_v5 = vld [vmem:[#allocation313_spill] sm:$0xff]  ;;  %v1901_v62 = vand.u32 2147483647, %v1773_v49  ;;  %v1005_v9 = vadd.f32 %v12107_v25, %v235_v15  ;;  %v12111_v34 = vld [vmem:[#allocation395_spill] sm:$0xff] }
 0x611   :  { %4960 = vmatpush.bf16.msk.msra.mxu0 %vm4959_vm15, %v11117_v22  ;;  %v9871_v37 = vpop.permute.xlu1 %3608  ;;  %v9873_v51 = vpop.permute.xlu2 %3658  ;;  %v3433_v0 = vsel %vm2793_vm10, %v12102_v5, -2.0  ;;  %vm2794_vm12 = vmand %vm2026_vm9, %vm2666_vm3  ;;  %vm2667_vm15 = vcmp.ne.s32.totalorder %v12106_v47, 0  ;;  %v12109_v49 = vld [vmem:[#allocation157_spill] sm:$0xff]  ;;  %vm2027_vm1 = vcmp.gt.f32.partialorder %v1899_v19, 0.0  ;;  %vm2669_vm2 = vcmp.ne.s32.totalorder %v12111_v34, 0  ;;  %v12114_v19 = vld [vmem:[#allocation319_spill] sm:$0xff] }
 0x612   :  { %v9877_v1 = vpop.permute.xlu0 %3618  ;;  %v3434_v52 = vsel %vm2794_vm12, %v12104_v2, -2.0  ;;  %v1004_v18 = vadd.f32 %v12105_v57, %v234_v4  ;;  %v1006_v21 = vadd.f32 %v12109_v49, %v236_v38  ;;  %v12110_v5 = vld [vmem:[#allocation141_spill] sm:$0xff]  ;;  %vm2028_vm3 = vcmp.gt.f32.partialorder %v1900_v14, 0.0  ;;  %vm2795_vm4 = vmand %vm2027_vm1, %vm2667_vm15  ;;  %v12116_v14 = vld [vmem:[#allocation155_spill] sm:$0xff] }
 0x613   :  { %vm2029_vm5 = vcmp.gt.f32.partialorder %v1901_v62, 0.0  ;;  %vm2796_vm7 = vmand %vm2028_vm3, %vm2668_vm0  ;;  %v5317_v62 = vld [vmem:[%s10932_s1 + $0x270] sm:$0xff]  ;;  %v12118_v34 = vld [vmem:[#allocation147_spill] sm:$0xff] }
 0x614   :  { %v1776_v2 = vadd.f32 %v12113_v28, %v1006_v21  ;;  %v3436_v57 = vsel %vm2796_vm7, %v12114_v19, -2.0  ;;  %v239_v47 = vmul.f32 %v5317_v62, %v9060_v29  ;;  %v12119_v28 = vld [vmem:[#allocation378_spill] sm:$0xff]  ;;  %v12120_v19 = vld [vmem:[#allocation136_spill] sm:$0xff]  ;;  %v12122_v62 = vld [vmem:[#allocation163_spill] sm:$0xff] }
 0x615   :  { %4962 = vmatpush.bf16.msk.msra.mxu0 %vm4961_vm8, %v11117_v22  ;;  %vm2797_vm8 = vmand %vm2029_vm5, %vm2669_vm2  ;;  %vm2670_vm9 = vcmp.ne.s32.totalorder %v12119_v28, 0 }
 0x616   :  { %v3437_v49 = vsel %vm2797_vm8, %v12117_v20, -2.0  ;;  %v1009_v20 = vadd.f32 %v12122_v62, %v239_v47  ;;  %v12125_v47 = vld [vmem:[#allocation138_spill] sm:$0xff]  ;;  %v12127_v62 = vld [vmem:[#allocation352_spill] sm:$0xff] }
 0x617   :  { %3833 = vperm.xlu1 %5105, %v3432_v53   ;;  %3838 = vperm.xlu2 %5103, %v3433_v0   ;;  %v1774_v0 = vadd.f32 %v12110_v5, %v1004_v18  ;;  %v12112_v53 = vld [vmem:[#allocation140_spill] sm:$0xff]  ;;  %v12115_v18 = vld [vmem:[#allocation346_spill] sm:$0xff]  ;;  %v1904_v5 = vand.u32 2147483647, %v1776_v2 }
 0x618   :  { %3843 = vperm.xlu0 %5104, %v3434_v52   ;;  %v1775_v15 = vadd.f32 %v12112_v53, %v1005_v9  ;;  %v5316_v52 = vld [vmem:[%s10932_s1 + $0x268] sm:$0xff]  ;;  %v3435_v25 = vsel %vm2795_vm4, %v12115_v18, -2.0  ;;  %v1007_v9 = vadd.f32 %v12116_v14, %v237_v60  ;;  %v12121_v14 = vld [vmem:[#allocation405_spill] sm:$0xff]  ;;  %vm2674_vm4 = vcmp.ne.s32.totalorder %v12133_v8, 0  ;;  %v5323_v8 = vld [vmem:[%s10932_s1 + $0x2a0] sm:$0xff] }
 0x619   :  { %4964 = vmatpush.bf16.msk.msra.mxu0 %vm4963_vm14, %v11117_v22  ;;  %v9925_v33 = vpop.permute.xlu1 %3623  ;;  %v9927_v50 = vpop.permute.xlu2 %3673  ;;  %v238_v38 = vmul.f32 %v5316_v52, %v9060_v29  ;;  %v1902_v48 = vand.u32 2147483647, %v1774_v0  ;;  %vm2671_vm10 = vcmp.ne.s32.totalorder %v12121_v14, 0  ;;  %vm2032_vm15 = vcmp.gt.f32.partialorder %v1904_v5, 0.0  ;;  %v12128_v5 = vld [vmem:[#allocation384_spill] sm:$0xff] }
 0x61a   :  { %v9935_v4 = vpop.permute.xlu0 %3633  ;;  %v1903_v21 = vand.u32 2147483647, %v1775_v15  ;;  %v1777_v53 = vadd.f32 %v12118_v34, %v1007_v9  ;;  %v5318_v15 = vld [vmem:[%s10932_s1 + $0x280] sm:$0xff]  ;;  %vm2673_vm2 = vcmp.ne.s32.totalorder %v12128_v5, 0 }
 0x61b   :  { %v1008_v18 = vadd.f32 %v12120_v19, %v238_v38  ;;  %vm2030_vm11 = vcmp.gt.f32.partialorder %v1902_v48, 0.0  ;;  %v241_v2 = vmul.f32 %v5318_v15, %v9060_v29  ;;  %v5319_v38 = vld [vmem:[%s10932_s1 + $0x278] sm:$0xff]  ;;  %v1779_v48 = vadd.f32 %v12125_v47, %v1009_v20  ;;  %v12129_v20 = vld [vmem:[#allocation356_spill] sm:$0xff] }
 0x61c   :  { %vm2031_vm13 = vcmp.gt.f32.partialorder %v1903_v21, 0.0  ;;  %vm2798_vm14 = vmand %vm2030_vm11, %vm2670_vm9  ;;  %v1905_v34 = vand.u32 2147483647, %v1777_v53  ;;  %v5320_v21 = vld [vmem:[%s10932_s1 + $0x288] sm:$0xff]  ;;  %v12126_v19 = vld [vmem:[#allocation325_spill] sm:$0xff] }
 0x61d   :  { %vm2799_vm0 = vmand %vm2031_vm13, %vm2671_vm10  ;;  %v242_v28 = vmul.f32 %v5320_v21, %v9060_v29  ;;  %v3438_v15 = vsel %vm2798_vm14, %v12127_v62, -2.0  ;;  %v12131_v47 = vld [vmem:[#allocation161_spill] sm:$0xff]  ;;  %v1907_v21 = vand.u32 2147483647, %v1779_v48  ;;  %v12132_v62 = vld [vmem:[#allocation167_spill] sm:$0xff]  ;;  %vm4168_vm10 = vcmp.eq.f32.partialorder %v9873_v51, %v9703_v61 }
 0x61e   :  { %vm2033_vm3 = vcmp.gt.f32.partialorder %v1905_v34, 0.0  ;;  %v12137_v48 = vld [vmem:[#allocation407_spill] sm:$0xff]  ;;  %v12138_v34 = vld [vmem:[#allocation152_spill] sm:$0xff] }
 0x61f   :  { %3848 = vperm.xlu1 %5105, %v3435_v25   ;;  %3853 = vperm.xlu2 %5103, %v3436_v57   ;;  %v12123_v57 = vld [vmem:[#allocation401_spill] sm:$0xff]  ;;  %v12124_v25 = vld [vmem:[#allocation146_spill] sm:$0xff]  ;;  %vm9994_vm5 = vmand %vm2033_vm3, %vm2673_vm2  ;;  %vm2675_vm9 = vcmp.ne.s32.totalorder %v12137_v48, 0  ;;  %vm4165_vm3 = vcmp.eq.f32.partialorder %v9817_v44, %v9703_v61 }
 0x620   :  { %3858 = vperm.xlu0 %5104, %v3437_v49   ;;  %vm2672_vm12 = vcmp.ne.s32.totalorder %v12123_v57, 0  ;;  %v1778_v9 = vadd.f32 %v12124_v25, %v1008_v18  ;;  %v240_v49 = vmul.f32 %v5319_v38, %v9060_v29  ;;  %v3439_v18 = vsel %vm2799_vm0, %v12126_v19, -2.0  ;;  %v12130_v25 = vld [vmem:[#allocation142_spill] sm:$0xff] }
 0x621   :  { %v9958_v52 = vpop.permute.xlu1 %3638  ;;  %v9960_v60 = vpop.permute.xlu2 %3688  ;;  %vm2800_vm1 = vmand %vm2032_vm15, %vm2672_vm12  ;;  %v1011_v38 = vadd.f32 %v12130_v25, %v241_v2  ;;  %v1012_v57 = vadd.f32 %v12132_v62, %v242_v28  ;;  %vm2035_vm0 = vcmp.gt.f32.partialorder %v1907_v21, 0.0  ;;  %v12143_v25 = vld [vmem:[#allocation331_spill] sm:$0xff]  ;;  %v245_v21 = vmul.f32 %v5323_v8, %v9060_v29  ;;  %v12146_v44 = vld [vmem:[#allocation166_spill] sm:$0xff] }
 0x622   :  { %v3649_v0 = vpop.permute.xlu0 %3648  ;;  %v3440_v53 = vsel %vm2800_vm1, %v12129_v20, -2.0  ;;  %v1906_v14 = vand.u32 2147483647, %v1778_v9  ;;  %v1010_v22 = vadd.f32 %v12131_v47, %v240_v49  ;;  %v12136_v9 = vld [vmem:[#allocation153_spill] sm:$0xff]  ;;  %vm4164_vm14 = vcmp.eq.f32.partialorder %v9958_v52, %v9703_v61  ;;  %v12144_v47 = vld [vmem:[#allocation358_spill] sm:$0xff]  ;;  %vm2803_vm2 = vmand %vm2035_vm0, %vm2675_vm9 }
 0x623   :  { %vm4166_vm7 = vcmp.eq.f32.partialorder %v3649_v0, %v9703_v61  ;;  %v1781_v28 = vadd.f32 %v12138_v34, %v1011_v38  ;;  %v12147_v34 = vld [vmem:[#allocation390_spill] sm:$0xff]  ;;  %v12148_v52 = vld [vmem:[#allocation148_spill] sm:$0xff]  ;;  %vm4162_vm9 = vcmp.eq.f32.partialorder %v9753_v27, %v9703_v61  ;;  %vm4161_vm0 = vcmp.eq.f32.partialorder %v9925_v33, %v9703_v61  ;;  %v5324_v27 = vld [vmem:[%s10932_s1 + $0x2a8] sm:$0xff] }
 0x624   :  { %v1780_v49 = vadd.f32 %v12136_v9, %v1010_v22  ;;  %vm2034_vm13 = vcmp.gt.f32.partialorder %v1906_v14, 0.0  ;;  %v5321_v22 = vld [vmem:[%s10932_s1 + $0x290] sm:$0xff]  ;;  %v12162_v33 = vld [vmem:[#allocation154_spill] sm:$0xff]  ;;  %v5348_v0 = vld [vmem:[%s10932_s1 + $0x348] sm:$0xff] }
 0x625   :  { %v243_v51 = vmul.f32 %v5321_v22, %v9060_v29  ;;  %vm2802_vm1 = vmand %vm2034_vm13, %vm2674_vm4  ;;  %v1909_v5 = vand.u32 2147483647, %v1781_v28 }
 0x626   :  { %v3442_v38 = vsel %vm2802_vm1, %v12143_v25, -2.0  ;;  %v1908_v62 = vand.u32 2147483647, %v1780_v49  ;;  %vm4969_vm4 = vmpackc.low %vm4165_vm3, %vm4164_vm14  ;;  %v12150_v25 = vld [vmem:[#allocation170_spill] sm:$0xff] }
 0x627   :  { %3863 = vperm.xlu1 %5105, %v3438_v15   ;;  %3868 = vperm.xlu2 %5103, %v3439_v18   ;;  %v12141_v18 = vmov 1.0|1.0   ;;  %v12142_v15 = vld [vmem:[#allocation144_spill] sm:$0xff]  ;;  %v1013_v9 = vadd.f32 %v12146_v44, %v243_v51  ;;  %vm2037_vm13 = vcmp.gt.f32.partialorder %v1909_v5, 0.0  ;;  %v12157_v5 = vld [vmem:[#allocation337_spill] sm:$0xff] }
 0x628   :  { %3873 = vperm.xlu0 %5104, %v3440_v53   ;;  %v1782_v20 = vadd.f32 %v12142_v15, %v1012_v57  ;;  %v5322_v53 = vld [vmem:[%s10932_s1 + $0x298] sm:$0xff]  ;;  %v12145_v57 = vld [vmem:[#allocation362_spill] sm:$0xff]  ;;  %v12151_v51 = vld [vmem:[#allocation224_spill] sm:$0xff] }
 0x629   :  { %v3654_v19 = vpop.permute.xlu1 %3653  ;;  %v9990_v17 = vpop.permute.xlu2 %3703  ;;  %v244_v14 = vmul.f32 %v5322_v53, %v9060_v29  ;;  %v12149_v53 = vld [vmem:[#allocation417_spill] sm:$0xff] }
 0x62a   :  { %vm4167_vm8 = vcmp.eq.f32.partialorder %v3654_v19, %v9703_v61  ;;  %v3664_v2 = vpop.permute.xlu0 %3663  ;;  %v3441_v19 = vsel %vm9994_vm5, %v12144_v47, -2.0  ;;  %vm4163_vm5 = vcmp.eq.f32.partialorder %v9935_v4, %v9703_v61  ;;  %v1910_v48 = vand.u32 2147483647, %v1782_v20  ;;  %v12152_v47 = vld [vmem:[#allocation413_spill] sm:$0xff]  ;;  %v12156_v4 = vld [vmem:[#allocation150_spill] sm:$0xff] }
 0x62b   :  { %vm4169_vm11 = vcmp.eq.f32.partialorder %v3664_v2, %v9703_v61  ;;  %vm4967_vm12 = vmpackc.low %vm4167_vm8, %vm4166_vm7  ;;  %v3443_v2 = vsel %vm2803_vm2, %v12145_v57, -2.0  ;;  %vm2676_vm7 = vcmp.ne.s32.totalorder %v12147_v34, 0  ;;  %v1014_v15 = vadd.f32 %v12148_v52, %v244_v14  ;;  %v12153_v14 = vld [vmem:[#allocation158_spill] sm:$0xff]  ;;  %v5325_v57 = vld [vmem:[%s10932_s1 + $0x2b0] sm:$0xff] }
 0x62c   :  { %vm10008_vm15 = vmpackc.low %vm4169_vm11, %vm4168_vm10  ;;  %4968 = vmatpush.bf16.msk.msra.mxu1 %vm4967_vm12, %v12141_v18  ;;  %vm2677_vm8 = vcmp.ne.s32.totalorder %v12149_v53, 0  ;;  %vm2036_vm10 = vcmp.gt.f32.partialorder %v1908_v62, 0.0  ;;  %v1783_v20 = vadd.f32 %v12151_v51, %v1013_v9  ;;  %vm2678_vm11 = vcmp.ne.s32.totalorder %v12152_v47, 0  ;;  %v12158_v9 = vld [vmem:[#allocation364_spill] sm:$0xff] }
 0x62d   :  { %vm4971_vm12 = vmpackc.low %vm4163_vm5, %vm4162_vm9  ;;  %vm2038_vm1 = vcmp.gt.f32.partialorder %v1910_v48, 0.0  ;;  %v5326_v48 = vld [vmem:[%s10932_s1 + $0x2b8] sm:$0xff]  ;;  %v12159_v53 = vld [vmem:[#allocation368_spill] sm:$0xff] }
 0x62e   :  { %vm10062_vm14 = vmand %vm2036_vm10, %vm2676_vm7  ;;  %v248_v52 = vmul.f32 %v5326_v48, %v9060_v29  ;;  %vm4158_vm7 = vcmp.eq.f32.partialorder %v9871_v37, %v9703_v61  ;;  %vm4159_vm10 = vcmp.eq.f32.partialorder %v9705_v56, %v9703_v61  ;;  %v5327_v56 = vld [vmem:[%s10932_s1 + $0x2c0] sm:$0xff]  ;;  %v12170_v37 = vld [vmem:[#allocation156_spill] sm:$0xff] }
 0x62f   :  { %3878 = vperm.xlu1 %5105, %v3441_v19   ;;  %3883 = vperm.xlu2 %5103, %v3442_v38   ;;  %v1015_v38 = vadd.f32 %v12150_v25, %v245_v21  ;;  %v1784_v19 = vadd.f32 %v12153_v14, %v1014_v15  ;;  %v246_v21 = vmul.f32 %v5324_v27, %v9060_v29  ;;  %vm2805_vm2 = vmand %vm2037_vm13, %vm2677_vm8  ;;  %v3444_v34 = vsel %vm10062_vm14, %v12158_v9, -2.0  ;;  %v12161_v14 = vld [vmem:[#allocation396_spill] sm:$0xff] }
 0x630   :  { %3888 = vperm.xlu0 %5104, %v3443_v2   ;;  %4970 = vmatpush.bf16.msk.msra.mxu1 %vm4969_vm4, %v12141_v18  ;;  %v247_v2 = vmul.f32 %v5325_v57, %v9060_v29  ;;  %v3445_v44 = vsel %vm2805_vm2, %v12157_v5, -2.0  ;;  %vm2806_vm3 = vmand %vm2038_vm1, %vm2678_vm11  ;;  %vm4160_vm4 = vcmp.eq.f32.partialorder %v9877_v1, %v9703_v61  ;;  %v1911_v15 = vand.u32 2147483647, %v1783_v20  ;;  %v12160_v1 = vld [vmem:[#allocation169_spill] sm:$0xff] }
 0x631   :  { %v10045_v49 = vpop.permute.xlu1 %3668  ;;  %v10047_v22 = vpop.permute.xlu2 %3718  ;;  %v1785_v62 = vadd.f32 %v12156_v4, %v1015_v38  ;;  %v3446_v25 = vsel %vm2806_vm3, %v12159_v53, -2.0  ;;  %vm4973_vm5 = vmpackc.low %vm4161_vm0, %vm4160_vm4  ;;  %v1912_v38 = vand.u32 2147483647, %v1784_v19  ;;  %v1016_v51 = vadd.f32 %v12160_v1, %v246_v21  ;;  %v12163_v4 = vld [vmem:[#allocation421_spill] sm:$0xff]  ;;  %v12165_v21 = vld [vmem:[#allocation226_spill] sm:$0xff] }
 0x632   :  { %v10053_v28 = vpop.permute.xlu0 %3678  ;;  %vm2679_vm8 = vcmp.ne.s32.totalorder %v12161_v14, 0  ;;  %v1017_v27 = vadd.f32 %v12162_v33, %v247_v2  ;;  %vm2680_vm9 = vcmp.ne.s32.totalorder %v12163_v4, 0  ;;  %v12164_v57 = vld [vmem:[#allocation173_spill] sm:$0xff]  ;;  %vm2039_vm11 = vcmp.gt.f32.partialorder %v1911_v15, 0.0  ;;  %vm4975_vm13 = vmpackc.low %vm4159_vm10, %vm4158_vm7  ;;  %v12167_v2 = vld [vmem:[#allocation164_spill] sm:$0xff] }
 0x633   :  { %v1913_v47 = vand.u32 2147483647, %v1785_v62  ;;  %v1018_v5 = vadd.f32 %v12164_v57, %v248_v52  ;;  %v1786_v62 = vadd.f32 %v12165_v21, %v1016_v51  ;;  %vm2040_vm14 = vcmp.gt.f32.partialorder %v1912_v38, 0.0  ;;  %vm10118_vm0 = vmand %vm2039_vm11, %vm2679_vm8  ;;  %v5328_v15 = vld [vmem:[%s10932_s1 + $0x2c8] sm:$0xff]  ;;  %v12172_v1 = vld [vmem:[#allocation370_spill] sm:$0xff] }
 0x634   :  { %4972 = vmatpush.bf16.msk.msra.mxu1 %vm4971_vm12, %v12141_v18  ;;  %v1787_v9 = vadd.f32 %v12167_v2, %v1017_v27  ;;  %vm4157_vm1 = vcmp.eq.f32.partialorder %v9822_v54, %v9703_v61  ;;  %v249_v48 = vmul.f32 %v5327_v56, %v9060_v29  ;;  %vm2808_vm3 = vmand %vm2040_vm14, %vm2680_vm9  ;;  %v250_v53 = vmul.f32 %v5328_v15, %v9060_v29  ;;  %v12174_v21 = vld [vmem:[#allocation402_spill] sm:$0xff]  ;;  %v12175_v54 = vld [vmem:[#allocation160_spill] sm:$0xff] }
 0x635   :  { %vm2041_vm2 = vcmp.gt.f32.partialorder %v1913_v47, 0.0  ;;  %v1788_v52 = vadd.f32 %v12170_v37, %v1018_v5  ;;  %v3447_v51 = vsel %vm10118_vm0, %v12172_v1, -2.0  ;;  %v5329_v47 = vld [vmem:[%s10932_s1 + $0x2d0] sm:$0xff]  ;;  %v1914_v33 = vand.u32 2147483647, %v1786_v62  ;;  %v12180_v15 = vld [vmem:[#allocation227_spill] sm:$0xff] }
 0x636   :  { %v251_v14 = vmul.f32 %v5329_v47, %v9060_v29  ;;  %v1915_v4 = vand.u32 2147483647, %v1787_v9  ;;  %vm4155_vm8 = vcmp.eq.f32.partialorder %v9815_v46, %v9703_v61  ;;  %vm2682_vm9 = vcmp.ne.s32.totalorder %v12174_v21, 0  ;;  %v12176_v2 = vld [vmem:[#allocation424_spill] sm:$0xff]  ;;  %v12183_v1 = vld [vmem:[#allocation162_spill] sm:$0xff] }
 0x637   :  { %3893 = vperm.xlu1 %5105, %v3444_v34   ;;  %3898 = vperm.xlu2 %5103, %v3445_v44   ;;  %v12166_v44 = vld [vmem:[#allocation419_spill] sm:$0xff]  ;;  %v1916_v5 = vand.u32 2147483647, %v1788_v52  ;;  %vm2683_vm10 = vcmp.ne.s32.totalorder %v12176_v2, 0  ;;  %vm4154_vm11 = vcmp.eq.f32.partialorder %v9766_v7, %v9703_v61  ;;  %v12177_v34 = vld [vmem:[#allocation176_spill] sm:$0xff]  ;;  %v12179_v52 = vld [vmem:[#allocation422_spill] sm:$0xff] }
 0x638   :  { %3903 = vperm.xlu0 %5104, %v3446_v25   ;;  %4974 = vmatpush.bf16.msk.msra.mxu1 %vm4973_vm5, %v12141_v18  ;;  %vm2681_vm12 = vcmp.ne.s32.totalorder %v12166_v44, 0  ;;  %v12171_v25 = vld [vmem:[#allocation343_spill] sm:$0xff]  ;;  %vm4156_vm5 = vcmp.eq.f32.partialorder %v9672_v35, %v9703_v61  ;;  %v12173_v35 = vld [vmem:[#allocation172_spill] sm:$0xff]  ;;  %v1020_v44 = vadd.f32 %v12175_v54, %v250_v53  ;;  %v1021_v56 = vadd.f32 %v12177_v34, %v251_v14  ;;  %vm4979_vm14 = vmpackc.low %vm4155_vm8, %vm4154_vm11 }
 0x639   :  { %v10101_v20 = vpop.permute.xlu1 %3683  ;;  %v10103_v8 = vpop.permute.xlu2 %3733  ;;  %v3448_v38 = vsel %vm2808_vm3, %v12171_v25, -2.0  ;;  %vm2809_vm4 = vmand %vm2041_vm2, %vm2681_vm12  ;;  %v1019_v57 = vadd.f32 %v12173_v35, %v249_v48  ;;  %vm2042_vm12 = vcmp.gt.f32.partialorder %v1914_v33, 0.0  ;;  %v12178_v48 = vld [vmem:[#allocation229_spill] sm:$0xff]  ;;  %vm2043_vm0 = vcmp.gt.f32.partialorder %v1915_v4, 0.0  ;;  %v5331_v46 = vld [vmem:[%s10932_s1 + $0x2e0] sm:$0xff] }
 0x63a   :  { %v10109_v19 = vpop.permute.xlu0 %3693  ;;  %v3449_v27 = vsel %vm2809_vm4, %v9130_v55, -2.0  ;;  %vm4977_vm7 = vmpackc.low %vm4157_vm1, %vm4156_vm5  ;;  %v1790_v53 = vadd.f32 %v12180_v15, %v1020_v44  ;;  %v5330_v7 = vld [vmem:[%s10932_s1 + $0x2d8] sm:$0xff]  ;;  %vm2044_vm2 = vcmp.gt.f32.partialorder %v1916_v5, 0.0  ;;  %v253_v47 = vmul.f32 %v5331_v46, %v9060_v29  ;;  %v5332_v4 = vld [vmem:[%s10932_s1 + $0x2e8] sm:$0xff] }
 0x63b   :  { %v1789_v37 = vadd.f32 %v12178_v48, %v1019_v57  ;;  %vm10174_vm1 = vmand %vm2042_vm12, %vm2682_vm9  ;;  %v12184_v14 = vld [vmem:[#allocation349_spill] sm:$0xff]  ;;  %v254_v35 = vmul.f32 %v5332_v4, %v9060_v29  ;;  %v12186_v2 = vld [vmem:[#allocation408_spill] sm:$0xff] }
 0x63c   :  { %4976 = vmatpush.bf16.msk.msra.mxu1 %vm4975_vm13, %v12141_v18  ;;  %vm2684_vm13 = vcmp.ne.s32.totalorder %v12179_v52, 0  ;;  %vm2811_vm3 = vmand %vm2043_vm0, %vm2683_vm10  ;;  %v1918_v21 = vand.u32 2147483647, %v1790_v53  ;;  %vm2685_vm5 = vcmp.ne.s32.totalorder %v12186_v2, 0  ;;  %v12187_v48 = vld [vmem:[#allocation165_spill] sm:$0xff]  ;;  %v12189_v15 = vld [vmem:[#allocation179_spill] sm:$0xff] }
 0x63d   :  { %v3451_v33 = vsel %vm2811_vm3, %v12184_v14, -2.0  ;;  %vm2812_vm4 = vmand %vm2044_vm2, %vm2684_vm13  ;;  %v1917_v57 = vand.u32 2147483647, %v1789_v37  ;;  %v1023_v37 = vadd.f32 %v12187_v48, %v253_v47  ;;  %v1024_v53 = vadd.f32 %v12189_v15, %v254_v35  ;;  %v12190_v25 = vld [vmem:[#allocation232_spill] sm:$0xff]  ;;  %v12193_v47 = vld [vmem:[#allocation159_spill] sm:$0xff] }
 0x63e   :  { %v3452_v5 = vsel %vm2812_vm4, %v9166_v23, -2.0  ;;  %v12188_v23 = vld [vmem:[#allocation427_spill] sm:$0xff]  ;;  %vm2046_vm9 = vcmp.gt.f32.partialorder %v1918_v21, 0.0  ;;  %v12195_v2 = vld [vmem:[#allocation197_spill] sm:$0xff] }
 0x63f   :  { %3908 = vperm.xlu1 %5105, %v3447_v51   ;;  %3913 = vperm.xlu2 %5103, %v3448_v38   ;;  %v252_v38 = vmul.f32 %v5330_v7, %v9060_v29  ;;  %v1791_v51 = vadd.f32 %v12183_v1, %v1021_v56  ;;  %vm2045_vm8 = vcmp.gt.f32.partialorder %v1917_v57, 0.0  ;;  %v12191_v7 = vld [vmem:[#allocation425_spill] sm:$0xff]  ;;  %v1794_v14 = vadd.f32 %v12193_v47, %v1024_v53  ;;  %v12194_v4 = vld [vmem:[#allocation355_spill] sm:$0xff]  ;;  %v12202_v47 = vld [vmem:[#allocation248_spill] sm:$0xff] }
 0x640   :  { %3918 = vperm.xlu0 %5104, %v3449_v27   ;;  %4978 = vmatpush.bf16.msk.msra.mxu1 %vm4977_vm7, %v12141_v18  ;;  %v3450_v27 = vsel %vm10174_vm1, %v9124_v59, -2.0  ;;  %v12185_v59 = vld [vmem:[#allocation175_spill] sm:$0xff]  ;;  %vm2686_vm7 = vcmp.ne.s32.totalorder %v12188_v23, 0  ;;  %vm2813_vm10 = vmand %vm2045_vm8, %vm2685_vm5  ;;  %v12196_v23 = vld [vmem:[#allocation414_spill] sm:$0xff]  ;;  %vm4183_vm1 = vcmp.eq.f32.partialorder %v10103_v8, %v9703_v61 }
 0x641   :  { %v10157_v62 = vpop.permute.xlu1 %3698  ;;  %v10159_v55 = vpop.permute.xlu2 %3748  ;;  %v1022_v54 = vadd.f32 %v12185_v59, %v252_v38  ;;  %v1919_v44 = vand.u32 2147483647, %v1791_v51  ;;  %v12192_v38 = vld [vmem:[#allocation230_spill] sm:$0xff]  ;;  %v5333_v51 = vld [vmem:[%s10932_s1 + $0x378] sm:$0xff]  ;;  %vm2814_vm12 = vmand %vm2046_vm9, %vm2686_vm7  ;;  %v3453_v57 = vsel %vm2813_vm10, %v9160_v16, -2.0 }
 0x642   :  { %v10165_v9 = vpop.permute.xlu0 %3708  ;;  %v1793_v1 = vadd.f32 %v12192_v38, %v1023_v37  ;;  %v272_v46 = vmul.f32 %v5333_v51, %v9060_v29  ;;  %v3454_v35 = vsel %vm2814_vm12, %v12194_v4, -2.0  ;;  %v1922_v37 = vand.u32 2147483647, %v1794_v14  ;;  %v12197_v53 = vld [vmem:[#allocation183_spill] sm:$0xff]  ;;  %v5336_v8 = vld [vmem:[%s10932_s1 + $0x2f0] sm:$0xff] }
 0x643   :  { %v1792_v31 = vadd.f32 %v12190_v25, %v1022_v54  ;;  %vm2047_vm11 = vcmp.gt.f32.partialorder %v1919_v44, 0.0  ;;  %v12205_v4 = vld [vmem:[#allocation255_spill] sm:$0xff]  ;;  %vm4180_vm12 = vcmp.eq.f32.partialorder %v10047_v22, %v9703_v61  ;;  %v12207_v22 = vld [vmem:[#allocation178_spill] sm:$0xff] }
 0x644   :  { %4980 = vmatpush.bf16.msk.msra.mxu1 %vm4979_vm14, %v12141_v18  ;;  %v1921_v44 = vand.u32 2147483647, %v1793_v1  ;;  %v1042_v48 = vadd.f32 %v12195_v2, %v272_v46  ;;  %vm2688_vm14 = vcmp.ne.s32.totalorder %v12196_v23, 0  ;;  %v12200_v1 = vld [vmem:[#allocation240_spill] sm:$0xff]  ;;  %vm2050_vm9 = vcmp.gt.f32.partialorder %v1922_v37, 0.0 }
 0x645   :  { %v1920_v59 = vand.u32 2147483647, %v1792_v31  ;;  %v12199_v31 = vld [vmem:[#allocation212_spill] sm:$0xff] }
 0x646   :  { %v1812_v51 = vadd.f32 %v12200_v1, %v1042_v48  ;;  %v12201_v46 = vld [vmem:[#allocation428_spill] sm:$0xff]  ;;  %vm2049_vm7 = vcmp.gt.f32.partialorder %v1921_v44, 0.0  ;;  %v5338_v44 = vld [vmem:[%s10932_s1 + $0x2f8] sm:$0xff] }
 0x647   :  { %3923 = vperm.xlu1 %5105, %v3450_v27   ;;  %3928 = vperm.xlu2 %5103, %v3451_v33   ;;  %v5334_v33 = vld [vmem:[%s10932_s1 + $0x370] sm:$0xff]  ;;  %vm2048_vm3 = vcmp.gt.f32.partialorder %v1920_v59, 0.0  ;;  %vm2690_vm4 = vcmp.ne.s32.totalorder %v12201_v46, 0  ;;  %v256_v2 = vmul.f32 %v5338_v44, %v9060_v29  ;;  %v12212_v46 = vld [vmem:[#allocation235_spill] sm:$0xff] }
 0x648   :  { %3933 = vperm.xlu0 %5104, %v3452_v5   ;;  %4982 = vmatpush.bf16.msk.msra.mxu1 %vm9772_vm6, %v12141_v18  ;;  %vm2687_vm6 = vcmp.ne.s32.totalorder %v12191_v7, 0  ;;  %v271_v27 = vmul.f32 %v5334_v33, %v9060_v29  ;;  %v5335_v5 = vld [vmem:[%s10932_s1 + $0x3f0] sm:$0xff]  ;;  %v12198_v7 = vld [vmem:[#allocation430_spill] sm:$0xff]  ;;  %vm10249_vm8 = vmand %vm2048_vm3, %vm2688_vm14  ;;  %v1940_v48 = vand.u32 2147483647, %v1812_v51 }
 0x649   :  { %v10206_v34 = vpop.permute.xlu1 %3713  ;;  %v10208_v56 = vpop.permute.xlu2 %3763  ;;  %vm2815_vm13 = vmand %vm2047_vm11, %vm2687_vm6  ;;  %v287_v21 = vmul.f32 %v5335_v5, %v9060_v29  ;;  %vm2689_vm0 = vcmp.ne.s32.totalorder %v12198_v7, 0  ;;  %v12211_v1 = vld [vmem:[#allocation168_spill] sm:$0xff] }
 0x64a   :  { %v3724_v52 = vpop.permute.xlu0 %3723  ;;  %v3455_v54 = vsel %vm2815_vm13, %v9196_v24, -2.0  ;;  %v1041_v25 = vadd.f32 %v12197_v53, %v271_v27  ;;  %v255_v27 = vmul.f32 %v5336_v8, %v9060_v29  ;;  %vm2817_vm10 = vmand %vm2049_vm7, %vm2689_vm0  ;;  %vm4179_vm14 = vcmp.eq.f32.partialorder %v10206_v34, %v9703_v61  ;;  %v12208_v53 = vld [vmem:[#allocation446_spill] sm:$0xff]  ;;  %v12214_v33 = vld [vmem:[#allocation268_spill] sm:$0xff] }
 0x64b   :  { %v1057_v38 = vadd.f32 %v12199_v31, %v287_v21  ;;  %vm4181_vm6 = vcmp.eq.f32.partialorder %v3724_v52, %v9703_v61  ;;  %v12206_v21 = vld [vmem:[#allocation361_spill] sm:$0xff]  ;;  %vm2818_vm11 = vmand %vm2050_vm9, %vm2690_vm4  ;;  %vm2708_vm0 = vcmp.ne.s32.totalorder %v12208_v53, 0  ;;  %v12209_v52 = vld [vmem:[#allocation210_spill] sm:$0xff]  ;;  %v1026_v51 = vadd.f32 %v12211_v1, %v256_v2 }
 0x64c   :  { %v1811_v14 = vadd.f32 %v12202_v47, %v1041_v25  ;;  %v3457_v59 = vsel %vm2817_vm10, %v12206_v21, -2.0  ;;  %v3458_v37 = vsel %vm2818_vm11, %v9226_v13, -2.0  ;;  %vm4987_vm13 = vmpackc.low %vm4181_vm6, %vm4180_vm12  ;;  %v1025_v23 = vadd.f32 %v12207_v22, %v255_v27  ;;  %v12210_v31 = vld [vmem:[#allocation448_spill] sm:$0xff]  ;;  %v12217_v34 = vld [vmem:[#allocation233_spill] sm:$0xff] }
 0x64d   :  { %vm2068_vm4 = vcmp.gt.f32.partialorder %v1940_v48, 0.0  ;;  %vm4176_vm6 = vcmp.eq.f32.partialorder %v10157_v62, %v9703_v61  ;;  %vm4177_vm12 = vcmp.eq.f32.partialorder %v9990_v17, %v9703_v61  ;;  %v12218_v17 = vld [vmem:[#allocation193_spill] sm:$0xff]  ;;  %v12220_v62 = vld [vmem:[#allocation194_spill] sm:$0xff]  ;;  %v5343_v27 = vld [vmem:[%s10932_s1 + $0x3e8] sm:$0xff] }
 0x64e   :  { %v1795_v47 = vadd.f32 %v12212_v46, %v1025_v23  ;;  %v12225_v46 = vld [vmem:[#allocation237_spill] sm:$0xff] }
 0x64f   :  { %3938 = vperm.xlu1 %5105, %v3453_v57   ;;  %3943 = vperm.xlu2 %5103, %v3454_v35   ;;  %v1827_v35 = vadd.f32 %v12205_v4, %v1057_v38  ;;  %v5337_v57 = vld [vmem:[%s10932_s1 + $0x3f8] sm:$0xff] }
 0x650   :  { %3948 = vperm.xlu0 %5104, %v3455_v54   ;;  %v288_v5 = vmul.f32 %v5337_v57, %v9060_v29  ;;  %v3456_v54 = vsel %vm10249_vm8, %v9190_v45, -2.0  ;;  %v1939_v45 = vand.u32 2147483647, %v1811_v14  ;;  %v12213_v14 = vld [vmem:[#allocation459_spill] sm:$0xff]  ;;  %vm10303_vm8 = vmand %vm2068_vm4, %vm2708_vm0  ;;  %v5340_v57 = vld [vmem:[%s10932_s1 + $0x360] sm:$0xff] }
 0x651   :  { %v3729_v16 = vpop.permute.xlu1 %3728  ;;  %v10234_v15 = vpop.permute.xlu2 %3778  ;;  %vm2723_vm3 = vcmp.ne.s32.totalorder %v12213_v14, 0  ;;  %v1923_v2 = vand.u32 2147483647, %v1795_v47 }
 0x652   :  { %vm4182_vm2 = vcmp.eq.f32.partialorder %v3729_v16, %v9703_v61  ;;  %v10241_v24 = vpop.permute.xlu0 %3738  ;;  %v1955_v16 = vand.u32 2147483647, %v1827_v35  ;;  %v1058_v7 = vadd.f32 %v12209_v52, %v288_v5  ;;  %vm2067_vm7 = vcmp.gt.f32.partialorder %v1939_v45, 0.0  ;;  %v12219_v45 = vld [vmem:[#allocation420_spill] sm:$0xff]  ;;  %v12222_v52 = vld [vmem:[#allocation207_spill] sm:$0xff] }
 0x653   :  { %vm4985_vm5 = vmpackc.low %vm4183_vm1, %vm4182_vm2  ;;  %vm2707_vm1 = vcmp.ne.s32.totalorder %v12210_v31, 0  ;;  %vm4178_vm2 = vcmp.eq.f32.partialorder %v10165_v9, %v9703_v61  ;;  %v5339_v9 = vld [vmem:[%s10932_s1 + $0x368] sm:$0xff]  ;;  %v1796_v35 = vadd.f32 %v12217_v34, %v1026_v51  ;;  %v269_v5 = vmul.f32 %v5340_v57, %v9060_v29  ;;  %v12223_v31 = vld [vmem:[#allocation250_spill] sm:$0xff] }
 0x654   :  { %4986 = vmatpush.bf16.msk.msra.mxu2 %vm4985_vm5, %v12141_v18  ;;  %vm4989_vm5 = vmpackc.low %vm4179_vm14, %vm4178_vm2  ;;  %v1828_v8 = vadd.f32 %v12214_v33, %v1058_v7  ;;  %v270_v4 = vmul.f32 %v5339_v9, %v9060_v29  ;;  %vm2083_vm10 = vcmp.gt.f32.partialorder %v1955_v16, 0.0  ;;  %vm4175_vm14 = vcmp.eq.f32.partialorder %v10109_v19, %v9703_v61  ;;  %v12221_v16 = vld [vmem:[#allocation453_spill] sm:$0xff] }
 0x655   :  { %vm2835_vm9 = vmand %vm2067_vm7, %vm2707_vm1  ;;  %vm2691_vm0 = vcmp.ne.s32.totalorder %v12219_v45, 0  ;;  %v1039_v23 = vadd.f32 %v12220_v62, %v269_v5  ;;  %vm2724_vm1 = vcmp.ne.s32.totalorder %v12221_v16, 0  ;;  %vm4174_vm2 = vcmp.eq.f32.partialorder %v9960_v60, %v9703_v61  ;;  %v12224_v51 = vld [vmem:[#allocation433_spill] sm:$0xff]  ;;  %v5342_v60 = vld [vmem:[%s10932_s1 + $0x350] sm:$0xff] }
 0x656   :  { %v3475_v21 = vsel %vm2835_vm9, %v9282_v10, -2.0  ;;  %vm2851_vm11 = vmand %vm2083_vm10, %vm2723_vm3  ;;  %v1956_v10 = vand.u32 2147483647, %v1828_v8  ;;  %vm2051_vm3 = vcmp.gt.f32.partialorder %v1923_v2, 0.0  ;;  %vm2692_vm4 = vcmp.ne.s32.totalorder %v12224_v51, 0  ;;  %v12228_v19 = vld [vmem:[#allocation265_spill] sm:$0xff] }
 0x657   :  { %3953 = vperm.xlu1 %5105, %v3456_v54   ;;  %3958 = vperm.xlu2 %5103, %v3457_v59   ;;  %v3476_v59 = vsel %vm10303_vm8, %v9406_v42, -2.0  ;;  %v5341_v54 = vld [vmem:[%s10932_s1 + $0x3e0] sm:$0xff]  ;;  %v3491_v48 = vsel %vm2851_vm11, %v9556_v26, -2.0  ;;  %v1040_v42 = vadd.f32 %v12218_v17, %v270_v4  ;;  %v1809_v47 = vadd.f32 %v12225_v46, %v1039_v23  ;;  %vm10359_vm7 = vmand %vm2051_vm3, %vm2691_vm0  ;;  %v12233_v17 = vld [vmem:[#allocation443_spill] sm:$0xff] }
 0x658   :  { %3963 = vperm.xlu0 %5104, %v3458_v37   ;;  %4988 = vmatpush.bf16.msk.msra.mxu2 %vm4987_vm13, %v12141_v18  ;;  %v285_v44 = vmul.f32 %v5341_v54, %v9060_v29  ;;  %vm4991_vm13 = vmpackc.low %vm4177_vm12, %vm4176_vm6  ;;  %v1924_v37 = vand.u32 2147483647, %v1796_v35  ;;  %vm2084_vm8 = vcmp.gt.f32.partialorder %v1956_v10, 0.0  ;;  %vm4173_vm6 = vcmp.eq.f32.partialorder %v10101_v20, %v9703_v61  ;;  %v5344_v35 = vld [vmem:[%s10932_s1 + $0x358] sm:$0xff]  ;;  %v12232_v20 = vld [vmem:[#allocation198_spill] sm:$0xff] }
 0x659   :  { %v10286_v25 = vpop.permute.xlu1 %3743  ;;  %v10288_v13 = vpop.permute.xlu2 %3793  ;;  %v1810_v1 = vadd.f32 %v12223_v31, %v1040_v42  ;;  %v267_v33 = vmul.f32 %v5342_v60, %v9060_v29  ;;  %vm2852_vm10 = vmand %vm2084_vm8, %vm2724_vm1  ;;  %v286_v9 = vmul.f32 %v5343_v27, %v9060_v29  ;;  %v3459_v4 = vsel %vm10359_vm7, %v9220_v41, -2.0  ;;  %v12235_v62 = vld [vmem:[#allocation247_spill] sm:$0xff]  ;;  %v12236_v16 = vld [vmem:[#allocation450_spill] sm:$0xff] }
 0x65a   :  { %v10294_v38 = vpop.permute.xlu0 %3753  ;;  %v1055_v7 = vadd.f32 %v12222_v52, %v285_v44  ;;  %vm2052_vm9 = vcmp.gt.f32.partialorder %v1924_v37, 0.0  ;;  %v3492_v34 = vsel %vm2852_vm10, %v9550_v3, -2.0  ;;  %vm4172_vm12 = vcmp.eq.f32.partialorder %v10053_v28, %v9703_v61  ;;  %v12230_v3 = vld [vmem:[#allocation190_spill] sm:$0xff]  ;;  %v12231_v44 = vld [vmem:[#allocation435_spill] sm:$0xff]  ;;  %v12234_v37 = vld [vmem:[#allocation180_spill] sm:$0xff] }
 0x65b   :  { %vm2820_vm11 = vmand %vm2052_vm9, %vm2692_vm4  ;;  %v268_v57 = vmul.f32 %v5344_v35, %v9060_v29  ;;  %v1938_v5 = vand.u32 2147483647, %v1810_v1  ;;  %v1937_v41 = vand.u32 2147483647, %v1809_v47  ;;  %v1037_v28 = vadd.f32 %v12230_v3, %v267_v33  ;;  %v5345_v52 = vld [vmem:[%s10932_s1 + $0x3d8] sm:$0xff]  ;;  %v5347_v60 = vld [vmem:[%s10932_s1 + $0x340] sm:$0xff] }
 0x65c   :  { %4990 = vmatpush.bf16.msk.msra.mxu2 %vm4989_vm5, %v12141_v18  ;;  %vm4993_vm5 = vmpackc.low %vm4175_vm14, %vm4174_vm2  ;;  %v1825_v8 = vadd.f32 %v12228_v19, %v1055_v7  ;;  %vm4170_vm14 = vcmp.eq.f32.partialorder %v10045_v49, %v9703_v61  ;;  %vm2706_vm0 = vcmp.ne.s32.totalorder %v12231_v44, 0  ;;  %v1056_v10 = vadd.f32 %v12232_v20, %v286_v9  ;;  %v12238_v1 = vld [vmem:[#allocation245_spill] sm:$0xff]  ;;  %v5346_v49 = vld [vmem:[%s10932_s1 + $0x3d0] sm:$0xff] }
 0x65d   :  { %vm2705_vm1 = vcmp.ne.s32.totalorder %v12233_v17, 0  ;;  %vm4171_vm2 = vcmp.eq.f32.partialorder %v9927_v50, %v9703_v61  ;;  %v1038_v45 = vadd.f32 %v12234_v37, %v268_v57  ;;  %v1807_v23 = vadd.f32 %v12235_v62, %v1037_v28  ;;  %v12237_v50 = vld [vmem:[#allocation263_spill] sm:$0xff]  ;;  %v12239_v27 = vld [vmem:[#allocation209_spill] sm:$0xff]  ;;  %v12246_v20 = vld [vmem:[#allocation260_spill] sm:$0xff] }
 0x65e   :  { %v1953_v54 = vand.u32 2147483647, %v1825_v8  ;;  %vm2066_vm3 = vcmp.gt.f32.partialorder %v1938_v5, 0.0  ;;  %vm2721_vm4 = vcmp.ne.s32.totalorder %v12236_v16, 0  ;;  %v284_v7 = vmul.f32 %v5345_v52, %v9060_v29  ;;  %v12241_v57 = vld [vmem:[#allocation195_spill] sm:$0xff]  ;;  %v12244_v3 = vld [vmem:[#allocation177_spill] sm:$0xff] }
 0x65f   :  { %4048 = vperm.xlu1 %5105, %v3475_v21   ;;  %4053 = vperm.xlu2 %5103, %v3476_v59   ;;  %v12229_v21 = vld [vmem:[#allocation376_spill] sm:$0xff]  ;;  %vm2065_vm7 = vcmp.gt.f32.partialorder %v1937_v41, 0.0  ;;  %v1826_v31 = vadd.f32 %v12237_v50, %v1056_v10  ;;  %vm2834_vm8 = vmand %vm2066_vm3, %vm2706_vm0  ;;  %v1808_v51 = vadd.f32 %v12238_v1, %v1038_v45  ;;  %v283_v46 = vmul.f32 %v5346_v49, %v9060_v29  ;;  %v12245_v44 = vld [vmem:[#allocation445_spill] sm:$0xff] }
 0x660   :  { %4128 = vperm.xlu0 %5104, %v3491_v48   ;;  %4992 = vmatpush.bf16.msk.msra.mxu2 %vm4991_vm13, %v12141_v18  ;;  %v3460_v59 = vsel %vm2820_vm11, %v12229_v21, -2.0  ;;  %vm4995_vm13 = vmpackc.low %vm4173_vm6, %vm4172_vm12  ;;  %vm2081_vm9 = vcmp.gt.f32.partialorder %v1953_v54, 0.0  ;;  %v3474_v47 = vsel %vm2834_vm8, %v9370_v6, -2.0  ;;  %v265_v33 = vmul.f32 %v5347_v60, %v9060_v29  ;;  %v12249_v37 = vld [vmem:[#allocation242_spill] sm:$0xff]  ;;  %v12250_v50 = vld [vmem:[#allocation191_spill] sm:$0xff] }
 0x661   :  { %v10342_v22 = vpop.permute.xlu1 %3758  ;;  %v10344_v26 = vpop.permute.xlu2 %3808  ;;  %vm2833_vm6 = vmand %vm2065_vm7, %vm2705_vm1  ;;  %v1935_v19 = vand.u32 2147483647, %v1807_v23  ;;  %v1054_v9 = vadd.f32 %v12239_v27, %v284_v7  ;;  %v1936_v6 = vand.u32 2147483647, %v1808_v51  ;;  %v1053_v5 = vadd.f32 %v12241_v57, %v283_v46  ;;  %v5349_v62 = vld [vmem:[%s10932_s1 + $0x3c0] sm:$0xff]  ;;  %v5350_v1 = vld [vmem:[%s10932_s1 + $0x3c8] sm:$0xff] }
 0x662   :  { %v10350_v53 = vpop.permute.xlu0 %3768  ;;  %v3473_v14 = vsel %vm2833_vm6, %v9376_v36, -2.0  ;;  %vm2849_vm10 = vmand %vm2081_vm9, %vm2721_vm4  ;;  %v12240_v36 = vld [vmem:[#allocation432_spill] sm:$0xff]  ;;  %v1035_v28 = vadd.f32 %v12244_v3, %v265_v33  ;;  %v266_v54 = vmul.f32 %v5348_v0, %v9060_v29  ;;  %v281_v23 = vmul.f32 %v5349_v62, %v9060_v29  ;;  %v12254_v27 = vld [vmem:[#allocation458_spill] sm:$0xff] }
 0x663   :  { %v3489_v8 = vsel %vm2849_vm10, %v9520_v39, -2.0  ;;  %vm2703_vm11 = vcmp.ne.s32.totalorder %v12240_v36, 0  ;;  %v12242_v39 = vld [vmem:[#allocation252_spill] sm:$0xff]  ;;  %v1823_v10 = vadd.f32 %v12246_v20, %v1053_v5  ;;  %vm2064_vm1 = vcmp.gt.f32.partialorder %v1936_v6, 0.0  ;;  %v12256_v6 = vld [vmem:[#allocation442_spill] sm:$0xff]  ;;  %v12259_v57 = vld [vmem:[#allocation249_spill] sm:$0xff] }
 0x664   :  { %4994 = vmatpush.bf16.msk.msra.mxu2 %vm4993_vm5, %v12141_v18  ;;  %vm4997_vm5 = vmpackc.low %vm4171_vm2, %vm4170_vm14  ;;  %v1824_v21 = vadd.f32 %v12242_v39, %v1054_v9  ;;  %v1805_v45 = vadd.f32 %v12249_v37, %v1035_v28  ;;  %v282_v51 = vmul.f32 %v5350_v1, %v9060_v29  ;;  %vm2701_vm8 = vcmp.ne.s32.totalorder %v12256_v6, 0  ;;  %v5351_v28 = vld [vmem:[%s10932_s1 + $0x330] sm:$0xff]  ;;  %v12262_v17 = vld [vmem:[#allocation455_spill] sm:$0xff] }
 0x665   :  { %v1951_v46 = vand.u32 2147483647, %v1823_v10  ;;  %vm4198_vm9 = vcmp.eq.f32.partialorder %v10344_v26, %v9703_v61  ;;  %v263_v0 = vmul.f32 %v5351_v28, %v9060_v29  ;;  %v12270_v1 = vld [vmem:[#allocation404_spill] sm:$0xff]  ;;  %v12277_v6 = vld [vmem:[#allocation259_spill] sm:$0xff] }
 0x666   :  { %v1952_v16 = vand.u32 2147483647, %v1824_v21  ;;  %v1933_v60 = vand.u32 2147483647, %v1805_v45  ;;  %v12260_v21 = vld [vmem:[#allocation262_spill] sm:$0xff]  ;;  %v12266_v45 = vld [vmem:[#allocation447_spill] sm:$0xff] }
 0x667   :  { %4133 = vperm.xlu1 %5105, %v3492_v34   ;;  %3968 = vperm.xlu2 %5103, %v3459_v4   ;;  %v1954_v4 = vand.u32 2147483647, %v1826_v31  ;;  %v1036_v31 = vadd.f32 %v12250_v50, %v266_v54  ;;  %v12261_v54 = vld [vmem:[#allocation440_spill] sm:$0xff]  ;;  %v5353_v50 = vld [vmem:[%s10932_s1 + $0x3b8] sm:$0xff] }
 0x668   :  { %3973 = vperm.xlu0 %5104, %v3460_v59   ;;  %4996 = vmatpush.bf16.msk.msra.mxu2 %vm4995_vm13, %v12141_v18  ;;  %v12243_v59 = vld [vmem:[#allocation460_spill] sm:$0xff]  ;;  %vm2704_vm13 = vcmp.ne.s32.totalorder %v12245_v44, 0  ;;  %vm2080_vm7 = vcmp.gt.f32.partialorder %v1952_v16, 0.0 }
 0x669   :  { %v10396_v2 = vpop.permute.xlu1 %3773  ;;  %v10398_v48 = vpop.permute.xlu2 %3823  ;;  %vm2722_vm12 = vcmp.ne.s32.totalorder %v12243_v59, 0  ;;  %vm2082_vm0 = vcmp.gt.f32.partialorder %v1954_v4, 0.0  ;;  %vm2832_vm3 = vmand %vm2064_vm1, %vm2704_vm13  ;;  %v12255_v4 = vld [vmem:[#allocation204_spill] sm:$0xff]  ;;  %vm2702_vm1 = vcmp.ne.s32.totalorder %v12261_v54, 0 }
 0x66a   :  { %v10404_v42 = vpop.permute.xlu0 %3783  ;;  %vm2850_vm2 = vmand %vm2082_vm0, %vm2722_vm12  ;;  %v3472_v49 = vsel %vm2832_vm3, %v9252_v43, -2.0  ;;  %v1052_v43 = vadd.f32 %v12255_v4, %v282_v51 }
 0x66b   :  { %v3490_v7 = vsel %vm2850_vm2, %v9432_v63, -2.0 }
 0x66c   :  { %4998 = vmatpush.bf16.msk.msra.mxu2 %vm4997_vm5, %v12141_v18  ;;  %vm2719_vm5 = vcmp.ne.s32.totalorder %v12254_v27, 0  ;;  %v1822_v59 = vadd.f32 %v12260_v21, %v1052_v43  ;;  %v4584_v43 = vld [vmem:[%s10934_s3] sm:$0xff] }
 0x66f   :  { %4038 = vperm.xlu1 %5105, %v3473_v14   ;;  %4043 = vperm.xlu2 %5103, %v3474_v47   ;;  %v12251_v47 = vld [vmem:[#allocation457_spill] sm:$0xff]  ;;  %v12252_v14 = vld [vmem:[#allocation234_spill] sm:$0xff] }
 0x670   :  { %4118 = vperm.xlu0 %5104, %v3489_v8   ;;  %5000 = vmatpush.bf16.msk.msra.mxu2 %vm10008_vm15, %v12141_v18  ;;  %vm2063_vm15 = vcmp.gt.f32.partialorder %v1935_v19, 0.0  ;;  %vm2720_vm4 = vcmp.ne.s32.totalorder %v12251_v47, 0  ;;  %v12253_v19 = vld [vmem:[#allocation206_spill] sm:$0xff]  ;;  %v12271_v47 = vld [vmem:[#allocation187_spill] sm:$0xff] }
 0x671   :  { %v10441_v34 = vpop.permute.xlu1 %3788  ;;  %v10443_v35 = vpop.permute.xlu2 %3838  ;;  %vm10455_vm14 = vmand %vm2063_vm15, %vm2703_vm11  ;;  %v1051_v8 = vadd.f32 %v12253_v19, %v281_v23  ;;  %vm2079_vm11 = vcmp.gt.f32.partialorder %v1951_v46, 0.0  ;;  %vm2061_vm15 = vcmp.gt.f32.partialorder %v1933_v60, 0.0  ;;  %v12269_v23 = vld [vmem:[#allocation231_spill] sm:$0xff]  ;;  %v12272_v60 = vld [vmem:[#allocation192_spill] sm:$0xff] }
 0x672   :  { %v3799_v41 = vpop.permute.xlu0 %3798  ;;  %v3471_v52 = vsel %vm10455_vm14, %v9340_v30, -2.0  ;;  %v1806_v30 = vadd.f32 %v12252_v14, %v1036_v31  ;;  %vm10482_vm6 = vmand %vm2080_vm7, %vm2720_vm4  ;;  %vm2717_vm7 = vcmp.ne.s32.totalorder %v12262_v17, 0  ;;  %v280_v31 = vmul.f32 %v5353_v50, %v9060_v29  ;;  %v12273_v19 = vld [vmem:[#allocation437_spill] sm:$0xff] }
 0x673   :  { %v1821_v5 = vadd.f32 %v12259_v57, %v1051_v8  ;;  %vm2847_vm13 = vmand %vm2079_vm11, %vm2719_vm5  ;;  %v3488_v26 = vsel %vm10482_vm6, %v9526_v58, -2.0  ;;  %vm4196_vm2 = vcmp.eq.f32.partialorder %v3799_v41, %v9703_v61  ;;  %vm4194_vm5 = vcmp.eq.f32.partialorder %v10441_v34, %v9703_v61  ;;  %v12265_v34 = vld [vmem:[#allocation188_spill] sm:$0xff]  ;;  %v5355_v57 = vld [vmem:[%s10932_s1 + $0x3a0] sm:$0xff] }
 0x674   :  { %v1934_v39 = vand.u32 2147483647, %v1806_v30  ;;  %vm2829_vm0 = vmand %vm2061_vm15, %vm2701_vm8  ;;  %v3487_v3 = vsel %vm2847_vm13, %v9402_v11, -2.0  ;;  %v1950_v11 = vand.u32 2147483647, %v1822_v59  ;;  %vm4201_vm6 = vcmp.eq.f32.partialorder %v10398_v48, %v9703_v61  ;;  %v5352_v48 = vld [vmem:[%s10932_s1 + $0x338] sm:$0xff] }
 0x675   :  { %v3469_v44 = vsel %vm2829_vm0, %v9222_v40, -2.0  ;;  %v1949_v20 = vand.u32 2147483647, %v1821_v5  ;;  %v1033_v37 = vadd.f32 %v12265_v34, %v263_v0  ;;  %vm4195_vm11 = vcmp.eq.f32.partialorder %v10288_v13, %v9703_v61  ;;  %v12281_v17 = vld [vmem:[#allocation189_spill] sm:$0xff]  ;;  %v12282_v34 = vld [vmem:[#allocation456_spill] sm:$0xff] }
 0x676   :  { %vm2062_vm4 = vcmp.gt.f32.partialorder %v1934_v39, 0.0  ;;  %vm5007_vm13 = vmpackc.low %vm4195_vm11, %vm4194_vm5  ;;  %v264_v13 = vmul.f32 %v5352_v48, %v9060_v29  ;;  %vm4191_vm5 = vcmp.eq.f32.partialorder %v10396_v2, %v9703_v61  ;;  %v12275_v2 = vld [vmem:[#allocation244_spill] sm:$0xff]  ;;  %v277_v5 = vmul.f32 %v5355_v57, %v9060_v29  ;;  %v12278_v39 = vld [vmem:[#allocation394_spill] sm:$0xff] }
 0x677   :  { %4123 = vperm.xlu1 %5105, %v3490_v7   ;;  %4028 = vperm.xlu2 %5103, %v3471_v52   ;;  %vm10512_vm8 = vmand %vm2062_vm4, %vm2702_vm1  ;;  %vm2077_vm15 = vcmp.gt.f32.partialorder %v1949_v20, 0.0  ;;  %v1803_v16 = vadd.f32 %v12269_v23, %v1033_v37  ;;  %vm4193_vm1 = vcmp.eq.f32.partialorder %v10404_v42, %v9703_v61  ;;  %v12274_v42 = vld [vmem:[#allocation201_spill] sm:$0xff]  ;;  %v12279_v59 = vmov 0   ;;  %v12285_v23 = vld [vmem:[#allocation174_spill] sm:$0xff] }
 0x678   :  { %4033 = vperm.xlu0 %5104, %v3472_v49   ;;  %vm2845_vm0 = vmand %vm2077_vm15, %vm2717_vm7  ;;  %v3470_v52 = vsel %vm10512_vm8, %v9346_v12, -2.0  ;;  %v5354_v12 = vld [vmem:[%s10932_s1 + $0x3b0] sm:$0xff]  ;;  %v1034_v14 = vadd.f32 %v12271_v47, %v264_v13  ;;  %vm2699_vm7 = vcmp.ne.s32.totalorder %v12273_v19, 0  ;;  %vm4190_vm8 = vcmp.eq.f32.partialorder %v10350_v53, %v9703_v61  ;;  %v4585_v53 = vld [vmem:[%s10934_s3 + $0x8] sm:$0xff] }
 0x679   :  { %v3804_v63 = vpop.permute.xlu1 %3803  ;;  %v10476_v33 = vpop.permute.xlu2 %3853  ;;  %v3485_v7 = vsel %vm2845_vm0, %v9496_v32, -2.0  ;;  %v279_v49 = vmul.f32 %v5354_v12, %v9060_v29  ;;  %v1931_v32 = vand.u32 2147483647, %v1803_v16  ;;  %vm4189_vm15 = vcmp.eq.f32.partialorder %v10208_v56, %v9703_v61  ;;  %v5357_v56 = vld [vmem:[%s10932_s1 + $0x328] sm:$0xff]  ;;  %v12286_v48 = vld [vmem:[#allocation254_spill] sm:$0xff]  ;;  %v5358_v50 = vld [vmem:[%s10932_s1 + $0x318] sm:$0xff] }
 0x67a   :  { %v3814_v9 = vpop.permute.xlu0 %3813  ;;  %vm4197_vm14 = vcmp.eq.f32.partialorder %v3804_v63, %v9703_v61  ;;  %v1050_v63 = vadd.f32 %v12272_v60, %v280_v31  ;;  %v1804_v27 = vadd.f32 %v12275_v2, %v1034_v14  ;;  %v262_v0 = vmul.f32 %v5357_v56, %v9060_v29  ;;  %v12291_v12 = vld [vmem:[#allocation392_spill] sm:$0xff]  ;;  %v5360_v60 = vld [vmem:[%s10932_s1 + $0x3a8] sm:$0xff]  ;;  %v12298_v57 = vld [vmem:[#allocation454_spill] sm:$0xff] }
 0x67b   :  { %vm4199_vm10 = vcmp.eq.f32.partialorder %v3814_v9, %v9703_v61  ;;  %vm5005_vm3 = vmpackc.low %vm4197_vm14, %vm4196_vm2  ;;  %vm2078_vm14 = vcmp.gt.f32.partialorder %v1950_v11, 0.0  ;;  %v1049_v8 = vadd.f32 %v12274_v42, %v279_v49  ;;  %v12276_v9 = vld [vmem:[#allocation257_spill] sm:$0xff]  ;;  %v1047_v40 = vadd.f32 %v12281_v17, %v277_v5  ;;  %v12295_v42 = vld [vmem:[#allocation379_spill] sm:$0xff] }
 0x67c   :  { %vm5003_vm12 = vmpackc.low %vm4199_vm10, %vm4198_vm9  ;;  %vm2718_vm10 = vcmp.ne.s32.totalorder %v12266_v45, 0  ;;  %v1820_v4 = vadd.f32 %v12276_v9, %v1050_v63  ;;  %v1932_v28 = vand.u32 2147483647, %v1804_v27  ;;  %v12280_v11 = vld [vmem:[#allocation429_spill] sm:$0xff]  ;;  %v12284_v45 = vld [vmem:[#allocation444_spill] sm:$0xff]  ;;  %v1032_v16 = vadd.f32 %v12285_v23, %v262_v0 }
 0x67d   :  { %5004 = vmatpush.bf16.msk.msra.mxu3 %vm5003_vm12, %v12141_v18  ;;  %vm2846_vm2 = vmand %vm2078_vm14, %vm2718_vm10  ;;  %vm4188_vm10 = vcmp.eq.f32.partialorder %v10342_v22, %v9703_v61  ;;  %v1819_v36 = vadd.f32 %v12277_v6, %v1049_v8  ;;  %vm4187_vm14 = vcmp.eq.f32.partialorder %v10294_v38, %v9703_v61  ;;  %vm2700_vm0 = vcmp.ne.s32.totalorder %v12280_v11, 0  ;;  %v12283_v38 = vld [vmem:[#allocation184_spill] sm:$0xff]  ;;  %v12296_v8 = vld [vmem:[#allocation406_spill] sm:$0xff] }
 0x67e   :  { %v3486_v51 = vsel %vm2846_vm2, %v12270_v1, -2.0  ;;  %v1948_v54 = vand.u32 2147483647, %v1820_v4  ;;  %vm4186_vm2 = vcmp.eq.f32.partialorder %v10159_v55, %v9703_v61  ;;  %v1817_v13 = vadd.f32 %v12286_v48, %v1047_v40  ;;  %v12289_v55 = vld [vmem:[#allocation241_spill] sm:$0xff]  ;;  %v12290_v1 = vld [vmem:[#allocation239_spill] sm:$0xff]  ;;  %v12304_v11 = vld [vmem:[#allocation236_spill] sm:$0xff] }
 0x67f   :  { %4108 = vperm.xlu1 %5105, %v3487_v3   ;;  %4113 = vperm.xlu2 %5103, %v3488_v26   ;;  %v5356_v3 = vld [vmem:[%s10932_s1 + $0x320] sm:$0xff]  ;;  %v1947_v22 = vand.u32 2147483647, %v1819_v36  ;;  %v260_v31 = vmul.f32 %v5358_v50, %v9060_v29  ;;  %v12294_v14 = vmov 1   ;;  %v278_v63 = vmul.f32 %v5360_v60, %v9060_v29  ;;  %v12297_v6 = vld [vmem:[#allocation185_spill] sm:$0xff]  ;;  %v12299_v5 = vld [vmem:[#allocation171_spill] sm:$0xff] }
 0x680   :  { %4018 = vperm.xlu0 %5104, %v3469_v44   ;;  %v261_v26 = vmul.f32 %v5356_v3, %v9060_v29  ;;  %v1945_v19 = vand.u32 2147483647, %v1817_v13  ;;  %v12301_v3 = vld [vmem:[#allocation203_spill] sm:$0xff]  ;;  %v5362_v40 = vld [vmem:[%s10932_s1 + $0x398] sm:$0xff]  ;;  %v12311_v60 = vld [vmem:[#allocation434_spill] sm:$0xff] }
 0x681   :  { %5006 = vmatpush.bf16.msk.msra.mxu3 %vm5005_vm3, %v12141_v18  ;;  %v3819_v58 = vpop.permute.xlu1 %3818  ;;  %v10507_v10 = vpop.permute.xlu2 %3868  ;;  %vm4192_vm3 = vcmp.eq.f32.partialorder %v10234_v15, %v9703_v61  ;;  %v1030_v36 = vadd.f32 %v12297_v6, %v260_v31  ;;  %v12303_v0 = vld [vmem:[#allocation439_spill] sm:$0xff]  ;;  %v12315_v6 = vld [vmem:[#allocation256_spill] sm:$0xff] }
 0x682   :  { %vm4200_vm9 = vcmp.eq.f32.partialorder %v3819_v58, %v9703_v61  ;;  %v10519_v41 = vpop.permute.xlu0 %3828  ;;  %vm5009_vm4 = vmpackc.low %vm4193_vm1, %vm4192_vm3  ;;  %vm2716_vm1 = vcmp.ne.s32.totalorder %v12282_v34, 0  ;;  %v1031_v37 = vadd.f32 %v12283_v38, %v261_v26  ;;  %vm2060_vm3 = vcmp.gt.f32.partialorder %v1932_v28, 0.0  ;;  %v12302_v28 = vld [vmem:[#allocation228_spill] sm:$0xff]  ;;  %v12305_v38 = vld [vmem:[#allocation246_spill] sm:$0xff] }
 0x683   :  { %vm10525_vm12 = vmpackc.low %vm4201_vm6, %vm4200_vm9  ;;  %vm2059_vm9 = vcmp.gt.f32.partialorder %v1931_v32, 0.0  ;;  %v5359_v32 = vld [vmem:[%s10932_s1 + $0x310] sm:$0xff]  ;;  %v1048_v26 = vadd.f32 %v12301_v3, %v278_v63  ;;  %v1800_v56 = vadd.f32 %v12302_v28, %v1030_v36  ;;  %v276_v34 = vmul.f32 %v5362_v40, %v9060_v29  ;;  %v5364_v63 = vld [vmem:[%s10932_s1 + $0x308] sm:$0xff] }
 0x684   :  { %vm5011_vm6 = vmpackc.low %vm4191_vm5, %vm4190_vm8  ;;  %vm2076_vm8 = vcmp.gt.f32.partialorder %v1948_v54, 0.0  ;;  %v259_v47 = vmul.f32 %v5359_v32, %v9060_v29  ;;  %v5361_v54 = vld [vmem:[%s10932_s1 + $0x300] sm:$0xff]  ;;  %v12310_v32 = vld [vmem:[#allocation199_spill] sm:$0xff] }
 0x685   :  { %5008 = vmatpush.bf16.msk.msra.mxu3 %vm5007_vm13, %v12141_v18  ;;  %vm2827_vm11 = vmand %vm2059_vm9, %vm2699_vm7  ;;  %v1928_v13 = vand.u32 2147483647, %v1800_v56  ;;  %v12321_v56 = vld [vmem:[#allocation181_spill] sm:$0xff]  ;;  %v12322_v40 = vld [vmem:[#allocation367_spill] sm:$0xff] }
 0x686   :  { %v3467_v21 = vsel %vm2827_vm11, %v12278_v39, -2.0  ;;  %vm5013_vm13 = vmpackc.low %vm4189_vm15, %vm4188_vm10  ;;  %vm2075_vm10 = vcmp.gt.f32.partialorder %v1947_v22, 0.0  ;;  %vm4184_vm15 = vcmp.eq.f32.partialorder %v10241_v24, %v9703_v61  ;;  %v1029_v39 = vadd.f32 %v12299_v5, %v259_v47  ;;  %v12346_v3 = vld [vmem:[#allocation400_spill] sm:$0xff] }
 0x687   :  { %4023 = vperm.xlu1 %5105, %v3470_v52   ;;  %4098 = vperm.xlu2 %5103, %v3485_v7   ;;  %vm5015_vm5 = vmpackc.low %vm4187_vm14, %vm4186_vm2  ;;  %v1801_v7 = vadd.f32 %v12289_v55, %v1031_v37  ;;  %vm2713_vm14 = vcmp.ne.s32.totalorder %v12298_v57, 0  ;;  %vm2073_vm2 = vcmp.gt.f32.partialorder %v1945_v19, 0.0  ;;  %v257_v22 = vmul.f32 %v5361_v54, %v9060_v29  ;;  %v12307_v52 = vld [vmem:[#allocation374_spill] sm:$0xff]  ;;  %v5365_v57 = vld [vmem:[%s10932_s1 + $0x388] sm:$0xff] }
 0x688   :  { %4103 = vperm.xlu0 %5104, %v3486_v51   ;;  %vm10620_vm7 = vmand %vm2060_vm3, %vm2700_vm0  ;;  %v1802_v51 = vadd.f32 %v12290_v1, %v1032_v16  ;;  %v1799_v17 = vadd.f32 %v12304_v11, %v1029_v39  ;;  %v1818_v37 = vadd.f32 %v12305_v38, %v1048_v26  ;;  %v5363_v16 = vld [vmem:[%s10932_s1 + $0x390] sm:$0xff]  ;;  %v1046_v47 = vadd.f32 %v12310_v32, %v276_v34  ;;  %v12317_v39 = vld [vmem:[#allocation243_spill] sm:$0xff] }
 0x689   :  { %5010 = vmatpush.bf16.msk.msra.mxu3 %vm5009_vm4, %v12141_v18  ;;  %v10558_v15 = vpop.permute.xlu1 %3833  ;;  %v10560_v46 = vpop.permute.xlu2 %3883  ;;  %vm2715_vm4 = vcmp.ne.s32.totalorder %v12284_v45, 0  ;;  %vm2844_vm9 = vmand %vm2076_vm8, %vm2716_vm1  ;;  %v3468_v24 = vsel %vm10620_vm7, %v12295_v42, -2.0  ;;  %v1929_v4 = vand.u32 2147483647, %v1801_v7  ;;  %vm2698_vm1 = vcmp.ne.s32.totalorder %v12303_v0, 0  ;;  %v12306_v45 = vld [vmem:[#allocation385_spill] sm:$0xff] }
 0x68a   :  { %v10563_v30 = vpop.permute.xlu0 %3843  ;;  %v3484_v49 = vsel %vm2844_vm9, %v12291_v12, -2.0  ;;  %vm10636_vm11 = vmand %vm2075_vm10, %vm2715_vm4  ;;  %v275_v48 = vmul.f32 %v5363_v16, %v9060_v29  ;;  %v12308_v7 = vld [vmem:[#allocation380_spill] sm:$0xff]  ;;  %v258_v19 = vmul.f32 %v5364_v63, %v9060_v29  ;;  %v12312_v42 = vld [vmem:[#allocation225_spill] sm:$0xff]  ;;  %vm2056_vm10 = vcmp.gt.f32.partialorder %v1928_v13, 0.0 }
 0x68b   :  { %v3483_v2 = vsel %vm10636_vm11, %v12296_v8, -2.0  ;;  %vm2057_vm3 = vcmp.gt.f32.partialorder %v1929_v4, 0.0  ;;  %vm2841_vm4 = vmand %vm2073_vm2, %vm2713_vm14  ;;  %v12313_v8 = vld [vmem:[#allocation436_spill] sm:$0xff]  ;;  %v1816_v36 = vadd.f32 %v12315_v6, %v1046_v47  ;;  %v274_v5 = vmul.f32 %v5365_v57, %v9060_v29  ;;  %v12323_v38 = vld [vmem:[#allocation397_spill] sm:$0xff] }
 0x68c   :  { %v3481_v23 = vsel %vm2841_vm4, %v12306_v45, -2.0  ;;  %vm2695_vm9 = vcmp.ne.s32.totalorder %v12313_v8, 0  ;;  %v12320_v26 = vld [vmem:[#allocation388_spill] sm:$0xff]  ;;  %v1028_v0 = vadd.f32 %v12321_v56, %v258_v19  ;;  %v12324_v16 = vld [vmem:[#allocation186_spill] sm:$0xff]  ;;  %v12325_v13 = vld [vmem:[#allocation431_spill] sm:$0xff] }
 0x68d   :  { %5012 = vmatpush.bf16.msk.msra.mxu3 %vm5011_vm6, %v12141_v18  ;;  %vm4185_vm6 = vcmp.eq.f32.partialorder %v10286_v25, %v9703_v61  ;;  %vm2693_vm2 = vcmp.ne.s32.totalorder %v12325_v13, 0  ;;  %v12339_v6 = vld [vmem:[#allocation423_spill] sm:$0xff]  ;;  %v10864_v13 = vld [vmem:[%s10933_s2] sm:$0xff]  ;;  %s5414_s2 = smov [#allocation5]  }
 0x68e   :  { %v12340_v57 = vld [vmem:[#allocation451_spill] sm:$0xff]  ;;  %v4603_v47 = vperm.slane %v10864_v13, 5  ;;  %s4788_s5 = sshll.u32 %s5414_s2, 4  ;;  %s4789_s5 = int_to_ptr.vmem [resolvable:$true] %s4788_s5 }
 0x68f   :  { %5106 = vset.pattern.permute.xlu1 %v12279_v59  ;;  %5107 = vset.pattern.permute.xlu2 %v12279_v59 }
 0x690   :  { %4008 = vperm.xlu0 %5104, %v3467_v21   ;;  %4589 = vperm.xlu1 %5106, %v4584_v43   ;;  %v12300_v21 = vld [vmem:[#allocation426_spill] sm:$0xff] }
 0x691   :  { %4594 = vperm.xlu2 %5107, %v4585_v53   ;;  %5014 = vmatpush.bf16.msk.msra.mxu3 %vm5013_vm13, %v12141_v18  ;;  %v10605_v44 = vpop.permute.xlu1 %3848  ;;  %v10607_v20 = vpop.permute.xlu2 %3898  ;;  %vm5017_vm13 = vmpackc.low %vm4185_vm6, %vm4184_vm15  ;;  %v1930_v53 = vand.u32 2147483647, %v1802_v51  ;;  %vm2697_vm0 = vcmp.ne.s32.totalorder %v12300_v21, 0  ;;  %v12309_v51 = vld [vmem:[#allocation182_spill] sm:$0xff]  ;;  %vm2696_vm6 = vcmp.ne.s32.totalorder %v12311_v60, 0  ;;  %v12336_v60 = vld [vmem:[#allocation373_spill] sm:$0xff] }
 0x692   :  { %v10610_v58 = vpop.permute.xlu0 %3858  ;;  %vm2825_vm7 = vmand %vm2057_vm3, %vm2697_vm0  ;;  %v1027_v12 = vadd.f32 %v12309_v51, %v257_v22  ;;  %v5366_v22 = vld [vmem:[%s10932_s1 + $0x380] sm:$0xff]  ;;  %v12328_v51 = vmov 0 }
 0x693   :  { %v3465_v50 = vsel %vm2825_vm7, %v12308_v7, -2.0  ;;  %v273_v11 = vmul.f32 %v5366_v22, %v9060_v29  ;;  %vm4216_vm7 = vcmp.eq.f32.partialorder %v10607_v20, %v9703_v61  ;;  %v12327_v7 = vld [vmem:[#allocation238_spill] sm:$0xff]  ;;  %v12332_v20 = vld [vmem:[#allocation449_spill] sm:$0xff] }
 0x695   :  { %5016 = vmatpush.bf16.msk.msra.mxu3 %vm5015_vm5, %v12141_v18  ;;  %vm2058_vm5 = vcmp.gt.f32.partialorder %v1930_v53, 0.0  ;;  %v12316_v53 = vld [vmem:[#allocation452_spill] sm:$0xff] }
 0x696   :  { %vm2826_vm8 = vmand %vm2058_vm5, %vm2698_vm1  ;;  %vm2714_vm11 = vcmp.ne.s32.totalorder %v12316_v53, 0 }
 0x697   :  { %v3466_v55 = vsel %vm2826_vm8, %v12307_v52, -2.0 }
 0x698   :  { %4093 = vperm.xlu0 %5104, %v3484_v49   ;;  %5108 = vset.pattern.permute.xlu1 %v12294_v14  ;;  %v1927_v49 = vand.u32 2147483647, %v1799_v17  ;;  %v1944_v17 = vand.u32 2147483647, %v1816_v36 }
 0x699   :  { %5109 = vset.pattern.permute.xlu2 %v12294_v14  ;;  %5018 = vmatpush.bf16.msk.msra.mxu3 %vm5017_vm13, %v12141_v18  ;;  %v10659_v27 = vpop.permute.xlu1 %3863  ;;  %v10661_v9 = vpop.permute.xlu2 %3913  ;;  %v1946_v14 = vand.u32 2147483647, %v1818_v37  ;;  %vm2824_vm13 = vmand %vm2056_vm10, %vm2696_vm6 }
 0x69a   :  { %4013 = vperm.xlu1 %5108, %v3468_v24   ;;  %v10663_v43 = vpop.permute.xlu0 %3873  ;;  %4088 = vperm.xlu2 %5109, %v3483_v2   ;;  %v1797_v24 = vadd.f32 %v12312_v42, %v1027_v12  ;;  %v12314_v2 = vld [vmem:[#allocation200_spill] sm:$0xff]  ;;  %vm2055_vm15 = vcmp.gt.f32.partialorder %v1927_v49, 0.0  ;;  %v3464_v28 = vsel %vm2824_vm13, %v12320_v26, -2.0 }
 0x69b   :  { %v1045_v4 = vadd.f32 %v12314_v2, %v275_v48  ;;  %vm10710_vm14 = vmand %vm2055_vm15, %vm2695_vm9  ;;  %vm2074_vm0 = vcmp.gt.f32.partialorder %v1946_v14, 0.0  ;;  %v1044_v48 = vadd.f32 %v12324_v16, %v274_v5  ;;  %v12330_v12 = vld [vmem:[#allocation196_spill] sm:$0xff]  ;;  %vm2711_vm15 = vcmp.ne.s32.totalorder %v12332_v20, 0  ;;  %v12344_v5 = vld [vmem:[#allocation386_spill] sm:$0xff] }
 0x69c   :  { %v1925_v54 = vand.u32 2147483647, %v1797_v24  ;;  %vm2842_vm1 = vmand %vm2074_vm0, %vm2714_vm11  ;;  %v3463_v34 = vsel %vm10710_vm14, %v12322_v40, -2.0  ;;  %v1043_v49 = vadd.f32 %v12330_v12, %v273_v11  ;;  %vm2072_vm14 = vcmp.gt.f32.partialorder %v1944_v17, 0.0  ;;  %v12337_v24 = vld [vmem:[#allocation391_spill] sm:$0xff] }
 0x69d   :  { %v1815_v21 = vadd.f32 %v12317_v39, %v1045_v4  ;;  %v3482_v37 = vsel %vm2842_vm1, %v12323_v38, -2.0  ;;  %vm4213_vm1 = vcmp.eq.f32.partialorder %v10560_v46, %v9703_v61  ;;  %v12338_v46 = vld [vmem:[#allocation398_spill] sm:$0xff]  ;;  %v4602_v20 = vperm.slane %v10864_v13, 4 }
 0x69e   :  { %vm2053_vm9 = vcmp.gt.f32.partialorder %v1925_v54, 0.0 }
 0x69f   :  { %v1943_v52 = vand.u32 2147483647, %v1815_v21  ;;  %vm2821_vm13 = vmand %vm2053_vm9, %vm2693_vm2  ;;  %vm4210_vm2 = vcmp.eq.f32.partialorder %v10507_v10, %v9703_v61  ;;  %vm4219_vm9 = vcmp.eq.f32.partialorder %v10661_v9, %v9703_v61  ;;  %v12343_v9 = vld [vmem:[#allocation438_spill] sm:$0xff] }
 0x6a0   :  { %4078 = vperm.xlu0 %5104, %v3481_v23   ;;  %v3461_v63 = vsel %vm2821_vm13, %v12336_v60, -2.0 }
 0x6a1   :  { %v10689_v31 = vpop.permute.xlu1 %3878  ;;  %v10691_v1 = vpop.permute.xlu2 %3928 }
 0x6a2   :  { %3998 = vperm.xlu1 %5108, %v3465_v50   ;;  %v3889_v25 = vpop.permute.xlu0 %3888  ;;  %4003 = vperm.xlu2 %5109, %v3466_v55   ;;  %v12326_v55 = vld [vmem:[#allocation441_spill] sm:$0xff]  ;;  %v1798_v50 = vadd.f32 %v12327_v7, %v1028_v0  ;;  %vm4212_vm10 = vcmp.eq.f32.partialorder %v10689_v31, %v9703_v61 }
 0x6a3   :  { %vm4214_vm3 = vcmp.eq.f32.partialorder %v3889_v25, %v9703_v61  ;;  %vm2712_vm5 = vcmp.ne.s32.totalorder %v12326_v55, 0  ;;  %v12331_v25 = vld [vmem:[#allocation251_spill] sm:$0xff]  ;;  %v12335_v31 = vld [vmem:[#allocation253_spill] sm:$0xff]  ;;  %v4600_v55 = vperm.slane %v10864_v13, 2 }
 0x6a4   :  { %v1814_v32 = vadd.f32 %v12331_v25, %v1044_v48  ;;  %vm10747_vm0 = vmand %vm2072_vm14, %vm2712_vm5  ;;  %v1813_v14 = vadd.f32 %v12335_v31, %v1043_v49  ;;  %v1926_v19 = vand.u32 2147483647, %v1798_v50  ;;  %vm2694_vm5 = vcmp.ne.s32.totalorder %v12339_v6, 0 }
 0x6a5   :  { %v3480_v8 = vsel %vm10747_vm0, %v12337_v24, -2.0  ;;  %vm4209_vm0 = vcmp.eq.f32.partialorder %v10659_v27, %v9703_v61  ;;  %v12345_v27 = vld [vmem:[#allocation382_spill] sm:$0xff]  ;;  %v4601_v50 = vperm.slane %v10864_v13, 3  ;;  %v4604_v6 = vperm.slane %v10864_v13, 6 }
 0x6a6   :  { %v1942_v42 = vand.u32 2147483647, %v1814_v32  ;;  %v1941_v53 = vand.u32 2147483647, %v1813_v14  ;;  %vm2054_vm14 = vcmp.gt.f32.partialorder %v1926_v19, 0.0 }
 0x6a8   :  { %3993 = vperm.xlu0 %5104, %v3464_v28  }
 0x6a9   :  { %v3894_v45 = vpop.permute.xlu1 %3893  ;;  %v10724_v23 = vpop.permute.xlu2 %3943 }
 0x6aa   :  { %vm4215_vm4 = vcmp.eq.f32.partialorder %v3894_v45, %v9703_v61  ;;  %4083 = vperm.xlu1 %5108, %v3482_v37   ;;  %v3904_v29 = vpop.permute.xlu0 %3903  ;;  %3988 = vperm.xlu2 %5109, %v3463_v34  }
 0x6ab   :  { %vm5021_vm8 = vmpackc.low %vm4215_vm4, %vm4214_vm3  ;;  %vm4217_vm6 = vcmp.eq.f32.partialorder %v3904_v29, %v9703_v61  ;;  %vm2071_vm3 = vcmp.gt.f32.partialorder %v1943_v52, 0.0  ;;  %vm4211_vm4 = vcmp.eq.f32.partialorder %v10663_v43, %v9703_v61  ;;  %v4598_v29 = vperm.slane %v10864_v13, 0 }
 0x6ac   :  { %vm10737_vm11 = vmpackc.low %vm4217_vm6, %vm4216_vm7  ;;  %5022 = vmatpush.bf16.msk.msrb.mxu0 %vm5021_vm8, %v12141_v18  ;;  %v4599_v52 = vperm.slane %v10864_v13, 1 }
 0x6ad   :  { %v12329_v51 = vsel %vm10737_vm11, 4294967295, %v12328_v51  ;;  %vm5023_vm7 = vmpackc.low %vm4213_vm1, %vm4212_vm10  ;;  %vm2709_vm1 = vcmp.ne.s32.totalorder %v12343_v9, 0  ;;  %vm4206_vm11 = vcmp.eq.f32.partialorder %v10605_v44, %v9703_v61 }
 0x6ae   :  { %vm2839_vm8 = vmand %vm2071_vm3, %vm2711_vm15  ;;  %vm2710_vm15 = vcmp.ne.s32.totalorder %v12340_v57, 0 }
 0x6af   :  { %v3479_v2 = vsel %vm2839_vm8, %v12338_v46, -2.0  ;;  %vm5025_vm6 = vmpackc.low %vm4211_vm4, %vm4210_vm2  ;;  %vm2070_vm4 = vcmp.gt.f32.partialorder %v1942_v42, 0.0  ;;  %vm4208_vm8 = vcmp.eq.f32.partialorder %v10610_v58, %v9703_v61  ;;  %vm2069_vm2 = vcmp.gt.f32.partialorder %v1941_v53, 0.0 }
 0x6b0   :  { %3978 = vperm.xlu0 %5104, %v3461_v63   ;;  %5024 = vmatpush.bf16.msk.msrb.mxu0 %vm5023_vm7, %v12141_v18  ;;  %vm2822_vm3 = vmand %vm2054_vm14, %vm2694_vm5  ;;  %vm4207_vm5 = vcmp.eq.f32.partialorder %v10476_v33, %v9703_v61  ;;  %vm4204_vm14 = vcmp.eq.f32.partialorder %v10443_v35, %v9703_v61 }
 0x6b1   :  { %v3909_v4 = vpop.permute.xlu1 %3908  ;;  %v10770_v36 = vpop.permute.xlu2 %3958  ;;  %vm2838_vm7 = vmand %vm2070_vm4, %vm2710_vm15  ;;  %v3462_v21 = vsel %vm2822_vm3, %v12345_v27, -2.0  ;;  %vm4205_vm15 = vcmp.eq.f32.partialorder %v10563_v30, %v9703_v61 }
 0x6b2   :  { %vm4218_vm10 = vcmp.eq.f32.partialorder %v3909_v4, %v9703_v61  ;;  %4068 = vperm.xlu1 %5108, %v3479_v2   ;;  %v10768_v43 = vpop.permute.xlu0 %3918  ;;  %4073 = vperm.xlu2 %5109, %v3480_v8   ;;  %v3478_v39 = vsel %vm2838_vm7, %v12344_v5, -2.0  ;;  %v4605_v2 = vperm.slane %v10864_v13, 7 }
 0x6b3   :  { %vm10773_vm13 = vmpackc.low %vm4219_vm9, %vm4218_vm10 }
 0x6b4   :  { %5026 = vmatpush.bf16.msk.msrb.mxu0 %vm5025_vm6, %v12141_v18  ;;  %vm5027_vm9 = vmpackc.low %vm4209_vm0, %vm4208_vm8 }
 0x6b5   :  { %vm2837_vm10 = vmand %vm2069_vm2, %vm2709_vm1  ;;  %vm4203_vm1 = vcmp.eq.f32.partialorder %v10558_v15, %v9703_v61 }
 0x6b6   :  { %v3477_v26 = vsel %vm2837_vm10, %v12346_v3, -2.0  ;;  %vm5029_vm6 = vmpackc.low %vm4207_vm5, %vm4206_vm11  ;;  %vm4202_vm11 = vcmp.eq.f32.partialorder %v10519_v41, %v9703_v61 }
 0x6b7   :  { %vm5031_vm0 = vmpackc.low %vm4205_vm15, %vm4204_vm14  ;;  %vm4228_vm14 = vcmp.eq.f32.partialorder %v10770_v36, %v9703_v61 }
 0x6b8   :  { %4063 = vperm.xlu0 %5104, %v3478_v39   ;;  %5028 = vmatpush.bf16.msk.msrb.mxu0 %vm5027_vm9, %v12141_v18  ;;  %vm5033_vm3 = vmpackc.low %vm4203_vm1, %vm4202_vm11 }
 0x6b9   :  { %v10791_v28 = vpop.permute.xlu1 %3923  ;;  %v4054_v44 = vpop.permute.xlu2 %4053 }
 0x6ba   :  { %3983 = vperm.xlu1 %5108, %v3462_v21   ;;  %v3934_v58 = vpop.permute.xlu0 %3933  ;;  %4058 = vperm.xlu2 %5109, %v3477_v26   ;;  %vm4247_vm4 = vcmp.eq.f32.partialorder %v4054_v44, %v9703_v61 }
 0x6bc   :  { %5030 = vmatpush.bf16.msk.msrb.mxu0 %vm5029_vm6, %v12141_v18 }
 0x6c0   :  { %5032 = vmatpush.bf16.msk.msrb.mxu0 %vm5031_vm0, %v12141_v18  ;;  %5110 = vset.pattern.permute.xlu0 %v12279_v59 }
 0x6c1   :  { %v3939_v33 = vpop.permute.xlu1 %3938  ;;  %v3969_v30 = vpop.permute.xlu2 %3968 }
 0x6c2   :  { %v3949_v56 = vpop.permute.xlu0 %3948 }
 0x6c4   :  { %5034 = vmatpush.bf16.msk.msrb.mxu0 %vm5033_vm3, %v12141_v18 }
 0x6c8   :  { %5036 = vmatpush.bf16.msk.msrb.mxu0 %vm10525_vm12, %v12141_v18  ;;  %vm4230_vm12 = vcmp.eq.f32.partialorder %v3969_v30, %v9703_v61 }
 0x6c9   :  { %v3954_v35 = vpop.permute.xlu1 %3953  ;;  %v4044_v15 = vpop.permute.xlu2 %4043 }
 0x6ca   :  { %v3964_v0 = vpop.permute.xlu0 %3963  ;;  %vm4227_vm1 = vcmp.eq.f32.partialorder %v3954_v35, %v9703_v61  ;;  %vm4245_vm11 = vcmp.eq.f32.partialorder %v4044_v15, %v9703_v61 }
 0x6cb   :  { %vm4229_vm15 = vcmp.eq.f32.partialorder %v3964_v0, %v9703_v61 }
 0x6cc   :  { %vm5041_vm0 = vmpackc.low %vm4229_vm15, %vm4228_vm14 }
 0x6d1   :  { %v4049_v54 = vpop.permute.xlu1 %4048  ;;  %v4029_v22 = vpop.permute.xlu2 %4028 }
 0x6d2   :  { %vm4246_vm7 = vcmp.eq.f32.partialorder %v4049_v54, %v9703_v61  ;;  %v4129_v59 = vpop.permute.xlu0 %4128 }
 0x6d3   :  { %vm5057_vm8 = vmpackc.low %vm4247_vm4, %vm4246_vm7  ;;  %vm4262_vm2 = vcmp.eq.f32.partialorder %v4129_v59, %v9703_v61  ;;  %vm4226_vm4 = vcmp.eq.f32.partialorder %v3949_v56, %v9703_v61 }
 0x6d4   :  { %5058 = vmatpush.bf16.msk.msrb.mxu2 %vm5057_vm8, %v12141_v18  ;;  %vm5043_vm8 = vmpackc.low %vm4227_vm1, %vm4226_vm4  ;;  %vm4221_vm4 = vcmp.eq.f32.partialorder %v10791_v28, %v9703_v61 }
 0x6d9   :  { %v4134_v41 = vpop.permute.xlu1 %4133  ;;  %v4114_v40 = vpop.permute.xlu2 %4113 }
 0x6da   :  { %vm4263_vm9 = vcmp.eq.f32.partialorder %v4134_v41, %v9703_v61  ;;  %v3974_v62 = vpop.permute.xlu0 %3973 }
 0x6db   :  { %vm5075_vm10 = vmpackc.low %vm4263_vm9, %vm4262_vm2  ;;  %vm4231_vm5 = vcmp.eq.f32.partialorder %v3974_v62, %v9703_v61  ;;  %vm4224_vm2 = vcmp.eq.f32.partialorder %v3939_v33, %v9703_v61  ;;  %vm4225_vm9 = vcmp.eq.f32.partialorder %v10724_v23, %v9703_v61 }
 0x6dc   :  { %vm5039_vm6 = vmpackc.low %vm4231_vm5, %vm4230_vm12  ;;  %5076 = vmatpush.bf16.msk.msrb.mxu3 %vm5075_vm10, %v12141_v18  ;;  %vm4223_vm12 = vcmp.eq.f32.partialorder %v3934_v58, %v9703_v61  ;;  %vm4222_vm5 = vcmp.eq.f32.partialorder %v10691_v1, %v9703_v61 }
 0x6dd   :  { %5040 = vmatpush.bf16.msk.msrb.mxu1 %vm5039_vm6, %v12141_v18  ;;  %vm5045_vm10 = vmpackc.low %vm4225_vm9, %vm4224_vm2  ;;  %vm4259_vm2 = vcmp.eq.f32.partialorder %v4114_v40, %v9703_v61 }
 0x6de   :  { %vm5047_vm6 = vmpackc.low %vm4223_vm12, %vm4222_vm5 }
 0x6e1   :  { %5042 = vmatpush.bf16.msk.msrb.mxu1 %vm5041_vm0, %v12141_v18  ;;  %v4039_v11 = vpop.permute.xlu1 %4038  ;;  %vm4242_vm0 = vcmp.eq.f32.partialorder %v4029_v22, %v9703_v61  ;;  %v4099_v1 = vpop.permute.xlu2 %4098 }
 0x6e2   :  { %vm4244_vm3 = vcmp.eq.f32.partialorder %v4039_v11, %v9703_v61  ;;  %v4119_v17 = vpop.permute.xlu0 %4118 }
 0x6e3   :  { %vm5059_vm7 = vmpackc.low %vm4245_vm11, %vm4244_vm3  ;;  %vm4260_vm15 = vcmp.eq.f32.partialorder %v4119_v17, %v9703_v61 }
 0x6e4   :  { %5060 = vmatpush.bf16.msk.msrb.mxu2 %vm5059_vm7, %v12141_v18  ;;  %vm4220_vm7 = vcmp.eq.f32.partialorder %v10768_v43, %v9703_v61 }
 0x6e5   :  { %5044 = vmatpush.bf16.msk.msrb.mxu1 %vm5043_vm8, %v12141_v18  ;;  %vm5049_vm8 = vmpackc.low %vm4221_vm4, %vm4220_vm7 }
 0x6e9   :  { %5046 = vmatpush.bf16.msk.msrb.mxu1 %vm5045_vm10, %v12141_v18  ;;  %v4124_v34 = vpop.permute.xlu1 %4123  ;;  %vm12347_vm10 = vnez %v12329_v51 }
 0x6ea   :  { %vm4261_vm14 = vcmp.eq.f32.partialorder %v4124_v34, %v9703_v61  ;;  %v4034_v38 = vpop.permute.xlu0 %4033 }
 0x6eb   :  { %vm5077_vm1 = vmpackc.low %vm4261_vm14, %vm4260_vm15  ;;  %vm4243_vm11 = vcmp.eq.f32.partialorder %v4034_v38, %v9703_v61  ;;  %v10854_v23 = vpop.permute.xlu2 %4594  ;;  %vm4256_vm15 = vcmp.eq.f32.partialorder %v4099_v1, %v9703_v61 }
 0x6ec   :  { %vm5061_vm3 = vmpackc.low %vm4243_vm11, %vm4242_vm0  ;;  %5078 = vmatpush.bf16.msk.msrb.mxu3 %vm5077_vm1, %v12141_v18  ;;  %vm4622_vm1 = vcmp.eq.f32.partialorder %v10854_v23, %v4598_v29  ;;  %vm4623_vm11 = vcmp.eq.f32.partialorder %v10854_v23, %v4599_v52 }
 0x6ed   :  { %5048 = vmatpush.bf16.msk.msrb.mxu1 %vm5047_vm6, %v12141_v18  ;;  %5062 = vmatpush.bf16.msk.msrb.mxu2 %vm5061_vm3, %v12141_v18 }
 0x6f1   :  { %5050 = vmatpush.bf16.msk.msrb.mxu1 %vm5049_vm8, %v12141_v18  ;;  %v4109_v37 = vpop.permute.xlu1 %4108  ;;  %vm4624_vm8 = vcmp.eq.f32.partialorder %v10854_v23, %v4600_v55 }
 0x6f2   :  { %vm4258_vm9 = vcmp.eq.f32.partialorder %v4109_v37, %v9703_v61  ;;  %v4019_v45 = vpop.permute.xlu0 %4018 }
 0x6f3   :  { %vm5079_vm12 = vmpackc.low %vm4259_vm2, %vm4258_vm9  ;;  %vm4240_vm5 = vcmp.eq.f32.partialorder %v4019_v45, %v9703_v61 }
 0x6f4   :  { %5080 = vmatpush.bf16.msk.msrb.mxu3 %vm5079_vm12, %v12141_v18  ;;  %v4089_v7 = vpop.permute.xlu2 %4088  ;;  %vm4625_vm12 = vcmp.eq.f32.partialorder %v10854_v23, %v4601_v50 }
 0x6f5   :  { %5052 = vmatpush.bf16.msk.msrb.mxu1 %vm10773_vm13, %v12141_v18 }
 0x6f9   :  { %5054 = vmatpush.bf16.msk.msrb.mxu1 %vm12347_vm10, %v12141_v18  ;;  %v4024_v16 = vpop.permute.xlu1 %4023 }
 0x6fa   :  { %vm4241_vm6 = vcmp.eq.f32.partialorder %v4024_v16, %v9703_v61  ;;  %v4104_v48 = vpop.permute.xlu0 %4103 }
 0x6fb   :  { %vm5063_vm13 = vmpackc.low %vm4241_vm6, %vm4240_vm5  ;;  %vm4257_vm14 = vcmp.eq.f32.partialorder %v4104_v48, %v9703_v61 }
 0x6fc   :  { %vm5081_vm0 = vmpackc.low %vm4257_vm14, %vm4256_vm15  ;;  %5064 = vmatpush.bf16.msk.msrb.mxu2 %vm5063_vm13, %v12141_v18  ;;  %v4004_v49 = vpop.permute.xlu2 %4003  ;;  %vm4254_vm15 = vcmp.eq.f32.partialorder %v4089_v7, %v9703_v61 }
 0x6fd   :  { %5082 = vmatpush.bf16.msk.msrb.mxu3 %vm5081_vm0, %v12141_v18 }
 0x702   :  { %v4009_v51 = vpop.permute.xlu0 %4008  ;;  %v10875_v12 = vpop.permute.xlu1 %4589 }
 0x703   :  { %vm4614_vm3 = vcmp.eq.f32.partialorder %v10875_v12, %v4598_v29  ;;  %vm4615_vm4 = vcmp.eq.f32.partialorder %v10875_v12, %v4599_v52  ;;  %vm4616_vm7 = vcmp.eq.f32.partialorder %v10875_v12, %v4600_v55  ;;  %vm4617_vm9 = vcmp.eq.f32.partialorder %v10875_v12, %v4601_v50 }
 0x704   :  { %vm4965_vm2 = vmpackc.low %vm4622_vm1, %vm4614_vm3  ;;  %vm4238_vm0 = vcmp.eq.f32.partialorder %v4009_v51, %v9703_v61  ;;  %vm4618_vm3 = vcmp.eq.f32.partialorder %v10875_v12, %v4602_v20  ;;  %v3989_v14 = vpop.permute.xlu2 %3988 }
 0x705   :  { %4966 = vmatmul.msk.bf16.vlgmr.msra.gmra.mxu0 %vm4965_vm2, %v12141_v18  ;;  %vm4983_vm10 = vmpackc.low %vm4623_vm11, %vm4615_vm4  ;;  %vm4626_vm4 = vcmp.eq.f32.partialorder %v10854_v23, %v4602_v20 }
 0x706   :  { %4984 = vmatmul.msk.bf16.vlgmr.msra.gmra.mxu1 %vm4983_vm10, %v12141_v18  ;;  %vm5001_vm5 = vmpackc.low %vm4624_vm8, %vm4616_vm7  ;;  %vm4619_vm7 = vcmp.eq.f32.partialorder %v10875_v12, %v4603_v47  ;;  %vm4627_vm8 = vcmp.eq.f32.partialorder %v10854_v23, %v4603_v47 }
 0x707   :  { %5002 = vmatmul.msk.bf16.vlgmr.msra.gmra.mxu2 %vm5001_vm5, %v12141_v18  ;;  %vm5019_vm6 = vmpackc.low %vm4625_vm12, %vm4617_vm9  ;;  %vm4237_vm9 = vcmp.eq.f32.partialorder %v4004_v49, %v9703_v61 }
 0x708   :  { %5020 = vmatmul.msk.bf16.vlgmr.msra.gmra.mxu3 %vm5019_vm6, %v12141_v18  ;;  %vm5037_vm2 = vmpackc.low %vm4626_vm4, %vm4618_vm3  ;;  %vm4234_vm6 = vcmp.eq.f32.partialorder %v3989_v14, %v9703_v61 }
 0x709   :  { %vm5055_vm10 = vmpackc.low %vm4627_vm8, %vm4619_vm7 }
 0x70a   :  { %v4094_v25 = vpop.permute.xlu0 %4093 }
 0x70b   :  { %vm4255_vm13 = vcmp.eq.f32.partialorder %v4094_v25, %v9703_v61 }
 0x70c   :  { %vm5083_vm14 = vmpackc.low %vm4255_vm13, %vm4254_vm15  ;;  %v4014_v32 = vpop.permute.xlu1 %4013  ;;  %v4074_v42 = vpop.permute.xlu2 %4073 }
 0x70d   :  { %vm4239_vm1 = vcmp.eq.f32.partialorder %v4014_v32, %v9703_v61  ;;  %5084 = vmatpush.bf16.msk.msrb.mxu3 %vm5083_vm14, %v12141_v18 }
 0x70e   :  { %vm5065_vm11 = vmpackc.low %vm4239_vm1, %vm4238_vm0 }
 0x70f   :  { %5066 = vmatpush.bf16.msk.msrb.mxu2 %vm5065_vm11, %v12141_v18  ;;  %vm4251_vm11 = vcmp.eq.f32.partialorder %v4074_v42, %v9703_v61 }
 0x712   :  { %v4079_v31 = vpop.permute.xlu0 %4078 }
 0x713   :  { %vm4252_vm14 = vcmp.eq.f32.partialorder %v4079_v31, %v9703_v61 }
 0x714   :  { %v3999_v60 = vpop.permute.xlu1 %3998  ;;  %v4059_v46 = vpop.permute.xlu2 %4058 }
 0x715   :  { %vm4236_vm12 = vcmp.eq.f32.partialorder %v3999_v60, %v9703_v61  ;;  %5038 = vmatmul.msk.bf16.vlgmr.msrb.gmra.mxu0 %vm5037_vm2, %v12141_v18  ;;  %vm4248_vm7 = vcmp.eq.f32.partialorder %v4059_v46, %v9703_v61 }
 0x716   :  { %vm5067_vm5 = vmpackc.low %vm4237_vm9, %vm4236_vm12  ;;  %5056 = vmatmul.msk.bf16.vlgmr.msrb.gmra.mxu1 %vm5055_vm10, %v12141_v18  ;;  %vm4621_vm9 = vcmp.eq.f32.partialorder %v10875_v12, %v4605_v2  ;;  %vm4629_vm12 = vcmp.eq.f32.partialorder %v10854_v23, %v4605_v2 }
 0x717   :  { %5068 = vmatpush.bf16.msk.msrb.mxu2 %vm5067_vm5, %v12141_v18 }
 0x71a   :  { %v3994_v63 = vpop.permute.xlu0 %3993 }
 0x71b   :  { %vm4235_vm15 = vcmp.eq.f32.partialorder %v3994_v63, %v9703_v61 }
 0x71c   :  { %vm5069_vm13 = vmpackc.low %vm4235_vm15, %vm4234_vm6  ;;  %v4084_v19 = vpop.permute.xlu1 %4083  ;;  %vm4620_vm15 = vcmp.eq.f32.partialorder %v10875_v12, %v4604_v6 }
 0x71d   :  { %vm4253_vm0 = vcmp.eq.f32.partialorder %v4084_v19, %v9703_v61  ;;  %5070 = vmatpush.bf16.msk.msrb.mxu2 %vm5069_vm13, %v12141_v18  ;;  %vm4628_vm13 = vcmp.eq.f32.partialorder %v10854_v23, %v4604_v6 }
 0x71e   :  { %vm5085_vm1 = vmpackc.low %vm4253_vm0, %vm4252_vm14 }
 0x71f   :  { %5086 = vmatpush.bf16.msk.msrb.mxu3 %vm5085_vm1, %v12141_v18  ;;  %vm5091_vm14 = vmpackc.low %vm4629_vm12, %vm4621_vm9 }
 0x720   :  { %vm5073_vm0 = vmpackc.low %vm4628_vm13, %vm4620_vm15 }
 0x722   :  { %v3979_v24 = vpop.permute.xlu0 %3978 }
 0x723   :  { %vm4232_vm10 = vcmp.eq.f32.partialorder %v3979_v24, %v9703_v61 }
 0x724   :  { %v4069_v8 = vpop.permute.xlu1 %4068 }
 0x725   :  { %vm4250_vm3 = vcmp.eq.f32.partialorder %v4069_v8, %v9703_v61 }
 0x726   :  { %vm5087_vm4 = vmpackc.low %vm4251_vm11, %vm4250_vm3 }
 0x727   :  { %5088 = vmatpush.bf16.msk.msrb.mxu3 %vm5087_vm4, %v12141_v18 }
 0x72a   :  { %v4064_v4 = vpop.permute.xlu0 %4063 }
 0x72b   :  { %vm4249_vm8 = vcmp.eq.f32.partialorder %v4064_v4, %v9703_v61 }
 0x72c   :  { %vm5089_vm2 = vmpackc.low %vm4249_vm8, %vm4248_vm7  ;;  %v3984_v43 = vpop.permute.xlu1 %3983 }
 0x72d   :  { %vm4233_vm5 = vcmp.eq.f32.partialorder %v3984_v43, %v9703_v61  ;;  %5090 = vmatpush.bf16.msk.msrb.mxu3 %vm5089_vm2, %v12141_v18 }
 0x72e   :  { %vm5071_vm6 = vmpackc.low %vm4233_vm5, %vm4232_vm10 }
 0x72f   :  { %5072 = vmatpush.bf16.msk.msrb.mxu2 %vm5071_vm6, %v12141_v18 }
 0x730   :  { %5092 = vmatmul.msk.bf16.vlgmr.msrb.gmra.mxu3 %vm5091_vm14, %v12141_v18 }
 0x732   :  { %5074 = vmatmul.msk.bf16.vlgmr.msrb.gmra.mxu2 %vm5073_vm0, %v12141_v18 }
 0x782   :  { %v4679_v36 = vpop.f32.mrf.mxu0 }
 0x783   :  { %v4693_v53 = vpop.f32.mrf.mxu1 }
 0x784   :  { %v4694_v5 = vadd.f32 %v4693_v53, %v4679_v36 }
 0x78a   :  { %v4681_v57 = vpop.f32.mrf.mxu0  ;;  %v4707_v10 = vpop.f32.mrf.mxu2 }
 0x78b   :  { %v4721_v61 = vpop.f32.mrf.mxu3  ;;  %v4695_v9 = vpop.f32.mrf.mxu1  ;;  %v4708_v39 = vadd.f32 %v4707_v10, %v4694_v5 }
 0x78c   :  { %v4696_v28 = vadd.f32 %v4695_v9, %v4681_v57 }
 0x78d   :  { %v4722_v26 = vadd.f32 %v4721_v61, %v4708_v39 }
 0x792   :  { %v4735_v27 = vpop.f32.mrf.mxu0  ;;  %v4709_v21 = vpop.f32.mrf.mxu2 }
 0x793   :  { %v4723_v3 = vpop.f32.mrf.mxu3  ;;  %v4736_v58 = vadd.f32 %v4735_v27, %v4722_v26  ;;  %v4749_v44 = vpop.f32.mrf.mxu1  ;;  %v4710_v33 = vadd.f32 %v4709_v21, %v4696_v28 }
 0x795   :  { %v4750_v56 = vadd.f32 %v4749_v44, %v4736_v58  ;;  %v4724_v0 = vadd.f32 %v4723_v3, %v4710_v33 }
 0x79a   :  { %v4737_v30 = vpop.f32.mrf.mxu0 }
 0x79b   :  { %v4738_v54 = vadd.f32 %v4737_v30, %v4724_v0  ;;  %v4751_v41 = vpop.f32.mrf.mxu1 }
 0x79d   :  { %v4752_v22 = vadd.f32 %v4751_v41, %v4738_v54 }
 0x7b3   :  { %v4777_v35 = vpop.f32.mrf.mxu3 }
 0x7b5   :  { %v4763_v18 = vpop.f32.mrf.mxu2 }
 0x7b6   :  { %v4764_v15 = vadd.f32 %v4763_v18, %v4750_v56 }
 0x7b8   :  { %v4778_v59 = vadd.f32 %v4777_v35, %v4764_v15 }
 0x7ba   :  { %4782 = vst [vmem:[#allocation5] sm:$0xff] %v4778_v59 }
 0x7bb   :  { %v4779_v17 = vpop.f32.mrf.mxu3 }
 0x7bd   :  { %v4765_v62 = vpop.f32.mrf.mxu2 }
 0x7be   :  { %v4766_v11 = vadd.f32 %v4765_v62, %v4752_v22 }
 0x7c0   :  { %v4780_v40 = vadd.f32 %v4779_v17, %v4766_v11 }
 0x7c2   :  { %4783 = vst [vmem:[#allocation5 + $0x8] sm:$0xff] %v4780_v40 }
 0x7c3   :  { %4796 = dma.vmem_to_hbm [thread:$0]  %s4789_s5, 256, %s4791_s8, [#allocation3], %s5415_s9, %s5415_s9, %s5416_s10  }
 0x7c4   :  { %5405 = dma.done.wait [#allocation3], 256  }
 0x7c5   :  { %5406 = vsyncadd [#allocation3], 4294967040 }
 0x7c6   :  { %4801 = vsyncpa [#allocation3], 1 }
 0x7c7   :  { %4802 = vsyncpa [#allocation4], 1 }

</bundles_post_ra>
